<compile_context>
chip_gen: v7x
topology: tpu7x:2x2x1
jax: 0.10.0
libtpu: 0.0.40
codegen_flags: <defaults>
</compile_context>

<pallas_src>
import functools

import jax
import jax.numpy as jnp
from jax.experimental import pallas as pl
from jax.experimental.pallas import tpu as pltpu


def _vmem_limit_bytes():
    # ~75% of physical VMEM: v5e/v6e -> ~96 MiB, v7x -> ~48 MiB.  Fall back to
    # a safe 64 MiB if the hardware query is unavailable.
    try:
        cap = int(pltpu.get_tpu_info().vmem_capacity_bytes)
        return max(32 * 1024 * 1024, (cap * 3) // 4)
    except Exception:
        return 64 * 1024 * 1024


def _sogclr_kernel(epoch_ref,                 # SMEM (1,) int32 (scalar prefetch)
                   img_ref,                   # VMEM (TM, D) bf16  image row block
                   txt_ref,                   # VMEM (B, D)  bf16  text features (resident)
                   ist_ref,                   # VMEM (TM, 3) f32   [old_b_I, old_s_I, diag]
                   tst_ref,                   # VMEM (3, B)  f32   [old_b_T, old_s_T, diag] (resident)
                   ist_out,                   # VMEM (TM, 2) f32   [new_b_I, new_s_I]
                   tst_out,                   # VMEM (3, B)  f32   [new_b_T, new_s_T, loss] (resident)
                   bT_scr, seT_scr, nuT_scr, lacc,     # scratch
                   *, gamma, temperature, eps):
    i = pl.program_id(0)
    nb = pl.num_programs(0)
    TM = img_ref.shape[0]
    B = txt_ref.shape[0]

    inv_t = jnp.float32(1.0 / temperature)
    inv_d = jnp.float32(1.0 / (B - 1))
    gma = jnp.float32(gamma)

    # -- init persistent column-side accumulators on the first block ---------
    @pl.when(i == 0)
    def _init():
        bT_scr[...] = tst_ref[0:1, :]              # running column max starts at old_b_T
        seT_scr[...] = jnp.zeros_like(seT_scr)
        nuT_scr[...] = jnp.zeros_like(nuT_scr)
        lacc[...] = jnp.zeros_like(lacc)

    # -- similarity block: bf16 inputs, f32 accumulation, MXU-native NT form --
    sim = jax.lax.dot_general(
        img_ref[...], txt_ref[...],
        dimension_numbers=(((1,), (1,)), ((), ())),
        preferred_element_type=jnp.float32)                       # (TM, B)

    old_b_I = ist_ref[:, 0:1]                                     # (TM, 1)
    old_s_I = ist_ref[:, 1:2]                                     # (TM, 1)
    diag_col = ist_ref[:, 2:3]                                    # (TM, 1)
    diag_row = tst_ref[2:3, :]                                    # (1, B)

    image_dt = (sim - diag_col) * inv_t          # image_diffs / temperature
    text_dt = (sim - diag_row) * inv_t           # text_diffs / temperature

    row0 = i * TM
    rid = jax.lax.broadcasted_iota(jnp.int32, (TM, B), 0) + row0
    cid = jax.lax.broadcasted_iota(jnp.int32, (TM, B), 1)
    is_diag = rid == cid

    is_e0 = epoch_ref[0] == 0

    # -- image (row) side: fully local to this row block ---------------------
    b_I = jnp.maximum(jnp.max(image_dt, axis=1, keepdims=True), old_b_I)     # (TM, 1)
    e_img = jnp.where(is_diag, 0.0, jnp.exp(image_dt - b_I))                 # (TM, B)
    g_I = jnp.sum(e_img, axis=1, keepdims=True) * inv_d
    s_I = jnp.where(is_e0, g_I,
                    (1.0 - gma) * old_s_I * jnp.exp(old_b_I - b_I) + gma * g_I)
    ist_out[:, 0:1] = b_I                     # state stored unclamped (as in torch)
    ist_out[:, 1:2] = s_I

    inv_s_I = pl.reciprocal(jnp.maximum(s_I, jnp.float32(eps)))              # (TM, 1)
    # sum_j (exp/s) * image_dt; temperature/(B-1)/B is folded in once at the end
    row_num = jnp.sum(e_img * image_dt, axis=1, keepdims=True) * inv_s_I
    lacc[...] = lacc[...] + jnp.sum(row_num, axis=0, keepdims=True)          # (1, 1)

    # -- text (column) side: flash-style online accumulation across blocks ---
    b_prev = bT_scr[...]                                                     # (1, B)
    b_new = jnp.maximum(b_prev, jnp.max(text_dt, axis=0, keepdims=True))
    rescale = jnp.exp(b_prev - b_new)
    # rank-1 rescale: exp(text_dt - b_new) = e_img * exp(diag_i/t + b_I) * exp(-diag_j/t - b_new)
    # (diagonal stays exactly zero since e_img is zero there).
    row_fac = jnp.exp(diag_col * inv_t + b_I)                                # (TM, 1)
    col_fac = jnp.exp(-diag_row * inv_t - b_new)                             # (1, B)
    e_txt = (e_img * row_fac) * col_fac                                      # (TM, B)
    seT_scr[...] = seT_scr[...] * rescale + jnp.sum(e_txt, axis=0, keepdims=True)
    nuT_scr[...] = nuT_scr[...] * rescale + jnp.sum(e_txt * text_dt, axis=0, keepdims=True)
    bT_scr[...] = b_new

    # -- finalize on the last block -------------------------------------------
    @pl.when(i == nb - 1)
    def _finalize():
        b_T = bT_scr[...]
        g_T = seT_scr[...] * inv_d
        old_b_T = tst_ref[0:1, :]
        old_s_T = tst_ref[1:2, :]
        s_T = jnp.where(is_e0, g_T,
                        (1.0 - gma) * old_s_T * jnp.exp(old_b_T - b_T) + gma * g_T)
        tst_out[0:1, :] = b_T
        tst_out[1:2, :] = s_T
        inv_s_T = pl.reciprocal(jnp.maximum(s_T, jnp.float32(eps)))
        txt_total = jnp.sum(nuT_scr[...] * inv_s_T, axis=1, keepdims=True)   # (1, 1)
        total = (lacc[...] + txt_total) * jnp.float32(temperature / (B - 1) / B)
        tst_out[2:3, :] = jnp.broadcast_to(total, (1, B))    # loss folded into the slab


class SogCLRLossPallas:
    """JAX/Pallas re-implementation of SogCLR_Loss forward (world_size == 1)."""

    def __init__(self, N=256, gamma=0.1, temperature=0.07, block_rows=256):
        self.gamma = float(gamma)
        self.temperature = float(temperature)
        self.eps = 1e-14
        self.block_rows = int(block_rows)
        self.s_I = jnp.zeros((N,), jnp.float32)
        self.s_T = jnp.zeros((N,), jnp.float32)
        self.b_I = jnp.zeros((N,), jnp.float32)
        self.b_T = jnp.zeros((N,), jnp.float32)
        self._kernels = {}

    # ------------------------------------------------------------------ build
    def _build(self, B, D, tm, single_buffer_resident):
        nb = B // tm
        kernel = functools.partial(
            _sogclr_kernel, gamma=self.gamma, temperature=self.temperature,
            eps=self.eps)

        def resident(shape):
            # Resident (constant index_map) operands: single-buffer if the jax
            # version supports it (halves resident VMEM, important on v7x).
            if single_buffer_resident:
                return pl.BlockSpec(shape, lambda i, ep: (0, 0),
                                    pipeline_mode=pl.Buffered(1))
            return pl.BlockSpec(shape, lambda i, ep: (0, 0))

        grid_spec = pltpu.PrefetchScalarGridSpec(
            num_scalar_prefetch=1,                       # epoch scalar in SMEM
            grid=(nb,),
            in_specs=[
                pl.BlockSpec((tm, D), lambda i, ep: (i, 0)),   # image rows (bf16, pipelined)
                resident((B, D)),                              # text features (bf16, resident)
                pl.BlockSpec((tm, 3), lambda i, ep: (i, 0)),   # [old_b_I, old_s_I, diag] rows
                resident((3, B)),                              # [old_b_T, old_s_T, diag]
            ],
            out_specs=(
                pl.BlockSpec((tm, 2), lambda i, ep: (i, 0)),   # new [b_I, s_I]
                pl.BlockSpec((3, B), lambda i, ep: (0, 0)),    # [new_b_T, new_s_T, loss]
            ),
            scratch_shapes=[
                pltpu.VMEM((1, B), jnp.float32),   # running column max b_T
                pltpu.VMEM((1, B), jnp.float32),   # running sum exp(text_dt - b_T)
                pltpu.VMEM((1, B), jnp.float32),   # running sum exp(...) * text_dt
                pltpu.VMEM((1, 1), jnp.float32),   # image-loss accumulator
            ],
        )
        return pl.pallas_call(
            kernel,
            out_shape=(jax.ShapeDtypeStruct((B, 2), jnp.float32),
                       jax.ShapeDtypeStruct((3, B), jnp.float32)),
            grid_spec=grid_spec,
            compiler_params=pltpu.CompilerParams(
                dimension_semantics=("arbitrary",),   # row axis carries the text-side reduction
                vmem_limit_bytes=_vmem_limit_bytes()),
        )

    def _run(self, key, args):
        fn = self._kernels.get(key)
        if fn is not None:
            return fn(*args)
        B, D, tm = key
        try:
            fn = self._build(B, D, tm, single_buffer_resident=True)
            out = fn(*args)
        except Exception:
            # Older jax without BlockSpec(pipeline_mode=Buffered(1)) support.
            fn = self._build(B, D, tm, single_buffer_resident=False)
            out = fn(*args)
        self._kernels[key] = fn
        return out

    def _pick_tile(self, B):
        tm = min(self.block_rows, B)
        if B % tm == 0:
            return tm
        for cand in (512, 256, 128, 64, 32, 16, 8):
            if cand <= self.block_rows and B % cand == 0:
                return cand
        return B   # TODO(synk): pad B up to a tile multiple and mask instead.

    # ------------------------------------------------------------------- call
    def __call__(self, image_features, text_features, image_ids, text_ids, epoch):
        B, D = image_features.shape
        tm = self._pick_tile(B)

        old_b_I = self.b_I[image_ids]
        old_b_T = self.b_T[text_ids]
        old_s_I = self.s_I[image_ids]
        old_s_T = self.s_T[text_ids]

        # Pre-cast once to the MXU input precision (halves DMA / resident VMEM).
        img_b16 = image_features.astype(jnp.bfloat16)
        txt_b16 = text_features.astype(jnp.bfloat16)
        # sim diagonal, computed once in the wrapper (cheap O(B*D) glue).
        diag = jnp.sum(img_b16.astype(jnp.float32) * txt_b16.astype(jnp.float32),
                       axis=-1)

        istate = jnp.stack([old_b_I, old_s_I, diag], axis=1)      # (B, 3), row-blocked
        tstate = jnp.stack([old_b_T, old_s_T, diag], axis=0)      # (3, B), resident
        epoch_arr = jnp.asarray([epoch], jnp.int32)

        istate_new, tstate_new = self._run(
            (B, D, tm), (epoch_arr, img_b16, txt_b16, istate, tstate))

        # scatter state back (plain JAX glue; order-dependent on duplicate ids,
        # same caveat as the PyTorch original; mutates python state, don't jit).
        self.b_I = self.b_I.at[image_ids].set(istate_new[:, 0])
        self.s_I = self.s_I.at[image_ids].set(istate_new[:, 1])
        self.b_T = self.b_T.at[text_ids].set(tstate_new[0])
        self.s_T = self.s_T.at[text_ids].set(tstate_new[1])
        return tstate_new[2, 0]


def _reference_step(img, txt, old_b_I, old_b_T, old_s_I, old_s_T, epoch,
                    gamma, temperature, eps):
    """Pure-JAX reference mirroring the PyTorch forward (bf16 matmul precision)."""
    B = img.shape[0]
    imgb = img.astype(jnp.bfloat16)
    txtb = txt.astype(jnp.bfloat16)
    sim = jnp.dot(imgb, txtb.T, preferred_element_type=jnp.float32)
    diag = jnp.sum(imgb.astype(jnp.float32) * txtb.astype(jnp.float32), axis=-1)
    mask_neg = 1.0 - jnp.eye(B, dtype=jnp.float32)
    image_diffs = sim - diag[:, None]
    text_diffs = sim - diag[None, :]
    image_dt = image_diffs / temperature
    text_dt = text_diffs / temperature
    b_I = jnp.maximum(jnp.max(image_dt, axis=1), old_b_I)
    b_T = jnp.maximum(jnp.max(text_dt, axis=0), old_b_T)
    exp_image = jnp.exp(image_dt - b_I[:, None]) * mask_neg
    exp_text = jnp.exp(text_dt - b_T[None, :]) * mask_neg
    g_I = jnp.sum(exp_image, axis=1, keepdims=True) / (B - 1)
    g_T = jnp.sum(exp_text, axis=0, keepdims=True) / (B - 1)
    if epoch == 0:
        s_I, s_T = g_I, g_T
    else:
        s_I = ((1.0 - gamma) * old_s_I * jnp.exp(old_b_I - b_I)
               + gamma * g_I.squeeze()).reshape(g_I.shape)
        s_T = ((1.0 - gamma) * old_s_T * jnp.exp(old_b_T - b_T)
               + gamma * g_T.squeeze()).reshape(g_T.shape)
    s_I_state = s_I.reshape(-1)
    s_T_state = s_T.reshape(-1)
    w_i = exp_image / jnp.maximum(s_I, eps)
    w_t = exp_text / jnp.maximum(s_T, eps)
    image_loss = jnp.sum(w_i * image_diffs, axis=1, keepdims=True) / (B - 1)
    text_loss = jnp.sum(w_t * text_diffs, axis=0, keepdims=True) / (B - 1)
    total = image_loss.mean() + text_loss.mean()
    return total, b_I, b_T, s_I_state, s_T_state


if __name__ == "__main__":
    # B=256 with block_rows=128 -> 2-step grid (exercises init / online
    # column accumulation / finalize).  D multiple of 128 for lane density.
    B, D, N = 256, 128, 1024
    key = jax.random.PRNGKey(0)
    k1, k2 = jax.random.split(key)
    img = jax.random.normal(k1, (B, D), jnp.float32)
    txt = jax.random.normal(k2, (B, D), jnp.float32)
    img = img / jnp.linalg.norm(img, axis=-1, keepdims=True)
    txt = txt / jnp.linalg.norm(txt, axis=-1, keepdims=True)
    image_ids = jnp.arange(B, dtype=jnp.int32)
    text_ids = jnp.arange(B, dtype=jnp.int32) + B

    loss_mod = SogCLRLossPallas(N=N, gamma=0.1, temperature=0.07, block_rows=128)

    tol = dict(rtol=5e-4, atol=5e-4)
    # epoch 0 (cold start) then epoch 1 (uses the running state written at epoch 0)
    for epoch in (0, 1):
        old_b_I = loss_mod.b_I[image_ids]
        old_b_T = loss_mod.b_T[text_ids]
        old_s_I = loss_mod.s_I[image_ids]
        old_s_T = loss_mod.s_T[text_ids]
        loss = loss_mod(img, txt, image_ids, text_ids, epoch)
        loss = jax.block_until_ready(loss)
        ref_loss, ref_b_I, ref_b_T, ref_s_I, ref_s_T = _reference_step(
            img, txt, old_b_I, old_b_T, old_s_I, old_s_T, epoch, 0.1, 0.07, 1e-14)
        assert jnp.allclose(loss, ref_loss, **tol), (epoch, loss, ref_loss)
        assert jnp.allclose(loss_mod.b_I[image_ids], ref_b_I, **tol), epoch
        assert jnp.allclose(loss_mod.b_T[text_ids], ref_b_T, **tol), epoch
        assert jnp.allclose(loss_mod.s_I[image_ids], ref_s_I, **tol), epoch
        assert jnp.allclose(loss_mod.s_T[text_ids], ref_s_T, **tol), epoch

    print("KERNEL_OK")
</pallas_src>

<mosaic_0001>
module attributes {stable_mosaic.version = 11 : i64} {
  func.func @_sogclr_kernel(%arg0: i32, %arg1: memref<1xi32, #tpu.memory_space<smem>>, %arg2: memref<128x128xbf16, #tpu.memory_space<vmem>>, %arg3: memref<256x128xbf16, #tpu.memory_space<vmem>>, %arg4: memref<128x3xf32, #tpu.memory_space<vmem>>, %arg5: memref<3x256xf32, #tpu.memory_space<vmem>>, %arg6: memref<128x2xf32, #tpu.memory_space<vmem>>, %arg7: memref<3x256xf32, #tpu.memory_space<vmem>>, %arg8: memref<1x256xf32, #tpu.memory_space<vmem>>, %arg9: memref<1x256xf32, #tpu.memory_space<vmem>>, %arg10: memref<1x256xf32, #tpu.memory_space<vmem>>, %arg11: memref<1x1xf32, #tpu.memory_space<vmem>>) attributes {dimension_semantics = [#tpu.dimension_semantics<arbitrary>], iteration_bounds = array<i64: 2>, scalar_prefetch = 1 : i64, scratch_operands = 4 : i64, tpu.core_type = #tpu.core_type<tc>, window_params = [{transform_indices = @transform_0, window_bounds = array<i64: 128, 128>}, {pipeline_mode = #tpu.pipeline_mode<synchronous>, transform_indices = @transform_1, window_bounds = array<i64: 256, 128>}, {transform_indices = @transform_2, window_bounds = array<i64: 128, 3>}, {pipeline_mode = #tpu.pipeline_mode<synchronous>, transform_indices = @transform_3, window_bounds = array<i64: 3, 256>}, {transform_indices = @transform_4, window_bounds = array<i64: 128, 2>}, {pipeline_mode = #tpu.pipeline_mode<synchronous>, transform_indices = @transform_5, window_bounds = array<i64: 3, 256>}]} {
    %c0_i32 = arith.constant 0 : i32
    %0 = arith.cmpi eq, %arg0, %c0_i32 : i32
    %1 = arith.extui %0 : i1 to i32
    %c0_i32_0 = arith.constant 0 : i32
    %2 = arith.cmpi ne, %1, %c0_i32_0 : i32
    scf.if %2 {
      %c0_53 = arith.constant 0 : index
      %c0_54 = arith.constant 0 : index
      %99 = vector.load %arg5[%c0_53, %c0_54] : memref<3x256xf32, #tpu.memory_space<vmem>>, vector<1x256xf32>
      %c0_55 = arith.constant 0 : index
      %c0_56 = arith.constant 0 : index
      %100 = vector.load %arg8[%c0_55, %c0_56] : memref<1x256xf32, #tpu.memory_space<vmem>>, vector<1x256xf32>
      tpu.vector_store %arg8[%c0_55, %c0_56], %99 {strides = array<i32>} : memref<1x256xf32, #tpu.memory_space<vmem>>, vector<1x256xf32>,
      %cst_57 = arith.constant 0.000000e+00 : f32
      %101 = vector.broadcast %cst_57 : f32 to vector<1x256xf32>
      %c0_58 = arith.constant 0 : index
      %c0_59 = arith.constant 0 : index
      %102 = vector.load %arg9[%c0_58, %c0_59] : memref<1x256xf32, #tpu.memory_space<vmem>>, vector<1x256xf32>
      tpu.vector_store %arg9[%c0_58, %c0_59], %101 {strides = array<i32>} : memref<1x256xf32, #tpu.memory_space<vmem>>, vector<1x256xf32>,
      %cst_60 = arith.constant 0.000000e+00 : f32
      %103 = vector.broadcast %cst_60 : f32 to vector<1x256xf32>
      %c0_61 = arith.constant 0 : index
      %c0_62 = arith.constant 0 : index
      %104 = vector.load %arg10[%c0_61, %c0_62] : memref<1x256xf32, #tpu.memory_space<vmem>>, vector<1x256xf32>
      tpu.vector_store %arg10[%c0_61, %c0_62], %103 {strides = array<i32>} : memref<1x256xf32, #tpu.memory_space<vmem>>, vector<1x256xf32>,
      %cst_63 = arith.constant 0.000000e+00 : f32
      %105 = vector.broadcast %cst_63 : f32 to vector<1x1xf32>
      %c0_64 = arith.constant 0 : index
      %c0_65 = arith.constant 0 : index
      %106 = vector.load %arg11[%c0_64, %c0_65] : memref<1x1xf32, #tpu.memory_space<vmem>>, vector<1x1xf32>
      tpu.vector_store %arg11[%c0_64, %c0_65], %105 {strides = array<i32>} : memref<1x1xf32, #tpu.memory_space<vmem>>, vector<1x1xf32>,
    } else {
    }
    %c0 = arith.constant 0 : index
    %c0_1 = arith.constant 0 : index
    %3 = vector.load %arg2[%c0, %c0_1] : memref<128x128xbf16, #tpu.memory_space<vmem>>, vector<128x128xbf16>
    %c0_2 = arith.constant 0 : index
    %c0_3 = arith.constant 0 : index
    %4 = vector.load %arg3[%c0_2, %c0_3] : memref<256x128xbf16, #tpu.memory_space<vmem>>, vector<256x128xbf16>
    %cst = arith.constant dense<0.000000e+00> : vector<128x256xf32>
    %5 = tpu.matmul %3, %4, %cst {dimension_numbers = #tpu.dot_dimension_numbers<[1], [1], [0], [0], [0, 0, 1, 0], [], []>} : vector<128x128xbf16>, vector<256x128xbf16>, vector<128x256xf32> -> vector<128x256xf32>
    %c0_4 = arith.constant 0 : index
    %c0_5 = arith.constant 0 : index
    %6 = vector.load %arg4[%c0_4, %c0_5] : memref<128x3xf32, #tpu.memory_space<vmem>>, vector<128x1xf32>
    %c0_6 = arith.constant 0 : index
    %c1 = arith.constant 1 : index
    %7 = vector.load %arg4[%c0_6, %c1] : memref<128x3xf32, #tpu.memory_space<vmem>>, vector<128x1xf32>
    %c0_7 = arith.constant 0 : index
    %c2 = arith.constant 2 : index
    %8 = vector.load %arg4[%c0_7, %c2] : memref<128x3xf32, #tpu.memory_space<vmem>>, vector<128x1xf32>
    %c2_8 = arith.constant 2 : index
    %c0_9 = arith.constant 0 : index
    %9 = vector.load %arg5[%c2_8, %c0_9] : memref<3x256xf32, #tpu.memory_space<vmem>>, vector<1x256xf32>
    %10 = vector.broadcast %8 : vector<128x1xf32> to vector<128x256xf32>
    %11 = arith.subf %5, %10 : vector<128x256xf32>
    %cst_10 = arith.constant 14.2857141 : f32
    %12 = vector.broadcast %cst_10 : f32 to vector<128x256xf32>
    %13 = arith.mulf %11, %12 : vector<128x256xf32>
    %14 = vector.broadcast %9 : vector<1x256xf32> to vector<128x256xf32>
    %15 = arith.subf %5, %14 : vector<128x256xf32>
    %cst_11 = arith.constant 14.2857141 : f32
    %16 = vector.broadcast %cst_11 : f32 to vector<128x256xf32>
    %17 = arith.mulf %15, %16 : vector<128x256xf32>
    %c128_i32 = arith.constant 128 : i32
    %18 = arith.muli %arg0, %c128_i32 : i32
    %19 = tpu.iota {dimensions = array<i32: 0>} : vector<128x256xi32>
    %20 = vector.broadcast %18 : i32 to vector<128x256xi32>
    %21 = arith.addi %19, %20 : vector<128x256xi32>
    %22 = tpu.iota {dimensions = array<i32: 1>} : vector<128x256xi32>
    %23 = arith.cmpi eq, %21, %22 : vector<128x256xi32>
    %c0_12 = arith.constant 0 : index
    %24 = memref.load %arg1[%c0_12] : memref<1xi32, #tpu.memory_space<smem>>
    %c0_i32_13 = arith.constant 0 : i32
    %25 = arith.cmpi eq, %24, %c0_i32_13 : i32
    %cst_14 = arith.constant dense<0xFF800000> : vector<128xf32>
    %26 = vector.multi_reduction <maximumf>, %13, %cst_14 [1] : vector<128x256xf32> to vector<128xf32>
    %27 = vector.shape_cast %26 : vector<128xf32> to vector<128x1xf32>
    %28 = arith.maximumf %27, %6 : vector<128x1xf32>
    %29 = vector.broadcast %28 : vector<128x1xf32> to vector<128x256xf32>
    %30 = arith.subf %13, %29 : vector<128x256xf32>
    %31 = math.exp %30 : vector<128x256xf32>
    %cst_15 = arith.constant 0.000000e+00 : f32
    %32 = vector.broadcast %cst_15 : f32 to vector<128x256xf32>
    %33 = arith.select %23, %32, %31 : vector<128x256xi1>, vector<128x256xf32>
    %cst_16 = arith.constant dense<0.000000e+00> : vector<128xf32>
    %34 = vector.multi_reduction <add>, %33, %cst_16 [1] : vector<128x256xf32> to vector<128xf32>
    %35 = vector.shape_cast %34 : vector<128xf32> to vector<128x1xf32>
    %cst_17 = arith.constant 0.00392156886 : f32
    %36 = vector.broadcast %cst_17 : f32 to vector<128x1xf32>
    %37 = arith.mulf %35, %36 : vector<128x1xf32>
    %cst_18 = arith.constant 1.000000e+00 : f32
    %cst_19 = arith.constant 1.000000e-01 : f32
    %38 = arith.subf %cst_18, %cst_19 : f32
    %39 = vector.broadcast %38 : f32 to vector<128x1xf32>
    %40 = arith.mulf %39, %7 : vector<128x1xf32>
    %41 = arith.subf %6, %28 : vector<128x1xf32>
    %42 = math.exp %41 : vector<128x1xf32>
    %43 = arith.mulf %40, %42 : vector<128x1xf32>
    %cst_20 = arith.constant 1.000000e-01 : f32
    %44 = vector.broadcast %cst_20 : f32 to vector<128x1xf32>
    %45 = arith.mulf %44, %37 : vector<128x1xf32>
    %46 = arith.addf %43, %45 : vector<128x1xf32>
    %47 = arith.select %25, %37, %46 : vector<128x1xf32>
    %c0_21 = arith.constant 0 : index
    %c0_22 = arith.constant 0 : index
    %48 = vector.load %arg6[%c0_21, %c0_22] : memref<128x2xf32, #tpu.memory_space<vmem>>, vector<128x1xf32>
    tpu.vector_store %arg6[%c0_21, %c0_22], %28 {strides = array<i32>} : memref<128x2xf32, #tpu.memory_space<vmem>>, vector<128x1xf32>,
    %c0_23 = arith.constant 0 : index
    %c1_24 = arith.constant 1 : index
    %49 = vector.load %arg6[%c0_23, %c1_24] : memref<128x2xf32, #tpu.memory_space<vmem>>, vector<128x1xf32>
    tpu.vector_store %arg6[%c0_23, %c1_24], %47 {strides = array<i32>} : memref<128x2xf32, #tpu.memory_space<vmem>>, vector<128x1xf32>,
    %cst_25 = arith.constant 9.99999982E-15 : f32
    %50 = vector.broadcast %cst_25 : f32 to vector<128x1xf32>
    %51 = arith.maximumf %47, %50 : vector<128x1xf32>
    %52 = tpu.reciprocal %51 : vector<128x1xf32> -> vector<128x1xf32>
    %53 = arith.mulf %33, %13 : vector<128x256xf32>
    %cst_26 = arith.constant dense<0.000000e+00> : vector<128xf32>
    %54 = vector.multi_reduction <add>, %53, %cst_26 [1] : vector<128x256xf32> to vector<128xf32>
    %55 = vector.shape_cast %54 : vector<128xf32> to vector<128x1xf32>
    %56 = arith.mulf %55, %52 : vector<128x1xf32>
    %c0_27 = arith.constant 0 : index
    %c0_28 = arith.constant 0 : index
    %57 = vector.load %arg11[%c0_27, %c0_28] : memref<1x1xf32, #tpu.memory_space<vmem>>, vector<1x1xf32>
    %cst_29 = arith.constant dense<0.000000e+00> : vector<1xf32>
    %58 = vector.multi_reduction <add>, %56, %cst_29 [0] : vector<128x1xf32> to vector<1xf32>
    %59 = vector.shape_cast %58 : vector<1xf32> to vector<1x1xf32>
    %60 = arith.addf %57, %59 : vector<1x1xf32>
    %c0_30 = arith.constant 0 : index
    %c0_31 = arith.constant 0 : index
    %61 = vector.load %arg11[%c0_30, %c0_31] : memref<1x1xf32, #tpu.memory_space<vmem>>, vector<1x1xf32>
    tpu.vector_store %arg11[%c0_30, %c0_31], %60 {strides = array<i32>} : memref<1x1xf32, #tpu.memory_space<vmem>>, vector<1x1xf32>,
    %c0_32 = arith.constant 0 : index
    %c0_33 = arith.constant 0 : index
    %62 = vector.load %arg8[%c0_32, %c0_33] : memref<1x256xf32, #tpu.memory_space<vmem>>, vector<1x256xf32>
    %cst_34 = arith.constant dense<0xFF800000> : vector<256xf32>
    %63 = vector.multi_reduction <maximumf>, %17, %cst_34 [0] : vector<128x256xf32> to vector<256xf32>
    %64 = vector.shape_cast %63 : vector<256xf32> to vector<1x256xf32>
    %65 = arith.maximumf %62, %64 : vector<1x256xf32>
    %66 = arith.subf %62, %65 : vector<1x256xf32>
    %67 = math.exp %66 : vector<1x256xf32>
    %cst_35 = arith.constant 14.2857141 : f32
    %68 = vector.broadcast %cst_35 : f32 to vector<128x1xf32>
    %69 = arith.mulf %8, %68 : vector<128x1xf32>
    %70 = arith.addf %69, %28 : vector<128x1xf32>
    %71 = math.exp %70 : vector<128x1xf32>
    %cst_36 = arith.constant 0.000000e+00 : f32
    %72 = vector.broadcast %cst_36 : f32 to vector<1x256xf32>
    %73 = arith.subf %72, %9 : vector<1x256xf32>
    %cst_37 = arith.constant 14.2857141 : f32
    %74 = vector.broadcast %cst_37 : f32 to vector<1x256xf32>
    %75 = arith.mulf %73, %74 : vector<1x256xf32>
    %76 = arith.subf %75, %65 : vector<1x256xf32>
    %77 = math.exp %76 : vector<1x256xf32>
    %78 = vector.broadcast %71 : vector<128x1xf32> to vector<128x256xf32>
    %79 = arith.mulf %33, %78 : vector<128x256xf32>
    %80 = vector.broadcast %77 : vector<1x256xf32> to vector<128x256xf32>
    %81 = arith.mulf %79, %80 : vector<128x256xf32>
    %c0_38 = arith.constant 0 : index
    %c0_39 = arith.constant 0 : index
    %82 = vector.load %arg9[%c0_38, %c0_39] : memref<1x256xf32, #tpu.memory_space<vmem>>, vector<1x256xf32>
    %83 = arith.mulf %82, %67 : vector<1x256xf32>
    %cst_40 = arith.constant dense<0.000000e+00> : vector<256xf32>
    %84 = vector.multi_reduction <add>, %81, %cst_40 [0] : vector<128x256xf32> to vector<256xf32>
    %85 = vector.shape_cast %84 : vector<256xf32> to vector<1x256xf32>
    %86 = arith.addf %83, %85 : vector<1x256xf32>
    %c0_41 = arith.constant 0 : index
    %c0_42 = arith.constant 0 : index
    %87 = vector.load %arg9[%c0_41, %c0_42] : memref<1x256xf32, #tpu.memory_space<vmem>>, vector<1x256xf32>
    tpu.vector_store %arg9[%c0_41, %c0_42], %86 {strides = array<i32>} : memref<1x256xf32, #tpu.memory_space<vmem>>, vector<1x256xf32>,
    %c0_43 = arith.constant 0 : index
    %c0_44 = arith.constant 0 : index
    %88 = vector.load %arg10[%c0_43, %c0_44] : memref<1x256xf32, #tpu.memory_space<vmem>>, vector<1x256xf32>
    %89 = arith.mulf %88, %67 : vector<1x256xf32>
    %90 = arith.mulf %81, %17 : vector<128x256xf32>
    %cst_45 = arith.constant dense<0.000000e+00> : vector<256xf32>
    %91 = vector.multi_reduction <add>, %90, %cst_45 [0] : vector<128x256xf32> to vector<256xf32>
    %92 = vector.shape_cast %91 : vector<256xf32> to vector<1x256xf32>
    %93 = arith.addf %89, %92 : vector<1x256xf32>
    %c0_46 = arith.constant 0 : index
    %c0_47 = arith.constant 0 : index
    %94 = vector.load %arg10[%c0_46, %c0_47] : memref<1x256xf32, #tpu.memory_space<vmem>>, vector<1x256xf32>
    tpu.vector_store %arg10[%c0_46, %c0_47], %93 {strides = array<i32>} : memref<1x256xf32, #tpu.memory_space<vmem>>, vector<1x256xf32>,
    %c0_48 = arith.constant 0 : index
    %c0_49 = arith.constant 0 : index
    %95 = vector.load %arg8[%c0_48, %c0_49] : memref<1x256xf32, #tpu.memory_space<vmem>>, vector<1x256xf32>
    tpu.vector_store %arg8[%c0_48, %c0_49], %65 {strides = array<i32>} : memref<1x256xf32, #tpu.memory_space<vmem>>, vector<1x256xf32>,
    %c1_i32 = arith.constant 1 : i32
    %96 = arith.cmpi eq, %arg0, %c1_i32 : i32
    %97 = arith.extui %96 : i1 to i32
    %cst_50 = arith.constant 0.00392156886 : f32
    %cst_51 = arith.constant 1.000000e-01 : f32
    %c0_i32_52 = arith.constant 0 : i32
    %98 = arith.cmpi ne, %97, %c0_i32_52 : i32
    scf.if %98 {
      %c0_53 = arith.constant 0 : index
      %c0_54 = arith.constant 0 : index
      %99 = vector.load %arg8[%c0_53, %c0_54] : memref<1x256xf32, #tpu.memory_space<vmem>>, vector<1x256xf32>
      %c0_55 = arith.constant 0 : index
      %c0_56 = arith.constant 0 : index
      %100 = vector.load %arg9[%c0_55, %c0_56] : memref<1x256xf32, #tpu.memory_space<vmem>>, vector<1x256xf32>
      %101 = vector.broadcast %cst_50 : f32 to vector<1x256xf32>
      %102 = arith.mulf %100, %101 : vector<1x256xf32>
      %c0_57 = arith.constant 0 : index
      %c0_58 = arith.constant 0 : index
      %103 = vector.load %arg5[%c0_57, %c0_58] : memref<3x256xf32, #tpu.memory_space<vmem>>, vector<1x256xf32>
      %c1_59 = arith.constant 1 : index
      %c0_60 = arith.constant 0 : index
      %104 = vector.load %arg5[%c1_59, %c0_60] : memref<3x256xf32, #tpu.memory_space<vmem>>, vector<1x256xf32>
      %cst_61 = arith.constant 1.000000e+00 : f32
      %105 = arith.subf %cst_61, %cst_51 : f32
      %106 = vector.broadcast %105 : f32 to vector<1x256xf32>
      %107 = arith.mulf %106, %104 : vector<1x256xf32>
      %108 = arith.subf %103, %99 : vector<1x256xf32>
      %109 = math.exp %108 : vector<1x256xf32>
      %110 = arith.mulf %107, %109 : vector<1x256xf32>
      %111 = vector.broadcast %cst_51 : f32 to vector<1x256xf32>
      %112 = arith.mulf %111, %102 : vector<1x256xf32>
      %113 = arith.addf %110, %112 : vector<1x256xf32>
      %114 = arith.select %25, %102, %113 : vector<1x256xf32>
      %c0_62 = arith.constant 0 : index
      %c0_63 = arith.constant 0 : index
      %115 = vector.load %arg7[%c0_62, %c0_63] : memref<3x256xf32, #tpu.memory_space<vmem>>, vector<1x256xf32>
      tpu.vector_store %arg7[%c0_62, %c0_63], %99 {strides = array<i32>} : memref<3x256xf32, #tpu.memory_space<vmem>>, vector<1x256xf32>,
      %c1_64 = arith.constant 1 : index
      %c0_65 = arith.constant 0 : index
      %116 = vector.load %arg7[%c1_64, %c0_65] : memref<3x256xf32, #tpu.memory_space<vmem>>, vector<1x256xf32>
      tpu.vector_store %arg7[%c1_64, %c0_65], %114 {strides = array<i32>} : memref<3x256xf32, #tpu.memory_space<vmem>>, vector<1x256xf32>,
      %cst_66 = arith.constant 9.99999982E-15 : f32
      %117 = vector.broadcast %cst_66 : f32 to vector<1x256xf32>
      %118 = arith.maximumf %114, %117 : vector<1x256xf32>
      %119 = tpu.reciprocal %118 : vector<1x256xf32> -> vector<1x256xf32>
      %c0_67 = arith.constant 0 : index
      %c0_68 = arith.constant 0 : index
      %120 = vector.load %arg10[%c0_67, %c0_68] : memref<1x256xf32, #tpu.memory_space<vmem>>, vector<1x256xf32>
      %121 = arith.mulf %120, %119 : vector<1x256xf32>
      %cst_69 = arith.constant dense<0.000000e+00> : vector<1xf32>
      %122 = vector.multi_reduction <add>, %121, %cst_69 [1] : vector<1x256xf32> to vector<1xf32>
      %123 = vector.shape_cast %122 : vector<1xf32> to vector<1x1xf32>
      %c0_70 = arith.constant 0 : index
      %c0_71 = arith.constant 0 : index
      %124 = vector.load %arg11[%c0_70, %c0_71] : memref<1x1xf32, #tpu.memory_space<vmem>>, vector<1x1xf32>
      %125 = arith.addf %124, %123 : vector<1x1xf32>
      %cst_72 = arith.constant 1.07230392E-6 : f32
      %126 = vector.broadcast %cst_72 : f32 to vector<1x1xf32>
      %127 = arith.mulf %125, %126 : vector<1x1xf32>
      %128 = vector.shape_cast %127 : vector<1x1xf32> to vector<1x1xf32>
      %129 = vector.broadcast %128 : vector<1x1xf32> to vector<1x256xf32>
      %c2_73 = arith.constant 2 : index
      %c0_74 = arith.constant 0 : index
      %130 = vector.load %arg7[%c2_73, %c0_74] : memref<3x256xf32, #tpu.memory_space<vmem>>, vector<1x256xf32>
      tpu.vector_store %arg7[%c2_73, %c0_74], %129 {strides = array<i32>} : memref<3x256xf32, #tpu.memory_space<vmem>>, vector<1x256xf32>,
    } else {
    }
    return
  }
  func.func @transform_0(%arg0: i32, %arg1: memref<1xi32, #tpu.memory_space<smem>>) -> (i32, i32) {
    %c0_i32 = arith.constant 0 : i32
    %c0_i32_0 = arith.constant 0 : i32
    return %arg0, %c0_i32 : i32, i32
  }
  func.func @transform_1(%arg0: i32, %arg1: memref<1xi32, #tpu.memory_space<smem>>) -> (i32, i32) {
    %c0_i32 = arith.constant 0 : i32
    %c0_i32_0 = arith.constant 0 : i32
    %c0_i32_1 = arith.constant 0 : i32
    return %c0_i32, %c0_i32_0 : i32, i32
  }
  func.func @transform_2(%arg0: i32, %arg1: memref<1xi32, #tpu.memory_space<smem>>) -> (i32, i32) {
    %c0_i32 = arith.constant 0 : i32
    %c0_i32_0 = arith.constant 0 : i32
    return %arg0, %c0_i32 : i32, i32
  }
  func.func @transform_3(%arg0: i32, %arg1: memref<1xi32, #tpu.memory_space<smem>>) -> (i32, i32) {
    %c0_i32 = arith.constant 0 : i32
    %c0_i32_0 = arith.constant 0 : i32
    %c0_i32_1 = arith.constant 0 : i32
    return %c0_i32, %c0_i32_0 : i32, i32
  }
  func.func @transform_4(%arg0: i32, %arg1: memref<1xi32, #tpu.memory_space<smem>>) -> (i32, i32) {
    %c0_i32 = arith.constant 0 : i32
    %c0_i32_0 = arith.constant 0 : i32
    return %arg0, %c0_i32 : i32, i32
  }
  func.func @transform_5(%arg0: i32, %arg1: memref<1xi32, #tpu.memory_space<smem>>) -> (i32, i32) {
    %c0_i32 = arith.constant 0 : i32
    %c0_i32_0 = arith.constant 0 : i32
    %c0_i32_1 = arith.constant 0 : i32
    return %c0_i32, %c0_i32_0 : i32, i32
  }
}

module attributes {stable_mosaic.version = 11 : i64} {
  func.func @_sogclr_kernel(%arg0: i32, %arg1: memref<1xi32, #tpu.memory_space<smem>>, %arg2: memref<128x128xbf16, #tpu.memory_space<vmem>>, %arg3: memref<256x128xbf16, #tpu.memory_space<vmem>>, %arg4: memref<128x3xf32, #tpu.memory_space<vmem>>, %arg5: memref<3x256xf32, #tpu.memory_space<vmem>>, %arg6: memref<128x2xf32, #tpu.memory_space<vmem>>, %arg7: memref<3x256xf32, #tpu.memory_space<vmem>>, %arg8: memref<1x256xf32, #tpu.memory_space<vmem>>, %arg9: memref<1x256xf32, #tpu.memory_space<vmem>>, %arg10: memref<1x256xf32, #tpu.memory_space<vmem>>, %arg11: memref<1x1xf32, #tpu.memory_space<vmem>>) attributes {dimension_semantics = [#tpu.dimension_semantics<arbitrary>], iteration_bounds = array<i64: 2>, scalar_prefetch = 1 : i64, scratch_operands = 4 : i64, tpu.core_type = #tpu.core_type<tc>, window_params = [{transform_indices = @transform_0, window_bounds = array<i64: 128, 128>}, {pipeline_mode = #tpu.pipeline_mode<synchronous>, transform_indices = @transform_1, window_bounds = array<i64: 256, 128>}, {transform_indices = @transform_2, window_bounds = array<i64: 128, 3>}, {pipeline_mode = #tpu.pipeline_mode<synchronous>, transform_indices = @transform_3, window_bounds = array<i64: 3, 256>}, {transform_indices = @transform_4, window_bounds = array<i64: 128, 2>}, {pipeline_mode = #tpu.pipeline_mode<synchronous>, transform_indices = @transform_5, window_bounds = array<i64: 3, 256>}]} {
    %c0_i32 = arith.constant 0 : i32
    %0 = arith.cmpi eq, %arg0, %c0_i32 : i32
    %1 = arith.extui %0 : i1 to i32
    %c0_i32_0 = arith.constant 0 : i32
    %2 = arith.cmpi ne, %1, %c0_i32_0 : i32
    scf.if %2 {
      %c0_53 = arith.constant 0 : index
      %c0_54 = arith.constant 0 : index
      %99 = vector.load %arg5[%c0_53, %c0_54] : memref<3x256xf32, #tpu.memory_space<vmem>>, vector<1x256xf32>
      %c0_55 = arith.constant 0 : index
      %c0_56 = arith.constant 0 : index
      %100 = vector.load %arg8[%c0_55, %c0_56] : memref<1x256xf32, #tpu.memory_space<vmem>>, vector<1x256xf32>
      tpu.vector_store %arg8[%c0_55, %c0_56], %99 {strides = array<i32>} : memref<1x256xf32, #tpu.memory_space<vmem>>, vector<1x256xf32>,
      %cst_57 = arith.constant 0.000000e+00 : f32
      %101 = vector.broadcast %cst_57 : f32 to vector<1x256xf32>
      %c0_58 = arith.constant 0 : index
      %c0_59 = arith.constant 0 : index
      %102 = vector.load %arg9[%c0_58, %c0_59] : memref<1x256xf32, #tpu.memory_space<vmem>>, vector<1x256xf32>
      tpu.vector_store %arg9[%c0_58, %c0_59], %101 {strides = array<i32>} : memref<1x256xf32, #tpu.memory_space<vmem>>, vector<1x256xf32>,
      %cst_60 = arith.constant 0.000000e+00 : f32
      %103 = vector.broadcast %cst_60 : f32 to vector<1x256xf32>
      %c0_61 = arith.constant 0 : index
      %c0_62 = arith.constant 0 : index
      %104 = vector.load %arg10[%c0_61, %c0_62] : memref<1x256xf32, #tpu.memory_space<vmem>>, vector<1x256xf32>
      tpu.vector_store %arg10[%c0_61, %c0_62], %103 {strides = array<i32>} : memref<1x256xf32, #tpu.memory_space<vmem>>, vector<1x256xf32>,
      %cst_63 = arith.constant 0.000000e+00 : f32
      %105 = vector.broadcast %cst_63 : f32 to vector<1x1xf32>
      %c0_64 = arith.constant 0 : index
      %c0_65 = arith.constant 0 : index
      %106 = vector.load %arg11[%c0_64, %c0_65] : memref<1x1xf32, #tpu.memory_space<vmem>>, vector<1x1xf32>
      tpu.vector_store %arg11[%c0_64, %c0_65], %105 {strides = array<i32>} : memref<1x1xf32, #tpu.memory_space<vmem>>, vector<1x1xf32>,
    } else {
    }
    %c0 = arith.constant 0 : index
    %c0_1 = arith.constant 0 : index
    %3 = vector.load %arg2[%c0, %c0_1] : memref<128x128xbf16, #tpu.memory_space<vmem>>, vector<128x128xbf16>
    %c0_2 = arith.constant 0 : index
    %c0_3 = arith.constant 0 : index
    %4 = vector.load %arg3[%c0_2, %c0_3] : memref<256x128xbf16, #tpu.memory_space<vmem>>, vector<256x128xbf16>
    %cst = arith.constant dense<0.000000e+00> : vector<128x256xf32>
    %5 = tpu.matmul %3, %4, %cst {dimension_numbers = #tpu.dot_dimension_numbers<[1], [1], [0], [0], [0, 0, 1, 0], [], []>} : vector<128x128xbf16>, vector<256x128xbf16>, vector<128x256xf32> -> vector<128x256xf32>
    %c0_4 = arith.constant 0 : index
    %c0_5 = arith.constant 0 : index
    %6 = vector.load %arg4[%c0_4, %c0_5] : memref<128x3xf32, #tpu.memory_space<vmem>>, vector<128x1xf32>
    %c0_6 = arith.constant 0 : index
    %c1 = arith.constant 1 : index
    %7 = vector.load %arg4[%c0_6, %c1] : memref<128x3xf32, #tpu.memory_space<vmem>>, vector<128x1xf32>
    %c0_7 = arith.constant 0 : index
    %c2 = arith.constant 2 : index
    %8 = vector.load %arg4[%c0_7, %c2] : memref<128x3xf32, #tpu.memory_space<vmem>>, vector<128x1xf32>
    %c2_8 = arith.constant 2 : index
    %c0_9 = arith.constant 0 : index
    %9 = vector.load %arg5[%c2_8, %c0_9] : memref<3x256xf32, #tpu.memory_space<vmem>>, vector<1x256xf32>
    %10 = vector.broadcast %8 : vector<128x1xf32> to vector<128x256xf32>
    %11 = arith.subf %5, %10 : vector<128x256xf32>
    %cst_10 = arith.constant 14.2857141 : f32
    %12 = vector.broadcast %cst_10 : f32 to vector<128x256xf32>
    %13 = arith.mulf %11, %12 : vector<128x256xf32>
    %14 = vector.broadcast %9 : vector<1x256xf32> to vector<128x256xf32>
    %15 = arith.subf %5, %14 : vector<128x256xf32>
    %cst_11 = arith.constant 14.2857141 : f32
    %16 = vector.broadcast %cst_11 : f32 to vector<128x256xf32>
    %17 = arith.mulf %15, %16 : vector<128x256xf32>
    %c128_i32 = arith.constant 128 : i32
    %18 = arith.muli %arg0, %c128_i32 : i32
    %19 = tpu.iota {dimensions = array<i32: 0>} : vector<128x256xi32>
    %20 = vector.broadcast %18 : i32 to vector<128x256xi32>
    %21 = arith.addi %19, %20 : vector<128x256xi32>
    %22 = tpu.iota {dimensions = array<i32: 1>} : vector<128x256xi32>
    %23 = arith.cmpi eq, %21, %22 : vector<128x256xi32>
    %c0_12 = arith.constant 0 : index
    %24 = memref.load %arg1[%c0_12] : memref<1xi32, #tpu.memory_space<smem>>
    %c0_i32_13 = arith.constant 0 : i32
    %25 = arith.cmpi eq, %24, %c0_i32_13 : i32
    %cst_14 = arith.constant dense<0xFF800000> : vector<128xf32>
    %26 = vector.multi_reduction <maximumf>, %13, %cst_14 [1] : vector<128x256xf32> to vector<128xf32>
    %27 = vector.shape_cast %26 : vector<128xf32> to vector<128x1xf32>
    %28 = arith.maximumf %27, %6 : vector<128x1xf32>
    %29 = vector.broadcast %28 : vector<128x1xf32> to vector<128x256xf32>
    %30 = arith.subf %13, %29 : vector<128x256xf32>
    %31 = math.exp %30 : vector<128x256xf32>
    %cst_15 = arith.constant 0.000000e+00 : f32
    %32 = vector.broadcast %cst_15 : f32 to vector<128x256xf32>
    %33 = arith.select %23, %32, %31 : vector<128x256xi1>, vector<128x256xf32>
    %cst_16 = arith.constant dense<0.000000e+00> : vector<128xf32>
    %34 = vector.multi_reduction <add>, %33, %cst_16 [1] : vector<128x256xf32> to vector<128xf32>
    %35 = vector.shape_cast %34 : vector<128xf32> to vector<128x1xf32>
    %cst_17 = arith.constant 0.00392156886 : f32
    %36 = vector.broadcast %cst_17 : f32 to vector<128x1xf32>
    %37 = arith.mulf %35, %36 : vector<128x1xf32>
    %cst_18 = arith.constant 1.000000e+00 : f32
    %cst_19 = arith.constant 1.000000e-01 : f32
    %38 = arith.subf %cst_18, %cst_19 : f32
    %39 = vector.broadcast %38 : f32 to vector<128x1xf32>
    %40 = arith.mulf %39, %7 : vector<128x1xf32>
    %41 = arith.subf %6, %28 : vector<128x1xf32>
    %42 = math.exp %41 : vector<128x1xf32>
    %43 = arith.mulf %40, %42 : vector<128x1xf32>
    %cst_20 = arith.constant 1.000000e-01 : f32
    %44 = vector.broadcast %cst_20 : f32 to vector<128x1xf32>
    %45 = arith.mulf %44, %37 : vector<128x1xf32>
    %46 = arith.addf %43, %45 : vector<128x1xf32>
    %47 = arith.select %25, %37, %46 : vector<128x1xf32>
    %c0_21 = arith.constant 0 : index
    %c0_22 = arith.constant 0 : index
    %48 = vector.load %arg6[%c0_21, %c0_22] : memref<128x2xf32, #tpu.memory_space<vmem>>, vector<128x1xf32>
    tpu.vector_store %arg6[%c0_21, %c0_22], %28 {strides = array<i32>} : memref<128x2xf32, #tpu.memory_space<vmem>>, vector<128x1xf32>,
    %c0_23 = arith.constant 0 : index
    %c1_24 = arith.constant 1 : index
    %49 = vector.load %arg6[%c0_23, %c1_24] : memref<128x2xf32, #tpu.memory_space<vmem>>, vector<128x1xf32>
    tpu.vector_store %arg6[%c0_23, %c1_24], %47 {strides = array<i32>} : memref<128x2xf32, #tpu.memory_space<vmem>>, vector<128x1xf32>,
    %cst_25 = arith.constant 9.99999982E-15 : f32
    %50 = vector.broadcast %cst_25 : f32 to vector<128x1xf32>
    %51 = arith.maximumf %47, %50 : vector<128x1xf32>
    %52 = tpu.reciprocal %51 : vector<128x1xf32> -> vector<128x1xf32>
    %53 = arith.mulf %33, %13 : vector<128x256xf32>
    %cst_26 = arith.constant dense<0.000000e+00> : vector<128xf32>
    %54 = vector.multi_reduction <add>, %53, %cst_26 [1] : vector<128x256xf32> to vector<128xf32>
    %55 = vector.shape_cast %54 : vector<128xf32> to vector<128x1xf32>
    %56 = arith.mulf %55, %52 : vector<128x1xf32>
    %c0_27 = arith.constant 0 : index
    %c0_28 = arith.constant 0 : index
    %57 = vector.load %arg11[%c0_27, %c0_28] : memref<1x1xf32, #tpu.memory_space<vmem>>, vector<1x1xf32>
    %cst_29 = arith.constant dense<0.000000e+00> : vector<1xf32>
    %58 = vector.multi_reduction <add>, %56, %cst_29 [0] : vector<128x1xf32> to vector<1xf32>
    %59 = vector.shape_cast %58 : vector<1xf32> to vector<1x1xf32>
    %60 = arith.addf %57, %59 : vector<1x1xf32>
    %c0_30 = arith.constant 0 : index
    %c0_31 = arith.constant 0 : index
    %61 = vector.load %arg11[%c0_30, %c0_31] : memref<1x1xf32, #tpu.memory_space<vmem>>, vector<1x1xf32>
    tpu.vector_store %arg11[%c0_30, %c0_31], %60 {strides = array<i32>} : memref<1x1xf32, #tpu.memory_space<vmem>>, vector<1x1xf32>,
    %c0_32 = arith.constant 0 : index
    %c0_33 = arith.constant 0 : index
    %62 = vector.load %arg8[%c0_32, %c0_33] : memref<1x256xf32, #tpu.memory_space<vmem>>, vector<1x256xf32>
    %cst_34 = arith.constant dense<0xFF800000> : vector<256xf32>
    %63 = vector.multi_reduction <maximumf>, %17, %cst_34 [0] : vector<128x256xf32> to vector<256xf32>
    %64 = vector.shape_cast %63 : vector<256xf32> to vector<1x256xf32>
    %65 = arith.maximumf %62, %64 : vector<1x256xf32>
    %66 = arith.subf %62, %65 : vector<1x256xf32>
    %67 = math.exp %66 : vector<1x256xf32>
    %cst_35 = arith.constant 14.2857141 : f32
    %68 = vector.broadcast %cst_35 : f32 to vector<128x1xf32>
    %69 = arith.mulf %8, %68 : vector<128x1xf32>
    %70 = arith.addf %69, %28 : vector<128x1xf32>
    %71 = math.exp %70 : vector<128x1xf32>
    %cst_36 = arith.constant 0.000000e+00 : f32
    %72 = vector.broadcast %cst_36 : f32 to vector<1x256xf32>
    %73 = arith.subf %72, %9 : vector<1x256xf32>
    %cst_37 = arith.constant 14.2857141 : f32
    %74 = vector.broadcast %cst_37 : f32 to vector<1x256xf32>
    %75 = arith.mulf %73, %74 : vector<1x256xf32>
    %76 = arith.subf %75, %65 : vector<1x256xf32>
    %77 = math.exp %76 : vector<1x256xf32>
    %78 = vector.broadcast %71 : vector<128x1xf32> to vector<128x256xf32>
    %79 = arith.mulf %33, %78 : vector<128x256xf32>
    %80 = vector.broadcast %77 : vector<1x256xf32> to vector<128x256xf32>
    %81 = arith.mulf %79, %80 : vector<128x256xf32>
    %c0_38 = arith.constant 0 : index
    %c0_39 = arith.constant 0 : index
    %82 = vector.load %arg9[%c0_38, %c0_39] : memref<1x256xf32, #tpu.memory_space<vmem>>, vector<1x256xf32>
    %83 = arith.mulf %82, %67 : vector<1x256xf32>
    %cst_40 = arith.constant dense<0.000000e+00> : vector<256xf32>
    %84 = vector.multi_reduction <add>, %81, %cst_40 [0] : vector<128x256xf32> to vector<256xf32>
    %85 = vector.shape_cast %84 : vector<256xf32> to vector<1x256xf32>
    %86 = arith.addf %83, %85 : vector<1x256xf32>
    %c0_41 = arith.constant 0 : index
    %c0_42 = arith.constant 0 : index
    %87 = vector.load %arg9[%c0_41, %c0_42] : memref<1x256xf32, #tpu.memory_space<vmem>>, vector<1x256xf32>
    tpu.vector_store %arg9[%c0_41, %c0_42], %86 {strides = array<i32>} : memref<1x256xf32, #tpu.memory_space<vmem>>, vector<1x256xf32>,
    %c0_43 = arith.constant 0 : index
    %c0_44 = arith.constant 0 : index
    %88 = vector.load %arg10[%c0_43, %c0_44] : memref<1x256xf32, #tpu.memory_space<vmem>>, vector<1x256xf32>
    %89 = arith.mulf %88, %67 : vector<1x256xf32>
    %90 = arith.mulf %81, %17 : vector<128x256xf32>
    %cst_45 = arith.constant dense<0.000000e+00> : vector<256xf32>
    %91 = vector.multi_reduction <add>, %90, %cst_45 [0] : vector<128x256xf32> to vector<256xf32>
    %92 = vector.shape_cast %91 : vector<256xf32> to vector<1x256xf32>
    %93 = arith.addf %89, %92 : vector<1x256xf32>
    %c0_46 = arith.constant 0 : index
    %c0_47 = arith.constant 0 : index
    %94 = vector.load %arg10[%c0_46, %c0_47] : memref<1x256xf32, #tpu.memory_space<vmem>>, vector<1x256xf32>
    tpu.vector_store %arg10[%c0_46, %c0_47], %93 {strides = array<i32>} : memref<1x256xf32, #tpu.memory_space<vmem>>, vector<1x256xf32>,
    %c0_48 = arith.constant 0 : index
    %c0_49 = arith.constant 0 : index
    %95 = vector.load %arg8[%c0_48, %c0_49] : memref<1x256xf32, #tpu.memory_space<vmem>>, vector<1x256xf32>
    tpu.vector_store %arg8[%c0_48, %c0_49], %65 {strides = array<i32>} : memref<1x256xf32, #tpu.memory_space<vmem>>, vector<1x256xf32>,
    %c1_i32 = arith.constant 1 : i32
    %96 = arith.cmpi eq, %arg0, %c1_i32 : i32
    %97 = arith.extui %96 : i1 to i32
    %cst_50 = arith.constant 0.00392156886 : f32
    %cst_51 = arith.constant 1.000000e-01 : f32
    %c0_i32_52 = arith.constant 0 : i32
    %98 = arith.cmpi ne, %97, %c0_i32_52 : i32
    scf.if %98 {
      %c0_53 = arith.constant 0 : index
      %c0_54 = arith.constant 0 : index
      %99 = vector.load %arg8[%c0_53, %c0_54] : memref<1x256xf32, #tpu.memory_space<vmem>>, vector<1x256xf32>
      %c0_55 = arith.constant 0 : index
      %c0_56 = arith.constant 0 : index
      %100 = vector.load %arg9[%c0_55, %c0_56] : memref<1x256xf32, #tpu.memory_space<vmem>>, vector<1x256xf32>
      %101 = vector.broadcast %cst_50 : f32 to vector<1x256xf32>
      %102 = arith.mulf %100, %101 : vector<1x256xf32>
      %c0_57 = arith.constant 0 : index
      %c0_58 = arith.constant 0 : index
      %103 = vector.load %arg5[%c0_57, %c0_58] : memref<3x256xf32, #tpu.memory_space<vmem>>, vector<1x256xf32>
      %c1_59 = arith.constant 1 : index
      %c0_60 = arith.constant 0 : index
      %104 = vector.load %arg5[%c1_59, %c0_60] : memref<3x256xf32, #tpu.memory_space<vmem>>, vector<1x256xf32>
      %cst_61 = arith.constant 1.000000e+00 : f32
      %105 = arith.subf %cst_61, %cst_51 : f32
      %106 = vector.broadcast %105 : f32 to vector<1x256xf32>
      %107 = arith.mulf %106, %104 : vector<1x256xf32>
      %108 = arith.subf %103, %99 : vector<1x256xf32>
      %109 = math.exp %108 : vector<1x256xf32>
      %110 = arith.mulf %107, %109 : vector<1x256xf32>
      %111 = vector.broadcast %cst_51 : f32 to vector<1x256xf32>
      %112 = arith.mulf %111, %102 : vector<1x256xf32>
      %113 = arith.addf %110, %112 : vector<1x256xf32>
      %114 = arith.select %25, %102, %113 : vector<1x256xf32>
      %c0_62 = arith.constant 0 : index
      %c0_63 = arith.constant 0 : index
      %115 = vector.load %arg7[%c0_62, %c0_63] : memref<3x256xf32, #tpu.memory_space<vmem>>, vector<1x256xf32>
      tpu.vector_store %arg7[%c0_62, %c0_63], %99 {strides = array<i32>} : memref<3x256xf32, #tpu.memory_space<vmem>>, vector<1x256xf32>,
      %c1_64 = arith.constant 1 : index
      %c0_65 = arith.constant 0 : index
      %116 = vector.load %arg7[%c1_64, %c0_65] : memref<3x256xf32, #tpu.memory_space<vmem>>, vector<1x256xf32>
      tpu.vector_store %arg7[%c1_64, %c0_65], %114 {strides = array<i32>} : memref<3x256xf32, #tpu.memory_space<vmem>>, vector<1x256xf32>,
      %cst_66 = arith.constant 9.99999982E-15 : f32
      %117 = vector.broadcast %cst_66 : f32 to vector<1x256xf32>
      %118 = arith.maximumf %114, %117 : vector<1x256xf32>
      %119 = tpu.reciprocal %118 : vector<1x256xf32> -> vector<1x256xf32>
      %c0_67 = arith.constant 0 : index
      %c0_68 = arith.constant 0 : index
      %120 = vector.load %arg10[%c0_67, %c0_68] : memref<1x256xf32, #tpu.memory_space<vmem>>, vector<1x256xf32>
      %121 = arith.mulf %120, %119 : vector<1x256xf32>
      %cst_69 = arith.constant dense<0.000000e+00> : vector<1xf32>
      %122 = vector.multi_reduction <add>, %121, %cst_69 [1] : vector<1x256xf32> to vector<1xf32>
      %123 = vector.shape_cast %122 : vector<1xf32> to vector<1x1xf32>
      %c0_70 = arith.constant 0 : index
      %c0_71 = arith.constant 0 : index
      %124 = vector.load %arg11[%c0_70, %c0_71] : memref<1x1xf32, #tpu.memory_space<vmem>>, vector<1x1xf32>
      %125 = arith.addf %124, %123 : vector<1x1xf32>
      %cst_72 = arith.constant 1.07230392E-6 : f32
      %126 = vector.broadcast %cst_72 : f32 to vector<1x1xf32>
      %127 = arith.mulf %125, %126 : vector<1x1xf32>
      %128 = vector.shape_cast %127 : vector<1x1xf32> to vector<1x1xf32>
      %129 = vector.broadcast %128 : vector<1x1xf32> to vector<1x256xf32>
      %c2_73 = arith.constant 2 : index
      %c0_74 = arith.constant 0 : index
      %130 = vector.load %arg7[%c2_73, %c0_74] : memref<3x256xf32, #tpu.memory_space<vmem>>, vector<1x256xf32>
      tpu.vector_store %arg7[%c2_73, %c0_74], %129 {strides = array<i32>} : memref<3x256xf32, #tpu.memory_space<vmem>>, vector<1x256xf32>,
    } else {
    }
    return
  }
  func.func @transform_0(%arg0: i32, %arg1: memref<1xi32, #tpu.memory_space<smem>>) -> (i32, i32) {
    %c0_i32 = arith.constant 0 : i32
    %c0_i32_0 = arith.constant 0 : i32
    return %arg0, %c0_i32 : i32, i32
  }
  func.func @transform_1(%arg0: i32, %arg1: memref<1xi32, #tpu.memory_space<smem>>) -> (i32, i32) {
    %c0_i32 = arith.constant 0 : i32
    %c0_i32_0 = arith.constant 0 : i32
    %c0_i32_1 = arith.constant 0 : i32
    return %c0_i32, %c0_i32_0 : i32, i32
  }
  func.func @transform_2(%arg0: i32, %arg1: memref<1xi32, #tpu.memory_space<smem>>) -> (i32, i32) {
    %c0_i32 = arith.constant 0 : i32
    %c0_i32_0 = arith.constant 0 : i32
    return %arg0, %c0_i32 : i32, i32
  }
  func.func @transform_3(%arg0: i32, %arg1: memref<1xi32, #tpu.memory_space<smem>>) -> (i32, i32) {
    %c0_i32 = arith.constant 0 : i32
    %c0_i32_0 = arith.constant 0 : i32
    %c0_i32_1 = arith.constant 0 : i32
    return %c0_i32, %c0_i32_0 : i32, i32
  }
  func.func @transform_4(%arg0: i32, %arg1: memref<1xi32, #tpu.memory_space<smem>>) -> (i32, i32) {
    %c0_i32 = arith.constant 0 : i32
    %c0_i32_0 = arith.constant 0 : i32
    return %arg0, %c0_i32 : i32, i32
  }
  func.func @transform_5(%arg0: i32, %arg1: memref<1xi32, #tpu.memory_space<smem>>) -> (i32, i32) {
    %c0_i32 = arith.constant 0 : i32
    %c0_i32_0 = arith.constant 0 : i32
    %c0_i32_1 = arith.constant 0 : i32
    return %c0_i32, %c0_i32_0 : i32, i32
  }
}

</mosaic_0001>

<bundles_post_ra>
// kernel: tpu_custom_call.1
= control target key start
LH: loop header
LB: loop body
LE: loop exit
PB: predicated region body
PF: predicated region fallthrough
CT: control target
= control target key end

     0   :  { %s4609_s0 = inlined_call_operand.<no memory space> [shape: s32[1], index: 0, kind: input, shape index: {}]   ;;  %s4610_s1 = inlined_call_operand.hbm [shape: bf16[256,128], index: 1, kind: input, shape index: {}]   ;;  %s4611_s2 = inlined_call_operand.hbm [shape: bf16[256,128], index: 2, kind: input, shape index: {}]   ;;  %s4612_s3 = inlined_call_operand.hbm [shape: f32[256,3], index: 3, kind: input, shape index: {}]   ;;  %s4613_s4 = inlined_call_operand.hbm [shape: f32[3,256], index: 4, kind: input, shape index: {}]   ;;  %s4614_s5 = inlined_call_operand.hbm [shape: f32[256,2], index: 5, kind: output, shape index: {0}]   ;;  %s4615_s6 = inlined_call_operand.hbm [shape: f32[3,256], index: 6, kind: output, shape index: {1}]  }
   0x1   :  { %4741 = sst [smem:[#allocation89_spill]] %s4610_s1 }
   0x2   :  { %4742 = sst [smem:[#allocation90_spill]] %s4611_s2 }
   0x3   :  { %12 = sst [smem:[#allocation7]] %s4609_s0 }
   0x4   :  { %13 = vsyncpa [#allocation9], 0 }
   0x5   :  { %15 = vsyncpa [#allocation9 + $0x1], 0 }
   0x6   :  { %16 = vsyncpa [#allocation12], 0 }
   0x7   :  { %17 = vsyncpa [#allocation10], 0 }
   0x8   :  { %19 = vsyncpa [#allocation10 + $0x1], 0 }
   0x9   :  { %20 = vsyncpa [#allocation17], 0  ;;  %s3093_s23 = smov 0   ;;  %s3095_s24 = smov 0  }
   0xa   :  { %s3097_s25 = smov 0   ;;  %s3099_s26 = smov 0  }
   0xb LB: > { %4743 = sst [smem:[#allocation24_spill]] %s3029_s25  ;;  %s3114_s0 = sadd.s32 4294967295, %s3033_s26   ;;  %s3033_s26 = sphi %s3099_s26, %s4955_s26   ;;  %s3029_s25 = sphi %s3097_s25, %s4957_s25   ;;  %s3025_s24 = sphi %s3095_s24, %s4959_s24   ;;  %s3021_s23 = sphi %s3093_s23, %s4958_s23  }
   0xc   : > { %s2398_s27 = sadd.s32 4294967294, %s3033_s26   ;;  %p46_p0 = scmp.ne.s32.totalorder %s3025_s24, %s3021_s23 }
   0xd   : > { %p4616_p1 = scmp.eq.s32.totalorder %s3114_s0, 0  ;;  %p144_p3 = scmp.eq.s32.totalorder %s2398_s27, 1 }
   0xe   : > { %p2399_p5 = scmp.ge.s32.totalorder %s3033_s26, 1  ;;  %p172_p7 = scmp.lt.s32.totalorder %s3033_s26, 3 }
   0xf   : > { %p3123_p4 = por %p4616_p1, %p46_p0  ;;  %p3128_p6 = por %p144_p3, %p46_p0 }
  0x10   : > { %p3134_p9 = pnand %p2399_p5, %p172_p7  ;;  %s3035_s7 = smov [#allocation11]  }
  0x11   : > { %s4744_s28 = scalar_select %p3123_p4, 1, 0 }
  0x12   : > { %s4745_s29 = scalar_select %p3128_p6, 1, 0 }
  0x13   : > { %s4746_s30 = scalar_select %p3134_p9, 1, 0 }
  0x14   : > { %s184_s8 = sshll.u32 %s3035_s7, 4  ;;  %p2518_p10 = pneg %p3134_p9  ;;  %s3138_s8 = int_to_ptr.vmem [resolvable:$true] %s184_s8 }
  0x15   : > { %s3150_s10 = sadd.s32 1, %s3033_s26   ;;  %s33_s11 = sadd.s32 1, %s3029_s25 }
  0x16   : > { %p3145_p12 = pnand %p2518_p10, %p4616_p1  ;;  %4748 = sst [smem:[#allocation25_spill]] %s3150_s10 }
  0x17   : > { %s30_s12 = ssub.s32 %s3033_s26, %s3150_s10  ;;  %s4749_s2 = sld [smem:[#allocation90_spill]] }
  0x18   : > { %p4619_p0 = pneg %p3145_p12 }
  0x1d   : > { %s2809_s15 = scalar_lea.hbm %s4749_s2, 2048 }
  0x1e   : > { %p2810_p13 = scmp.ne.s32.totalorder %s4749_s2, %s2809_s15  ;;  %p2816_p7 = scmp.lt.u32.totalorder %s2809_s15, %s4749_s2 }
  0x20   : > { %p2812_p3 = pnand %p4619_p0, %p2810_p13 }
  0x22   : > { %p2813_p5 = pneg %p2812_p3 }
  0x24   : > { %p2818_p10 = pnand %p2816_p7, %p2813_p5 }
  0x26   : > { %2821 = shalt.err (!%p2818_p10)
}
  0x27   : > { %s2822_s20 = scalar_lea.vmem %s3138_s8, 2048  ;;  %p2830_p2 = scmp.lt.s32.totalorder %s3138_s8, %s3138_s8 }
  0x28   : > { %p2823_p11 = scmp.ne.s32.totalorder %s3138_s8, %s2822_s20  ;;  %p2831_p13 = scmp.lt.s32.totalorder %s2822_s20, %s2822_s20 }
  0x2a   : > { %p2825_p8 = pnand %p2823_p11, %p4619_p0  ;;  %p2832_p3 = por %p2831_p13, %p2830_p2 }
  0x2c   : > { %p2826_p1 = pneg %p2825_p8 }
  0x2e   : > { %p2833_p6 = pnand %p2832_p3, %p2826_p1 }
  0x30   : > { %2836 = shalt.err (!%p2833_p6)
}
  0x31   : > { %s4617_s21 = smov 64   ;;  %s4618_s22 = smov 4  }
  0x32   : > { %2521 = dma.hbm_to_vmem [thread:$0]  (!%p3145_p12), %s4749_s2, 2048, %s3138_s8, [#allocation12], %s4617_s21, %s4617_s21, %s4618_s22  }
  0x33   : > { %p31_p1 = scmp.eq.s32.totalorder %s30_s12, 0  ;;  %p40_p2 = scmp.ne.s32.totalorder %s3029_s25, %s3025_s24 }
  0x34   : > { %p41_p6 = scmp.eq.s32.totalorder %s3033_s26, 0  ;;  %p2538_p8 = scmp.lt.s32.totalorder %s3033_s26, 2 }
  0x35   : > { %s3190_s13 = scalar_select %p31_p1, %s3029_s25, %s33_s11  }
  0x36   : > { %p42_p11 = por %p41_p6, %p40_p2  ;;  %p4751_p5 = scmp.eq.s32.totalorder %s3114_s0, 1 }
  0x37   : > { %4750 = sst [smem:[#allocation26_spill]] %s3190_s13  ;;  %s209_s15 = sand.u32 1, %s3033_s26  }
  0x38   : > { %p3194_p7 = por %p4751_p5, %p40_p2  ;;  %s211_s16 = sand.u32 1, %s3029_s25  }
  0x39   : > { %s2403_s17 = sshll.u32 %s211_s16, 6  ;;  %s2449_s18 = sshll.u32 %s3033_s26, 10 }
  0x3a   : > { %s4752_s14 = scalar_select %p3194_p7, 1, 0 }
  0x3b   : > { %s4753_s1 = sld [smem:[#allocation89_spill]]  ;;  %s213_s11 = scalar_lea.vmem [#allocation8], %s2403_s17 }
  0x3c   : > { %s220_s12 = sshll.u32 %s213_s11, 4  ;;  %p3208_p10 = pnand %p2538_p8, %p42_p11  ;;  %s3206_s12 = int_to_ptr.vmem [resolvable:$true] %s220_s12 }
  0x3d   : > { %s3212_s7 = sshll.u32 %s211_s16, 7  ;;  %s3214_s21 = scalar_lea.sflag [#allocation9], %s209_s15 }
  0x3e   : > { %s4754_s27 = scalar_select %p3208_p10, 1, 0 }
  0x3f   : > { %p4626_p3 = pneg %p3208_p10 }
  0x41   : > { %s3204_s8 = scalar_lea.hbm %s4753_s1, %s2449_s18  ;;  %s2842_s20 = scalar_lea.hbm %s4753_s1, 2048 }
  0x42   : > { %s2837_s18 = scalar_lea.hbm %s3204_s8, 1024  ;;  %p2843_p6 = scmp.lt.u32.totalorder %s3204_s8, %s4753_s1 }
  0x43   : > { %p2838_p13 = scmp.ne.s32.totalorder %s3204_s8, %s2837_s18  ;;  %p2844_p8 = scmp.lt.u32.totalorder %s2842_s20, %s2837_s18 }
  0x44   : > { %p2846_p5 = scmp.lt.u32.totalorder %s2837_s18, %s3204_s8 }
  0x45   : > { %p2840_p1 = pnand %p4626_p3, %p2838_p13  ;;  %p2845_p11 = por %p2844_p8, %p2843_p6 }
  0x47   : > { %p2841_p2 = pneg %p2840_p1  ;;  %p2847_p0 = por %p2846_p5, %p2845_p11 }
  0x49   : > { %p2848_p7 = pnand %p2847_p0, %p2841_p2 }
  0x4b   : > { %2851 = shalt.err (!%p2848_p7)
}
  0x4c   : > { %s2852_s15 = scalar_lea.vmem %s3206_s12, 1024  ;;  %s3038_s16 = smov [#allocation8]  }
  0x4d   : > { %p2853_p13 = scmp.ne.s32.totalorder %s3206_s12, %s2852_s15  ;;  %s2857_s17 = sshll.u32 %s3038_s16, 4  ;;  %s2858_s17 = int_to_ptr.vmem [resolvable:$false] %s2857_s17 }
  0x4e   : > { %s2859_s22 = scalar_lea.vmem %s2858_s17, 2048  ;;  %p2860_p9 = scmp.lt.s32.totalorder %s3206_s12, %s2858_s17 }
  0x4f   : > { %p2855_p1 = pnand %p2853_p13, %p4626_p3  ;;  %p2861_p6 = scmp.lt.s32.totalorder %s2859_s22, %s2852_s15 }
  0x51   : > { %p2856_p4 = pneg %p2855_p1  ;;  %p2862_p8 = por %p2861_p6, %p2860_p9 }
  0x53   : > { %p2863_p11 = pnand %p2862_p8, %p2856_p4 }
  0x55   : > { %2866 = shalt.err (!%p2863_p11)
}
  0x56   : > { %s4755_s18 = smov 4   ;;  %s4756_s19 = smov 64  }
  0x57   : > { %2528 = dma.hbm_to_vmem [thread:$0]  (!%p3208_p10), %s3204_s8, 1024, %s3206_s12, %s3214_s21, %s4756_s19, %s4756_s19, %s4755_s18  }
  0x58   : > { %s234_s20 = scalar_lea.vmem [#allocation13], %s3212_s7  ;;  %s3039_s16 = smov [#allocation14]  }
  0x59   : > { %s241_s11 = sshll.u32 %s234_s20, 4  ;;  %s198_s17 = sshll.u32 %s3039_s16, 4  ;;  %s199_s17 = int_to_ptr.vmem [resolvable:$true] %s198_s17  ;;  %s3272_s11 = int_to_ptr.vmem [resolvable:$true] %s241_s11 }
  0x5a   : > { %s2450_s15 = sshll.u32 %s3033_s26, 11  ;;  %s2867_s2 = scalar_lea.hbm %s4613_s4, 128 }
  0x5b   : > { %p2868_p4 = scmp.ne.s32.totalorder %s4613_s4, %s2867_s2  ;;  %p4757_p9 = pneg %p3145_p12 }
  0x5c   : > { %p2874_p2 = scmp.lt.u32.totalorder %s2867_s2, %s4613_s4 }
  0x5d   : > { %p2870_p0 = pnand %p2868_p4, %p4757_p9 }
  0x5f   : > { %p2871_p7 = pneg %p2870_p0 }
  0x61   : > { %p2876_p5 = pnand %p2874_p2, %p2871_p7 }
  0x63   : > { %2879 = shalt.err (!%p2876_p5)
}
  0x64   : > { %s2880_s12 = scalar_lea.vmem %s199_s17, 128  ;;  %p4758_p1 = pmov %p4757_p9 }
  0x65   : > { %p2881_p13 = scmp.ne.s32.totalorder %s199_s17, %s2880_s12  ;;  %p2888_p11 = scmp.lt.s32.totalorder %s199_s17, %s199_s17 }
  0x66   : > { %p2889_p3 = scmp.lt.s32.totalorder %s2880_s12, %s2880_s12 }
  0x67   : > { %p2883_p6 = pnand %p2881_p13, %p4758_p1 }
  0x68   : > { %p2890_p10 = por %p2889_p3, %p2888_p11 }
  0x69   : > { %p2884_p8 = pneg %p2883_p6 }
  0x6b   : > { %p2891_p4 = pnand %p2890_p10, %p2884_p8 }
  0x6d   : > { %2894 = shalt.err (!%p2891_p4)
}
  0x6e   : > { %2524 = dma.hbm_to_vmem [thread:$0]  (!%p3145_p12), %s4613_s4, 128, %s199_s17, [#allocation12]  }
  0x6f   : > { %s3270_s13 = scalar_lea.hbm %s4612_s3, %s2450_s15  ;;  %p4759_p3 = scmp.ne.s32.totalorder %s4754_s27, 0 }
  0x70   : > { %s2895_s7 = scalar_lea.hbm %s3270_s13, 2048  ;;  %s2900_s19 = scalar_lea.hbm %s4612_s3, 4096 }
  0x71   : > { %p2896_p10 = scmp.ne.s32.totalorder %s3270_s13, %s2895_s7  ;;  %p4760_p9 = pneg %p4759_p3 }
  0x72   : > { %p2901_p12 = scmp.lt.u32.totalorder %s3270_s13, %s4612_s3  ;;  %p2902_p2 = scmp.lt.u32.totalorder %s2900_s19, %s2895_s7 }
  0x73   : > { %p2898_p0 = pnand %p2896_p10, %p4760_p9  ;;  %p2904_p13 = scmp.lt.u32.totalorder %s2895_s7, %s3270_s13 }
  0x74   : > { %p2903_p5 = por %p2902_p2, %p2901_p12 }
  0x75   : > { %p2899_p7 = pneg %p2898_p0 }
  0x76   : > { %p2905_p1 = por %p2904_p13, %p2903_p5 }
  0x78   : > { %p2906_p6 = pnand %p2905_p1, %p2899_p7 }
  0x7a   : > { %2909 = shalt.err (!%p2906_p6)
}
  0x7b   : > { %s2910_s17 = scalar_lea.vmem %s3272_s11, 2048  ;;  %p4761_p11 = pmov %p4760_p9 }
  0x7c   : > { %p2911_p8 = scmp.ne.s32.totalorder %s3272_s11, %s2910_s17  ;;  %s3040_s15 = smov [#allocation13]  }
  0x7d   : > { %s2915_s22 = sshll.u32 %s3040_s15, 4  ;;  %s2916_s22 = int_to_ptr.vmem [resolvable:$false] %s2915_s22 }
  0x7e   : > { %p2913_p4 = pnand %p2911_p8, %p4761_p11  ;;  %s2917_s8 = scalar_lea.vmem %s2916_s22, 4096 }
  0x7f   : > { %p2918_p9 = scmp.lt.s32.totalorder %s3272_s11, %s2916_s22  ;;  %p2919_p0 = scmp.lt.s32.totalorder %s2917_s8, %s2910_s17 }
  0x80   : > { %p2914_p10 = pneg %p2913_p4 }
  0x81   : > { %p2920_p12 = por %p2919_p0, %p2918_p9 }
  0x83   : > { %p2921_p2 = pnand %p2920_p12, %p2914_p10 }
  0x85   : > { %2924 = shalt.err (!%p2921_p2)
}
  0x86   : > { %s3041_s12 = smov 128   ;;  %s3042_s1 = smov 8  }
  0x87   : > { %2531 = dma.hbm_to_vmem [thread:$0]  (!%p4759_p3), %s3270_s13, 2048, %s3272_s11, %s3214_s21, %s3041_s12, %s3041_s12, %s3042_s1  }
  0x88   : > { %p4762_p7 = scmp.ne.s32.totalorder %s4746_s30, 0 }
  0x8a   : > { %253 = sbr.rel (%p4762_p7) target bundleno = 1477 (0x5c5), region = 36 }
  0x91   : > { %s255_s25 = sand.u32 1, %s3114_s0   ;;  %s3302_s2 = sand.u32 1, %s3025_s24  }
  0x92   : > { %s2410_s10 = sshll.u32 %s3302_s2, 6  ;;  %s256_s7 = scalar_lea.sflag [#allocation9], %s255_s25 }
  0x93   : > { %s3305_s9 = scalar_lea.vmem [#allocation8], %s2410_s10  ;;  %p4763_p5 = scmp.ne.s32.totalorder %s4744_s28, 0 }
  0x95   : > { %2996 = dma.done.wait (%p4763_p5), %s256_s7, 1024  }
  0x96   : > { %2998 = vsyncadd (%p4763_p5), %s256_s7, 4294966272  ;;  %p4764_p3 = scmp.eq.s32.totalorder %s3114_s0, 0 }
  0x98   : > { %3000 = dma.done.wait (%p4764_p3), [#allocation12], 2048   ;;  %p4765_p13 = pmov %p4764_p3 }
  0x99   : > { %s2412_s30 = sshll.u32 %s3302_s2, 7 }
  0x9a   : > { %3002 = vsyncadd (%p4765_p13), [#allocation12], 4294965248  ;;  %s3316_s21 = scalar_lea.vmem [#allocation13], %s2412_s30 }
  0x9b   : > { %3004 = dma.done.wait (%p4763_p5), %s256_s7, 2048  }
  0x9c   : > { %3006 = vsyncadd (%p4763_p5), %s256_s7, 4294965248  ;;  %p4766_p1 = pmov %p4764_p3 }
  0x9e   : > { %3008 = dma.done.wait (%p4766_p1), [#allocation12], 128   ;;  %p4767_p6 = pmov %p4766_p1 }
  0x9f   : > { %s3326_s27 = scalar_lea.vmem [#allocation15], %s2412_s30  ;;  %p4768_p8 = scmp.ne.s32.totalorder %s3114_s0, 0 }
  0xa0   : > { %3010 = vsyncadd (%p4767_p6), [#allocation12], 4294967168  ;;  %v316_v0 = vld [vmem:[#allocation14] ss:$4 sm:$0x3] (!%p4768_p8)  ;;  %v317_v1 = vlaneseq (!%p4768_p8)  ;;  %vm324_vm0 = vcmask (!%p4768_p8), 0  }
  0xa1   : > { %315 = sbr.rel (%p4768_p8) target bundleno = 168 (0xa8), region = 56  ;;  %v3043_v2 = vmov (!%p4768_p8), 0.0  }
  0xa2   : > { %325 = vst.msk [vmem:[#allocation5] sm:$0x1] (!%p4768_p8), %vm324_vm0, %v3043_v2  ;;  %vm319_vm1 = vcmp.lt.s32.totalorder (!%p4768_p8), %v317_v1, 256 }
  0xa3   : > { %321 = vst.msk [vmem:[#allocation2] sm:$0x3] (!%p4768_p8), %vm319_vm1, %v316_v0  ;;  %322 = vst.msk [vmem:[#allocation3] sm:$0x3] (!%p4768_p8), %vm319_vm1, %v3043_v2 }
  0xa4   : > { %323 = vst.msk [vmem:[#allocation4] sm:$0x3] (!%p4768_p8), %vm319_vm1, %v3043_v2 }
  0xa8 PF: > { %v2599_v3 = vld [vmem:[#allocation11 + $0x40] sm:$0xff]   ;;  %v4629_v5 = vmov 2   ;;  %v2601_v6 = vld [vmem:[#allocation11 + $0x48] sm:$0xff]   ;;  %v2603_v8 = vld [vmem:[#allocation11 + $0x50] sm:$0xff]   ;;  %v4631_v49 = vlaneseq  ;;  %vm1471_vm3 = vcmask 7168   ;;  %s3047_s28 = smov 2  }
  0xa9   : > { %v2600_v4 = vld [vmem:[#allocation11] sm:$0xff]   ;;  %2593 = vset.pattern.permute.xlu0 %v4629_v5  ;;  %2594 = vset.pattern.permute.xlu1 %v4629_v5  ;;  %v2602_v7 = vld [vmem:[#allocation11 + $0x8] sm:$0xff]   ;;  %v2604_v9 = vld [vmem:[#allocation11 + $0x10] sm:$0xff]   ;;  %s3048_s11 = smov 1   ;;  %s2440_s13 = sshll.u32 %s3114_s0, 7 }
  0xaa   : > { %2452 = vmatprep.subr.bf16.mxu0 %v2599_v3  ;;  %2484 = vmatprep.subr.bf16.mxu1 %v2599_v3  ;;  %v2605_v10 = vld [vmem:[#allocation11 + $0x58] sm:$0xff]   ;;  %v3333_v11 = vld [vmem:[%s3305_s9] sm:$0xff]   ;;  %v3344_v16 = vld [vmem:[%s3316_s21 + $0x10] sm:$0xff]  ;;  %v3421_v50 = vshrl.u32 %v4631_v49, 7  ;;  %s938_s18 = sld [smem:[#allocation7]]  ;;  %s3049_s20 = smov 127  }
  0xab   : > { %2453 = vmatpush3.bf16.xpose.msra.mxu0 %v2600_v4  ;;  %2492 = vmatpush3.bf16.xpose.msra.mxu1 %v2600_v4  ;;  %v3336_v12 = vld [vmem:[%s3305_s9 + $0x20] sm:$0xff]   ;;  %v2606_v13 = vld [vmem:[#allocation11 + $0x18] sm:$0xff]   ;;  %v3349_v17 = vld [vmem:[%s3316_s21 + $0x8] sm:$0xff]  ;;  %p2441_p4 = scmp.ne.s32.totalorder %s3114_s0, 1 }
  0xac   : > { %2454 = vmatprep.subr.bf16.mxu0 %v2601_v6  ;;  %2485 = vmatprep.subr.bf16.mxu1 %v2601_v6  ;;  %v2607_v14 = vld [vmem:[#allocation11 + $0x60] sm:$0xff]   ;;  %v3352_v18 = vld [vmem:[%s3316_s21 + $0x18] sm:$0xff]  ;;  %v3360_v20 = vld [vmem:[%s3316_s21 + $0x28] sm:$0xff]  ;;  %v3428_v53 = vsub.s32 0, %v3421_v50  ;;  %v3431_v55 = vsub.s32 1, %v3421_v50 }
  0xad   : > { %2468 = vmatprep.mubr.bf16.mxu0 %v3333_v11  ;;  %2476 = vmatprep.mubr.bf16.mxu1 %v3336_v12  ;;  %v3341_v15 = vld [vmem:[%s3316_s21] sm:$0xff]  ;;  %4769 = vst [vmem:[#allocation27_spill] sm:$0xff] %v3360_v20  ;;  %v2609_v22 = vld [vmem:[#allocation11 + $0x68] sm:$0xff]   ;;  %v3365_v23 = vld [vmem:[%s3316_s21 + $0x30] sm:$0xff] }
  0xae   : > { %651 = vperm.xlu0 %2593, %v3341_v15   ;;  %661 = vperm.xlu1 %2594, %v3344_v16   ;;  %v3357_v19 = vld [vmem:[%s3316_s21 + $0x20] sm:$0xff]  ;;  %4770 = vst [vmem:[#allocation28_spill] sm:$0xff] %v3365_v23  ;;  %v3368_v24 = vld [vmem:[%s3316_s21 + $0x38] sm:$0xff]  ;;  %v3376_v26 = vld [vmem:[%s3316_s21 + $0x48] sm:$0xff] }
  0xaf   : > { %v2608_v21 = vld [vmem:[#allocation11 + $0x20] sm:$0xff]   ;;  %4771 = vst [vmem:[#allocation29_spill] sm:$0xff] %v3368_v24  ;;  %v2610_v27 = vld [vmem:[#allocation11 + $0x28] sm:$0xff]   ;;  %v2611_v28 = vld [vmem:[#allocation11 + $0x70] sm:$0xff]  }
  0xb0   : > { %v3373_v25 = vld [vmem:[%s3316_s21 + $0x40] sm:$0xff]  ;;  %v3381_v29 = vld [vmem:[%s3316_s21 + $0x50] sm:$0xff]  ;;  %v3384_v30 = vld [vmem:[%s3316_s21 + $0x58] sm:$0xff]  ;;  %4775 = vst [vmem:[#allocation33_spill] sm:$0xff] %v3428_v53  ;;  %p939_p11 = scmp.eq.s32.totalorder %s938_s18, 0 }
  0xb1   : > { %v3389_v31 = vld [vmem:[%s3316_s21 + $0x60] sm:$0xff]  ;;  %v3392_v32 = vld [vmem:[%s3316_s21 + $0x68] sm:$0xff]  ;;  %v2612_v33 = vld [vmem:[#allocation11 + $0x30] sm:$0xff]   ;;  %4776 = vst [vmem:[#allocation34_spill] sm:$0xff] %v3431_v55 }
  0xb2   : > { %656 = vperm.xlu0 %2593, %v3349_v17   ;;  %666 = vperm.xlu1 %2594, %v3352_v18   ;;  %4772 = vst [vmem:[#allocation30_spill] sm:$0xff] %v3392_v32  ;;  %v2613_v34 = vld [vmem:[#allocation11 + $0x78] sm:$0xff]   ;;  %v3397_v35 = vld [vmem:[%s3316_s21 + $0x70] sm:$0xff]  ;;  %v2617_v38 = vld [vmem:[%s3305_s9 + $0x8] sm:$0xff]   ;;  %s1452_s19 = scalar_select %p939_p11, 1, 0 }
  0xb3   : > { %2455 = vmatpush3.bf16.xpose.msra.mxu0 %v2602_v7  ;;  %2493 = vmatpush3.bf16.xpose.msra.mxu1 %v2602_v7  ;;  %4773 = vst [vmem:[#allocation31_spill] sm:$0xff] %v3397_v35  ;;  %v3400_v36 = vld [vmem:[%s3316_s21 + $0x78] sm:$0xff]  ;;  %v2618_v39 = vld [vmem:[%s3305_s9 + $0x28] sm:$0xff]   ;;  %v2619_v40 = vld [vmem:[%s3305_s9 + $0x10] sm:$0xff]  }
  0xb4   : > { %2456 = vmatprep.subr.bf16.mxu0 %v2603_v8  ;;  %2486 = vmatprep.subr.bf16.mxu1 %v2603_v8  ;;  %4774 = vst [vmem:[#allocation32_spill] sm:$0xff] %v3400_v36  ;;  %v2614_v37 = vld [vmem:[#allocation11 + $0x38] sm:$0xff]   ;;  %v2620_v41 = vld [vmem:[%s3305_s9 + $0x30] sm:$0xff]   ;;  %v648_v54 = vld [vmem:[#allocation14 + $0x2] ss:$4 sm:$0x3] }
  0xb5   : > { %v2621_v42 = vld [vmem:[%s3305_s9 + $0x18] sm:$0xff]   ;;  %v3436_v58 = vrot.slane %v648_v54, %v3428_v53  ;;  %v3439_v0 = vrot.slane %v648_v54, %v3431_v55 }
  0xb6   : > { %671 = vperm.xlu0 %2593, %v3357_v19   ;;  %676 = vperm.xlu1 %2594, %v3360_v20   ;;  %v2622_v43 = vld [vmem:[%s3305_s9 + $0x38] sm:$0xff]  }
  0xba   : > { %681 = vperm.xlu0 %2593, %v3365_v23   ;;  %686 = vperm.xlu1 %2594, %v3368_v24  }
  0xbb   : > { %2457 = vmatpush3.bf16.xpose.msra.mxu0 %v2604_v9  ;;  %2494 = vmatpush3.bf16.xpose.msra.mxu1 %v2604_v9 }
  0xbc   : > { %2458 = vmatprep.subr.bf16.mxu0 %v2605_v10  ;;  %2487 = vmatprep.subr.bf16.mxu1 %v2605_v10 }
  0xbe   : > { %691 = vperm.xlu0 %2593, %v3373_v25   ;;  %696 = vperm.xlu1 %2594, %v3376_v26  }
  0xc2   : > { %701 = vperm.xlu0 %2593, %v3381_v29   ;;  %706 = vperm.xlu1 %2594, %v3384_v30  }
  0xc3   : > { %2459 = vmatpush3.bf16.xpose.msra.mxu0 %v2606_v13  ;;  %2495 = vmatpush3.bf16.xpose.msra.mxu1 %v2606_v13 }
  0xc4   : > { %2460 = vmatprep.subr.bf16.mxu0 %v2607_v14  ;;  %2488 = vmatprep.subr.bf16.mxu1 %v2607_v14 }
  0xc6   : > { %711 = vperm.xlu0 %2593, %v3389_v31   ;;  %716 = vperm.xlu1 %2594, %v3392_v32  }
  0xca   : > { %721 = vperm.xlu0 %2593, %v3397_v35   ;;  %726 = vperm.xlu1 %2594, %v3400_v36  }
  0xcb   : > { %2461 = vmatpush3.bf16.xpose.msra.mxu0 %v2608_v21  ;;  %2496 = vmatpush3.bf16.xpose.msra.mxu1 %v2608_v21 }
  0xcc   : > { %2462 = vmatprep.subr.bf16.mxu0 %v2609_v22  ;;  %2489 = vmatprep.subr.bf16.mxu1 %v2609_v22 }
  0xd3   : > { %2463 = vmatpush3.bf16.xpose.msra.mxu0 %v2610_v27  ;;  %2497 = vmatpush3.bf16.xpose.msra.mxu1 %v2610_v27 }
  0xd4   : > { %2464 = vmatprep.subr.bf16.mxu0 %v2611_v28  ;;  %2490 = vmatprep.subr.bf16.mxu1 %v2611_v28 }
  0xdb   : > { %2465 = vmatpush3.bf16.xpose.msra.mxu0 %v2612_v33  ;;  %2498 = vmatpush3.bf16.xpose.msra.mxu1 %v2612_v33 }
  0xdc   : > { %2466 = vmatprep.subr.bf16.mxu0 %v2613_v34  ;;  %2491 = vmatprep.subr.bf16.mxu1 %v2613_v34 }
  0xe3   : > { %2467 = vmatpush3.bf16.xpose.msra.mxu0 %v2614_v37  ;;  %2499 = vmatpush3.bf16.xpose.msra.mxu1 %v2614_v37 }
  0xea   : > { %2469 = vmatmul.mubr.bf16.vlgmr.msra.gmra.mrb[0].mxu0 %v3333_v11  ;;  %2477 = vmatmul.mubr.bf16.vlgmr.msra.gmra.mrb[0].mxu1 %v3336_v12 }
  0xeb   : > { %2470 = vmatprep.mubr.bf16.mxu0 %v2617_v38  ;;  %2478 = vmatprep.mubr.bf16.mxu1 %v2618_v39 }
  0xf2   : > { %2471 = vmatmul.mubr.bf16.gmra.mrb[4].mxu0 %v2617_v38  ;;  %2479 = vmatmul.mubr.bf16.gmra.mrb[4].mxu1 %v2618_v39 }
  0xf3   : > { %2472 = vmatprep.mubr.bf16.mxu0 %v2619_v40  ;;  %2480 = vmatprep.mubr.bf16.mxu1 %v2620_v41 }
  0xfa   : > { %2473 = vmatmul.mubr.bf16.gmra.mrb[8].mxu0 %v2619_v40  ;;  %2481 = vmatmul.mubr.bf16.gmra.mrb[8].mxu1 %v2620_v41 }
  0xfb   : > { %2474 = vmatprep.mubr.bf16.mxu0 %v2621_v42  ;;  %2482 = vmatprep.mubr.bf16.mxu1 %v2622_v43 }
 0x102   : > { %2475 = vmatmul.mubr.bf16.gmra.mrb[12].mxu0 %v2621_v42  ;;  %2483 = vmatmul.mubr.bf16.gmra.mrb[12].mxu1 %v2622_v43 }
 0x12d   : > { %v652_v44 = vpop.permute.xlu0 %651  ;;  %v3414_v46 = vpop.permute.xlu1 %661 }
 0x131   : > { %v3412_v45 = vpop.permute.xlu0 %656  ;;  %v3418_v48 = vpop.permute.xlu1 %666 }
 0x135   : > { %v3416_v47 = vpop.permute.xlu0 %671  ;;  %v3425_v52 = vpop.permute.xlu1 %676 }
 0x139   : > { %v3423_v51 = vpop.permute.xlu0 %681  ;;  %v3433_v57 = vpop.permute.xlu1 %686 }
 0x13d   : > { %v692_v56 = vpop.permute.xlu0 %691  ;;  %v697_v12 = vpop.permute.xlu1 %696 }
 0x1bd   : > { %v552_v59 = vpop.f32.mrb[0].mxu0  ;;  %v592_v60 = vpop.f32.mrb[0].mxu1 }
 0x1be   : > { %v729_v61 = vsub.f32 %v552_v59, %v652_v44  ;;  %v745_v62 = vsub.f32 %v592_v60, %v692_v56  ;;  %v554_v63 = vpop.f32.mrb[1].mxu0  ;;  %v594_v1 = vpop.f32.mrb[1].mxu1  ;;  %v804_v8 = vsub.f32 %v552_v59, %v3436_v58  ;;  %v820_v10 = vsub.f32 %v592_v60, %v3436_v58 }
 0x1bf   : > { %v730_v2 = vsub.f32 %v554_v63, %v652_v44  ;;  %v746_v3 = vsub.f32 %v594_v1, %v692_v56  ;;  %v556_v4 = vpop.f32.mrb[2].mxu0  ;;  %v596_v6 = vpop.f32.mrb[2].mxu1  ;;  %v805_v13 = vsub.f32 %v554_v63, %v3439_v0  ;;  %v821_v21 = vsub.f32 %v594_v1, %v3439_v0 }
 0x1c0   : > { %v3441_v7 = vmul.f32 14.285714, %v729_v61  ;;  %v3444_v9 = vmul.f32 14.285714, %v745_v62  ;;  %v731_v22 = vsub.f32 %v556_v4, %v3412_v45  ;;  %v806_v27 = vsub.f32 %v556_v4, %v3436_v58  ;;  %v558_v28 = vpop.f32.mrb[3].mxu0  ;;  %v598_v33 = vpop.f32.mrb[3].mxu1 }
 0x1c1   : > { %v3447_v11 = vmul.f32 14.285714, %v730_v2  ;;  %v3450_v14 = vmul.f32 14.285714, %v746_v3  ;;  %v3457_v37 = vmul.f32 14.285714, %v804_v8  ;;  %v747_v38 = vsub.f32 %v596_v6, %v697_v12  ;;  %v702_v56 = vpop.permute.xlu0 %701 }
 0x1c2   : > { %4777 = vst [vmem:[#allocation35_spill] sm:$0xff] %v3441_v7  ;;  %4778 = vst [vmem:[#allocation36_spill] sm:$0xff] %v3444_v9  ;;  %v822_v39 = vsub.f32 %v596_v6, %v3436_v58  ;;  %v3460_v40 = vmul.f32 14.285714, %v820_v10  ;;  %v732_v41 = vsub.f32 %v558_v28, %v3412_v45  ;;  %v807_v42 = vsub.f32 %v558_v28, %v3439_v0 }
 0x1c3   : > { %4779 = vst [vmem:[#allocation37_spill] sm:$0xff] %v3447_v11  ;;  %4780 = vst [vmem:[#allocation38_spill] sm:$0xff] %v3450_v14  ;;  %v940_v34 = vmax.f32 %v3441_v7, %v3447_v11  ;;  %v964_v43 = vmax.f32 %v3444_v9, %v3450_v14  ;;  %v3466_v59 = vmul.f32 14.285714, %v805_v13  ;;  %v3468_v60 = vmul.f32 14.285714, %v821_v21 }
 0x1c4   : > { %4781 = vst [vmem:[#allocation39_spill] sm:$0xff] %v3457_v37  ;;  %4782 = vst [vmem:[#allocation40_spill] sm:$0xff] %v3460_v40  ;;  %v748_v61 = vsub.f32 %v598_v33, %v697_v12  ;;  %v823_v62 = vsub.f32 %v598_v33, %v3439_v0  ;;  %v3471_v63 = vmul.f32 14.285714, %v731_v22  ;;  %v3473_v1 = vmul.f32 14.285714, %v806_v27 }
 0x1c5   : > { %v602_v44 = vpop.f32.mrb[4].mxu1  ;;  %941 = vmax.xlane.f32.xlu0 %v940_v34  ;;  %v562_v54 = vpop.f32.mrb[4].mxu0  ;;  %4783 = vst [vmem:[#allocation41_spill] sm:$0xff] %v3466_v59  ;;  %4784 = vst [vmem:[#allocation42_spill] sm:$0xff] %v3468_v60  ;;  %965 = vmax.xlane.f32.xlu1 %v964_v43  ;;  %v3476_v6 = vmul.f32 14.285714, %v747_v38 }
 0x1c6   : > { %4785 = vst [vmem:[#allocation43_spill] sm:$0xff] %v3471_v63  ;;  %4786 = vst [vmem:[#allocation44_spill] sm:$0xff] %v3473_v1  ;;  %v749_v45 = vsub.f32 %v602_v44, %v702_v56  ;;  %v733_v2 = vsub.f32 %v562_v54, %v3414_v46  ;;  %v564_v3 = vpop.f32.mrb[5].mxu0  ;;  %v604_v4 = vpop.f32.mrb[5].mxu1  ;;  %v3478_v8 = vmul.f32 14.285714, %v822_v39  ;;  %v808_v10 = vsub.f32 %v562_v54, %v3436_v58 }
 0x1c7   : > { %4787 = vst [vmem:[#allocation45_spill] sm:$0xff] %v3476_v6  ;;  %v809_v12 = vsub.f32 %v564_v3, %v3439_v0  ;;  %v566_v13 = vpop.f32.mrb[6].mxu0  ;;  %v606_v21 = vpop.f32.mrb[6].mxu1  ;;  %v3482_v22 = vmul.f32 14.285714, %v732_v41  ;;  %v734_v28 = vsub.f32 %v564_v3, %v3414_v46  ;;  %v750_v33 = vsub.f32 %v604_v4, %v702_v56 }
 0x1c8   : > { %4788 = vst [vmem:[#allocation46_spill] sm:$0xff] %v3478_v8  ;;  %v3484_v27 = vmul.f32 14.285714, %v807_v42  ;;  %v707_v34 = vpop.permute.xlu1 %706  ;;  %v3487_v43 = vmul.f32 14.285714, %v748_v61  ;;  %v824_v39 = vsub.f32 %v602_v44, %v3436_v58  ;;  %v825_v54 = vsub.f32 %v604_v4, %v3439_v0  ;;  %v568_v42 = vpop.f32.mrb[7].mxu0 }
 0x1c9   : > { %4789 = vst [vmem:[#allocation47_spill] sm:$0xff] %v3482_v22  ;;  %v3489_v38 = vmul.f32 14.285714, %v823_v62  ;;  %v3493_v5 = vmul.f32 14.285714, %v749_v45  ;;  %v735_v41 = vsub.f32 %v566_v13, %v3418_v48  ;;  %v608_v55 = vpop.f32.mrb[7].mxu1  ;;  %v810_v56 = vsub.f32 %v566_v13, %v3436_v58 }
 0x1ca   : > { %4790 = vst [vmem:[#allocation48_spill] sm:$0xff] %v3484_v27  ;;  %4791 = vst [vmem:[#allocation49_spill] sm:$0xff] %v3487_v43  ;;  %v3495_v49 = vmul.f32 14.285714, %v733_v2  ;;  %v3498_v53 = vmul.f32 14.285714, %v808_v10  ;;  %v751_v61 = vsub.f32 %v606_v21, %v707_v34  ;;  %v826_v14 = vsub.f32 %v606_v21, %v3436_v58 }
 0x1cb   : > { %4792 = vst [vmem:[#allocation50_spill] sm:$0xff] %v3489_v38  ;;  %4793 = vst [vmem:[#allocation51_spill] sm:$0xff] %v3493_v5  ;;  %v3500_v46 = vmul.f32 14.285714, %v809_v12  ;;  %v3503_v62 = vmul.f32 14.285714, %v734_v28  ;;  %v967_v10 = vmax.f32 %v3476_v6, %v3487_v43  ;;  %v736_v13 = vsub.f32 %v568_v42, %v3418_v48 }
 0x1cc   : > { %4794 = vst [vmem:[#allocation52_spill] sm:$0xff] %v3495_v49  ;;  %4795 = vst [vmem:[#allocation53_spill] sm:$0xff] %v3498_v53  ;;  %v3505_v44 = vmul.f32 14.285714, %v750_v33  ;;  %v3507_v4 = vmul.f32 14.285714, %v824_v39  ;;  %v811_v28 = vsub.f32 %v568_v42, %v3439_v0  ;;  %v943_v33 = vmax.f32 %v3471_v63, %v3482_v22 }
 0x1cd   : > { %4796 = vst [vmem:[#allocation54_spill] sm:$0xff] %v3500_v46  ;;  %4797 = vst [vmem:[#allocation55_spill] sm:$0xff] %v3503_v62  ;;  %v612_v3 = vpop.f32.mrb[8].mxu1  ;;  %v572_v45 = vpop.f32.mrb[8].mxu0  ;;  %v3509_v2 = vmul.f32 14.285714, %v825_v54  ;;  %v1693_v21 = vmax.f32 %v3457_v37, %v3498_v53  ;;  %v1714_v54 = vmax.f32 %v3466_v59, %v3500_v46  ;;  %968 = vmax.xlane.f32.xlu0 %v967_v10 }
 0x1ce   : > { %4798 = vst [vmem:[#allocation56_spill] sm:$0xff] %v3505_v44  ;;  %4799 = vst [vmem:[#allocation57_spill] sm:$0xff] %v3507_v4  ;;  %v574_v12 = vpop.f32.mrb[9].mxu0  ;;  %v614_v9 = vpop.f32.mrb[9].mxu1  ;;  %v3514_v11 = vmul.f32 14.285714, %v735_v41  ;;  %v752_v6 = vsub.f32 %v608_v55, %v707_v34  ;;  %944 = vmax.xlane.f32.xlu1 %v943_v33  ;;  %v970_v22 = vmax.f32 %v3493_v5, %v3505_v44 }
 0x1cf   : > { %4800 = vst [vmem:[#allocation58_spill] sm:$0xff] %v3509_v2  ;;  %v576_v39 = vpop.f32.mrb[10].mxu0  ;;  %v3520_v7 = vpop.f32.mrb[10].mxu1  ;;  %v3526_v43 = vmul.f32 14.285714, %v810_v56  ;;  %v946_v53 = vmax.f32 %v3495_v49, %v3503_v62  ;;  %v812_v37 = vsub.f32 %v572_v45, %v3436_v58  ;;  %v738_v10 = vsub.f32 %v574_v12, %v3416_v47 }
 0x1d0   : > { %v3528_v41 = vmul.f32 14.285714, %v751_v61  ;;  %v3530_v48 = vpop.f32.mrb[11].mxu0  ;;  %v3532_v42 = vpop.f32.mrb[11].mxu1  ;;  %v3539_v56 = vmul.f32 14.285714, %v826_v14  ;;  %v737_v61 = vsub.f32 %v572_v45, %v3416_v47  ;;  %v813_v59 = vsub.f32 %v574_v12, %v3439_v0 }
 0x1d1   : > { %4801 = vst [vmem:[#allocation59_spill] sm:$0xff] %v3526_v43  ;;  %v712_v46 = vpop.permute.xlu0 %711  ;;  %v3544_v63 = vmul.f32 14.285714, %v736_v13  ;;  %v3546_v34 = vmul.f32 14.285714, %v811_v28  ;;  %v827_v33 = vsub.f32 %v608_v55, %v3439_v0  ;;  %v717_v5 = vpop.permute.xlu1 %716  ;;  %v1694_v62 = vmax.f32 %v3473_v1, %v3526_v43  ;;  %947 = vmax.xlane.f32.xlu0 %v946_v53 }
 0x1d2   : > { %4802 = vst [vmem:[#allocation60_spill] sm:$0xff] %v3539_v56  ;;  %v753_v44 = vsub.f32 %v612_v3, %v712_v46  ;;  %v828_v14 = vsub.f32 %v612_v3, %v3436_v58  ;;  %v3552_v49 = vmul.f32 14.285714, %v812_v37  ;;  %v754_v45 = vsub.f32 %v614_v9, %v712_v46  ;;  %971 = vmax.xlane.f32.xlu1 %v970_v22 }
 0x1d3   : > { %4803 = vst [vmem:[#allocation61_spill] sm:$0xff] %v3544_v63  ;;  %4804 = vst [vmem:[#allocation62_spill] sm:$0xff] %v3546_v34  ;;  %v3554_v47 = vmul.f32 14.285714, %v752_v6  ;;  %v3556_v12 = vmul.f32 14.285714, %v813_v59  ;;  %v829_v13 = vsub.f32 %v614_v9, %v3439_v0  ;;  %v814_v55 = vsub.f32 %v576_v39, %v3436_v58 }
 0x1d4   : > { %4805 = vst [vmem:[#allocation63_spill] sm:$0xff] %v3552_v49  ;;  %v3560_v24 = vmul.f32 14.285714, %v737_v61  ;;  %v3562_v43 = vmul.f32 14.285714, %v738_v10  ;;  %v739_v53 = vsub.f32 %v576_v39, %v3425_v52  ;;  %v755_v37 = vsub.f32 %v3520_v7, %v717_v5 }
 0x1d5   : > { %4806 = vst [vmem:[#allocation64_spill] sm:$0xff] %v3554_v47  ;;  %4807 = vst [vmem:[#allocation65_spill] sm:$0xff] %v3556_v12  ;;  %v622_v28 = vpop.f32.mrb[12].mxu1  ;;  %v582_v36 = vpop.f32.mrb[12].mxu0  ;;  %v1715_v59 = vmax.f32 %v3484_v27, %v3546_v34  ;;  %v3570_v22 = vmul.f32 14.285714, %v827_v33  ;;  %v815_v3 = vsub.f32 %v3530_v48, %v3439_v0  ;;  %v1695_v1 = vmax.f32 %v1693_v21, %v3552_v49 }
 0x1d6   : > { %4808 = vst [vmem:[#allocation66_spill] sm:$0xff] %v3560_v24  ;;  %4809 = vst [vmem:[#allocation67_spill] sm:$0xff] %v3562_v43  ;;  %v584_v46 = vpop.f32.mrb[13].mxu0  ;;  %v3566_v6 = vpop.f32.mrb[13].mxu1  ;;  %v3572_v9 = vmul.f32 14.285714, %v753_v44  ;;  %v949_v34 = vmax.f32 %v3514_v11, %v3544_v63  ;;  %v1716_v27 = vmax.f32 %v1714_v54, %v3556_v12  ;;  %v952_v49 = vmax.f32 %v3560_v24, %v3562_v43 }
 0x1d7   : > { %4810 = vst [vmem:[#allocation68_spill] sm:$0xff] %v3570_v22  ;;  %v3576_v61 = vpop.f32.mrb[14].mxu0  ;;  %v3578_v10 = vpop.f32.mrb[14].mxu1  ;;  %v3580_v39 = vmul.f32 14.285714, %v828_v14  ;;  %v830_v14 = vsub.f32 %v3520_v7, %v3436_v58  ;;  %v816_v7 = vsub.f32 %v582_v36, %v3436_v58  ;;  %v742_v43 = vsub.f32 %v584_v46, %v3423_v51 }
 0x1d8   : > { %v3583_v35 = vmul.f32 14.285714, %v754_v45  ;;  %v3587_v33 = vpop.f32.mrb[15].mxu0  ;;  %v3589_v44 = vpop.f32.mrb[15].mxu1  ;;  %v3592_v23 = vmul.f32 14.285714, %v829_v13  ;;  %v740_v45 = vsub.f32 %v3530_v48, %v3425_v52  ;;  %950 = vmax.xlane.f32.xlu0 %v949_v34  ;;  %v756_v13 = vsub.f32 %v3532_v42, %v717_v5  ;;  %953 = vmax.xlane.f32.xlu1 %v952_v49 }
 0x1d9   : > { %4811 = vst [vmem:[#allocation69_spill] sm:$0xff] %v3580_v39  ;;  %v3594_v32 = vmul.f32 14.285714, %v814_v55  ;;  %v3598_v20 = vmul.f32 14.285714, %v739_v53  ;;  %v722_v63 = vpop.permute.xlu0 %721  ;;  %v831_v55 = vsub.f32 %v3532_v42, %v3439_v0  ;;  %v973_v52 = vmax.f32 %v3528_v41, %v3554_v47 }
 0x1da   : > { %4812 = vst [vmem:[#allocation70_spill] sm:$0xff] %v3592_v23  ;;  %v3600_v21 = vmul.f32 14.285714, %v755_v37  ;;  %v3606_v54 = vmul.f32 14.285714, %v815_v3  ;;  %v757_v53 = vsub.f32 %v622_v28, %v722_v63  ;;  %v832_v37 = vsub.f32 %v622_v28, %v3436_v58 }
 0x1db   : > { %4813 = vst [vmem:[#allocation71_spill] sm:$0xff] %v3594_v32  ;;  %v817_v48 = vsub.f32 %v584_v46, %v3439_v0  ;;  %v1696_v34 = vmax.f32 %v1694_v62, %v3594_v32  ;;  %v3617_v3 = vmul.f32 14.285714, %v830_v14  ;;  %v741_v5 = vsub.f32 %v582_v36, %v3423_v51 }
 0x1dc   : > { %4814 = vst [vmem:[#allocation72_spill] sm:$0xff] %v3606_v54  ;;  %v3620_v12 = vmul.f32 14.285714, %v816_v7  ;;  %v3622_v42 = vmul.f32 14.285714, %v740_v45  ;;  %974 = vmax.xlane.f32.xlu0 %v973_v52  ;;  %v818_v49 = vsub.f32 %v3576_v61, %v3436_v58  ;;  %v1717_v24 = vmax.f32 %v1715_v59, %v3606_v54 }
 0x1dd   : > { %4815 = vst [vmem:[#allocation73_spill] sm:$0xff] %v3617_v3  ;;  %v3625_v28 = vmul.f32 14.285714, %v817_v48  ;;  %v3630_v47 = vmul.f32 14.285714, %v756_v13  ;;  %v758_v59 = vsub.f32 %v3566_v6, %v722_v63  ;;  %v819_v13 = vsub.f32 %v3587_v33, %v3439_v0 }
 0x1de   : > { %4816 = vst [vmem:[#allocation74_spill] sm:$0xff] %v3620_v12  ;;  %v3632_v62 = vmul.f32 14.285714, %v831_v55  ;;  %v1697_v36 = vmax.f32 %v1695_v1, %v3620_v12  ;;  %v3635_v14 = vmul.f32 14.285714, %v757_v53  ;;  %v833_v48 = vsub.f32 %v3566_v6, %v3439_v0 }
 0x1df   : > { %4817 = vst [vmem:[#allocation75_spill] sm:$0xff] %v3625_v28  ;;  %v3637_v45 = vmul.f32 14.285714, %v832_v37  ;;  %v1718_v7 = vmax.f32 %v1716_v27, %v3625_v28  ;;  %v3640_v51 = vmul.f32 14.285714, %v818_v49  ;;  %v834_v27 = vsub.f32 %v3578_v10, %v3436_v58 }
 0x1e0   : > { %4818 = vst [vmem:[#allocation76_spill] sm:$0xff] %v3632_v62  ;;  %v3642_v46 = vmul.f32 14.285714, %v741_v5  ;;  %v1699_v52 = vmax.f32 %v1697_v36, %v3460_v40  ;;  %v3648_v55 = vmul.f32 14.285714, %v742_v43  ;;  %v743_v63 = vsub.f32 %v3576_v61, %v3433_v57 }
 0x1e1   : > { %4819 = vst [vmem:[#allocation77_spill] sm:$0xff] %v3637_v45  ;;  %4820 = vst [vmem:[#allocation78_spill] sm:$0xff] %v3640_v51  ;;  %v1720_v1 = vmax.f32 %v1718_v7, %v3468_v60  ;;  %v1698_v53 = vmax.f32 %v1696_v34, %v3640_v51  ;;  %v3659_v5 = vmul.f32 14.285714, %v819_v13  ;;  %v744_v49 = vsub.f32 %v3587_v33, %v3433_v57 }
 0x1e2   : > { %v1701_v37 = vmax.f32 %v1699_v52, %v3507_v4  ;;  %v976_v34 = vmax.f32 %v3572_v9, %v3583_v35  ;;  %v955_v58 = vmax.f32 %v3598_v20, %v3622_v42  ;;  %v3668_v36 = vmul.f32 14.285714, %v758_v59  ;;  %v727_v52 = vpop.permute.xlu1 %726 }
 0x1e3   : > { %4821 = vst [vmem:[#allocation79_spill] sm:$0xff] %v3659_v5  ;;  %v1700_v43 = vmax.f32 %v1698_v53, %v3478_v8  ;;  %v1722_v6 = vmax.f32 %v1720_v1, %v3509_v2  ;;  %v1719_v7 = vmax.f32 %v1717_v24, %v3659_v5  ;;  %v835_v61 = vsub.f32 %v3589_v44, %v3439_v0  ;;  %v4854_v8 = vld [vmem:[#allocation55_spill] sm:$0xff] }
 0x1e4   : > { %v3674_v13 = vmul.f32 14.285714, %v834_v27  ;;  %v1703_v33 = vmax.f32 %v1701_v37, %v3580_v39  ;;  %977 = vmax.xlane.f32.xlu1 %v976_v34  ;;  %956 = vmax.xlane.f32.xlu0 %v955_v58  ;;  %v958_v59 = vmax.f32 %v3642_v46, %v3648_v55  ;;  %v3680_v53 = vmul.f32 14.285714, %v743_v63 }
 0x1e5   : > { %v1702_v57 = vmax.f32 %v1700_v43, %v3539_v56  ;;  %v759_v1 = vsub.f32 %v3578_v10, %v727_v52  ;;  %v1721_v24 = vmax.f32 %v1719_v7, %v3489_v38  ;;  %v760_v0 = vsub.f32 %v3589_v44, %v727_v52  ;;  %v4853_v56 = vld [vmem:[#allocation52_spill] sm:$0xff] }
 0x1e6   : > { %4822 = vst [vmem:[#allocation80_spill] sm:$0xff] %v3674_v13  ;;  %v3686_v2 = vmul.f32 14.285714, %v744_v49  ;;  %v979_v37 = vmax.f32 %v3600_v21, %v3630_v47  ;;  %v3690_v43 = vmul.f32 14.285714, %v833_v48  ;;  %v1724_v34 = vmax.f32 %v1722_v6, %v3592_v23 }
 0x1e7   : > { %v1704_v27 = vmax.f32 %v1702_v57, %v3617_v3  ;;  %v3693_v58 = vmul.f32 14.285714, %v835_v61  ;;  %v1723_v63 = vmax.f32 %v1721_v24, %v3570_v22  ;;  %v3045_v10 = vmov 0   ;;  %v4852_v22 = vld [vmem:[#allocation56_spill] sm:$0xff] }
 0x1e8   : > { %4823 = vst [vmem:[#allocation81_spill] sm:$0xff] %v3690_v43  ;;  %2595 = vset.pattern.permute.xlu1 %v3045_v10  ;;  %2596 = vset.pattern.permute.xlu0 %v3045_v10  ;;  %v1705_v44 = vmax.f32 %v1703_v33, %v3637_v45  ;;  %v3698_v49 = vmul.f32 14.285714, %v759_v1  ;;  %v3701_v57 = vmul.f32 14.285714, %v760_v0  ;;  %v982_v6 = vmax.f32 %v3635_v14, %v3668_v36 }
 0x1e9   : > { %4824 = vst [vmem:[#allocation82_spill] sm:$0xff] %v3693_v58  ;;  %v1706_v7 = vmax.f32 %v1704_v27, %v3674_v13  ;;  %980 = vmax.xlane.f32.xlu0 %v979_v37  ;;  %959 = vmax.xlane.f32.xlu1 %v958_v59  ;;  %v1725_v48 = vmax.f32 %v1723_v63, %v3632_v62  ;;  %v3046_v10 = vmov 1966171168  }
 0x1ea   : > { %v961_v61 = vmax.f32 %v3680_v53, %v3686_v2  ;;  %v1726_v24 = vmax.f32 %v1724_v34, %v3690_v43  ;;  %v985_v37 = vmax.f32 %v3698_v49, %v3701_v57 }
 0x1eb   : > { %v1707_v52 = vmax.f32 %v1705_v44, %v1706_v7  ;;  %v1727_v33 = vmax.f32 %v1725_v48, %v3693_v58  ;;  %v1673_v44 = vunpack.c.l.s4 %v3046_v10 }
 0x1ed   : > { %v1708_v27 = vrot.slane %v1707_v52, 4  ;;  %983 = vmax.xlane.f32.xlu1 %v982_v6  ;;  %962 = vmax.xlane.f32.xlu0 %v961_v61  ;;  %v1728_v59 = vmax.f32 %v1726_v24, %v1727_v33  ;;  %v1674_v34 = vunpack.c.0.s8 %v1673_v44  ;;  %v3715_v33 = vld [vmem:[#allocation2] sm:$0x3] }
 0x1ee   : > { %4826 = vst [vmem:[#allocation84_spill] sm:$0xff] %v3715_v33 }
 0x1ef   : > { %v1709_v1 = vmax.f32 %v1707_v52, %v1708_v27  ;;  %v1729_v0 = vrot.slane %v1728_v59, 4  ;;  %v3712_v6 = vsub.s32 %v1674_v34, %v3421_v50 }
 0x1f1   : > { %v1710_v63 = vrot.slane %v1709_v1, 2  ;;  %986 = vmax.xlane.f32.xlu0 %v985_v37  ;;  %v1730_v7 = vmax.f32 %v1728_v59, %v1729_v0  ;;  %4825 = vst [vmem:[#allocation83_spill] sm:$0xff] %v3712_v6  ;;  %v4827_v59 = vlaneseq }
 0x1f3   : > { %v1711_v13 = vmax.f32 %v1709_v1, %v1710_v63  ;;  %v1731_v45 = vrot.slane %v1730_v7, 2  ;;  %vm3719_vm2 = vcmp.lt.s32.totalorder %v4827_v59, 256  ;;  %v4828_v1 = vmov 0 }
 0x1f4   : > { %v4829_v1 = vsel %vm3719_vm2, 4294967295, %v4828_v1 }
 0x1f5   : > { %v1712_v62 = vrot.slane %v1711_v13, 1  ;;  %v1732_v43 = vmax.f32 %v1730_v7, %v1731_v45  ;;  %4830 = vst [vmem:[#allocation85_spill] sm:$0xff] %v4829_v1  ;;  %v4834_v45 = vld [vmem:[#allocation28_spill] sm:$0xff] }
 0x1f7   : > { %v1713_v48 = vmax.f32 %v1711_v13, %v1712_v62  ;;  %v1733_v58 = vrot.slane %v1732_v43, 1 }
 0x1f9   : > { %v1734_v52 = vmax.f32 %v1732_v43, %v1733_v58 }
 0x1fb   : > { %v1737_v61 = vcombine.low %v1713_v48, %v1734_v52 }
 0x1fd   : > { %v1744_v24 = vrot.slane %v1737_v61, %v3712_v6 }
 0x1ff   : > { %v1751_v27 = vrot.slane %v1744_v24, %v3712_v6 }
 0x201   : > { %v3724_v62 = vmax.f32 %v3715_v33, %v1751_v27 }
 0x203   : > { %4831 = vst [vmem:[#allocation86_spill] sm:$0xff] %v3724_v62  ;;  %2193 = vst.msk [vmem:[#allocation2] sm:$0x3] %vm3719_vm2, %v3724_v62 }
 0x252   : > { %v942_v13 = vpop.xlane.xlu0 %941  ;;  %v966_v58 = vpop.xlane.xlu1 %965 }
 0x253   : > { %v988_v43 = vmax.f32 %v942_v13, %v3341_v15  ;;  %v996_v37 = vmax.f32 %v966_v58, %v3373_v25 }
 0x255   : > { %1472 = vst.msk [vmem:[%s3326_s27] sm:$0xff] %vm1471_vm3, %v988_v43  ;;  %1006 = vperm.xlu1 %2595, %v988_v43   ;;  %1480 = vst.msk [vmem:[%s3326_s27 + $0x40] sm:$0xff] %vm1471_vm3, %v996_v37  ;;  %1789 = vrot.lane.b32.xlu0 %v996_v37, %s3047_s28  ;;  %v1292_v63 = vsub.f32 %v3341_v15, %v988_v43  ;;  %v1300_v48 = vsub.f32 %v3373_v25, %v996_v37 }
 0x257   : > { %v1308_v52 = vmul.f32 1.442695, %v1292_v63  ;;  %v1324_v25 = vmul.f32 1.442695, %v1300_v48 }
 0x259   : > { %1046 = vperm.xlu1 %2595, %v996_v37   ;;  %2623 = vpow2.f32 %v1308_v52 }
 0x25a   : > { %v969_v0 = vpop.xlane.xlu0 %968  ;;  %2625 = vpow2.f32 %v1324_v25  ;;  %v4832_v25 = vld [vmem:[#allocation27_spill] sm:$0xff] }
 0x25b   : > { %v997_v10 = vmax.f32 %v969_v0, %v3376_v26  ;;  %v945_v44 = vpop.xlane.xlu1 %944 }
 0x25c   : > { %v989_v7 = vmax.f32 %v945_v44, %v3349_v17 }
 0x25d   : > { %1773 = vrot.lane.b32.xlu1 %v988_v43, %s3047_s28  ;;  %1481 = vst.msk [vmem:[%s3326_s27 + $0x48] sm:$0xff] %vm1471_vm3, %v997_v10 }
 0x25e   : > { %1473 = vst.msk [vmem:[%s3326_s27 + $0x8] sm:$0xff] %vm1471_vm3, %v989_v7  ;;  %1011 = vperm.xlu0 %2596, %v989_v7   ;;  %v948_v34 = vpop.xlane.xlu0 %947  ;;  %v1293_v44 = vsub.f32 %v3349_v17, %v989_v7 }
 0x25f   : > { %v972_v61 = vpop.xlane.xlu1 %971  ;;  %v3748_v24 = vmax.f32 %v948_v34, %v3344_v16 }
 0x260   : > { %v3751_v15 = vmax.f32 %v972_v61, %v3381_v29 }
 0x261   : > { %1051 = vperm.xlu1 %2595, %v997_v10   ;;  %1474 = vst.msk [vmem:[%s3326_s27 + $0x10] sm:$0xff] %vm1471_vm3, %v3748_v24 }
 0x262   : > { %1482 = vst.msk [vmem:[%s3326_s27 + $0x50] sm:$0xff] %vm1471_vm3, %v3751_v15  ;;  %1775 = vrot.lane.b32.xlu0 %v989_v7, %s3047_s28 }
 0x263   : > { %v2624_v63 = vpop.eup %2623 }
 0x264   : > { %v2626_v52 = vpop.eup %2625 }
 0x265   : > { %1791 = vrot.lane.b32.xlu1 %v997_v10, %s3047_s28  ;;  %v951_v27 = vpop.xlane.xlu0 %950  ;;  %v954_v43 = vpop.xlane.xlu1 %953 }
 0x266   : > { %v3762_v13 = vmax.f32 %v951_v27, %v3352_v18  ;;  %1056 = vperm.xlu0 %2596, %v3751_v15   ;;  %v3770_v58 = vmax.f32 %v954_v43, %v3357_v19  ;;  %v1301_v43 = vsub.f32 %v3376_v26, %v997_v10 }
 0x268   : > { %1475 = vst.msk [vmem:[%s3326_s27 + $0x18] sm:$0xff] %vm1471_vm3, %v3762_v13  ;;  %1476 = vst.msk [vmem:[%s3326_s27 + $0x20] sm:$0xff] %vm1471_vm3, %v3770_v58  ;;  %v1326_v26 = vmul.f32 1.442695, %v1301_v43 }
 0x269   : > { %1016 = vperm.xlu1 %2595, %v3748_v24   ;;  %v975_v37 = vpop.xlane.xlu0 %974 }
 0x26a   : > { %v999_v0 = vmax.f32 %v975_v37, %v3384_v30  ;;  %1793 = vrot.lane.b32.xlu0 %v3751_v15, %s3047_s28  ;;  %v1310_v37 = vmul.f32 1.442695, %v1293_v44 }
 0x26c   : > { %1483 = vst.msk [vmem:[%s3326_s27 + $0x58] sm:$0xff] %vm1471_vm3, %v999_v0  ;;  %2627 = vpow2.f32 %v1310_v37  ;;  %v1303_v43 = vsub.f32 %v3384_v30, %v999_v0 }
 0x26d   : > { %1777 = vrot.lane.b32.xlu1 %v3748_v24, %s3047_s28  ;;  %2629 = vpow2.f32 %v1326_v26 }
 0x26e   : > { %1356 = vrot.lane.b32.xlu0 %v2624_v63, %s3048_s11  ;;  %v4833_v63 = vld [vmem:[#allocation30_spill] sm:$0xff] }
 0x271   : > { %1021 = vperm.xlu1 %2595, %v3762_v13   ;;  %v978_v34 = vpop.xlane.xlu1 %977  ;;  %v957_v48 = vpop.xlane.xlu0 %956 }
 0x272   : > { %v3786_v61 = vmax.f32 %v978_v34, %v3389_v31  ;;  %v3789_v27 = vmax.f32 %v957_v48, %v4832_v25  ;;  %1372 = vrot.lane.b32.xlu0 %v2626_v52, %s3048_s11  ;;  %v4835_v52 = vld [vmem:[#allocation31_spill] sm:$0xff] }
 0x274   : > { %1484 = vst.msk [vmem:[%s3326_s27 + $0x60] sm:$0xff] %vm1471_vm3, %v3786_v61  ;;  %1477 = vst.msk [vmem:[%s3326_s27 + $0x28] sm:$0xff] %vm1471_vm3, %v3789_v27 }
 0x275   : > { %1061 = vperm.xlu1 %2595, %v999_v0  }
 0x276   : > { %v981_v17 = vpop.xlane.xlu0 %980  ;;  %v960_v7 = vpop.xlane.xlu1 %959  ;;  %1066 = vperm.xlu0 %2596, %v3786_v61  }
 0x277   : > { %v1001_v34 = vmax.f32 %v981_v17, %v4833_v63  ;;  %v3801_v48 = vmax.f32 %v960_v7, %v4834_v45  ;;  %v4836_v7 = vld [vmem:[#allocation29_spill] sm:$0xff]  ;;  %v2628_v30 = vpop.eup %2627 }
 0x278   : > { %v2630_v26 = vpop.eup %2629 }
 0x279   : > { %1779 = vrot.lane.b32.xlu1 %v3762_v13, %s3047_s28  ;;  %1485 = vst.msk [vmem:[%s3326_s27 + $0x68] sm:$0xff] %vm1471_vm3, %v1001_v34  ;;  %1478 = vst.msk [vmem:[%s3326_s27 + $0x30] sm:$0xff] %vm1471_vm3, %v3801_v48 }
 0x27a   : > { %v984_v10 = vpop.xlane.xlu1 %983  ;;  %v963_v44 = vpop.xlane.xlu0 %962  ;;  %1781 = vrot.lane.b32.xlu0 %v3770_v58, %s3047_s28 }
 0x27b   : > { %v3812_v17 = vmax.f32 %v984_v10, %v4835_v52  ;;  %v3815_v1 = vmax.f32 %v963_v44, %v4836_v7  ;;  %v4837_v10 = vld [vmem:[#allocation32_spill] sm:$0xff]  ;;  %v1330_v44 = vmul.f32 1.442695, %v1303_v43 }
 0x27d   : > { %1795 = vrot.lane.b32.xlu1 %v999_v0, %s3047_s28  ;;  %1486 = vst.msk [vmem:[%s3326_s27 + $0x70] sm:$0xff] %vm1471_vm3, %v3812_v17  ;;  %1479 = vst.msk [vmem:[%s3326_s27 + $0x38] sm:$0xff] %vm1471_vm3, %v3815_v1  ;;  %v1294_v0 = vsub.f32 %v3344_v16, %v3748_v24  ;;  %2631 = vpow2.f32 %v1330_v44  ;;  %v4838_v24 = vmov 2  }
 0x27e   : > { %v987_v37 = vpop.xlane.xlu0 %986  ;;  %1797 = vrot.lane.b32.xlu0 %v3786_v61, %s3047_s28 }
 0x27f   : > { %v3828_v33 = vmax.f32 %v987_v37, %v4837_v10  ;;  %v1302_v37 = vsub.f32 %v3381_v29, %v3751_v15  ;;  %v1312_v43 = vmul.f32 1.442695, %v1294_v0  ;;  %v1305_v10 = vsub.f32 %v4833_v63, %v1001_v34 }
 0x280   : > { %v1295_v29 = vsub.f32 %v3352_v18, %v3762_v13  ;;  %v1304_v13 = vsub.f32 %v3389_v31, %v3786_v61  ;;  %v1306_v31 = vsub.f32 %v4835_v52, %v3812_v17 }
 0x281   : > { %1026 = vperm.xlu1 %2595, %v3770_v58   ;;  %1487 = vst.msk [vmem:[%s3326_s27 + $0x78] sm:$0xff] %vm1471_vm3, %v3828_v33  ;;  %v1328_v3 = vmul.f32 1.442695, %v1302_v37  ;;  %2633 = vpow2.f32 %v1312_v43  ;;  %v1334_v16 = vmul.f32 1.442695, %v1305_v10  ;;  %v1297_v37 = vsub.f32 %v4832_v25, %v3789_v27 }
 0x282   : > { %1799 = vrot.lane.b32.xlu0 %v1001_v34, %s3047_s28  ;;  %v1336_v10 = vmul.f32 1.442695, %v1306_v31  ;;  %v1299_v25 = vsub.f32 %v4836_v7, %v3815_v1  ;;  %v4839_v7 = vld [vmem:[#allocation35_spill] sm:$0xff] }
 0x283   : > { %2635 = vpow2.f32 %v1328_v3  ;;  %v1314_v3 = vmul.f32 1.442695, %v1295_v29  ;;  %v1318_v43 = vmul.f32 1.442695, %v1297_v37 }
 0x284   : > { %2637 = vpow2.f32 %v1334_v16 }
 0x285   : > { %1358 = vrot.lane.b32.xlu1 %v2628_v30, %s3048_s11  ;;  %2639 = vpow2.f32 %v1314_v3 }
 0x286   : > { %1076 = vperm.xlu0 %2596, %v3812_v17  }
 0x287   : > { %v2632_v44 = vpop.eup %2631 }
 0x289   : > { %1374 = vrot.lane.b32.xlu1 %v2630_v26, %s3048_s11  ;;  %v1332_v26 = vmul.f32 1.442695, %v1304_v13 }
 0x28a   : > { %1785 = vrot.lane.b32.xlu0 %v3801_v48, %s3047_s28 }
 0x28b   : > { %2598 = vset.pattern.permute.xlu0 %v4838_v24  ;;  %v2634_v15 = vpop.eup %2633 }
 0x28d   : > { %1031 = vperm.xlu1 %2595, %v3789_v27   ;;  %v2636_v63 = vpop.eup %2635 }
 0x28e   : > { %1378 = vrot.lane.b32.xlu0 %v2632_v44, %s3048_s11  ;;  %v2638_v30 = vpop.eup %2637  ;;  %v4840_v44 = vld [vmem:[#allocation37_spill] sm:$0xff] }
 0x28f   : > { %v2640_v0 = vpop.eup %2639 }
 0x291   : > { %1071 = vperm.xlu1 %2595, %v1001_v34   ;;  %v1296_v34 = vsub.f32 %v3357_v19, %v3770_v58  ;;  %v1298_v19 = vsub.f32 %v4834_v45, %v3801_v48  ;;  %v1322_v45 = vmul.f32 1.442695, %v1299_v25 }
 0x292   : > { %1787 = vrot.lane.b32.xlu0 %v3815_v1, %s3047_s28 }
 0x293   : > { %v1316_v18 = vmul.f32 1.442695, %v1296_v34  ;;  %v1320_v58 = vmul.f32 1.442695, %v1298_v19 }
 0x295   : > { %1783 = vrot.lane.b32.xlu1 %v3789_v27, %s3047_s28  ;;  %2641 = vpow2.f32 %v1316_v18  ;;  %v4842_v18 = vld [vmem:[#allocation38_spill] sm:$0xff] }
 0x296   : > { %1803 = vrot.lane.b32.xlu0 %v3828_v33, %s3047_s28  ;;  %2643 = vpow2.f32 %v1332_v26  ;;  %v3894_v26 = vand.u32 127, %v4827_v59  ;;  %v4843_v59 = vld [vmem:[#allocation43_spill] sm:$0xff] }
 0x297   : > { %2645 = vpow2.f32 %v1318_v43 }
 0x298   : > { %2647 = vpow2.f32 %v1320_v58 }
 0x299   : > { %1360 = vrot.lane.b32.xlu1 %v2634_v15, %s3048_s11  ;;  %2649 = vpow2.f32 %v1336_v10  ;;  %v3904_v10 = vadd.s32 128, %v3894_v26 }
 0x29a   : > { %1382 = vrot.lane.b32.xlu0 %v2638_v30, %s3048_s11  ;;  %2651 = vpow2.f32 %v1322_v45  ;;  %v4841_v30 = vld [vmem:[#allocation36_spill] sm:$0xff] }
 0x29d   : > { %1376 = vrot.lane.b32.xlu1 %v2636_v63, %s3048_s11 }
 0x29f   : > { %v2642_v61 = vpop.eup %2641 }
 0x2a0   : > { %v2644_v27 = vpop.eup %2643 }
 0x2a1   : > { %1036 = vperm.xlu1 %2595, %v3801_v48   ;;  %v2646_v48 = vpop.eup %2645 }
 0x2a2   : > { %v2648_v52 = vpop.eup %2647 }
 0x2a5   : > { %1801 = vrot.lane.b32.xlu1 %v3812_v17, %s3047_s28  ;;  %v2650_v17 = vpop.eup %2649 }
 0x2a6   : > { %v2652_v16 = vpop.eup %2651 }
 0x2a9   : > { %1362 = vrot.lane.b32.xlu1 %v2640_v0, %s3048_s11  ;;  %v3891_v0 = vstv %s2440_s13 }
 0x2aa   : > { %v887_v31 = vadd.s32 %v3891_v0, %v3421_v50 }
 0x2ac   : > { %vm906_vm4 = vcmp.eq.s32.totalorder %v887_v31, %v3894_v26  ;;  %vm907_vm5 = vcmp.eq.s32.totalorder %v887_v31, %v3904_v10 }
 0x2ad   : > { %1041 = vperm.xlu1 %2595, %v3815_v1  }
 0x2b1   : > { %1081 = vperm.xlu1 %2595, %v3828_v33  }
 0x2b5   : > { %1364 = vrot.lane.b32.xlu1 %v2642_v61, %s3048_s11  ;;  %v878_v61 = vadd.s32 64, %v3421_v50 }
 0x2b6   : > { %2597 = vset.pattern.permute.xlu1 %v4838_v24 }
 0x2b9   : > { %1380 = vrot.lane.b32.xlu1 %v2644_v27, %s3048_s11 }
 0x2bd   : > { %1366 = vrot.lane.b32.xlu1 %v2646_v48, %s3048_s11  ;;  %v4844_v48 = vld [vmem:[#allocation47_spill] sm:$0xff] }
 0x2c1   : > { %1368 = vrot.lane.b32.xlu1 %v2648_v52, %s3048_s11 }
 0x2c5   : > { %1384 = vrot.lane.b32.xlu1 %v2650_v17, %s3048_s11  ;;  %v4845_v17 = vld [vmem:[#allocation45_spill] sm:$0xff] }
 0x2c7   : > { %v3896_v19 = vpop.permute.xlu0 %1789 }
 0x2c9   : > { %1370 = vrot.lane.b32.xlu1 %v2652_v16, %s3048_s11 }
 0x2d4   : > { %v1007_v1 = vpop.permute.xlu1 %1006 }
 0x2d5   : > { %v1084_v24 = vsub.f32 %v4839_v7, %v1007_v1  ;;  %v1085_v29 = vsub.f32 %v4840_v44, %v1007_v1  ;;  %v895_v1 = vadd.s32 %v3891_v0, %v878_v61  ;;  %v871_v61 = vadd.s32 8, %v3421_v50 }
 0x2d7   : > { %v1116_v15 = vmul.f32 1.442695, %v1084_v24  ;;  %v1118_v3 = vmul.f32 1.442695, %v1085_v29  ;;  %v4846_v24 = vld [vmem:[#allocation49_spill] sm:$0xff]  ;;  %vm922_vm6 = vcmp.eq.s32.totalorder %v895_v1, %v3894_v26  ;;  %vm923_vm7 = vcmp.eq.s32.totalorder %v895_v1, %v3904_v10 }
 0x2d8   : > { %v1047_v63 = vpop.permute.xlu1 %1046  ;;  %v888_v38 = vadd.s32 %v3891_v0, %v871_v61 }
 0x2d9   : > { %2653 = vpow2.f32 %v1116_v15  ;;  %v1100_v34 = vsub.f32 %v4841_v30, %v1047_v63  ;;  %v1101_v13 = vsub.f32 %v4842_v18, %v1047_v63 }
 0x2da   : > { %2655 = vpow2.f32 %v1118_v3  ;;  %vm908_vm8 = vcmp.eq.s32.totalorder %v888_v38, %v3894_v26  ;;  %vm909_vm9 = vcmp.eq.s32.totalorder %v888_v38, %v3904_v10  ;;  %v872_v38 = vadd.s32 16, %v3421_v50 }
 0x2db   : > { %v1148_v37 = vmul.f32 1.442695, %v1100_v34  ;;  %v1150_v43 = vmul.f32 1.442695, %v1101_v13 }
 0x2dc   : > { %v3898_v58 = vpop.permute.xlu1 %1773 }
 0x2dd   : > { %2657 = vpow2.f32 %v1148_v37  ;;  %v1012_v25 = vpop.permute.xlu0 %1011 }
 0x2de   : > { %2659 = vpow2.f32 %v1150_v43  ;;  %v1086_v45 = vsub.f32 %v4843_v59, %v1012_v25  ;;  %v1087_v52 = vsub.f32 %v4844_v48, %v1012_v25 }
 0x2e0   : > { %v1052_v27 = vpop.permute.xlu1 %1051  ;;  %v1120_v3 = vmul.f32 1.442695, %v1086_v45  ;;  %v1122_v63 = vmul.f32 1.442695, %v1087_v52 }
 0x2e1   : > { %v1102_v16 = vsub.f32 %v4845_v17, %v1052_v27  ;;  %v1103_v29 = vsub.f32 %v4846_v24, %v1052_v27  ;;  %v3913_v37 = vpop.permute.xlu0 %1775  ;;  %v879_v27 = vadd.s32 72, %v3421_v50 }
 0x2e2   : > { %2661 = vpow2.f32 %v1120_v3  ;;  %v4851_v3 = vld [vmem:[#allocation51_spill] sm:$0xff] }
 0x2e3   : > { %v2654_v15 = vpop.eup %2653  ;;  %v1152_v34 = vmul.f32 1.442695, %v1102_v16  ;;  %v1154_v43 = vmul.f32 1.442695, %v1103_v29  ;;  %2663 = vpow2.f32 %v1122_v63  ;;  %v896_v1 = vadd.s32 %v3891_v0, %v879_v27 }
 0x2e4   : > { %v2656_v13 = vpop.eup %2655  ;;  %v3915_v23 = vpop.permute.xlu1 %1791  ;;  %v3917_v39 = vsel %vm906_vm4, 0.0, %v2654_v15 }
 0x2e5   : > { %4847 = vst [vmem:[#allocation27_spill] sm:$0xff] %v3915_v23  ;;  %4848 = vst [vmem:[#allocation30_spill] sm:$0xff] %v3917_v39  ;;  %v3919_v25 = vsel %vm907_vm5, 0.0, %v2656_v13  ;;  %2665 = vpow2.f32 %v1152_v34  ;;  %v1057_v16 = vpop.permute.xlu0 %1056  ;;  %vm924_vm10 = vcmp.eq.s32.totalorder %v896_v1, %v3894_v26  ;;  %vm925_vm11 = vcmp.eq.s32.totalorder %v896_v1, %v3904_v10 }
 0x2e6   : > { %4849 = vst [vmem:[#allocation28_spill] sm:$0xff] %v3919_v25  ;;  %v1212_v31 = vadd.f32 %v3919_v25, %v3917_v39  ;;  %2667 = vpow2.f32 %v1154_v43  ;;  %v1104_v13 = vsub.f32 %v4851_v3, %v1057_v16  ;;  %v1105_v63 = vsub.f32 %v4852_v22, %v1057_v16 }
 0x2e7   : > { %v2658_v45 = vpop.eup %2657  ;;  %v1537_v62 = vmul.f32 %v3917_v39, %v4839_v7 }
 0x2e8   : > { %v2660_v52 = vpop.eup %2659  ;;  %1213 = vadd.xlane.f32.xlu0 %v1212_v31  ;;  %v1017_v29 = vpop.permute.xlu1 %1016  ;;  %v3927_v15 = vsel %vm922_vm6, 0.0, %v2658_v45  ;;  %v1156_v43 = vmul.f32 1.442695, %v1104_v13  ;;  %v1158_v40 = vmul.f32 1.442695, %v1105_v63  ;;  %v4857_v63 = vld [vmem:[#allocation61_spill] sm:$0xff] }
 0x2e9   : > { %4850 = vst [vmem:[#allocation31_spill] sm:$0xff] %v3927_v15  ;;  %v1088_v4 = vsub.f32 %v4853_v56, %v1017_v29  ;;  %v1089_v60 = vsub.f32 %v4854_v8, %v1017_v29  ;;  %v3934_v34 = vsel %vm923_vm7, 0.0, %v2660_v52  ;;  %v3939_v5 = vpop.permute.xlu0 %1793 }
 0x2ea   : > { %4855 = vst [vmem:[#allocation29_spill] sm:$0xff] %v3934_v34  ;;  %v1236_v45 = vadd.f32 %v3934_v34, %v3927_v15  ;;  %4856 = vst [vmem:[#allocation32_spill] sm:$0xff] %v3939_v5  ;;  %2669 = vpow2.f32 %v1156_v43  ;;  %v1554_v1 = vmul.f32 %v3934_v34, %v4842_v18 }
 0x2eb   : > { %v1124_v31 = vmul.f32 1.442695, %v1088_v4  ;;  %v1126_v51 = vmul.f32 1.442695, %v1089_v60  ;;  %2671 = vpow2.f32 %v1158_v40  ;;  %v880_v60 = vadd.s32 80, %v3421_v50 }
 0x2ec   : > { %v3941_v16 = vpop.permute.xlu1 %1777  ;;  %v2662_v61 = vpop.eup %2661 }
 0x2ed   : > { %1237 = vadd.xlane.f32.xlu1 %v1236_v45  ;;  %2673 = vpow2.f32 %v1124_v31  ;;  %v2664_v4 = vpop.eup %2663  ;;  %v3946_v27 = vpop.permute.xlu0 %1356  ;;  %v3948_v29 = vsel %vm908_vm8, 0.0, %v2662_v61  ;;  %v873_v31 = vadd.s32 24, %v3421_v50  ;;  %v1553_v61 = vmul.f32 %v3927_v15, %v4841_v30 }
 0x2ee   : > { %2675 = vpow2.f32 %v1126_v51  ;;  %v3956_v51 = vsel %vm909_vm9, 0.0, %v2664_v4  ;;  %v1538_v30 = vmul.f32 %v3919_v25, %v4840_v44  ;;  %v889_v15 = vadd.s32 %v3891_v0, %v872_v38 }
 0x2ef   : > { %v2666_v13 = vpop.eup %2665  ;;  %v1593_v34 = vadd.f32 %v1554_v1, %v1553_v61  ;;  %v890_v5 = vadd.s32 %v3891_v0, %v873_v31  ;;  %v1540_v44 = vmul.f32 %v3956_v51, %v4844_v48 }
 0x2f0   : > { %v1022_v52 = vpop.permute.xlu1 %1021  ;;  %v2668_v45 = vpop.eup %2667  ;;  %v3958_v6 = vsel %vm924_vm10, 0.0, %v2666_v13  ;;  %vm910_vm14 = vcmp.eq.s32.totalorder %v889_v15, %v3894_v26  ;;  %vm911_vm15 = vcmp.eq.s32.totalorder %v889_v15, %v3904_v10 }
 0x2f1   : > { %v1090_v40 = vsub.f32 %v3514_v11, %v1022_v52  ;;  %v1091_v43 = vsub.f32 %v4857_v63, %v1022_v52  ;;  %4858 = vst [vmem:[#allocation35_spill] sm:$0xff] %v3958_v6  ;;  %v1215_v52 = vadd.f32 %v3956_v51, %v3948_v29  ;;  %v3966_v54 = vsel %vm925_vm11, 0.0, %v2668_v45  ;;  %v3968_v32 = vpop.permute.xlu0 %1372 }
 0x2f2   : > { %4859 = vst [vmem:[#allocation37_spill] sm:$0xff] %v3966_v54  ;;  %v1239_v4 = vadd.f32 %v3966_v54, %v3958_v6  ;;  %v897_v45 = vadd.s32 %v3891_v0, %v880_v60  ;;  %v1556_v60 = vmul.f32 %v3966_v54, %v4846_v24  ;;  %vm912_vm0 = vcmp.eq.s32.totalorder %v890_v5, %v3894_v26  ;;  %v4227_v54 = vld [vmem:[%s3316_s21 + $0x20] sm:$0xff] }
 0x2f3   : > { %v1128_v28 = vmul.f32 1.442695, %v1090_v40  ;;  %v1130_v12 = vmul.f32 1.442695, %v1091_v43  ;;  %1216 = vadd.xlane.f32.xlu1 %v1215_v52  ;;  %v4860_v40 = vld [vmem:[#allocation64_spill] sm:$0xff]  ;;  %vm913_vm1 = vcmp.eq.s32.totalorder %v890_v5, %v3904_v10 }
 0x2f4   : > { %v1062_v13 = vpop.permute.xlu1 %1061  ;;  %1240 = vadd.xlane.f32.xlu0 %v1239_v4  ;;  %v2670_v23 = vpop.eup %2669  ;;  %vm926_vm12 = vcmp.eq.s32.totalorder %v897_v45, %v3894_v26  ;;  %vm927_vm13 = vcmp.eq.s32.totalorder %v897_v45, %v3904_v10 }
 0x2f5   : > { %2677 = vpow2.f32 %v1128_v28  ;;  %v1106_v18 = vsub.f32 %v3528_v41, %v1062_v13  ;;  %v1107_v43 = vsub.f32 %v4860_v40, %v1062_v13  ;;  %v1539_v28 = vmul.f32 %v3948_v29, %v4843_v59  ;;  %v2672_v52 = vpop.eup %2671  ;;  %v1067_v31 = vpop.permute.xlu0 %1066 }
 0x2f6   : > { %2679 = vpow2.f32 %v1130_v12  ;;  %v1569_v13 = vadd.f32 %v1538_v30, %v1537_v62  ;;  %v1555_v12 = vmul.f32 %v3958_v6, %v4845_v17  ;;  %v881_v59 = vadd.s32 88, %v3421_v50 }
 0x2f7   : > { %v1160_v7 = vmul.f32 1.442695, %v1106_v18  ;;  %v1162_v39 = vmul.f32 1.442695, %v1107_v43  ;;  %v2674_v38 = vpop.eup %2673  ;;  %1594 = vadd.xlane.f32.xlu1 %v1593_v34  ;;  %v1572_v62 = vadd.f32 %v1540_v44, %v1539_v28  ;;  %v1108_v17 = vsub.f32 %v3572_v9, %v1067_v31 }
 0x2f8   : > { %v3985_v25 = vpop.permute.xlu1 %1779  ;;  %v2676_v48 = vpop.eup %2675  ;;  %1570 = vadd.xlane.f32.xlu0 %v1569_v13  ;;  %v1596_v24 = vadd.f32 %v1556_v60, %v1555_v12  ;;  %v4000_v61 = vsel %vm926_vm12, 0.0, %v2670_v23  ;;  %v4002_v1 = vsel %vm927_vm13, 0.0, %v2672_v52  ;;  %v1109_v4 = vsub.f32 %v3583_v35, %v1067_v31  ;;  %v4863_v60 = vld [vmem:[#allocation66_spill] sm:$0xff] }
 0x2f9   : > { %2681 = vpow2.f32 %v1160_v7  ;;  %4861 = vst [vmem:[#allocation36_spill] sm:$0xff] %v4000_v61  ;;  %4862 = vst [vmem:[#allocation38_spill] sm:$0xff] %v4002_v1  ;;  %v4007_v30 = vsel %vm911_vm15, 0.0, %v2676_v48  ;;  %v898_v15 = vadd.s32 %v3891_v0, %v881_v59  ;;  %v1242_v43 = vadd.f32 %v4002_v1, %v4000_v61 }
 0x2fa   : > { %2683 = vpow2.f32 %v1162_v39  ;;  %v4005_v39 = vsel %vm910_vm14, 0.0, %v2674_v38  ;;  %v1557_v23 = vmul.f32 %v4000_v61, %v4851_v3  ;;  %v1558_v45 = vmul.f32 %v4002_v1, %v4852_v22  ;;  %v4864_v3 = vld [vmem:[#allocation67_spill] sm:$0xff] }
 0x2fb   : > { %1573 = vadd.xlane.f32.xlu1 %v1572_v62  ;;  %v1164_v28 = vmul.f32 1.442695, %v1108_v17  ;;  %v1218_v44 = vadd.f32 %v4007_v30, %v4005_v39  ;;  %v1166_v12 = vmul.f32 1.442695, %v1109_v4  ;;  %vm928_vm3 = vcmp.eq.s32.totalorder %v898_v15, %v3894_v26 }
 0x2fc   : > { %v3998_v34 = vpop.permute.xlu1 %1795  ;;  %1597 = vadd.xlane.f32.xlu0 %v1596_v24  ;;  %vm929_vm4 = vcmp.eq.s32.totalorder %v898_v15, %v3904_v10  ;;  %v1599_v17 = vadd.f32 %v1558_v45, %v1557_v23  ;;  %v1761_v6 = vmul.f32 14.285714, %v4227_v54 }
 0x2fd   : > { %2685 = vpow2.f32 %v1164_v28  ;;  %v874_v28 = vadd.s32 32, %v3421_v50 }
 0x2fe   : > { %2687 = vpow2.f32 %v1166_v12  ;;  %v882_v12 = vadd.s32 96, %v3421_v50 }
 0x2ff   : > { %v2678_v18 = vpop.eup %2677  ;;  %1243 = vadd.xlane.f32.xlu1 %v1242_v43 }
 0x300   : > { %v2680_v7 = vpop.eup %2679  ;;  %v1027_v52 = vpop.permute.xlu1 %1026  ;;  %v4021_v13 = vsel %vm912_vm0, 0.0, %v2678_v18  ;;  %1219 = vadd.xlane.f32.xlu0 %v1218_v44 }
 0x301   : > { %v1092_v38 = vsub.f32 %v4863_v60, %v1027_v52  ;;  %v1093_v31 = vsub.f32 %v4864_v3, %v1027_v52  ;;  %v4026_v22 = vsel %vm913_vm1, 0.0, %v2680_v7  ;;  %v1543_v59 = vmul.f32 %v4021_v13, %v3514_v11  ;;  %v4039_v11 = vpop.permute.xlu0 %1781 }
 0x302   : > { %v1221_v24 = vadd.f32 %v4026_v22, %v4021_v13  ;;  %v1544_v43 = vmul.f32 %v4026_v22, %v4857_v63  ;;  %v1541_v63 = vmul.f32 %v4005_v39, %v4853_v56  ;;  %v1542_v52 = vmul.f32 %v4007_v30, %v4854_v8 }
 0x303   : > { %v2682_v48 = vpop.eup %2681  ;;  %v1132_v5 = vmul.f32 1.442695, %v1092_v38  ;;  %v1134_v62 = vmul.f32 1.442695, %v1093_v31  ;;  %1600 = vadd.xlane.f32.xlu1 %v1599_v17  ;;  %v891_v31 = vadd.s32 %v3891_v0, %v874_v28  ;;  %v899_v17 = vadd.s32 %v3891_v0, %v882_v12 }
 0x304   : > { %v2684_v4 = vpop.eup %2683  ;;  %v4033_v18 = vpop.permute.xlu1 %1358  ;;  %v4037_v7 = vsel %vm928_vm3, 0.0, %v2682_v48  ;;  %1222 = vadd.xlane.f32.xlu0 %v1221_v24  ;;  %v1578_v23 = vadd.f32 %v1544_v43, %v1543_v59  ;;  %v1575_v59 = vadd.f32 %v1542_v52, %v1541_v63 }
 0x305   : > { %4865 = vst [vmem:[#allocation43_spill] sm:$0xff] %v4037_v7  ;;  %v4041_v15 = vsel %vm929_vm4, 0.0, %v2684_v4  ;;  %2689 = vpow2.f32 %v1132_v5  ;;  %v4053_v38 = vpop.permute.xlu0 %1797  ;;  %v1559_v5 = vmul.f32 %v4037_v7, %v3528_v41  ;;  %vm914_vm5 = vcmp.eq.s32.totalorder %v891_v31, %v3894_v26 }
 0x306   : > { %4866 = vst [vmem:[#allocation47_spill] sm:$0xff] %v4041_v15  ;;  %v1245_v45 = vadd.f32 %v4041_v15, %v4037_v7  ;;  %2691 = vpow2.f32 %v1134_v62  ;;  %v1560_v62 = vmul.f32 %v4041_v15, %v4860_v40  ;;  %vm915_vm6 = vcmp.eq.s32.totalorder %v891_v31, %v3904_v10 }
 0x307   : > { %1579 = vadd.xlane.f32.xlu1 %v1578_v23  ;;  %v2686_v24 = vpop.eup %2685  ;;  %vm930_vm7 = vcmp.eq.s32.totalorder %v899_v17, %v3894_v26  ;;  %vm931_vm8 = vcmp.eq.s32.totalorder %v899_v17, %v3904_v10  ;;  %v875_v31 = vadd.s32 40, %v3421_v50  ;;  %v883_v17 = vadd.s32 104, %v3421_v50 }
 0x308   : > { %v4046_v44 = vpop.permute.xlu1 %1374  ;;  %1246 = vadd.xlane.f32.xlu0 %v1245_v45  ;;  %v2688_v4 = vpop.eup %2687  ;;  %v1602_v41 = vadd.f32 %v1560_v62, %v1559_v5 }
 0x309   : > { %v4065_v40 = vpop.permute.xlu0 %1799  ;;  %v4082_v15 = vsel %vm931_vm8, 0.0, %v2688_v4  ;;  %v900_v4 = vadd.s32 %v3891_v0, %v883_v17  ;;  %vm1690_vm8 = vcmask 0  }
 0x30a   : > { %4868 = vst [vmem:[#allocation49_spill] sm:$0xff] %v4082_v15 }
 0x30b   : > { %vm932_vm11 = vcmp.eq.s32.totalorder %v900_v4, %v3894_v26  ;;  %vm933_vm12 = vcmp.eq.s32.totalorder %v900_v4, %v3904_v10 }
 0x30c   : > { %v1032_v48 = vpop.permute.xlu1 %1031  ;;  %1576 = vadd.xlane.f32.xlu0 %v1575_v59 }
 0x30d   : > { %v1094_v56 = vsub.f32 %v3598_v20, %v1032_v48  ;;  %v1095_v8 = vsub.f32 %v3622_v42, %v1032_v48 }
 0x30f   : > { %v1136_v43 = vmul.f32 1.442695, %v1094_v56  ;;  %v1138_v23 = vmul.f32 1.442695, %v1095_v8  ;;  %v2690_v45 = vpop.eup %2689 }
 0x310   : > { %v1072_v28 = vpop.permute.xlu1 %1071  ;;  %v2692_v63 = vpop.eup %2691  ;;  %1603 = vadd.xlane.f32.xlu0 %v1602_v41  ;;  %v4071_v12 = vsel %vm914_vm5, 0.0, %v2690_v45 }
 0x311   : > { %v1110_v52 = vsub.f32 %v3600_v21, %v1072_v28  ;;  %v1111_v48 = vsub.f32 %v3630_v47, %v1072_v28  ;;  %2693 = vpow2.f32 %v1136_v43  ;;  %v4073_v59 = vsel %vm915_vm6, 0.0, %v2692_v63  ;;  %v1077_v45 = vpop.permute.xlu0 %1076 }
 0x312   : > { %2695 = vpow2.f32 %v1138_v23  ;;  %v1224_v56 = vadd.f32 %v4073_v59, %v4071_v12  ;;  %v4080_v28 = vsel %vm930_vm7, 0.0, %v2686_v24  ;;  %v892_v43 = vadd.s32 %v3891_v0, %v875_v31 }
 0x313   : > { %v1168_v5 = vmul.f32 1.442695, %v1110_v52  ;;  %v1170_v62 = vmul.f32 1.442695, %v1111_v48  ;;  %4867 = vst [vmem:[#allocation45_spill] sm:$0xff] %v4080_v28  ;;  %v1248_v23 = vadd.f32 %v4082_v15, %v4080_v28  ;;  %v1561_v41 = vmul.f32 %v4080_v28, %v3572_v9 }
 0x314   : > { %v4078_v8 = vpop.permute.xlu1 %1783  ;;  %1225 = vadd.xlane.f32.xlu1 %v1224_v56  ;;  %v1562_v24 = vmul.f32 %v4082_v15, %v3583_v35  ;;  %v1112_v52 = vsub.f32 %v3635_v14, %v1077_v45  ;;  %vm916_vm9 = vcmp.eq.s32.totalorder %v892_v43, %v3894_v26  ;;  %vm917_vm10 = vcmp.eq.s32.totalorder %v892_v43, %v3904_v10 }
 0x315   : > { %2697 = vpow2.f32 %v1168_v5  ;;  %v1113_v5 = vsub.f32 %v3668_v36, %v1077_v45  ;;  %vm1488_vm7 = vcmask 15368  }
 0x316   : > { %2699 = vpow2.f32 %v1170_v62  ;;  %v1605_v48 = vadd.f32 %v1562_v24, %v1561_v41  ;;  %v1172_v56 = vmul.f32 1.442695, %v1112_v52 }
 0x318   : > { %v4092_v63 = vpop.permute.xlu1 %1360  ;;  %1249 = vadd.xlane.f32.xlu1 %v1248_v23  ;;  %2701 = vpow2.f32 %v1172_v56 }
 0x31b   : > { %v2694_v31 = vpop.eup %2693 }
 0x31c   : > { %v4099_v62 = vpop.permute.xlu1 %1376  ;;  %v2696_v9 = vpop.eup %2695  ;;  %1606 = vadd.xlane.f32.xlu1 %v1605_v48  ;;  %v4101_v35 = vsel %vm916_vm9, 0.0, %v2694_v31  ;;  %v1174_v48 = vmul.f32 1.442695, %v1113_v5  ;;  %v1546_v5 = vmul.f32 %v4073_v59, %v4864_v3  ;;  %vm2230_vm9 = vcmask (!%p2441_p4), 1040384  }
 0x31d   : > { %v4104_v17 = vsel %vm917_vm10, 0.0, %v2696_v9  ;;  %v1547_v23 = vmul.f32 %v4101_v35, %v3598_v20 }
 0x31e   : > { %v1227_v45 = vadd.f32 %v4104_v17, %v4101_v35  ;;  %v1548_v41 = vmul.f32 %v4104_v17, %v3622_v42  ;;  %v1545_v42 = vmul.f32 %v4071_v12, %v4863_v60  ;;  %2703 = vpow2.f32 %v1174_v48 }
 0x31f   : > { %v2698_v43 = vpop.eup %2697 }
 0x320   : > { %v2700_v24 = vpop.eup %2699  ;;  %v1037_v31 = vpop.permute.xlu1 %1036  ;;  %v4113_v15 = vsel %vm932_vm11, 0.0, %v2698_v43  ;;  %1228 = vadd.xlane.f32.xlu0 %v1227_v45  ;;  %v1584_v20 = vadd.f32 %v1548_v41, %v1547_v23  ;;  %v876_v23 = vadd.s32 48, %v3421_v50  ;;  %v1581_v56 = vadd.f32 %v1546_v5, %v1545_v42 }
 0x321   : > { %4869 = vst [vmem:[#allocation51_spill] sm:$0xff] %v4113_v15  ;;  %v1096_v52 = vsub.f32 %v3642_v46, %v1037_v31  ;;  %v1097_v9 = vsub.f32 %v3648_v55, %v1037_v31  ;;  %v4117_v28 = vsel %vm933_vm12, 0.0, %v2700_v24  ;;  %v884_v41 = vadd.s32 112, %v3421_v50 }
 0x322   : > { %4870 = vst [vmem:[#allocation56_spill] sm:$0xff] %v4117_v28  ;;  %v1251_v4 = vadd.f32 %v4117_v28, %v4113_v15  ;;  %1585 = vadd.xlane.f32.xlu1 %v1584_v20  ;;  %v893_v24 = vadd.s32 %v3891_v0, %v876_v23  ;;  %v2702_v60 = vpop.eup %2701  ;;  %v877_v23 = vadd.s32 56, %v3421_v50 }
 0x323   : > { %v1140_v7 = vmul.f32 1.442695, %v1096_v52  ;;  %v1142_v1 = vmul.f32 1.442695, %v1097_v9  ;;  %v901_v3 = vadd.s32 %v3891_v0, %v884_v41 }
 0x324   : > { %v4125_v43 = vpop.permute.xlu1 %1801  ;;  %1252 = vadd.xlane.f32.xlu0 %v1251_v4  ;;  %vm918_vm13 = vcmp.eq.s32.totalorder %v893_v24, %v3894_v26  ;;  %vm919_vm14 = vcmp.eq.s32.totalorder %v893_v24, %v3904_v10 }
 0x325   : > { %2705 = vpow2.f32 %v1140_v7  ;;  %vm934_vm15 = vcmp.eq.s32.totalorder %v901_v3, %v3894_v26  ;;  %vm935_vm0 = vcmp.eq.s32.totalorder %v901_v3, %v3904_v10  ;;  %v894_v3 = vadd.s32 %v3891_v0, %v877_v23 }
 0x326   : > { %2707 = vpow2.f32 %v1142_v1 }
 0x327   : > { %vm920_vm1 = vcmp.eq.s32.totalorder %v894_v3, %v3894_v26  ;;  %vm921_vm3 = vcmp.eq.s32.totalorder %v894_v3, %v3904_v10 }
 0x328   : > { %v4128_v45 = vpop.permute.xlu1 %1362  ;;  %1582 = vadd.xlane.f32.xlu0 %v1581_v56  ;;  %v2704_v52 = vpop.eup %2703 }
 0x329   : > { %v4150_v61 = vsel %vm935_vm0, 0.0, %v2704_v52 }
 0x32a   : > { %4874 = vst [vmem:[#allocation64_spill] sm:$0xff] %v4150_v61 }
 0x32c   : > { %v1042_v31 = vpop.permute.xlu1 %1041 }
 0x32d   : > { %v1098_v48 = vsub.f32 %v3680_v53, %v1042_v31  ;;  %v1099_v7 = vsub.f32 %v3686_v2, %v1042_v31 }
 0x32f   : > { %v2706_v1 = vpop.eup %2705  ;;  %v1144_v9 = vmul.f32 1.442695, %v1098_v48  ;;  %v1146_v20 = vmul.f32 1.442695, %v1099_v7 }
 0x330   : > { %v2708_v4 = vpop.eup %2707  ;;  %v1082_v42 = vpop.permute.xlu1 %1081  ;;  %v4137_v5 = vsel %vm918_vm13, 0.0, %v2706_v1  ;;  %v4148_v1 = vsel %vm934_vm15, 0.0, %v2702_v60  ;;  %v2787_v60 = vld [vmem:[%s3316_s21] sm:$0xff] }
 0x331   : > { %4871 = vst [vmem:[#allocation52_spill] sm:$0xff] %v4137_v5  ;;  %2709 = vpow2.f32 %v1144_v9  ;;  %v1114_v56 = vsub.f32 %v3698_v49, %v1082_v42  ;;  %v1115_v41 = vsub.f32 %v3701_v57, %v1082_v42  ;;  %v4144_v31 = vsel %vm919_vm14, 0.0, %v2708_v4  ;;  %4873 = vst [vmem:[#allocation61_spill] sm:$0xff] %v4148_v1 }
 0x332   : > { %4872 = vst [vmem:[#allocation55_spill] sm:$0xff] %v4144_v31  ;;  %2711 = vpow2.f32 %v1146_v20  ;;  %v1230_v24 = vadd.f32 %v4144_v31, %v4137_v5  ;;  %v885_v9 = vadd.s32 120, %v3421_v50  ;;  %v1254_v4 = vadd.f32 %v4150_v61, %v4148_v1 }
 0x333   : > { %v1176_v48 = vmul.f32 1.442695, %v1114_v56  ;;  %v1178_v7 = vmul.f32 1.442695, %v1115_v41  ;;  %v1549_v20 = vmul.f32 %v4137_v5, %v3642_v46  ;;  %v1550_v42 = vmul.f32 %v4144_v31, %v3648_v55 }
 0x334   : > { %1231 = vadd.xlane.f32.xlu1 %v1230_v24  ;;  %v1757_v52 = vmul.f32 14.285714, %v2787_v60  ;;  %v902_v56 = vadd.s32 %v3891_v0, %v885_v9  ;;  %v1565_v50 = vmul.f32 %v4148_v1, %v3635_v14  ;;  %v1566_v41 = vmul.f32 %v4150_v61, %v3668_v36 }
 0x335   : > { %2713 = vpow2.f32 %v1176_v48  ;;  %v1587_v23 = vadd.f32 %v1550_v42, %v1549_v20  ;;  %v1453_v1 = vstv %s1452_s19 }
 0x336   : > { %2715 = vpow2.f32 %v1178_v7  ;;  %vm936_vm4 = vcmp.eq.s32.totalorder %v902_v56, %v3894_v26  ;;  %v1821_v0 = vadd.f32 %v3898_v58, %v1757_v52  ;;  %v1611_v3 = vadd.f32 %v1566_v41, %v1565_v50  ;;  %v4188_v52 = vld [vmem:[%s3316_s21 + $0x78] sm:$0xff]  ;;  %v4192_v41 = vpop.permute.xlu1 %1364 }
 0x337   : > { %vm937_vm5 = vcmp.eq.s32.totalorder %v902_v56, %v3904_v10  ;;  %v1307_v56 = vsub.f32 %v4188_v52, %v3828_v33  ;;  %vm4236_vm6 = vcmp.eq.s32.totalorder %v1453_v1, 1 }
 0x338   : > { %1255 = vadd.xlane.f32.xlu1 %v1254_v4  ;;  %v1837_v20 = vmul.f32 1.442695, %v1821_v0 }
 0x33a   : > { %2717 = vpow2.f32 %v1837_v20 }
 0x33b   : > { %v2710_v46 = vpop.eup %2709 }
 0x33c   : > { %v2712_v24 = vpop.eup %2711  ;;  %1588 = vadd.xlane.f32.xlu1 %v1587_v23  ;;  %v4168_v55 = vsel %vm920_vm1, 0.0, %v2710_v46  ;;  %v1338_v23 = vmul.f32 1.442695, %v1307_v56 }
 0x33d   : > { %4875 = vst [vmem:[#allocation66_spill] sm:$0xff] %v4168_v55  ;;  %v4170_v48 = vsel %vm921_vm3, 0.0, %v2712_v24  ;;  %v1551_v58 = vmul.f32 %v4168_v55, %v3680_v53  ;;  %v4194_v53 = vpop.permute.xlu0 %1785 }
 0x33e   : > { %4876 = vst [vmem:[#allocation67_spill] sm:$0xff] %v4170_v48  ;;  %v1233_v7 = vadd.f32 %v4170_v48, %v4168_v55  ;;  %v1552_v42 = vmul.f32 %v4170_v48, %v3686_v2  ;;  %2719 = vpow2.f32 %v1338_v23  ;;  %v4196_v2 = vpop.permute.xlu1 %1380 }
 0x33f   : > { %v2714_v14 = vpop.eup %2713 }
 0x340   : > { %v2716_v36 = vpop.eup %2715  ;;  %1234 = vadd.xlane.f32.xlu0 %v1233_v7  ;;  %1612 = vadd.xlane.f32.xlu1 %v1611_v3  ;;  %v4177_v9 = vsel %vm936_vm4, 0.0, %v2714_v14  ;;  %v1590_v10 = vadd.f32 %v1552_v42, %v1551_v58  ;;  %v2789_v14 = vld [vmem:[%s3316_s21 + $0x8] sm:$0xff] }
 0x341   : > { %4877 = vst [vmem:[#allocation87_spill] sm:$0xff] %v4177_v9  ;;  %v4179_v4 = vsel %vm937_vm5, 0.0, %v2716_v36  ;;  %v4199_v24 = vpop.permute.xlu0 %1378  ;;  %v1758_v36 = vmul.f32 14.285714, %v2789_v14  ;;  %v1567_v20 = vmul.f32 %v4177_v9, %v3698_v49 }
 0x342   : > { %4878 = vst [vmem:[#allocation88_spill] sm:$0xff] %v4179_v4  ;;  %v1257_v26 = vadd.f32 %v4179_v4, %v4177_v9  ;;  %v4201_v0 = vpop.permute.xlu1 %1366 }
 0x343   : > { %v1822_v23 = vadd.f32 %v3913_v37, %v1758_v36  ;;  %v1563_v37 = vmul.f32 %v4113_v15, %v3600_v21  ;;  %v4246_v15 = vld [vmem:[%s3316_s21 + $0x18] sm:$0xff] }
 0x344   : > { %1258 = vadd.xlane.f32.xlu0 %v1257_v26  ;;  %v2718_v50 = vpop.eup %2717  ;;  %v1568_v26 = vmul.f32 %v4179_v4, %v3701_v57  ;;  %v1760_v1 = vmul.f32 14.285714, %v4246_v15 }
 0x345   : > { %v4203_v33 = vpop.permute.xlu0 %1787  ;;  %v1839_v9 = vmul.f32 1.442695, %v1822_v23 }
 0x346   : > { %v4205_v7 = vpop.permute.xlu1 %1368 }
 0x347   : > { %2721 = vpow2.f32 %v1839_v9  ;;  %v1772_v9 = vmul.f32 14.285714, %v4188_v52 }
 0x348   : > { %1591 = vadd.xlane.f32.xlu0 %v1590_v10  ;;  %v2720_v46 = vpop.eup %2719  ;;  %v4219_v10 = vld [vmem:[%s3316_s21 + $0x10] sm:$0xff] }
 0x349   : > { %v4207_v3 = vpop.permute.xlu0 %1803  ;;  %v1759_v56 = vmul.f32 14.285714, %v4219_v10 }
 0x34a   : > { %v4214_v58 = vpop.permute.xlu1 %1384 }
 0x34b   : > { %v1823_v57 = vadd.f32 %v3941_v16, %v1759_v56  ;;  %v2792_v16 = vld [vmem:[%s3316_s21 + $0x40] sm:$0xff] }
 0x34d   : > { %v4216_v42 = vpop.permute.xlu0 %1382  ;;  %v1841_v23 = vmul.f32 1.442695, %v1823_v57 }
 0x34e   : > { %v4224_v61 = vpop.permute.xlu1 %1370 }
 0x34f   : > { %2723 = vpow2.f32 %v1841_v23  ;;  %v2796_v23 = vld [vmem:[%s3316_s21 + $0x48] sm:$0xff] }
 0x351   : > { %1876 = vperm.xlu1 %2597, %v2718_v50   ;;  %v1614_v50 = vadd.f32 %v1568_v26, %v1567_v20  ;;  %v1284_v26 = vmul.f32 0.9, %v2792_v16 }
 0x353   : > { %v1412_v48 = vmul.f32 %v3968_v32, %v1284_v26 }
 0x35e   : > { %1386 = vrot.lane.b32.xlu0 %v2720_v46, %s3048_s11  ;;  %v1276_v46 = vmul.f32 0.9, %v2787_v60  ;;  %v1564_v60 = vmul.f32 %v4117_v28, %v3630_v47 }
 0x360   : > { %v1404_v36 = vmul.f32 %v3946_v27, %v1276_v46  ;;  %v1825_v27 = vadd.f32 %v4039_v11, %v1761_v6  ;;  %v1608_v28 = vadd.f32 %v1564_v60, %v1563_v37  ;;  %v4255_v6 = vld [vmem:[%s3316_s21 + $0x30] sm:$0xff]  ;;  %v1824_v60 = vadd.f32 %v3985_v25, %v1760_v1 }
 0x361   : > { %v1763_v11 = vmul.f32 14.285714, %v4255_v6 }
 0x362   : > { %v1845_v37 = vmul.f32 1.442695, %v1825_v27 }
 0x375   : > { %1615 = vadd.xlane.f32.xlu1 %v1614_v50  ;;  %v1214_v49 = vpop.xlane.xlu0 %1213  ;;  %v4241_v50 = vld [vmem:[%s3316_s21 + $0x28] sm:$0xff] }
 0x376   : > { %v1260_v4 = vmul.f32 0.003921569, %v1214_v49  ;;  %v1762_v49 = vmul.f32 14.285714, %v4241_v50 }
 0x378   : > { %v1420_v20 = vmul.f32 0.1, %v1260_v4 }
 0x37a   : > { %v1436_v21 = vadd.f32 %v1420_v20, %v1404_v36  ;;  %v1238_v47 = vpop.xlane.xlu1 %1237  ;;  %v1277_v20 = vmul.f32 0.9, %v2789_v14 }
 0x37b   : > { %v1268_v46 = vmul.f32 0.003921569, %v1238_v47  ;;  %v4266_v47 = vld [vmem:[%s3316_s21 + $0x38] sm:$0xff] }
 0x37c   : > { %v1455_v57 = vsel %vm4236_vm6, %v1260_v4, %v1436_v21  ;;  %v1826_v4 = vadd.f32 %v4078_v8, %v1762_v49  ;;  %v1285_v21 = vmul.f32 0.9, %v2796_v23  ;;  %v1843_v49 = vmul.f32 1.442695, %v1824_v60 }
 0x37d   : > { %1489 = vst.msk [vmem:[%s3326_s27] sm:$0xff] %vm1488_vm7, %v1455_v57  ;;  %v1505_v55 = vmax.f32 %v1455_v57, 1e-14  ;;  %v1428_v36 = vmul.f32 0.1, %v1268_v46  ;;  %1609 = vadd.xlane.f32.xlu0 %v1608_v28  ;;  %v1827_v28 = vadd.f32 %v4194_v53, %v1763_v11  ;;  %v2722_v53 = vpop.eup %2721  ;;  %v1405_v1 = vmul.f32 %v4033_v18, %v1277_v20 }
 0x37e   : > { %v1764_v57 = vmul.f32 14.285714, %v4266_v47  ;;  %v1847_v25 = vmul.f32 1.442695, %v1826_v4  ;;  %v1765_v11 = vmul.f32 14.285714, %v2792_v16  ;;  %v1413_v31 = vmul.f32 %v4046_v44, %v1285_v21  ;;  %v2724_v60 = vpop.eup %2723 }
 0x37f   : > { %2725 = vrcp.f32 %v1505_v55  ;;  %v1444_v32 = vadd.f32 %v1428_v36, %v1412_v48  ;;  %v1836_v55 = vadd.f32 %v4207_v3, %v1772_v9  ;;  %v1766_v20 = vmul.f32 14.285714, %v2796_v23 }
 0x380   : > { %v1217_v8 = vpop.xlane.xlu1 %1216  ;;  %2727 = vpow2.f32 %v1845_v37  ;;  %v1828_v3 = vadd.f32 %v4203_v33, %v1764_v57  ;;  %v1829_v57 = vadd.f32 %v3896_v19, %v1765_v11 }
 0x381   : > { %v1463_v26 = vsel %vm4236_vm6, %v1268_v46, %v1444_v32  ;;  %v1261_v48 = vmul.f32 0.003921569, %v1217_v8  ;;  %v1241_v14 = vpop.xlane.xlu0 %1240  ;;  %v1849_v32 = vmul.f32 1.442695, %v1827_v28  ;;  %v1867_v9 = vmul.f32 1.442695, %v1836_v55 }
 0x382   : > { %1497 = vst.msk [vmem:[%s3326_s27 + $0x40] sm:$0xff] %vm1488_vm7, %v1463_v26  ;;  %v1513_v27 = vmax.f32 %v1463_v26, 1e-14  ;;  %v1269_v46 = vmul.f32 0.003921569, %v1241_v14  ;;  %v2798_v14 = vld [vmem:[%s3316_s21 + $0x50] sm:$0xff] }
 0x383   : > { %v1421_v36 = vmul.f32 0.1, %v1261_v48  ;;  %v1853_v19 = vmul.f32 1.442695, %v1829_v57 }
 0x384   : > { %2729 = vrcp.f32 %v1513_v27  ;;  %v1429_v26 = vmul.f32 0.1, %v1269_v46  ;;  %v1595_v5 = vpop.xlane.xlu1 %1594 }
 0x385   : > { %2731 = vpow2.f32 %v1847_v25  ;;  %v1437_v37 = vadd.f32 %v1421_v36, %v1405_v1  ;;  %v1571_v4 = vpop.xlane.xlu0 %1570  ;;  %v4881_v25 = vld [vmem:[#allocation27_spill] sm:$0xff]  ;;  %v1278_v1 = vmul.f32 0.9, %v4219_v10  ;;  %v1279_v10 = vmul.f32 0.9, %v4246_v15 }
 0x386   : > { %1881 = vperm.xlu1 %2597, %v2722_v53   ;;  %2733 = vpow2.f32 %v1843_v49  ;;  %v1445_v27 = vadd.f32 %v1429_v26, %v1413_v31  ;;  %v1851_v31 = vmul.f32 1.442695, %v1828_v3  ;;  %v1286_v49 = vmul.f32 0.9, %v2798_v14 }
 0x387   : > { %v1456_v16 = vsel %vm4236_vm6, %v1261_v48, %v1437_v37  ;;  %2735 = vpow2.f32 %v1849_v32  ;;  %v1830_v48 = vadd.f32 %v4881_v25, %v1766_v20  ;;  %v1767_v53 = vmul.f32 14.285714, %v2798_v14 }
 0x388   : > { %1490 = vst.msk [vmem:[%s3326_s27 + $0x8] sm:$0xff] %vm1488_vm7, %v1456_v16  ;;  %v1506_v44 = vmax.f32 %v1456_v16, 1e-14  ;;  %v1464_v33 = vsel %vm4236_vm6, %v1269_v46, %v1445_v27  ;;  %v1574_v21 = vpop.xlane.xlu1 %1573  ;;  %2737 = vpow2.f32 %v1867_v9  ;;  %v4882_v16 = vld [vmem:[#allocation32_spill] sm:$0xff] }
 0x389   : > { %v2726_v18 = vpop.eup %2725  ;;  %1498 = vst.msk [vmem:[%s3326_s27 + $0x48] sm:$0xff] %vm1488_vm7, %v1464_v33  ;;  %v1514_v23 = vmax.f32 %v1464_v33, 1e-14  ;;  %v1598_v8 = vpop.xlane.xlu0 %1597  ;;  %v1855_v37 = vmul.f32 1.442695, %v1830_v48 }
 0x38a   : > { %v4281_v28 = vmul.f32 %v2726_v18, %v1571_v4  ;;  %1886 = vperm.xlu1 %2597, %v2724_v60   ;;  %2739 = vrcp.f32 %v1506_v44  ;;  %v2728_v55 = vpop.eup %2727  ;;  %v1414_v4 = vmul.f32 %v4099_v62, %v1286_v49  ;;  %v1406_v18 = vmul.f32 %v4092_v63, %v1278_v1  ;;  %v2799_v44 = vld [vmem:[%s3316_s21 + $0x58] sm:$0xff]  ;;  %v4297_v63 = vld [vmem:[%s3316_s21 + $0x60] sm:$0xff] }
 0x38b   : > { %2741 = vrcp.f32 %v1514_v23  ;;  %v1768_v33 = vmul.f32 14.285714, %v2799_v44  ;;  %v1769_v15 = vmul.f32 14.285714, %v4297_v63  ;;  %v1287_v48 = vmul.f32 0.9, %v2799_v44 }
 0x38c   : > { %v1244_v36 = vpop.xlane.xlu1 %1243  ;;  %2743 = vpow2.f32 %v1851_v31 }
 0x38d   : > { %v1270_v32 = vmul.f32 0.003921569, %v1244_v36  ;;  %v1220_v26 = vpop.xlane.xlu0 %1219  ;;  %2745 = vpow2.f32 %v1853_v19 }
 0x38e   : > { %v2730_v46 = vpop.eup %2729  ;;  %1896 = vperm.xlu1 %2597, %v2728_v55   ;;  %v1262_v3 = vmul.f32 0.003921569, %v1220_v26  ;;  %2747 = vpow2.f32 %v1855_v37 }
 0x38f   : > { %v4289_v11 = vmul.f32 %v2730_v46, %v1595_v5  ;;  %v2732_v9 = vpop.eup %2731  ;;  %v1430_v60 = vmul.f32 0.1, %v1270_v32  ;;  %v1831_v5 = vadd.f32 %v4882_v16, %v1767_v53  ;;  %v1407_v46 = vmul.f32 %v4128_v45, %v1279_v10  ;;  %v4313_v10 = vld [vmem:[%s3316_s21 + $0x68] sm:$0xff] }
 0x390   : > { %v2734_v27 = vpop.eup %2733  ;;  %v1422_v20 = vmul.f32 0.1, %v1262_v3  ;;  %v1415_v16 = vmul.f32 %v4199_v24, %v1287_v48 }
 0x391   : > { %v1446_v57 = vadd.f32 %v1430_v60, %v1414_v4  ;;  %v1223_v31 = vpop.xlane.xlu0 %1222  ;;  %v2736_v23 = vpop.eup %2735  ;;  %v1857_v26 = vmul.f32 1.442695, %v1831_v5 }
 0x392   : > { %1901 = vperm.xlu1 %2597, %v2732_v9   ;;  %v1438_v62 = vadd.f32 %v1422_v20, %v1406_v18  ;;  %v1263_v55 = vmul.f32 0.003921569, %v1223_v31  ;;  %v2738_v25 = vpop.eup %2737  ;;  %v1832_v9 = vadd.f32 %v3998_v34, %v1768_v33  ;;  %v1601_v60 = vpop.xlane.xlu1 %1600  ;;  %v1770_v20 = vmul.f32 14.285714, %v4313_v10 }
 0x393   : > { %1891 = vperm.xlu0 %2598, %v2734_v27   ;;  %v1465_v14 = vsel %vm4236_vm6, %v1270_v32, %v1446_v57  ;;  %v1634_v34 = vsel %vm1488_vm7, %v4281_v28, 0.0  ;;  %v1833_v33 = vadd.f32 %v4053_v38, %v1769_v15 }
 0x394   : > { %v2740_v49 = vpop.eup %2739  ;;  %1499 = vst.msk [vmem:[%s3326_s27 + $0x50] sm:$0xff] %vm1488_vm7, %v1465_v14  ;;  %v1515_v53 = vmax.f32 %v1465_v14, 1e-14  ;;  %v1457_v1 = vsel %vm4236_vm6, %v1262_v3, %v1438_v62  ;;  %v1423_v36 = vmul.f32 0.1, %v1263_v55  ;;  %v1834_v24 = vadd.f32 %v4065_v40, %v1770_v20  ;;  %v4329_v14 = vld [vmem:[%s3316_s21 + $0x70] sm:$0xff] }
 0x395   : > { %v2742_v19 = vpop.eup %2741  ;;  %v1618_v37 = vmul.f32 %v2740_v49, %v1574_v21  ;;  %1491 = vst.msk [vmem:[%s3326_s27 + $0x10] sm:$0xff] %vm1488_vm7, %v1457_v1  ;;  %v1507_v32 = vmax.f32 %v1457_v1, 1e-14  ;;  %v1247_v4 = vpop.xlane.xlu0 %1246  ;;  %v1859_v57 = vmul.f32 1.442695, %v1832_v9 }
 0x396   : > { %1906 = vperm.xlu1 %2597, %v2736_v23   ;;  %v4310_v45 = vmul.f32 %v2742_v19, %v1598_v8  ;;  %2749 = vrcp.f32 %v1515_v53  ;;  %v1439_v27 = vadd.f32 %v1423_v36, %v1407_v46  ;;  %v1271_v3 = vmul.f32 0.003921569, %v1247_v4  ;;  %v2744_v18 = vpop.eup %2743  ;;  %v1580_v62 = vpop.xlane.xlu1 %1579 }
 0x397   : > { %1951 = vperm.xlu0 %2598, %v2738_v25   ;;  %v1635_v21 = vsel %vm1488_vm7, %v1618_v37, 0.0  ;;  %2751 = vrcp.f32 %v1507_v32  ;;  %v2746_v23 = vpop.eup %2745  ;;  %v1861_v48 = vmul.f32 1.442695, %v1833_v33  ;;  %v1771_v38 = vmul.f32 14.285714, %v4329_v14 }
 0x398   : > { %v1636_v8 = vadd.f32 %v1635_v21, %v1634_v34  ;;  %v1458_v5 = vsel %vm4236_vm6, %v1263_v55, %v1439_v27  ;;  %v1431_v44 = vmul.f32 0.1, %v1271_v3  ;;  %2753 = vpow2.f32 %v1857_v26  ;;  %v2748_v25 = vpop.eup %2747 }
 0x399   : > { %1492 = vst.msk [vmem:[%s3326_s27 + $0x18] sm:$0xff] %vm1488_vm7, %v1458_v5  ;;  %v1508_v28 = vmax.f32 %v1458_v5, 1e-14  ;;  %v1280_v49 = vmul.f32 0.9, %v4227_v54  ;;  %v1835_v36 = vadd.f32 %v4125_v43, %v1771_v38  ;;  %v1577_v26 = vpop.xlane.xlu0 %1576 }
 0x39a   : > { %1911 = vperm.xlu1 %2597, %v2744_v18   ;;  %v1447_v31 = vadd.f32 %v1431_v44, %v1415_v16  ;;  %v1863_v40 = vmul.f32 1.442695, %v1834_v24  ;;  %v1288_v27 = vmul.f32 0.9, %v4297_v63 }
 0x39b   : > { %2755 = vrcp.f32 %v1508_v28  ;;  %v1408_v4 = vmul.f32 %v4192_v41, %v1280_v49  ;;  %v1865_v34 = vmul.f32 1.442695, %v1835_v36  ;;  %v1289_v49 = vmul.f32 0.9, %v4313_v10 }
 0x39c   : > { %v1466_v55 = vsel %vm4236_vm6, %v1271_v3, %v1447_v31  ;;  %2757 = vpow2.f32 %v1859_v57  ;;  %v1416_v44 = vmul.f32 %v4196_v2, %v1288_v27 }
 0x39d   : > { %1500 = vst.msk [vmem:[%s3326_s27 + $0x58] sm:$0xff] %vm1488_vm7, %v1466_v55  ;;  %v1516_v15 = vmax.f32 %v1466_v55, 1e-14  ;;  %v1604_v57 = vpop.xlane.xlu0 %1603 }
 0x39e   : > { %1916 = vperm.xlu1 %2597, %v2746_v23  }
 0x39f   : > { %2759 = vrcp.f32 %v1516_v15 }
 0x3a0   : > { %v2750_v46 = vpop.eup %2749  ;;  %2761 = vpow2.f32 %v1861_v48 }
 0x3a1   : > { %v1226_v53 = vpop.xlane.xlu1 %1225  ;;  %v2752_v1 = vpop.eup %2751  ;;  %v4336_v19 = vmul.f32 %v2750_v46, %v1601_v60  ;;  %2763 = vpow2.f32 %v1863_v40 }
 0x3a2   : > { %1921 = vperm.xlu1 %2597, %v2748_v25   ;;  %v1264_v9 = vmul.f32 0.003921569, %v1226_v53  ;;  %v1619_v37 = vmul.f32 %v2752_v1, %v1577_v26  ;;  %v2754_v32 = vpop.eup %2753  ;;  %2765 = vpow2.f32 %v1865_v34  ;;  %v1417_v26 = vmul.f32 %v4216_v42, %v1289_v49 }
 0x3a4   : > { %v1424_v54 = vmul.f32 0.1, %v1264_v9  ;;  %v1637_v3 = vsel %vm1488_vm7, %v1619_v37, 0.0 }
 0x3a5   : > { %v1250_v18 = vpop.xlane.xlu1 %1249  ;;  %v2756_v20 = vpop.eup %2755  ;;  %v1638_v43 = vadd.f32 %v1637_v3, %v1636_v8 }
 0x3a6   : > { %1926 = vperm.xlu1 %2597, %v2754_v32   ;;  %v1440_v60 = vadd.f32 %v1424_v54, %v1408_v4  ;;  %v1272_v21 = vmul.f32 0.003921569, %v1250_v18  ;;  %v1620_v16 = vmul.f32 %v2756_v20, %v1580_v62  ;;  %v2758_v5 = vpop.eup %2757  ;;  %v1281_v62 = vmul.f32 0.9, %v4241_v50 }
 0x3a8   : > { %v1459_v41 = vsel %vm4236_vm6, %v1264_v9, %v1440_v60  ;;  %v1432_v63 = vmul.f32 0.1, %v1272_v21  ;;  %v1639_v33 = vsel %vm1488_vm7, %v1620_v16, 0.0  ;;  %v1409_v46 = vmul.f32 %v4201_v0, %v1281_v62 }
 0x3a9   : > { %1493 = vst.msk [vmem:[%s3326_s27 + $0x20] sm:$0xff] %vm1488_vm7, %v1459_v41  ;;  %v1509_v28 = vmax.f32 %v1459_v41, 1e-14  ;;  %v2760_v31 = vpop.eup %2759  ;;  %v1640_v23 = vadd.f32 %v1639_v33, %v1638_v43  ;;  %v1607_v54 = vpop.xlane.xlu1 %1606  ;;  %v1282_v60 = vmul.f32 0.9, %v4255_v6 }
 0x3aa   : > { %1931 = vperm.xlu1 %2597, %v2758_v5   ;;  %v1448_v8 = vadd.f32 %v1432_v63, %v1416_v44  ;;  %v4347_v24 = vmul.f32 %v2760_v31, %v1604_v57  ;;  %v2762_v2 = vpop.eup %2761  ;;  %v1290_v63 = vmul.f32 0.9, %v4329_v14  ;;  %v1283_v14 = vmul.f32 0.9, %v4266_v47 }
 0x3ab   : > { %2767 = vrcp.f32 %v1509_v28  ;;  %v2764_v15 = vpop.eup %2763  ;;  %v1410_v41 = vmul.f32 %v4205_v7, %v1282_v60  ;;  %v1651_v60 = vsel %vm1488_vm7, %v4310_v45, 0.0 }
 0x3ac   : > { %v1467_v55 = vsel %vm4236_vm6, %v1272_v21, %v1448_v8  ;;  %v2766_v36 = vpop.eup %2765 }
 0x3ad   : > { %1501 = vst.msk [vmem:[%s3326_s27 + $0x60] sm:$0xff] %vm1488_vm7, %v1467_v55  ;;  %v1517_v25 = vmax.f32 %v1467_v55, 1e-14  ;;  %v1229_v48 = vpop.xlane.xlu0 %1228 }
 0x3ae   : > { %1936 = vperm.xlu1 %2597, %v2762_v2   ;;  %v1265_v38 = vmul.f32 0.003921569, %v1229_v48  ;;  %v1418_v2 = vmul.f32 %v4214_v58, %v1290_v63  ;;  %v1411_v58 = vmul.f32 %v4224_v61, %v1283_v14 }
 0x3af   : > { %2769 = vrcp.f32 %v1517_v25  ;;  %v1586_v43 = vpop.xlane.xlu1 %1585 }
 0x3b0   : > { %v1425_v40 = vmul.f32 0.1, %v1265_v38 }
 0x3b1   : > { %v1253_v53 = vpop.xlane.xlu0 %1252 }
 0x3b2   : > { %1941 = vperm.xlu1 %2597, %v2764_v15   ;;  %v1441_v50 = vadd.f32 %v1425_v40, %v1409_v46  ;;  %v1273_v1 = vmul.f32 0.003921569, %v1253_v53 }
 0x3b4   : > { %v1460_v9 = vsel %vm4236_vm6, %v1265_v38, %v1441_v50  ;;  %v1433_v37 = vmul.f32 0.1, %v1273_v1 }
 0x3b5   : > { %v2768_v32 = vpop.eup %2767  ;;  %1494 = vst.msk [vmem:[%s3326_s27 + $0x28] sm:$0xff] %vm1488_vm7, %v1460_v9  ;;  %v1510_v4 = vmax.f32 %v1460_v9, 1e-14  ;;  %v1583_v10 = vpop.xlane.xlu0 %1582  ;;  %v1291_v9 = vmul.f32 0.9, %v4188_v52  ;;  %v1649_v52 = vsel %vm1488_vm7, %v4289_v11, 0.0 }
 0x3b6   : > { %1946 = vperm.xlu1 %2597, %v2766_v36   ;;  %v1449_v0 = vadd.f32 %v1433_v37, %v1417_v26  ;;  %v1621_v27 = vmul.f32 %v2768_v32, %v1583_v10  ;;  %v4883_v11 = vld [vmem:[#allocation86_spill] sm:$0xff] }
 0x3b7   : > { %2771 = vrcp.f32 %v1510_v4 }
 0x3b8   : > { %v4363_v3 = vsel %vm4236_vm6, %v1273_v1, %v1449_v0  ;;  %v1641_v42 = vsel %vm1488_vm7, %v1621_v27, 0.0 }
 0x3b9   : > { %v2770_v18 = vpop.eup %2769  ;;  %1502 = vst.msk [vmem:[%s3326_s27 + $0x68] sm:$0xff] %vm1488_vm7, %v4363_v3  ;;  %v1642_v20 = vadd.f32 %v1641_v42, %v1640_v23 }
 0x3ba   : > { %v1629_v34 = vmul.f32 %v2770_v18, %v1607_v54 }
 0x3bc   : > { %v1657_v63 = vsel %vm1488_vm7, %v1629_v34, 0.0 }
 0x3c1   : > { %v1232_v21 = vpop.xlane.xlu1 %1231  ;;  %v2772_v16 = vpop.eup %2771 }
 0x3c2   : > { %v1266_v5 = vmul.f32 0.003921569, %v1232_v21  ;;  %v1622_v44 = vmul.f32 %v2772_v16, %v1586_v43  ;;  %v1653_v16 = vsel %vm1488_vm7, %v4336_v19, 0.0 }
 0x3c4   : > { %v1426_v33 = vmul.f32 0.1, %v1266_v5  ;;  %v1643_v57 = vsel %vm1488_vm7, %v1622_v44, 0.0  ;;  %v1655_v44 = vsel %vm1488_vm7, %v4347_v24, 0.0 }
 0x3c5   : > { %v1256_v28 = vpop.xlane.xlu1 %1255  ;;  %v1644_v23 = vadd.f32 %v1643_v57, %v1642_v20  ;;  %v2803_v57 = vld [vmem:[#allocation14 + $0x2] ss:$4 sm:$0x3] }
 0x3c6   : > { %v1442_v31 = vadd.f32 %v1426_v33, %v1410_v41  ;;  %v1274_v8 = vmul.f32 0.003921569, %v1256_v28  ;;  %v1869_v28 = vsub.f32 0.0, %v2803_v57  ;;  %v4891_v57 = vld [vmem:[#allocation41_spill] sm:$0xff] }
 0x3c8   : > { %v1461_v6 = vsel %vm4236_vm6, %v1266_v5, %v1442_v31  ;;  %v1434_v62 = vmul.f32 0.1, %v1274_v8  ;;  %v1870_v31 = vmul.f32 14.285714, %v1869_v28 }
 0x3c9   : > { %1495 = vst.msk [vmem:[%s3326_s27 + $0x30] sm:$0xff] %vm1488_vm7, %v1461_v6  ;;  %v1511_v7 = vmax.f32 %v1461_v6, 1e-14  ;;  %v1589_v50 = vpop.xlane.xlu1 %1588  ;;  %v1518_v6 = vmax.f32 %v4363_v3, 1e-14 }
 0x3ca   : > { %v1450_v55 = vadd.f32 %v1434_v62, %v1418_v2 }
 0x3cb   : > { %2773 = vrcp.f32 %v1511_v7 }
 0x3cc   : > { %v1469_v25 = vsel %vm4236_vm6, %v1274_v8, %v1450_v55  ;;  %v1871_v8 = vsub.f32 %v1870_v31, %v4883_v11 }
 0x3cd   : > { %1503 = vst.msk [vmem:[%s3326_s27 + $0x70] sm:$0xff] %vm1488_vm7, %v1469_v25  ;;  %v1235_v48 = vpop.xlane.xlu0 %1234  ;;  %v1519_v2 = vmax.f32 %v1469_v25, 1e-14 }
 0x3ce   : > { %v1267_v38 = vmul.f32 0.003921569, %v1235_v48  ;;  %v1872_v45 = vmul.f32 1.442695, %v1871_v8 }
 0x3d0   : > { %v1427_v15 = vmul.f32 0.1, %v1267_v38 }
 0x3d1   : > { %v1259_v49 = vpop.xlane.xlu0 %1258 }
 0x3d2   : > { %v1443_v46 = vadd.f32 %v1427_v15, %v1411_v58  ;;  %v1275_v26 = vmul.f32 0.003921569, %v1259_v49 }
 0x3d4   : > { %v1462_v40 = vsel %vm4236_vm6, %v1267_v38, %v1443_v46  ;;  %v1435_v4 = vmul.f32 0.1, %v1275_v26  ;;  %v4884_v46 = vld [vmem:[#allocation33_spill] sm:$0xff] }
 0x3d5   : > { %v2774_v53 = vpop.eup %2773  ;;  %1496 = vst.msk [vmem:[%s3326_s27 + $0x38] sm:$0xff] %vm1488_vm7, %v1462_v40  ;;  %v1512_v47 = vmax.f32 %v1462_v40, 1e-14  ;;  %v1592_v1 = vpop.xlane.xlu0 %1591 }
 0x3d6   : > { %v1623_v36 = vmul.f32 %v2774_v53, %v1589_v50  ;;  %v4885_v53 = vld [vmem:[#allocation30_spill] sm:$0xff] }
 0x3d7   : > { %2775 = vrcp.f32 %v1512_v47  ;;  %v4886_v47 = vld [vmem:[#allocation28_spill] sm:$0xff] }
 0x3d8   : > { %v1645_v61 = vsel %vm1488_vm7, %v1623_v36, 0.0  ;;  %2777 = vrcp.f32 %v1519_v2  ;;  %v4887_v36 = vld [vmem:[#allocation34_spill] sm:$0xff]  ;;  %v4892_v2 = vld [vmem:[#allocation53_spill] sm:$0xff] }
 0x3d9   : > { %v1646_v37 = vadd.f32 %v1645_v61, %v1644_v23  ;;  %v1387_v32 = vpop.permute.xlu0 %1386  ;;  %v1613_v23 = vpop.xlane.xlu1 %1612  ;;  %2779 = vpow2.f32 %v1872_v45 }
 0x3da   : > { %v1419_v10 = vmul.f32 %v1387_v32, %v1291_v9  ;;  %2781 = vrcp.f32 %v1518_v6 }
 0x3dc   : > { %v1451_v0 = vadd.f32 %v1435_v4, %v1419_v10 }
 0x3dd   : > { %v1877_v62 = vpop.permute.xlu1 %1876 }
 0x3de   : > { %v1470_v27 = vsel %vm4236_vm6, %v1275_v26, %v1451_v0  ;;  %v1954_v50 = vmul.f32 %v1877_v62, %v4885_v53 }
 0x3df   : > { %1504 = vst.msk [vmem:[%s3326_s27 + $0x78] sm:$0xff] %vm1488_vm7, %v1470_v27  ;;  %v1520_v19 = vmax.f32 %v1470_v27, 1e-14 }
 0x3e1   : > { %v2776_v54 = vpop.eup %2775  ;;  %2783 = vrcp.f32 %v1520_v19 }
 0x3e2   : > { %v1624_v42 = vmul.f32 %v2776_v54, %v1592_v1  ;;  %v2778_v34 = vpop.eup %2777  ;;  %v1955_v1 = vmul.f32 %v1877_v62, %v4886_v47 }
 0x3e3   : > { %v2780_v55 = vpop.eup %2779  ;;  %v1631_v58 = vmul.f32 %v2778_v34, %v1613_v23 }
 0x3e4   : > { %v1647_v18 = vsel %vm1488_vm7, %v1624_v42, 0.0  ;;  %v2782_v38 = vpop.eup %2781  ;;  %v4409_v40 = vrot.slane %v2780_v55, %v4884_v46  ;;  %v4414_v26 = vrot.slane %v2780_v55, %v4887_v36 }
 0x3e5   : > { %v1648_v20 = vadd.f32 %v1647_v18, %v1646_v37  ;;  %v1661_v4 = vsel %vm1488_vm7, %v1631_v58, 0.0 }
 0x3e6   : > { %v1997_v27 = vmul.f32 %v4409_v40, %v1954_v50  ;;  %v1998_v54 = vmul.f32 %v4414_v26, %v1955_v1 }
 0x3e7   : > { %v1650_v43 = vadd.f32 %v1649_v52, %v1648_v20 }
 0x3e8   : > { %v2100_v28 = vmul.f32 %v1998_v54, %v4891_v57 }
 0x3e9   : > { %v1652_v21 = vadd.f32 %v1651_v60, %v1650_v43  ;;  %v4888_v60 = vld [vmem:[#allocation44_spill] sm:$0xff] }
 0x3eb   : > { %v1654_v5 = vadd.f32 %v1653_v16, %v1652_v21  ;;  %v2784_v3 = vpop.eup %2783  ;;  %v4889_v16 = vld [vmem:[#allocation48_spill] sm:$0xff] }
 0x3ed   : > { %v1656_v41 = vadd.f32 %v1655_v44, %v1654_v5 }
 0x3ef   : > { %v1658_v33 = vadd.f32 %v1657_v63, %v1656_v41  ;;  %v4890_v63 = vld [vmem:[#allocation39_spill] sm:$0xff] }
 0x402   : > { %v1616_v24 = vpop.xlane.xlu1 %1615 }
 0x403   : > { %v1632_v9 = vmul.f32 %v2784_v3, %v1616_v24 }
 0x405   : > { %v1663_v18 = vsel %vm1488_vm7, %v1632_v9, 0.0 }
 0x406   : > { %v1882_v7 = vpop.permute.xlu1 %1881 }
 0x407   : > { %v1956_v15 = vmul.f32 %v1882_v7, %v3948_v29  ;;  %v1957_v25 = vmul.f32 %v1882_v7, %v3956_v51  ;;  %v4893_v7 = vld [vmem:[#allocation54_spill] sm:$0xff] }
 0x409   : > { %v1999_v10 = vmul.f32 %v4409_v40, %v1956_v15  ;;  %v2000_v0 = vmul.f32 %v4414_v26, %v1957_v25  ;;  %v4895_v25 = vld [vmem:[#allocation62_spill] sm:$0xff] }
 0x40a   : > { %v1887_v14 = vpop.permute.xlu1 %1886  ;;  %v1610_v48 = vpop.xlane.xlu0 %1609 }
 0x40b   : > { %v1630_v49 = vmul.f32 %v2782_v38, %v1610_v48  ;;  %v1958_v61 = vmul.f32 %v1887_v14, %v4005_v39  ;;  %v1959_v51 = vmul.f32 %v1887_v14, %v4007_v30  ;;  %v2101_v21 = vmul.f32 %v1999_v10, %v4888_v60  ;;  %v4894_v48 = vld [vmem:[#allocation59_spill] sm:$0xff] }
 0x40c   : > { %v2102_v5 = vmul.f32 %v2000_v0, %v4889_v16  ;;  %v2031_v23 = vadd.f32 %v1999_v10, %v1997_v27  ;;  %v2052_v24 = vadd.f32 %v2000_v0, %v1998_v54  ;;  %v4897_v0 = vld [vmem:[#allocation52_spill] sm:$0xff]  ;;  %v4898_v54 = vld [vmem:[#allocation65_spill] sm:$0xff] }
 0x40d   : > { %v1659_v37 = vsel %vm1488_vm7, %v1630_v49, 0.0  ;;  %v2001_v39 = vmul.f32 %v4409_v40, %v1958_v61  ;;  %v2002_v30 = vmul.f32 %v4414_v26, %v1959_v51 }
 0x40e   : > { %v1897_v29 = vpop.permute.xlu1 %1896  ;;  %v1660_v32 = vadd.f32 %v1659_v37, %v1658_v33  ;;  %v2099_v33 = vmul.f32 %v1997_v27, %v4890_v63  ;;  %v2152_v14 = vadd.f32 %v2102_v5, %v2100_v28  ;;  %v4896_v37 = vld [vmem:[#allocation63_spill] sm:$0xff] }
 0x40f   : > { %v1962_v8 = vmul.f32 %v1897_v29, %v4071_v12  ;;  %v2103_v45 = vmul.f32 %v2001_v39, %v4892_v2  ;;  %v2032_v58 = vadd.f32 %v2031_v23, %v2001_v39  ;;  %v2053_v12 = vadd.f32 %v2052_v24, %v2002_v30  ;;  %v4902_v5 = vld [vmem:[#allocation71_spill] sm:$0xff] }
 0x410   : > { %v1662_v42 = vadd.f32 %v1661_v4, %v1660_v32  ;;  %v2131_v55 = vadd.f32 %v2101_v21, %v2099_v33  ;;  %v4901_v21 = vld [vmem:[#allocation67_spill] sm:$0xff] }
 0x411   : > { %v2005_v15 = vmul.f32 %v4409_v40, %v1962_v8  ;;  %v4904_v23 = vld [vmem:[#allocation31_spill] sm:$0xff] }
 0x412   : > { %v1902_v20 = vpop.permute.xlu1 %1901  ;;  %v1892_v52 = vpop.permute.xlu0 %1891  ;;  %v1664_v43 = vadd.f32 %v1663_v18, %v1662_v42  ;;  %v2132_v3 = vadd.f32 %v2131_v55, %v2103_v45  ;;  %v4899_v18 = vld [vmem:[#allocation55_spill] sm:$0xff]  ;;  %v4905_v45 = vld [vmem:[#allocation29_spill] sm:$0xff] }
 0x413   : > { %v1960_v44 = vmul.f32 %v1892_v52, %v4021_v13  ;;  %v1961_v41 = vmul.f32 %v1892_v52, %v4026_v22  ;;  %v2104_v13 = vmul.f32 %v2002_v30, %v4893_v7  ;;  %v1963_v22 = vmul.f32 %v1897_v29, %v4073_v59 }
 0x414   : > { %v1665_v31 = vrot.slane %v1664_v43, 4  ;;  %v1964_v53 = vmul.f32 %v1902_v20, %v4101_v35  ;;  %v1965_v50 = vmul.f32 %v1902_v20, %v4104_v17  ;;  %v2107_v29 = vmul.f32 %v2005_v15, %v4896_v37 }
 0x415   : > { %v2003_v6 = vmul.f32 %v4409_v40, %v1960_v44  ;;  %v2004_v62 = vmul.f32 %v4414_v26, %v1961_v41  ;;  %v2153_v1 = vadd.f32 %v2152_v14, %v2104_v13  ;;  %v2006_v59 = vmul.f32 %v4414_v26, %v1963_v22  ;;  %v4903_v41 = vld [vmem:[#allocation72_spill] sm:$0xff]  ;;  %v4906_v22 = vld [vmem:[#allocation74_spill] sm:$0xff]  ;;  %v4907_v14 = vld [vmem:[#allocation35_spill] sm:$0xff] }
 0x416   : > { %v1907_v19 = vpop.permute.xlu1 %1906  ;;  %v1666_v34 = vadd.f32 %v1665_v31, %v1664_v43  ;;  %v2007_v4 = vmul.f32 %v4409_v40, %v1964_v53  ;;  %v2008_v10 = vmul.f32 %v4414_v26, %v1965_v50  ;;  %v4900_v43 = vld [vmem:[#allocation66_spill] sm:$0xff]  ;;  %v4910_v50 = vld [vmem:[#allocation83_spill] sm:$0xff] }
 0x417   : > { %v2105_v38 = vmul.f32 %v2003_v6, %v4894_v48  ;;  %v2106_v49 = vmul.f32 %v2004_v62, %v4895_v25  ;;  %v2033_v36 = vadd.f32 %v2032_v58, %v2003_v6  ;;  %v2054_v9 = vadd.f32 %v2053_v12, %v2004_v62  ;;  %v4909_v25 = vld [vmem:[#allocation75_spill] sm:$0xff] }
 0x418   : > { %v1667_v46 = vrot.slane %v1666_v34, 2  ;;  %v1966_v27 = vmul.f32 %v1907_v19, %v4897_v0  ;;  %v2108_v17 = vmul.f32 %v2006_v59, %v4898_v54  ;;  %v1967_v39 = vmul.f32 %v1907_v19, %v4899_v18  ;;  %v4915_v54 = vld [vmem:[#allocation40_spill] sm:$0xff] }
 0x419   : > { %v2133_v61 = vadd.f32 %v2132_v3, %v2105_v38  ;;  %v2154_v51 = vadd.f32 %v2153_v1, %v2106_v49  ;;  %v2034_v42 = vadd.f32 %v2033_v36, %v2005_v15  ;;  %v2055_v20 = vadd.f32 %v2054_v9, %v2006_v59  ;;  %v4908_v38 = vld [vmem:[#allocation37_spill] sm:$0xff]  ;;  %v4911_v1 = vld [vmem:[#allocation36_spill] sm:$0xff]  ;;  %v4912_v36 = vld [vmem:[#allocation38_spill] sm:$0xff] }
 0x41a   : > { %v1912_v47 = vpop.permute.xlu1 %1911  ;;  %v1668_v32 = vadd.f32 %v1667_v46, %v1666_v34  ;;  %v2109_v44 = vmul.f32 %v2007_v4, %v4902_v5  ;;  %v2110_v63 = vmul.f32 %v2008_v10, %v4903_v41  ;;  %v2009_v33 = vmul.f32 %v4409_v40, %v1966_v27  ;;  %v1952_v41 = vpop.permute.xlu0 %1951 }
 0x41b   : > { %v2134_v52 = vadd.f32 %v2133_v61, %v2107_v29  ;;  %v2155_v30 = vadd.f32 %v2154_v51, %v2108_v17  ;;  %v1968_v60 = vmul.f32 %v1912_v47, %v4900_v43  ;;  %v1969_v16 = vmul.f32 %v1912_v47, %v4901_v21  ;;  %v4913_v29 = vld [vmem:[#allocation78_spill] sm:$0xff] }
 0x41c   : > { %v1669_v28 = vrot.slane %v1668_v32, 1  ;;  %v2010_v31 = vmul.f32 %v4414_v26, %v1967_v39  ;;  %v2035_v8 = vadd.f32 %v2034_v42, %v2007_v4  ;;  %v2056_v62 = vadd.f32 %v2055_v20, %v2008_v10  ;;  %v4916_v42 = vld [vmem:[#allocation42_spill] sm:$0xff]  ;;  %v4917_v39 = vld [vmem:[#allocation43_spill] sm:$0xff] }
 0x41d   : > { %v2135_v19 = vadd.f32 %v2134_v52, %v2109_v44  ;;  %v2156_v24 = vadd.f32 %v2155_v30, %v2110_v63  ;;  %v2011_v7 = vmul.f32 %v4409_v40, %v1968_v60  ;;  %v2012_v13 = vmul.f32 %v4414_v26, %v1969_v16  ;;  %v4918_v52 = vld [vmem:[#allocation47_spill] sm:$0xff] }
 0x41e   : > { %v1917_v35 = vpop.permute.xlu1 %1916  ;;  %v1670_v34 = vadd.f32 %v1669_v28, %v1668_v32  ;;  %v2111_v55 = vmul.f32 %v2009_v33, %v4906_v22  ;;  %v2036_v15 = vadd.f32 %v2035_v8, %v2009_v33  ;;  %v2112_v49 = vmul.f32 %v2010_v31, %v4909_v25  ;;  %v4914_v32 = vld [vmem:[#allocation79_spill] sm:$0xff] }
 0x41f   : > { %v1970_v2 = vmul.f32 %v1917_v35, %v4904_v23  ;;  %v1971_v6 = vmul.f32 %v1917_v35, %v4905_v45  ;;  %v2057_v53 = vadd.f32 %v2056_v62, %v2010_v31  ;;  %v2113_v51 = vmul.f32 %v2011_v7, %v4913_v29  ;;  %v4920_v31 = vld [vmem:[#allocation50_spill] sm:$0xff]  ;;  %v4930_v29 = vld [vmem:[#allocation56_spill] sm:$0xff] }
 0x420   : > { %v1678_v47 = vrot.slane %v1670_v34, %v4910_v50  ;;  %v2136_v61 = vadd.f32 %v2135_v19, %v2111_v55  ;;  %v2157_v37 = vadd.f32 %v2156_v24, %v2112_v49  ;;  %v2114_v4 = vmul.f32 %v2012_v13, %v4914_v32  ;;  %v4921_v19 = vld [vmem:[#allocation57_spill] sm:$0xff] }
 0x421   : > { %v2013_v3 = vmul.f32 %v4409_v40, %v1970_v2  ;;  %v2014_v46 = vmul.f32 %v4414_v26, %v1971_v6  ;;  %v2037_v43 = vadd.f32 %v2036_v15, %v2011_v7  ;;  %v2058_v60 = vadd.f32 %v2057_v53, %v2012_v13  ;;  %v4922_v7 = vld [vmem:[#allocation58_spill] sm:$0xff]  ;;  %v4923_v34 = vld [vmem:[#allocation45_spill] sm:$0xff] }
 0x422   : > { %v1922_v57 = vpop.permute.xlu1 %1921  ;;  %v1685_v27 = vrot.slane %v1678_v47, %v4910_v50  ;;  %v2137_v5 = vadd.f32 %v2136_v61, %v2113_v51  ;;  %v2158_v44 = vadd.f32 %v2157_v37, %v2114_v4  ;;  %v4924_v55 = vld [vmem:[#allocation49_spill] sm:$0xff]  ;;  %v4929_v61 = vld [vmem:[#allocation51_spill] sm:$0xff] }
 0x423   : > { %v1972_v48 = vmul.f32 %v1922_v57, %v4907_v14  ;;  %v1973_v58 = vmul.f32 %v1922_v57, %v4908_v38  ;;  %v2115_v17 = vmul.f32 %v2013_v3, %v4915_v54  ;;  %v2116_v18 = vmul.f32 %v2014_v46, %v4916_v42  ;;  %v4919_v57 = vld [vmem:[#allocation46_spill] sm:$0xff] }
 0x424   : > { %1686 = vrot.lane.b32.xlu1 %v1685_v27, %s3049_s20  ;;  %v2038_v63 = vadd.f32 %v2037_v43, %v2013_v3  ;;  %v2059_v33 = vadd.f32 %v2058_v60, %v2014_v46  ;;  %v4932_v54 = vld [vmem:[#allocation70_spill] sm:$0xff]  ;;  %v4933_v60 = vld [vmem:[#allocation73_spill] sm:$0xff] }
 0x425   : > { %v2015_v10 = vmul.f32 %v4409_v40, %v1972_v48  ;;  %v2016_v0 = vmul.f32 %v4414_v26, %v1973_v58  ;;  %v2138_v2 = vadd.f32 %v2137_v5, %v2115_v17  ;;  %v2159_v45 = vadd.f32 %v2158_v44, %v2116_v18  ;;  %v4925_v48 = vld [vmem:[#allocation87_spill] sm:$0xff]  ;;  %v4926_v58 = vld [vmem:[#allocation88_spill] sm:$0xff] }
 0x426   : > { %v1927_v12 = vpop.permute.xlu1 %1926  ;;  %v1984_v38 = vmul.f32 %v1952_v41, %v4925_v48  ;;  %v4934_v44 = vld [vmem:[#allocation76_spill] sm:$0xff] }
 0x427   : > { %v1974_v59 = vmul.f32 %v1927_v12, %v4911_v1  ;;  %v1975_v9 = vmul.f32 %v1927_v12, %v4912_v36  ;;  %v2117_v28 = vmul.f32 %v2015_v10, %v4919_v57  ;;  %v2118_v8 = vmul.f32 %v2016_v0, %v4920_v31  ;;  %v4927_v1 = vld [vmem:[#allocation60_spill] sm:$0xff] }
 0x428   : > { %v1985_v12 = vmul.f32 %v1952_v41, %v4926_v58  ;;  %v2039_v15 = vadd.f32 %v2038_v63, %v2015_v10  ;;  %v2060_v25 = vadd.f32 %v2059_v33, %v2016_v0  ;;  %v4928_v36 = vld [vmem:[#allocation68_spill] sm:$0xff]  ;;  %v4931_v0 = vld [vmem:[#allocation69_spill] sm:$0xff]  ;;  %v2027_v31 = vmul.f32 %v4409_v40, %v1984_v38 }
 0x429   : > { %v2017_v21 = vmul.f32 %v4409_v40, %v1974_v59  ;;  %v2018_v16 = vmul.f32 %v4414_v26, %v1975_v9  ;;  %v2139_v49 = vadd.f32 %v2138_v2, %v2117_v28  ;;  %v2160_v3 = vadd.f32 %v2159_v45, %v2118_v8  ;;  %v4935_v63 = vld [vmem:[#allocation61_spill] sm:$0xff]  ;;  %v4936_v57 = vld [vmem:[#allocation64_spill] sm:$0xff] }
 0x42a   : > { %v1932_v35 = vpop.permute.xlu1 %1931  ;;  %v2028_v8 = vmul.f32 %v4414_v26, %v1985_v12  ;;  %v4939_v58 = vld [vmem:[#allocation80_spill] sm:$0xff] }
 0x42b   : > { %v1976_v20 = vmul.f32 %v1932_v35, %v4917_v39  ;;  %v1977_v30 = vmul.f32 %v1932_v35, %v4918_v52  ;;  %v2119_v24 = vmul.f32 %v2017_v21, %v4921_v19  ;;  %v2120_v13 = vmul.f32 %v2018_v16, %v4922_v7 }
 0x42c   : > { %v2040_v32 = vadd.f32 %v2039_v15, %v2017_v21  ;;  %v2061_v4 = vadd.f32 %v2060_v25, %v2018_v16  ;;  %v2129_v38 = vmul.f32 %v2027_v31, %v4939_v58  ;;  %v4940_v15 = vld [vmem:[#allocation82_spill] sm:$0xff] }
 0x42d   : > { %v2019_v6 = vmul.f32 %v4409_v40, %v1976_v20  ;;  %v2020_v62 = vmul.f32 %v4414_v26, %v1977_v30  ;;  %v2140_v27 = vadd.f32 %v2139_v49, %v2119_v24  ;;  %v2161_v10 = vadd.f32 %v2160_v3, %v2120_v13 }
 0x42e   : > { %v1937_v23 = vpop.permute.xlu1 %1936  ;;  %v2130_v12 = vmul.f32 %v2028_v8, %v4940_v15 }
 0x42f   : > { %v1978_v22 = vmul.f32 %v1937_v23, %v4923_v34  ;;  %v1979_v14 = vmul.f32 %v1937_v23, %v4924_v55  ;;  %v2121_v59 = vmul.f32 %v2019_v6, %v4927_v1  ;;  %v2122_v9 = vmul.f32 %v2020_v62, %v4928_v36 }
 0x430   : > { %v2041_v39 = vadd.f32 %v2040_v32, %v2019_v6  ;;  %v2062_v20 = vadd.f32 %v2061_v4, %v2020_v62 }
 0x431   : > { %v2021_v46 = vmul.f32 %v4409_v40, %v1978_v22  ;;  %v2022_v53 = vmul.f32 %v4414_v26, %v1979_v14  ;;  %v2141_v30 = vadd.f32 %v2140_v27, %v2121_v59  ;;  %v2162_v43 = vadd.f32 %v2161_v10, %v2122_v9  ;;  %v4937_v22 = vld [vmem:[#allocation77_spill] sm:$0xff] }
 0x432   : > { %v1942_v47 = vpop.permute.xlu1 %1941  ;;  %v4938_v14 = vld [vmem:[#allocation81_spill] sm:$0xff] }
 0x433   : > { %v1980_v37 = vmul.f32 %v1942_v47, %v4929_v61  ;;  %v1981_v51 = vmul.f32 %v1942_v47, %v4930_v29  ;;  %v2123_v35 = vmul.f32 %v2021_v46, %v4931_v0  ;;  %v2124_v17 = vmul.f32 %v2022_v53, %v4932_v54 }
 0x434   : > { %v2042_v16 = vadd.f32 %v2041_v39, %v2021_v46  ;;  %v2063_v41 = vadd.f32 %v2062_v20, %v2022_v53  ;;  %v4941_v53 = vld [vmem:[#allocation84_spill] sm:$0xff] }
 0x435   : > { %v2023_v42 = vmul.f32 %v4409_v40, %v1980_v37  ;;  %v2024_v18 = vmul.f32 %v4414_v26, %v1981_v51  ;;  %v2142_v23 = vadd.f32 %v2141_v30, %v2123_v35  ;;  %v2163_v2 = vadd.f32 %v2162_v43, %v2124_v17 }
 0x436   : > { %v1947_v52 = vpop.permute.xlu1 %1946 }
 0x437   : > { %v2125_v5 = vmul.f32 %v2023_v42, %v4933_v60  ;;  %v2126_v21 = vmul.f32 %v2024_v18, %v4934_v44  ;;  %v1982_v33 = vmul.f32 %v1947_v52, %v4935_v63  ;;  %v1983_v28 = vmul.f32 %v1947_v52, %v4936_v57  ;;  %v2097_v63 = vld [vmem:[#allocation4] sm:$0x3] }
 0x438   : > { %v2043_v45 = vadd.f32 %v2042_v16, %v2023_v42  ;;  %v2064_v6 = vadd.f32 %v2063_v41, %v2024_v18 }
 0x439   : > { %v2025_v62 = vmul.f32 %v4409_v40, %v1982_v33  ;;  %v2026_v19 = vmul.f32 %v4414_v26, %v1983_v28  ;;  %v2143_v24 = vadd.f32 %v2142_v23, %v2125_v5  ;;  %v2164_v7 = vadd.f32 %v2163_v2, %v2126_v21  ;;  %v2029_v21 = vld [vmem:[#allocation3] sm:$0x3] }
 0x43a   : > { %v4942_v40 = vsub.f32 %v4941_v53, %v4883_v11 }
 0x43b   : > { %v2044_v13 = vadd.f32 %v2043_v45, %v2025_v62  ;;  %v2065_v34 = vadd.f32 %v2064_v6, %v2026_v19  ;;  %v2127_v55 = vmul.f32 %v2025_v62, %v4937_v22  ;;  %v2128_v48 = vmul.f32 %v2026_v19, %v4938_v14  ;;  %v1633_v6 = vld [vmem:[#allocation5] sm:$0x1] }
 0x43c   : > { %v1755_v26 = vmul.f32 1.442695, %v4942_v40  ;;  %v4945_v40 = vld [vmem:[#allocation33_spill] sm:$0xff] (!%p2441_p4) }
 0x43d   : > { %v2045_v25 = vadd.f32 %v2044_v13, %v2027_v31  ;;  %v2066_v49 = vadd.f32 %v2065_v34, %v2028_v8  ;;  %v2144_v3 = vadd.f32 %v2143_v24, %v2127_v55  ;;  %v2165_v46 = vadd.f32 %v2164_v7, %v2128_v48  ;;  %v2198_v24 = vld [vmem:[#allocation2] sm:$0x3] (!%p2441_p4)  ;;  %v2201_v7 = vld [vmem:[#allocation14] ss:$4 sm:$0x3] (!%p2441_p4) }
 0x43e   : > { %2785 = vpow2.f32 %v1755_v26  ;;  %2212 = vst.msk [vmem:[#allocation16] ss:$4 sm:$0x3] (!%p2441_p4), %vm3719_vm2, %v2198_v24  ;;  %v2203_v55 = vld [vmem:[#allocation14 + $0x1] ss:$4 sm:$0x3] (!%p2441_p4) }
 0x43f   : > { %v2046_v47 = vrot.slane %v2045_v25, 4  ;;  %v2067_v1 = vrot.slane %v2066_v49, 4  ;;  %v2145_v59 = vadd.f32 %v2144_v3, %v2129_v38  ;;  %v2166_v36 = vadd.f32 %v2165_v46, %v2130_v12 }
 0x440   : > { %v2204_v48 = vmul.f32 (!%p2441_p4), 0.9, %v2203_v55 }
 0x441   : > { %v2047_v9 = vadd.f32 %v2046_v47, %v2045_v25  ;;  %v2068_v61 = vadd.f32 %v2067_v1, %v2066_v49  ;;  %v2146_v37 = vrot.slane %v2145_v59, 4  ;;  %v2167_v29 = vrot.slane %v2166_v36, 4  ;;  %v4946_v47 = vld [vmem:[#allocation34_spill] sm:$0xff] (!%p2441_p4) }
 0x443   : > { %v2048_v51 = vrot.slane %v2047_v9, 2  ;;  %v2069_v32 = vrot.slane %v2068_v61, 2  ;;  %v2147_v4 = vadd.f32 %v2146_v37, %v2145_v59  ;;  %v2168_v27 = vadd.f32 %v2167_v29, %v2166_v36 }
 0x445   : > { %v2049_v10 = vadd.f32 %v2048_v51, %v2047_v9  ;;  %v2070_v0 = vadd.f32 %v2069_v32, %v2068_v61  ;;  %v2148_v35 = vrot.slane %v2147_v4, 2  ;;  %v2169_v54 = vrot.slane %v2168_v27, 2 }
 0x446   : > { %v3050_v61 = vmov (!%p2441_p4), 0  }
 0x447   : > { %v2050_v17 = vrot.slane %v2049_v10, 1  ;;  %v2071_v11 = vrot.slane %v2070_v0, 1  ;;  %v2149_v42 = vadd.f32 %v2148_v35, %v2147_v4  ;;  %v2170_v18 = vadd.f32 %v2169_v54, %v2168_v27  ;;  %2804 = vset.pattern.permute.xlu0 (!%p2441_p4), %v3050_v61 }
 0x448   : > { %v2786_v44 = vpop.eup %2785 }
 0x449   : > { %v2051_v39 = vadd.f32 %v2050_v17, %v2049_v10  ;;  %v2072_v20 = vadd.f32 %v2071_v11, %v2070_v0  ;;  %v2150_v52 = vrot.slane %v2149_v42, 1  ;;  %v2171_v30 = vrot.slane %v2170_v18, 1 }
 0x44a   : > { %v2030_v33 = vmul.f32 %v2786_v44, %v2029_v21  ;;  %v2098_v31 = vmul.f32 %v2786_v44, %v2097_v63 }
 0x44b   : > { %v2075_v43 = vcombine.low %v2051_v39, %v2072_v20  ;;  %v2151_v60 = vadd.f32 %v2150_v52, %v2149_v42  ;;  %v2172_v5 = vadd.f32 %v2171_v30, %v2170_v18 }
 0x44d   : > { %v2082_v16 = vrot.slane %v2075_v43, %v4910_v50  ;;  %v2175_v41 = vcombine.low %v2151_v60, %v2172_v5 }
 0x44f   : > { %v2089_v57 = vrot.slane %v2082_v16, %v4910_v50  ;;  %v2182_v28 = vrot.slane %v2175_v41, %v4910_v50 }
 0x451   : > { %v2091_v8 = vadd.f32 %v2089_v57, %v2030_v33  ;;  %v2189_v23 = vrot.slane %v2182_v28, %v4910_v50  ;;  %v2205_v50 = vsub.f32 (!%p2441_p4), %v2201_v7, %v2198_v24 }
 0x453   : > { %2096 = vst.msk [vmem:[#allocation3] sm:$0x3] %vm3719_vm2, %v2091_v8  ;;  %v2191_v45 = vadd.f32 %v2189_v23, %v2098_v31  ;;  %v2206_v34 = vmul.f32 (!%p2441_p4), 1.442695, %v2205_v50 }
 0x455   : > { %2192 = vst.msk [vmem:[#allocation4] sm:$0x3] %vm3719_vm2, %v2191_v45  ;;  %2805 = vpow2.f32 (!%p2441_p4), %v2206_v34 }
 0x45a   : > { %v2199_v22 = vld [vmem:[#allocation3] sm:$0x3] (!%p2441_p4) }
 0x45b   : > { %v2200_v14 = vmul.f32 (!%p2441_p4), 0.003921569, %v2199_v22 }
 0x45c   : > { %v2217_v3 = vld [vmem:[#allocation4] sm:$0x3] (!%p2441_p4) }
 0x45d   : > { %v2209_v58 = vmul.f32 (!%p2441_p4), 0.1, %v2200_v14 }
 0x45f   : > { %v2806_v38 = vpop.eup (!%p2441_p4), %2805 }
 0x460   : > { %v2208_v15 = vmul.f32 (!%p2441_p4), %v2806_v38, %v2204_v48 }
 0x462   : > { %v2210_v12 = vadd.f32 (!%p2441_p4), %v2209_v58, %v2208_v15 }
 0x464   : > { %v2211_v25 = vsel (!%p2441_p4), %vm4236_vm6, %v2200_v14, %v2210_v12 }
 0x465   : > { %v2215_v49 = vmax.f32 (!%p2441_p4), %v2211_v25, 1e-14  ;;  %2214 = vst.msk [vmem:[#allocation16 + $0x1] ss:$4 sm:$0x3] (!%p2441_p4), %vm3719_vm2, %v2211_v25 }
 0x467   : > { %2807 = vrcp.f32 (!%p2441_p4), %v2215_v49 }
 0x471   : > { %v2808_v46 = vpop.eup (!%p2441_p4), %2807 }
 0x472   : > { %v2218_v53 = vmul.f32 (!%p2441_p4), %v2808_v46, %v2217_v3 }
 0x474   : > { %v2223_v26 = vrot.slane (!%p2441_p4), %v2218_v53, %v4945_v40  ;;  %v2227_v1 = vrot.slane (!%p2441_p4), %v2218_v53, %v4946_v47 }
 0x476   : > { %v2231_v59 = vsel (!%p2441_p4), %vm2230_vm9, %v2223_v26, 0.0  ;;  %v2232_v36 = vsel (!%p2441_p4), %vm2230_vm9, %v2227_v1, 0.0 }
 0x477   : > { %v2233_v9 = vadd.f32 (!%p2441_p4), %v2232_v36, %v2231_v59 }
 0x479   : > { %2234 = vadd.xlane.f32.xlu0 (!%p2441_p4), %v2233_v9 }
 0x493   : > { %2197 = sbr.rel (%p2441_p4) target bundleno = 1422 (0x58e), region = 60 }
 0x496   : > { %v1687_v62 = vpop.permute.xlu1 %1686 }
 0x497   : > { %v1689_v19 = vadd.f32 %v1687_v62, %v1633_v6 }
 0x499   : > { %1691 = vst.msk [vmem:[#allocation5] sm:$0x1] %vm1690_vm8, %v1689_v19 }
 0x4a0   : > { %v2236_v56 = vld [vmem:[#allocation5] sm:$0x1] }
 0x506   : > { %v2235_v37 = vpop.xlane.xlu0 %2234 }
 0x507   : > { %v2237_v29 = vadd.f32 %v2236_v56, %v2235_v37 }
 0x509   : > { %v2238_v51 = vmul.f32 1.0723039e-06, %v2237_v29 }
 0x50b   : > { %2241 = vperm.xlu0 %2804, %v2238_v51  }
 0x58a   : > { %v2242_v32 = vpop.permute.xlu0 %2241 }
 0x58b   : > { %v2247_v4 = vrot.slane %v2242_v32, %v4945_v40 }
 0x58d   : > { %2249 = vst.msk [vmem:[#allocation16 + $0x2] ss:$4 sm:$0x3] %vm3719_vm2, %v2247_v4 }
 0x58e PF: > { %s2451_s16 = sshll.u32 %s3114_s0, 11  ;;  %s2264_s8 = sshll.u32 %s3326_s27, 4  ;;  %s4543_s8 = int_to_ptr.vmem [resolvable:$true] %s2264_s8 }
 0x58f   : > { %s4540_s22 = scalar_lea.hbm %s4614_s5, %s2451_s16  ;;  %s2251_s12 = scalar_lea.sflag [#allocation10], %s3302_s2 }
 0x590   : > { %s2925_s1 = scalar_lea.vmem %s4543_s8, 2048  ;;  %p4947_p9 = scmp.ne.s32.totalorder %s4752_s14, 0 }
 0x591   : > { %p2926_p10 = scmp.ne.s32.totalorder %s4543_s8, %s2925_s1  ;;  %s3051_s25 = smov [#allocation15]  }
 0x592   : > { %s2929_s10 = sshll.u32 %s3051_s25, 4  ;;  %s2930_s10 = int_to_ptr.vmem [resolvable:$false] %s2929_s10 }
 0x593   : > { %p2927_p0 = pnand %p2926_p10, %p4947_p9  ;;  %s2931_s7 = scalar_lea.vmem %s2930_s10, 4096 }
 0x594   : > { %p2932_p2 = scmp.lt.s32.totalorder %s4543_s8, %s2930_s10  ;;  %p2933_p7 = scmp.lt.s32.totalorder %s2931_s7, %s2925_s1 }
 0x595   : > { %p2928_p12 = pneg %p2927_p0 }
 0x596   : > { %p2934_p5 = por %p2933_p7, %p2932_p2 }
 0x598   : > { %p2935_p3 = pnand %p2934_p5, %p2928_p12 }
 0x59a   : > { %2938 = shalt.err (!%p2935_p3)
}
 0x59b   : > { %s2939_s9 = scalar_lea.hbm %s4540_s22, 2048  ;;  %s2943_s27 = scalar_lea.hbm %s4614_s5, 4096 }
 0x59c   : > { %p2940_p13 = scmp.ne.s32.totalorder %s4540_s22, %s2939_s9  ;;  %p2944_p8 = scmp.lt.u32.totalorder %s4540_s22, %s4614_s5 }
 0x59d   : > { %p2945_p11 = scmp.lt.u32.totalorder %s2943_s27, %s2939_s9  ;;  %p2947_p10 = scmp.lt.u32.totalorder %s2939_s9, %s4540_s22 }
 0x59e   : > { %p2941_p1 = pnand %p2940_p13, %p4947_p9 }
 0x59f   : > { %p2946_p4 = por %p2945_p11, %p2944_p8 }
 0x5a0   : > { %p2942_p6 = pneg %p2941_p1 }
 0x5a1   : > { %p2948_p0 = por %p2947_p10, %p2946_p4 }
 0x5a3   : > { %p2949_p12 = pnand %p2948_p0, %p2942_p6 }
 0x5a5   : > { %2952 = shalt.err (!%p2949_p12)
}
 0x5a6   : > { %s3052_s13 = smov 128   ;;  %s3053_s18 = smov 8  }
 0x5a7   : > { %2512 = dma.vmem_to_hbm [thread:$0]  (%p4947_p9), %s4543_s8, 2048, %s4540_s22, %s2251_s12, %s3052_s13, %s3052_s13, %s3053_s18  }
 0x5a8   : > { %s3054_s19 = smov [#allocation16]   ;;  %p4948_p7 = scmp.eq.s32.totalorder %s3114_s0, 1 }
 0x5a9   : > { %s2278_s20 = sshll.u32 %s3054_s19, 4  ;;  %s2279_s20 = int_to_ptr.vmem [resolvable:$true] %s2278_s20 }
 0x5aa   : > { %s2953_s16 = scalar_lea.vmem %s2279_s20, 128  ;;  %p2960_p13 = scmp.lt.s32.totalorder %s2279_s20, %s2279_s20 }
 0x5ab   : > { %p2954_p2 = scmp.ne.s32.totalorder %s2279_s20, %s2953_s16  ;;  %p2961_p1 = scmp.lt.s32.totalorder %s2953_s16, %s2953_s16 }
 0x5ad   : > { %p2955_p5 = pnand %p2954_p2, %p4948_p7  ;;  %p2962_p6 = por %p2961_p1, %p2960_p13 }
 0x5af   : > { %p2956_p3 = pneg %p2955_p5 }
 0x5b1   : > { %p2963_p8 = pnand %p2962_p6, %p2956_p3 }
 0x5b3   : > { %2966 = shalt.err (!%p2963_p8)
}
 0x5b4   : > { %s2967_s14 = scalar_lea.hbm %s4615_s6, 128  ;;  %p4949_p11 = pmov %p4948_p7 }
 0x5b5   : > { %p2968_p9 = scmp.ne.s32.totalorder %s4615_s6, %s2967_s14  ;;  %p2973_p0 = scmp.lt.u32.totalorder %s2967_s14, %s4615_s6 }
 0x5b7   : > { %p2969_p4 = pnand %p2968_p9, %p4949_p11 }
 0x5b9   : > { %p2970_p10 = pneg %p2969_p4 }
 0x5bb   : > { %p2975_p12 = pnand %p2973_p0, %p2970_p10 }
 0x5bd   : > { %2978 = shalt.err (!%p2975_p12)
}
 0x5be   : > { %p4950_p2 = pmov %p4948_p7 }
 0x5c0   : > { %2514 = dma.vmem_to_hbm [thread:$0]  (%p4950_p2), %s2279_s20, 128, %s4615_s6, [#allocation17]  }
 0x5c1   : > { %p4951_p7 = pmov %p4950_p2 }
 0x5c2   : > { %p4952_p5 = pmov %p4950_p2 }
 0x5c3   : > { %3012 = dma.done.wait (%p4951_p7), [#allocation17], 128  }
 0x5c4   : > { %3014 = vsyncadd (%p4952_p5), [#allocation17], 4294967168 }
 0x5c5 PF: > { %s2294_s10 = sand.u32 1, %s3021_s23   ;;  %p4953_p3 = scmp.ne.s32.totalorder %s4745_s29, 0 }
 0x5c6   : > { %p4954_p13 = scmp.ge.s32.totalorder %s3033_s26, 2  ;;  %s2295_s7 = scalar_lea.sflag [#allocation10], %s2294_s10 }
 0x5c8   : > { %p2533_p1 = pnand %p4954_p13, %p4953_p3 }
 0x5ca   : > { %3016 = dma.done.wait (!%p2533_p1), %s2295_s7, 2048  }
 0x5cb   : > { %3018 = vsyncadd (!%p2533_p1), %s2295_s7, 4294965248  ;;  %s4955_s26 = sld [smem:[#allocation25_spill]]  ;;  %s4956_s9 = sld [smem:[#allocation24_spill]] }
 0x5cc   : > { %s4957_s25 = sld [smem:[#allocation26_spill]]  ;;  %s4958_s23 = smov %s3025_s24 }
 0x5d1   : > { %p23_p6 = scmp.ge.s32.totalorder %s4955_s26, 4   ;;  %s4959_s24 = smov %s4956_s9 }
 0x5d3   :  { %25 = sbr.rel (!%p23_p6) target bundleno = 11 (0xb), region = 120 }
 0x5da   :  { %2300 = vsyncpa [#allocation9], 1 }
 0x5db   :  { %2302 = vsyncpa [#allocation9 + $0x1], 1 }
 0x5dc   :  { %2303 = vsyncpa [#allocation12], 1 }
 0x5dd   :  { %2304 = vsyncpa [#allocation10], 1 }
 0x5de   :  { %2306 = vsyncpa [#allocation10 + $0x1], 1 }
 0x5df   :  { %2307 = vsyncpa [#allocation17], 1 }

// kernel: tpu_custom_call.1
= control target key start
LH: loop header
LB: loop body
LE: loop exit
PB: predicated region body
PF: predicated region fallthrough
CT: control target
= control target key end

     0   :  { %s4609_s0 = inlined_call_operand.<no memory space> [shape: s32[1], index: 0, kind: input, shape index: {}]   ;;  %s4610_s1 = inlined_call_operand.hbm [shape: bf16[256,128], index: 1, kind: input, shape index: {}]   ;;  %s4611_s2 = inlined_call_operand.hbm [shape: bf16[256,128], index: 2, kind: input, shape index: {}]   ;;  %s4612_s3 = inlined_call_operand.hbm [shape: f32[256,3], index: 3, kind: input, shape index: {}]   ;;  %s4613_s4 = inlined_call_operand.hbm [shape: f32[3,256], index: 4, kind: input, shape index: {}]   ;;  %s4614_s5 = inlined_call_operand.hbm [shape: f32[256,2], index: 5, kind: output, shape index: {0}]   ;;  %s4615_s6 = inlined_call_operand.hbm [shape: f32[3,256], index: 6, kind: output, shape index: {1}]  }
   0x1   :  { %4741 = sst [smem:[#allocation89_spill]] %s4610_s1 }
   0x2   :  { %4742 = sst [smem:[#allocation90_spill]] %s4611_s2 }
   0x3   :  { %12 = sst [smem:[#allocation7]] %s4609_s0 }
   0x4   :  { %13 = vsyncpa [#allocation9], 0 }
   0x5   :  { %15 = vsyncpa [#allocation9 + $0x1], 0 }
   0x6   :  { %16 = vsyncpa [#allocation12], 0 }
   0x7   :  { %17 = vsyncpa [#allocation10], 0 }
   0x8   :  { %19 = vsyncpa [#allocation10 + $0x1], 0 }
   0x9   :  { %20 = vsyncpa [#allocation17], 0  ;;  %s3093_s23 = smov 0   ;;  %s3095_s24 = smov 0  }
   0xa   :  { %s3097_s25 = smov 0   ;;  %s3099_s26 = smov 0  }
   0xb LB: > { %4743 = sst [smem:[#allocation24_spill]] %s3029_s25  ;;  %s3114_s0 = sadd.s32 4294967295, %s3033_s26   ;;  %s3033_s26 = sphi %s3099_s26, %s4955_s26   ;;  %s3029_s25 = sphi %s3097_s25, %s4957_s25   ;;  %s3025_s24 = sphi %s3095_s24, %s4959_s24   ;;  %s3021_s23 = sphi %s3093_s23, %s4958_s23  }
   0xc   : > { %s2398_s27 = sadd.s32 4294967294, %s3033_s26   ;;  %p46_p0 = scmp.ne.s32.totalorder %s3025_s24, %s3021_s23 }
   0xd   : > { %p4616_p1 = scmp.eq.s32.totalorder %s3114_s0, 0  ;;  %p144_p3 = scmp.eq.s32.totalorder %s2398_s27, 1 }
   0xe   : > { %p2399_p5 = scmp.ge.s32.totalorder %s3033_s26, 1  ;;  %p172_p7 = scmp.lt.s32.totalorder %s3033_s26, 3 }
   0xf   : > { %p3123_p4 = por %p4616_p1, %p46_p0  ;;  %p3128_p6 = por %p144_p3, %p46_p0 }
  0x10   : > { %p3134_p9 = pnand %p2399_p5, %p172_p7  ;;  %s3035_s7 = smov [#allocation11]  }
  0x11   : > { %s4744_s28 = scalar_select %p3123_p4, 1, 0 }
  0x12   : > { %s4745_s29 = scalar_select %p3128_p6, 1, 0 }
  0x13   : > { %s4746_s30 = scalar_select %p3134_p9, 1, 0 }
  0x14   : > { %s184_s8 = sshll.u32 %s3035_s7, 4  ;;  %p2518_p10 = pneg %p3134_p9  ;;  %s3138_s8 = int_to_ptr.vmem [resolvable:$true] %s184_s8 }
  0x15   : > { %s3150_s10 = sadd.s32 1, %s3033_s26   ;;  %s33_s11 = sadd.s32 1, %s3029_s25 }
  0x16   : > { %p3145_p12 = pnand %p2518_p10, %p4616_p1  ;;  %4748 = sst [smem:[#allocation25_spill]] %s3150_s10 }
  0x17   : > { %s30_s12 = ssub.s32 %s3033_s26, %s3150_s10  ;;  %s4749_s2 = sld [smem:[#allocation90_spill]] }
  0x18   : > { %p4619_p0 = pneg %p3145_p12 }
  0x1d   : > { %s2809_s15 = scalar_lea.hbm %s4749_s2, 2048 }
  0x1e   : > { %p2810_p13 = scmp.ne.s32.totalorder %s4749_s2, %s2809_s15  ;;  %p2816_p7 = scmp.lt.u32.totalorder %s2809_s15, %s4749_s2 }
  0x20   : > { %p2812_p3 = pnand %p4619_p0, %p2810_p13 }
  0x22   : > { %p2813_p5 = pneg %p2812_p3 }
  0x24   : > { %p2818_p10 = pnand %p2816_p7, %p2813_p5 }
  0x26   : > { %2821 = shalt.err (!%p2818_p10)
}
  0x27   : > { %s2822_s20 = scalar_lea.vmem %s3138_s8, 2048  ;;  %p2830_p2 = scmp.lt.s32.totalorder %s3138_s8, %s3138_s8 }
  0x28   : > { %p2823_p11 = scmp.ne.s32.totalorder %s3138_s8, %s2822_s20  ;;  %p2831_p13 = scmp.lt.s32.totalorder %s2822_s20, %s2822_s20 }
  0x2a   : > { %p2825_p8 = pnand %p2823_p11, %p4619_p0  ;;  %p2832_p3 = por %p2831_p13, %p2830_p2 }
  0x2c   : > { %p2826_p1 = pneg %p2825_p8 }
  0x2e   : > { %p2833_p6 = pnand %p2832_p3, %p2826_p1 }
  0x30   : > { %2836 = shalt.err (!%p2833_p6)
}
  0x31   : > { %s4617_s21 = smov 64   ;;  %s4618_s22 = smov 4  }
  0x32   : > { %2521 = dma.hbm_to_vmem [thread:$0]  (!%p3145_p12), %s4749_s2, 2048, %s3138_s8, [#allocation12], %s4617_s21, %s4617_s21, %s4618_s22  }
  0x33   : > { %p31_p1 = scmp.eq.s32.totalorder %s30_s12, 0  ;;  %p40_p2 = scmp.ne.s32.totalorder %s3029_s25, %s3025_s24 }
  0x34   : > { %p41_p6 = scmp.eq.s32.totalorder %s3033_s26, 0  ;;  %p2538_p8 = scmp.lt.s32.totalorder %s3033_s26, 2 }
  0x35   : > { %s3190_s13 = scalar_select %p31_p1, %s3029_s25, %s33_s11  }
  0x36   : > { %p42_p11 = por %p41_p6, %p40_p2  ;;  %p4751_p5 = scmp.eq.s32.totalorder %s3114_s0, 1 }
  0x37   : > { %4750 = sst [smem:[#allocation26_spill]] %s3190_s13  ;;  %s209_s15 = sand.u32 1, %s3033_s26  }
  0x38   : > { %p3194_p7 = por %p4751_p5, %p40_p2  ;;  %s211_s16 = sand.u32 1, %s3029_s25  }
  0x39   : > { %s2403_s17 = sshll.u32 %s211_s16, 6  ;;  %s2449_s18 = sshll.u32 %s3033_s26, 10 }
  0x3a   : > { %s4752_s14 = scalar_select %p3194_p7, 1, 0 }
  0x3b   : > { %s4753_s1 = sld [smem:[#allocation89_spill]]  ;;  %s213_s11 = scalar_lea.vmem [#allocation8], %s2403_s17 }
  0x3c   : > { %s220_s12 = sshll.u32 %s213_s11, 4  ;;  %p3208_p10 = pnand %p2538_p8, %p42_p11  ;;  %s3206_s12 = int_to_ptr.vmem [resolvable:$true] %s220_s12 }
  0x3d   : > { %s3212_s7 = sshll.u32 %s211_s16, 7  ;;  %s3214_s21 = scalar_lea.sflag [#allocation9], %s209_s15 }
  0x3e   : > { %s4754_s27 = scalar_select %p3208_p10, 1, 0 }
  0x3f   : > { %p4626_p3 = pneg %p3208_p10 }
  0x41   : > { %s3204_s8 = scalar_lea.hbm %s4753_s1, %s2449_s18  ;;  %s2842_s20 = scalar_lea.hbm %s4753_s1, 2048 }
  0x42   : > { %s2837_s18 = scalar_lea.hbm %s3204_s8, 1024  ;;  %p2843_p6 = scmp.lt.u32.totalorder %s3204_s8, %s4753_s1 }
  0x43   : > { %p2838_p13 = scmp.ne.s32.totalorder %s3204_s8, %s2837_s18  ;;  %p2844_p8 = scmp.lt.u32.totalorder %s2842_s20, %s2837_s18 }
  0x44   : > { %p2846_p5 = scmp.lt.u32.totalorder %s2837_s18, %s3204_s8 }
  0x45   : > { %p2840_p1 = pnand %p4626_p3, %p2838_p13  ;;  %p2845_p11 = por %p2844_p8, %p2843_p6 }
  0x47   : > { %p2841_p2 = pneg %p2840_p1  ;;  %p2847_p0 = por %p2846_p5, %p2845_p11 }
  0x49   : > { %p2848_p7 = pnand %p2847_p0, %p2841_p2 }
  0x4b   : > { %2851 = shalt.err (!%p2848_p7)
}
  0x4c   : > { %s2852_s15 = scalar_lea.vmem %s3206_s12, 1024  ;;  %s3038_s16 = smov [#allocation8]  }
  0x4d   : > { %p2853_p13 = scmp.ne.s32.totalorder %s3206_s12, %s2852_s15  ;;  %s2857_s17 = sshll.u32 %s3038_s16, 4  ;;  %s2858_s17 = int_to_ptr.vmem [resolvable:$false] %s2857_s17 }
  0x4e   : > { %s2859_s22 = scalar_lea.vmem %s2858_s17, 2048  ;;  %p2860_p9 = scmp.lt.s32.totalorder %s3206_s12, %s2858_s17 }
  0x4f   : > { %p2855_p1 = pnand %p2853_p13, %p4626_p3  ;;  %p2861_p6 = scmp.lt.s32.totalorder %s2859_s22, %s2852_s15 }
  0x51   : > { %p2856_p4 = pneg %p2855_p1  ;;  %p2862_p8 = por %p2861_p6, %p2860_p9 }
  0x53   : > { %p2863_p11 = pnand %p2862_p8, %p2856_p4 }
  0x55   : > { %2866 = shalt.err (!%p2863_p11)
}
  0x56   : > { %s4755_s18 = smov 4   ;;  %s4756_s19 = smov 64  }
  0x57   : > { %2528 = dma.hbm_to_vmem [thread:$0]  (!%p3208_p10), %s3204_s8, 1024, %s3206_s12, %s3214_s21, %s4756_s19, %s4756_s19, %s4755_s18  }
  0x58   : > { %s234_s20 = scalar_lea.vmem [#allocation13], %s3212_s7  ;;  %s3039_s16 = smov [#allocation14]  }
  0x59   : > { %s241_s11 = sshll.u32 %s234_s20, 4  ;;  %s198_s17 = sshll.u32 %s3039_s16, 4  ;;  %s199_s17 = int_to_ptr.vmem [resolvable:$true] %s198_s17  ;;  %s3272_s11 = int_to_ptr.vmem [resolvable:$true] %s241_s11 }
  0x5a   : > { %s2450_s15 = sshll.u32 %s3033_s26, 11  ;;  %s2867_s2 = scalar_lea.hbm %s4613_s4, 128 }
  0x5b   : > { %p2868_p4 = scmp.ne.s32.totalorder %s4613_s4, %s2867_s2  ;;  %p4757_p9 = pneg %p3145_p12 }
  0x5c   : > { %p2874_p2 = scmp.lt.u32.totalorder %s2867_s2, %s4613_s4 }
  0x5d   : > { %p2870_p0 = pnand %p2868_p4, %p4757_p9 }
  0x5f   : > { %p2871_p7 = pneg %p2870_p0 }
  0x61   : > { %p2876_p5 = pnand %p2874_p2, %p2871_p7 }
  0x63   : > { %2879 = shalt.err (!%p2876_p5)
}
  0x64   : > { %s2880_s12 = scalar_lea.vmem %s199_s17, 128  ;;  %p4758_p1 = pmov %p4757_p9 }
  0x65   : > { %p2881_p13 = scmp.ne.s32.totalorder %s199_s17, %s2880_s12  ;;  %p2888_p11 = scmp.lt.s32.totalorder %s199_s17, %s199_s17 }
  0x66   : > { %p2889_p3 = scmp.lt.s32.totalorder %s2880_s12, %s2880_s12 }
  0x67   : > { %p2883_p6 = pnand %p2881_p13, %p4758_p1 }
  0x68   : > { %p2890_p10 = por %p2889_p3, %p2888_p11 }
  0x69   : > { %p2884_p8 = pneg %p2883_p6 }
  0x6b   : > { %p2891_p4 = pnand %p2890_p10, %p2884_p8 }
  0x6d   : > { %2894 = shalt.err (!%p2891_p4)
}
  0x6e   : > { %2524 = dma.hbm_to_vmem [thread:$0]  (!%p3145_p12), %s4613_s4, 128, %s199_s17, [#allocation12]  }
  0x6f   : > { %s3270_s13 = scalar_lea.hbm %s4612_s3, %s2450_s15  ;;  %p4759_p3 = scmp.ne.s32.totalorder %s4754_s27, 0 }
  0x70   : > { %s2895_s7 = scalar_lea.hbm %s3270_s13, 2048  ;;  %s2900_s19 = scalar_lea.hbm %s4612_s3, 4096 }
  0x71   : > { %p2896_p10 = scmp.ne.s32.totalorder %s3270_s13, %s2895_s7  ;;  %p4760_p9 = pneg %p4759_p3 }
  0x72   : > { %p2901_p12 = scmp.lt.u32.totalorder %s3270_s13, %s4612_s3  ;;  %p2902_p2 = scmp.lt.u32.totalorder %s2900_s19, %s2895_s7 }
  0x73   : > { %p2898_p0 = pnand %p2896_p10, %p4760_p9  ;;  %p2904_p13 = scmp.lt.u32.totalorder %s2895_s7, %s3270_s13 }
  0x74   : > { %p2903_p5 = por %p2902_p2, %p2901_p12 }
  0x75   : > { %p2899_p7 = pneg %p2898_p0 }
  0x76   : > { %p2905_p1 = por %p2904_p13, %p2903_p5 }
  0x78   : > { %p2906_p6 = pnand %p2905_p1, %p2899_p7 }
  0x7a   : > { %2909 = shalt.err (!%p2906_p6)
}
  0x7b   : > { %s2910_s17 = scalar_lea.vmem %s3272_s11, 2048  ;;  %p4761_p11 = pmov %p4760_p9 }
  0x7c   : > { %p2911_p8 = scmp.ne.s32.totalorder %s3272_s11, %s2910_s17  ;;  %s3040_s15 = smov [#allocation13]  }
  0x7d   : > { %s2915_s22 = sshll.u32 %s3040_s15, 4  ;;  %s2916_s22 = int_to_ptr.vmem [resolvable:$false] %s2915_s22 }
  0x7e   : > { %p2913_p4 = pnand %p2911_p8, %p4761_p11  ;;  %s2917_s8 = scalar_lea.vmem %s2916_s22, 4096 }
  0x7f   : > { %p2918_p9 = scmp.lt.s32.totalorder %s3272_s11, %s2916_s22  ;;  %p2919_p0 = scmp.lt.s32.totalorder %s2917_s8, %s2910_s17 }
  0x80   : > { %p2914_p10 = pneg %p2913_p4 }
  0x81   : > { %p2920_p12 = por %p2919_p0, %p2918_p9 }
  0x83   : > { %p2921_p2 = pnand %p2920_p12, %p2914_p10 }
  0x85   : > { %2924 = shalt.err (!%p2921_p2)
}
  0x86   : > { %s3041_s12 = smov 128   ;;  %s3042_s1 = smov 8  }
  0x87   : > { %2531 = dma.hbm_to_vmem [thread:$0]  (!%p4759_p3), %s3270_s13, 2048, %s3272_s11, %s3214_s21, %s3041_s12, %s3041_s12, %s3042_s1  }
  0x88   : > { %p4762_p7 = scmp.ne.s32.totalorder %s4746_s30, 0 }
  0x8a   : > { %253 = sbr.rel (%p4762_p7) target bundleno = 1477 (0x5c5), region = 36 }
  0x91   : > { %s255_s25 = sand.u32 1, %s3114_s0   ;;  %s3302_s2 = sand.u32 1, %s3025_s24  }
  0x92   : > { %s2410_s10 = sshll.u32 %s3302_s2, 6  ;;  %s256_s7 = scalar_lea.sflag [#allocation9], %s255_s25 }
  0x93   : > { %s3305_s9 = scalar_lea.vmem [#allocation8], %s2410_s10  ;;  %p4763_p5 = scmp.ne.s32.totalorder %s4744_s28, 0 }
  0x95   : > { %2996 = dma.done.wait (%p4763_p5), %s256_s7, 1024  }
  0x96   : > { %2998 = vsyncadd (%p4763_p5), %s256_s7, 4294966272  ;;  %p4764_p3 = scmp.eq.s32.totalorder %s3114_s0, 0 }
  0x98   : > { %3000 = dma.done.wait (%p4764_p3), [#allocation12], 2048   ;;  %p4765_p13 = pmov %p4764_p3 }
  0x99   : > { %s2412_s30 = sshll.u32 %s3302_s2, 7 }
  0x9a   : > { %3002 = vsyncadd (%p4765_p13), [#allocation12], 4294965248  ;;  %s3316_s21 = scalar_lea.vmem [#allocation13], %s2412_s30 }
  0x9b   : > { %3004 = dma.done.wait (%p4763_p5), %s256_s7, 2048  }
  0x9c   : > { %3006 = vsyncadd (%p4763_p5), %s256_s7, 4294965248  ;;  %p4766_p1 = pmov %p4764_p3 }
  0x9e   : > { %3008 = dma.done.wait (%p4766_p1), [#allocation12], 128   ;;  %p4767_p6 = pmov %p4766_p1 }
  0x9f   : > { %s3326_s27 = scalar_lea.vmem [#allocation15], %s2412_s30  ;;  %p4768_p8 = scmp.ne.s32.totalorder %s3114_s0, 0 }
  0xa0   : > { %3010 = vsyncadd (%p4767_p6), [#allocation12], 4294967168  ;;  %v316_v0 = vld [vmem:[#allocation14] ss:$4 sm:$0x3] (!%p4768_p8)  ;;  %v317_v1 = vlaneseq (!%p4768_p8)  ;;  %vm324_vm0 = vcmask (!%p4768_p8), 0  }
  0xa1   : > { %315 = sbr.rel (%p4768_p8) target bundleno = 168 (0xa8), region = 56  ;;  %v3043_v2 = vmov (!%p4768_p8), 0.0  }
  0xa2   : > { %325 = vst.msk [vmem:[#allocation5] sm:$0x1] (!%p4768_p8), %vm324_vm0, %v3043_v2  ;;  %vm319_vm1 = vcmp.lt.s32.totalorder (!%p4768_p8), %v317_v1, 256 }
  0xa3   : > { %321 = vst.msk [vmem:[#allocation2] sm:$0x3] (!%p4768_p8), %vm319_vm1, %v316_v0  ;;  %322 = vst.msk [vmem:[#allocation3] sm:$0x3] (!%p4768_p8), %vm319_vm1, %v3043_v2 }
  0xa4   : > { %323 = vst.msk [vmem:[#allocation4] sm:$0x3] (!%p4768_p8), %vm319_vm1, %v3043_v2 }
  0xa8 PF: > { %v2599_v3 = vld [vmem:[#allocation11 + $0x40] sm:$0xff]   ;;  %v4629_v5 = vmov 2   ;;  %v2601_v6 = vld [vmem:[#allocation11 + $0x48] sm:$0xff]   ;;  %v2603_v8 = vld [vmem:[#allocation11 + $0x50] sm:$0xff]   ;;  %v4631_v49 = vlaneseq  ;;  %vm1471_vm3 = vcmask 7168   ;;  %s3047_s28 = smov 2  }
  0xa9   : > { %v2600_v4 = vld [vmem:[#allocation11] sm:$0xff]   ;;  %2593 = vset.pattern.permute.xlu0 %v4629_v5  ;;  %2594 = vset.pattern.permute.xlu1 %v4629_v5  ;;  %v2602_v7 = vld [vmem:[#allocation11 + $0x8] sm:$0xff]   ;;  %v2604_v9 = vld [vmem:[#allocation11 + $0x10] sm:$0xff]   ;;  %s3048_s11 = smov 1   ;;  %s2440_s13 = sshll.u32 %s3114_s0, 7 }
  0xaa   : > { %2452 = vmatprep.subr.bf16.mxu0 %v2599_v3  ;;  %2484 = vmatprep.subr.bf16.mxu1 %v2599_v3  ;;  %v2605_v10 = vld [vmem:[#allocation11 + $0x58] sm:$0xff]   ;;  %v3333_v11 = vld [vmem:[%s3305_s9] sm:$0xff]   ;;  %v3344_v16 = vld [vmem:[%s3316_s21 + $0x10] sm:$0xff]  ;;  %v3421_v50 = vshrl.u32 %v4631_v49, 7  ;;  %s938_s18 = sld [smem:[#allocation7]]  ;;  %s3049_s20 = smov 127  }
  0xab   : > { %2453 = vmatpush3.bf16.xpose.msra.mxu0 %v2600_v4  ;;  %2492 = vmatpush3.bf16.xpose.msra.mxu1 %v2600_v4  ;;  %v3336_v12 = vld [vmem:[%s3305_s9 + $0x20] sm:$0xff]   ;;  %v2606_v13 = vld [vmem:[#allocation11 + $0x18] sm:$0xff]   ;;  %v3349_v17 = vld [vmem:[%s3316_s21 + $0x8] sm:$0xff]  ;;  %p2441_p4 = scmp.ne.s32.totalorder %s3114_s0, 1 }
  0xac   : > { %2454 = vmatprep.subr.bf16.mxu0 %v2601_v6  ;;  %2485 = vmatprep.subr.bf16.mxu1 %v2601_v6  ;;  %v2607_v14 = vld [vmem:[#allocation11 + $0x60] sm:$0xff]   ;;  %v3352_v18 = vld [vmem:[%s3316_s21 + $0x18] sm:$0xff]  ;;  %v3360_v20 = vld [vmem:[%s3316_s21 + $0x28] sm:$0xff]  ;;  %v3428_v53 = vsub.s32 0, %v3421_v50  ;;  %v3431_v55 = vsub.s32 1, %v3421_v50 }
  0xad   : > { %2468 = vmatprep.mubr.bf16.mxu0 %v3333_v11  ;;  %2476 = vmatprep.mubr.bf16.mxu1 %v3336_v12  ;;  %v3341_v15 = vld [vmem:[%s3316_s21] sm:$0xff]  ;;  %4769 = vst [vmem:[#allocation27_spill] sm:$0xff] %v3360_v20  ;;  %v2609_v22 = vld [vmem:[#allocation11 + $0x68] sm:$0xff]   ;;  %v3365_v23 = vld [vmem:[%s3316_s21 + $0x30] sm:$0xff] }
  0xae   : > { %651 = vperm.xlu0 %2593, %v3341_v15   ;;  %661 = vperm.xlu1 %2594, %v3344_v16   ;;  %v3357_v19 = vld [vmem:[%s3316_s21 + $0x20] sm:$0xff]  ;;  %4770 = vst [vmem:[#allocation28_spill] sm:$0xff] %v3365_v23  ;;  %v3368_v24 = vld [vmem:[%s3316_s21 + $0x38] sm:$0xff]  ;;  %v3376_v26 = vld [vmem:[%s3316_s21 + $0x48] sm:$0xff] }
  0xaf   : > { %v2608_v21 = vld [vmem:[#allocation11 + $0x20] sm:$0xff]   ;;  %4771 = vst [vmem:[#allocation29_spill] sm:$0xff] %v3368_v24  ;;  %v2610_v27 = vld [vmem:[#allocation11 + $0x28] sm:$0xff]   ;;  %v2611_v28 = vld [vmem:[#allocation11 + $0x70] sm:$0xff]  }
  0xb0   : > { %v3373_v25 = vld [vmem:[%s3316_s21 + $0x40] sm:$0xff]  ;;  %v3381_v29 = vld [vmem:[%s3316_s21 + $0x50] sm:$0xff]  ;;  %v3384_v30 = vld [vmem:[%s3316_s21 + $0x58] sm:$0xff]  ;;  %4775 = vst [vmem:[#allocation33_spill] sm:$0xff] %v3428_v53  ;;  %p939_p11 = scmp.eq.s32.totalorder %s938_s18, 0 }
  0xb1   : > { %v3389_v31 = vld [vmem:[%s3316_s21 + $0x60] sm:$0xff]  ;;  %v3392_v32 = vld [vmem:[%s3316_s21 + $0x68] sm:$0xff]  ;;  %v2612_v33 = vld [vmem:[#allocation11 + $0x30] sm:$0xff]   ;;  %4776 = vst [vmem:[#allocation34_spill] sm:$0xff] %v3431_v55 }
  0xb2   : > { %656 = vperm.xlu0 %2593, %v3349_v17   ;;  %666 = vperm.xlu1 %2594, %v3352_v18   ;;  %4772 = vst [vmem:[#allocation30_spill] sm:$0xff] %v3392_v32  ;;  %v2613_v34 = vld [vmem:[#allocation11 + $0x78] sm:$0xff]   ;;  %v3397_v35 = vld [vmem:[%s3316_s21 + $0x70] sm:$0xff]  ;;  %v2617_v38 = vld [vmem:[%s3305_s9 + $0x8] sm:$0xff]   ;;  %s1452_s19 = scalar_select %p939_p11, 1, 0 }
  0xb3   : > { %2455 = vmatpush3.bf16.xpose.msra.mxu0 %v2602_v7  ;;  %2493 = vmatpush3.bf16.xpose.msra.mxu1 %v2602_v7  ;;  %4773 = vst [vmem:[#allocation31_spill] sm:$0xff] %v3397_v35  ;;  %v3400_v36 = vld [vmem:[%s3316_s21 + $0x78] sm:$0xff]  ;;  %v2618_v39 = vld [vmem:[%s3305_s9 + $0x28] sm:$0xff]   ;;  %v2619_v40 = vld [vmem:[%s3305_s9 + $0x10] sm:$0xff]  }
  0xb4   : > { %2456 = vmatprep.subr.bf16.mxu0 %v2603_v8  ;;  %2486 = vmatprep.subr.bf16.mxu1 %v2603_v8  ;;  %4774 = vst [vmem:[#allocation32_spill] sm:$0xff] %v3400_v36  ;;  %v2614_v37 = vld [vmem:[#allocation11 + $0x38] sm:$0xff]   ;;  %v2620_v41 = vld [vmem:[%s3305_s9 + $0x30] sm:$0xff]   ;;  %v648_v54 = vld [vmem:[#allocation14 + $0x2] ss:$4 sm:$0x3] }
  0xb5   : > { %v2621_v42 = vld [vmem:[%s3305_s9 + $0x18] sm:$0xff]   ;;  %v3436_v58 = vrot.slane %v648_v54, %v3428_v53  ;;  %v3439_v0 = vrot.slane %v648_v54, %v3431_v55 }
  0xb6   : > { %671 = vperm.xlu0 %2593, %v3357_v19   ;;  %676 = vperm.xlu1 %2594, %v3360_v20   ;;  %v2622_v43 = vld [vmem:[%s3305_s9 + $0x38] sm:$0xff]  }
  0xba   : > { %681 = vperm.xlu0 %2593, %v3365_v23   ;;  %686 = vperm.xlu1 %2594, %v3368_v24  }
  0xbb   : > { %2457 = vmatpush3.bf16.xpose.msra.mxu0 %v2604_v9  ;;  %2494 = vmatpush3.bf16.xpose.msra.mxu1 %v2604_v9 }
  0xbc   : > { %2458 = vmatprep.subr.bf16.mxu0 %v2605_v10  ;;  %2487 = vmatprep.subr.bf16.mxu1 %v2605_v10 }
  0xbe   : > { %691 = vperm.xlu0 %2593, %v3373_v25   ;;  %696 = vperm.xlu1 %2594, %v3376_v26  }
  0xc2   : > { %701 = vperm.xlu0 %2593, %v3381_v29   ;;  %706 = vperm.xlu1 %2594, %v3384_v30  }
  0xc3   : > { %2459 = vmatpush3.bf16.xpose.msra.mxu0 %v2606_v13  ;;  %2495 = vmatpush3.bf16.xpose.msra.mxu1 %v2606_v13 }
  0xc4   : > { %2460 = vmatprep.subr.bf16.mxu0 %v2607_v14  ;;  %2488 = vmatprep.subr.bf16.mxu1 %v2607_v14 }
  0xc6   : > { %711 = vperm.xlu0 %2593, %v3389_v31   ;;  %716 = vperm.xlu1 %2594, %v3392_v32  }
  0xca   : > { %721 = vperm.xlu0 %2593, %v3397_v35   ;;  %726 = vperm.xlu1 %2594, %v3400_v36  }
  0xcb   : > { %2461 = vmatpush3.bf16.xpose.msra.mxu0 %v2608_v21  ;;  %2496 = vmatpush3.bf16.xpose.msra.mxu1 %v2608_v21 }
  0xcc   : > { %2462 = vmatprep.subr.bf16.mxu0 %v2609_v22  ;;  %2489 = vmatprep.subr.bf16.mxu1 %v2609_v22 }
  0xd3   : > { %2463 = vmatpush3.bf16.xpose.msra.mxu0 %v2610_v27  ;;  %2497 = vmatpush3.bf16.xpose.msra.mxu1 %v2610_v27 }
  0xd4   : > { %2464 = vmatprep.subr.bf16.mxu0 %v2611_v28  ;;  %2490 = vmatprep.subr.bf16.mxu1 %v2611_v28 }
  0xdb   : > { %2465 = vmatpush3.bf16.xpose.msra.mxu0 %v2612_v33  ;;  %2498 = vmatpush3.bf16.xpose.msra.mxu1 %v2612_v33 }
  0xdc   : > { %2466 = vmatprep.subr.bf16.mxu0 %v2613_v34  ;;  %2491 = vmatprep.subr.bf16.mxu1 %v2613_v34 }
  0xe3   : > { %2467 = vmatpush3.bf16.xpose.msra.mxu0 %v2614_v37  ;;  %2499 = vmatpush3.bf16.xpose.msra.mxu1 %v2614_v37 }
  0xea   : > { %2469 = vmatmul.mubr.bf16.vlgmr.msra.gmra.mrb[0].mxu0 %v3333_v11  ;;  %2477 = vmatmul.mubr.bf16.vlgmr.msra.gmra.mrb[0].mxu1 %v3336_v12 }
  0xeb   : > { %2470 = vmatprep.mubr.bf16.mxu0 %v2617_v38  ;;  %2478 = vmatprep.mubr.bf16.mxu1 %v2618_v39 }
  0xf2   : > { %2471 = vmatmul.mubr.bf16.gmra.mrb[4].mxu0 %v2617_v38  ;;  %2479 = vmatmul.mubr.bf16.gmra.mrb[4].mxu1 %v2618_v39 }
  0xf3   : > { %2472 = vmatprep.mubr.bf16.mxu0 %v2619_v40  ;;  %2480 = vmatprep.mubr.bf16.mxu1 %v2620_v41 }
  0xfa   : > { %2473 = vmatmul.mubr.bf16.gmra.mrb[8].mxu0 %v2619_v40  ;;  %2481 = vmatmul.mubr.bf16.gmra.mrb[8].mxu1 %v2620_v41 }
  0xfb   : > { %2474 = vmatprep.mubr.bf16.mxu0 %v2621_v42  ;;  %2482 = vmatprep.mubr.bf16.mxu1 %v2622_v43 }
 0x102   : > { %2475 = vmatmul.mubr.bf16.gmra.mrb[12].mxu0 %v2621_v42  ;;  %2483 = vmatmul.mubr.bf16.gmra.mrb[12].mxu1 %v2622_v43 }
 0x12d   : > { %v652_v44 = vpop.permute.xlu0 %651  ;;  %v3414_v46 = vpop.permute.xlu1 %661 }
 0x131   : > { %v3412_v45 = vpop.permute.xlu0 %656  ;;  %v3418_v48 = vpop.permute.xlu1 %666 }
 0x135   : > { %v3416_v47 = vpop.permute.xlu0 %671  ;;  %v3425_v52 = vpop.permute.xlu1 %676 }
 0x139   : > { %v3423_v51 = vpop.permute.xlu0 %681  ;;  %v3433_v57 = vpop.permute.xlu1 %686 }
 0x13d   : > { %v692_v56 = vpop.permute.xlu0 %691  ;;  %v697_v12 = vpop.permute.xlu1 %696 }
 0x1bd   : > { %v552_v59 = vpop.f32.mrb[0].mxu0  ;;  %v592_v60 = vpop.f32.mrb[0].mxu1 }
 0x1be   : > { %v729_v61 = vsub.f32 %v552_v59, %v652_v44  ;;  %v745_v62 = vsub.f32 %v592_v60, %v692_v56  ;;  %v554_v63 = vpop.f32.mrb[1].mxu0  ;;  %v594_v1 = vpop.f32.mrb[1].mxu1  ;;  %v804_v8 = vsub.f32 %v552_v59, %v3436_v58  ;;  %v820_v10 = vsub.f32 %v592_v60, %v3436_v58 }
 0x1bf   : > { %v730_v2 = vsub.f32 %v554_v63, %v652_v44  ;;  %v746_v3 = vsub.f32 %v594_v1, %v692_v56  ;;  %v556_v4 = vpop.f32.mrb[2].mxu0  ;;  %v596_v6 = vpop.f32.mrb[2].mxu1  ;;  %v805_v13 = vsub.f32 %v554_v63, %v3439_v0  ;;  %v821_v21 = vsub.f32 %v594_v1, %v3439_v0 }
 0x1c0   : > { %v3441_v7 = vmul.f32 14.285714, %v729_v61  ;;  %v3444_v9 = vmul.f32 14.285714, %v745_v62  ;;  %v731_v22 = vsub.f32 %v556_v4, %v3412_v45  ;;  %v806_v27 = vsub.f32 %v556_v4, %v3436_v58  ;;  %v558_v28 = vpop.f32.mrb[3].mxu0  ;;  %v598_v33 = vpop.f32.mrb[3].mxu1 }
 0x1c1   : > { %v3447_v11 = vmul.f32 14.285714, %v730_v2  ;;  %v3450_v14 = vmul.f32 14.285714, %v746_v3  ;;  %v3457_v37 = vmul.f32 14.285714, %v804_v8  ;;  %v747_v38 = vsub.f32 %v596_v6, %v697_v12  ;;  %v702_v56 = vpop.permute.xlu0 %701 }
 0x1c2   : > { %4777 = vst [vmem:[#allocation35_spill] sm:$0xff] %v3441_v7  ;;  %4778 = vst [vmem:[#allocation36_spill] sm:$0xff] %v3444_v9  ;;  %v822_v39 = vsub.f32 %v596_v6, %v3436_v58  ;;  %v3460_v40 = vmul.f32 14.285714, %v820_v10  ;;  %v732_v41 = vsub.f32 %v558_v28, %v3412_v45  ;;  %v807_v42 = vsub.f32 %v558_v28, %v3439_v0 }
 0x1c3   : > { %4779 = vst [vmem:[#allocation37_spill] sm:$0xff] %v3447_v11  ;;  %4780 = vst [vmem:[#allocation38_spill] sm:$0xff] %v3450_v14  ;;  %v940_v34 = vmax.f32 %v3441_v7, %v3447_v11  ;;  %v964_v43 = vmax.f32 %v3444_v9, %v3450_v14  ;;  %v3466_v59 = vmul.f32 14.285714, %v805_v13  ;;  %v3468_v60 = vmul.f32 14.285714, %v821_v21 }
 0x1c4   : > { %4781 = vst [vmem:[#allocation39_spill] sm:$0xff] %v3457_v37  ;;  %4782 = vst [vmem:[#allocation40_spill] sm:$0xff] %v3460_v40  ;;  %v748_v61 = vsub.f32 %v598_v33, %v697_v12  ;;  %v823_v62 = vsub.f32 %v598_v33, %v3439_v0  ;;  %v3471_v63 = vmul.f32 14.285714, %v731_v22  ;;  %v3473_v1 = vmul.f32 14.285714, %v806_v27 }
 0x1c5   : > { %v602_v44 = vpop.f32.mrb[4].mxu1  ;;  %941 = vmax.xlane.f32.xlu0 %v940_v34  ;;  %v562_v54 = vpop.f32.mrb[4].mxu0  ;;  %4783 = vst [vmem:[#allocation41_spill] sm:$0xff] %v3466_v59  ;;  %4784 = vst [vmem:[#allocation42_spill] sm:$0xff] %v3468_v60  ;;  %965 = vmax.xlane.f32.xlu1 %v964_v43  ;;  %v3476_v6 = vmul.f32 14.285714, %v747_v38 }
 0x1c6   : > { %4785 = vst [vmem:[#allocation43_spill] sm:$0xff] %v3471_v63  ;;  %4786 = vst [vmem:[#allocation44_spill] sm:$0xff] %v3473_v1  ;;  %v749_v45 = vsub.f32 %v602_v44, %v702_v56  ;;  %v733_v2 = vsub.f32 %v562_v54, %v3414_v46  ;;  %v564_v3 = vpop.f32.mrb[5].mxu0  ;;  %v604_v4 = vpop.f32.mrb[5].mxu1  ;;  %v3478_v8 = vmul.f32 14.285714, %v822_v39  ;;  %v808_v10 = vsub.f32 %v562_v54, %v3436_v58 }
 0x1c7   : > { %4787 = vst [vmem:[#allocation45_spill] sm:$0xff] %v3476_v6  ;;  %v809_v12 = vsub.f32 %v564_v3, %v3439_v0  ;;  %v566_v13 = vpop.f32.mrb[6].mxu0  ;;  %v606_v21 = vpop.f32.mrb[6].mxu1  ;;  %v3482_v22 = vmul.f32 14.285714, %v732_v41  ;;  %v734_v28 = vsub.f32 %v564_v3, %v3414_v46  ;;  %v750_v33 = vsub.f32 %v604_v4, %v702_v56 }
 0x1c8   : > { %4788 = vst [vmem:[#allocation46_spill] sm:$0xff] %v3478_v8  ;;  %v3484_v27 = vmul.f32 14.285714, %v807_v42  ;;  %v707_v34 = vpop.permute.xlu1 %706  ;;  %v3487_v43 = vmul.f32 14.285714, %v748_v61  ;;  %v824_v39 = vsub.f32 %v602_v44, %v3436_v58  ;;  %v825_v54 = vsub.f32 %v604_v4, %v3439_v0  ;;  %v568_v42 = vpop.f32.mrb[7].mxu0 }
 0x1c9   : > { %4789 = vst [vmem:[#allocation47_spill] sm:$0xff] %v3482_v22  ;;  %v3489_v38 = vmul.f32 14.285714, %v823_v62  ;;  %v3493_v5 = vmul.f32 14.285714, %v749_v45  ;;  %v735_v41 = vsub.f32 %v566_v13, %v3418_v48  ;;  %v608_v55 = vpop.f32.mrb[7].mxu1  ;;  %v810_v56 = vsub.f32 %v566_v13, %v3436_v58 }
 0x1ca   : > { %4790 = vst [vmem:[#allocation48_spill] sm:$0xff] %v3484_v27  ;;  %4791 = vst [vmem:[#allocation49_spill] sm:$0xff] %v3487_v43  ;;  %v3495_v49 = vmul.f32 14.285714, %v733_v2  ;;  %v3498_v53 = vmul.f32 14.285714, %v808_v10  ;;  %v751_v61 = vsub.f32 %v606_v21, %v707_v34  ;;  %v826_v14 = vsub.f32 %v606_v21, %v3436_v58 }
 0x1cb   : > { %4792 = vst [vmem:[#allocation50_spill] sm:$0xff] %v3489_v38  ;;  %4793 = vst [vmem:[#allocation51_spill] sm:$0xff] %v3493_v5  ;;  %v3500_v46 = vmul.f32 14.285714, %v809_v12  ;;  %v3503_v62 = vmul.f32 14.285714, %v734_v28  ;;  %v967_v10 = vmax.f32 %v3476_v6, %v3487_v43  ;;  %v736_v13 = vsub.f32 %v568_v42, %v3418_v48 }
 0x1cc   : > { %4794 = vst [vmem:[#allocation52_spill] sm:$0xff] %v3495_v49  ;;  %4795 = vst [vmem:[#allocation53_spill] sm:$0xff] %v3498_v53  ;;  %v3505_v44 = vmul.f32 14.285714, %v750_v33  ;;  %v3507_v4 = vmul.f32 14.285714, %v824_v39  ;;  %v811_v28 = vsub.f32 %v568_v42, %v3439_v0  ;;  %v943_v33 = vmax.f32 %v3471_v63, %v3482_v22 }
 0x1cd   : > { %4796 = vst [vmem:[#allocation54_spill] sm:$0xff] %v3500_v46  ;;  %4797 = vst [vmem:[#allocation55_spill] sm:$0xff] %v3503_v62  ;;  %v612_v3 = vpop.f32.mrb[8].mxu1  ;;  %v572_v45 = vpop.f32.mrb[8].mxu0  ;;  %v3509_v2 = vmul.f32 14.285714, %v825_v54  ;;  %v1693_v21 = vmax.f32 %v3457_v37, %v3498_v53  ;;  %v1714_v54 = vmax.f32 %v3466_v59, %v3500_v46  ;;  %968 = vmax.xlane.f32.xlu0 %v967_v10 }
 0x1ce   : > { %4798 = vst [vmem:[#allocation56_spill] sm:$0xff] %v3505_v44  ;;  %4799 = vst [vmem:[#allocation57_spill] sm:$0xff] %v3507_v4  ;;  %v574_v12 = vpop.f32.mrb[9].mxu0  ;;  %v614_v9 = vpop.f32.mrb[9].mxu1  ;;  %v3514_v11 = vmul.f32 14.285714, %v735_v41  ;;  %v752_v6 = vsub.f32 %v608_v55, %v707_v34  ;;  %944 = vmax.xlane.f32.xlu1 %v943_v33  ;;  %v970_v22 = vmax.f32 %v3493_v5, %v3505_v44 }
 0x1cf   : > { %4800 = vst [vmem:[#allocation58_spill] sm:$0xff] %v3509_v2  ;;  %v576_v39 = vpop.f32.mrb[10].mxu0  ;;  %v3520_v7 = vpop.f32.mrb[10].mxu1  ;;  %v3526_v43 = vmul.f32 14.285714, %v810_v56  ;;  %v946_v53 = vmax.f32 %v3495_v49, %v3503_v62  ;;  %v812_v37 = vsub.f32 %v572_v45, %v3436_v58  ;;  %v738_v10 = vsub.f32 %v574_v12, %v3416_v47 }
 0x1d0   : > { %v3528_v41 = vmul.f32 14.285714, %v751_v61  ;;  %v3530_v48 = vpop.f32.mrb[11].mxu0  ;;  %v3532_v42 = vpop.f32.mrb[11].mxu1  ;;  %v3539_v56 = vmul.f32 14.285714, %v826_v14  ;;  %v737_v61 = vsub.f32 %v572_v45, %v3416_v47  ;;  %v813_v59 = vsub.f32 %v574_v12, %v3439_v0 }
 0x1d1   : > { %4801 = vst [vmem:[#allocation59_spill] sm:$0xff] %v3526_v43  ;;  %v712_v46 = vpop.permute.xlu0 %711  ;;  %v3544_v63 = vmul.f32 14.285714, %v736_v13  ;;  %v3546_v34 = vmul.f32 14.285714, %v811_v28  ;;  %v827_v33 = vsub.f32 %v608_v55, %v3439_v0  ;;  %v717_v5 = vpop.permute.xlu1 %716  ;;  %v1694_v62 = vmax.f32 %v3473_v1, %v3526_v43  ;;  %947 = vmax.xlane.f32.xlu0 %v946_v53 }
 0x1d2   : > { %4802 = vst [vmem:[#allocation60_spill] sm:$0xff] %v3539_v56  ;;  %v753_v44 = vsub.f32 %v612_v3, %v712_v46  ;;  %v828_v14 = vsub.f32 %v612_v3, %v3436_v58  ;;  %v3552_v49 = vmul.f32 14.285714, %v812_v37  ;;  %v754_v45 = vsub.f32 %v614_v9, %v712_v46  ;;  %971 = vmax.xlane.f32.xlu1 %v970_v22 }
 0x1d3   : > { %4803 = vst [vmem:[#allocation61_spill] sm:$0xff] %v3544_v63  ;;  %4804 = vst [vmem:[#allocation62_spill] sm:$0xff] %v3546_v34  ;;  %v3554_v47 = vmul.f32 14.285714, %v752_v6  ;;  %v3556_v12 = vmul.f32 14.285714, %v813_v59  ;;  %v829_v13 = vsub.f32 %v614_v9, %v3439_v0  ;;  %v814_v55 = vsub.f32 %v576_v39, %v3436_v58 }
 0x1d4   : > { %4805 = vst [vmem:[#allocation63_spill] sm:$0xff] %v3552_v49  ;;  %v3560_v24 = vmul.f32 14.285714, %v737_v61  ;;  %v3562_v43 = vmul.f32 14.285714, %v738_v10  ;;  %v739_v53 = vsub.f32 %v576_v39, %v3425_v52  ;;  %v755_v37 = vsub.f32 %v3520_v7, %v717_v5 }
 0x1d5   : > { %4806 = vst [vmem:[#allocation64_spill] sm:$0xff] %v3554_v47  ;;  %4807 = vst [vmem:[#allocation65_spill] sm:$0xff] %v3556_v12  ;;  %v622_v28 = vpop.f32.mrb[12].mxu1  ;;  %v582_v36 = vpop.f32.mrb[12].mxu0  ;;  %v1715_v59 = vmax.f32 %v3484_v27, %v3546_v34  ;;  %v3570_v22 = vmul.f32 14.285714, %v827_v33  ;;  %v815_v3 = vsub.f32 %v3530_v48, %v3439_v0  ;;  %v1695_v1 = vmax.f32 %v1693_v21, %v3552_v49 }
 0x1d6   : > { %4808 = vst [vmem:[#allocation66_spill] sm:$0xff] %v3560_v24  ;;  %4809 = vst [vmem:[#allocation67_spill] sm:$0xff] %v3562_v43  ;;  %v584_v46 = vpop.f32.mrb[13].mxu0  ;;  %v3566_v6 = vpop.f32.mrb[13].mxu1  ;;  %v3572_v9 = vmul.f32 14.285714, %v753_v44  ;;  %v949_v34 = vmax.f32 %v3514_v11, %v3544_v63  ;;  %v1716_v27 = vmax.f32 %v1714_v54, %v3556_v12  ;;  %v952_v49 = vmax.f32 %v3560_v24, %v3562_v43 }
 0x1d7   : > { %4810 = vst [vmem:[#allocation68_spill] sm:$0xff] %v3570_v22  ;;  %v3576_v61 = vpop.f32.mrb[14].mxu0  ;;  %v3578_v10 = vpop.f32.mrb[14].mxu1  ;;  %v3580_v39 = vmul.f32 14.285714, %v828_v14  ;;  %v830_v14 = vsub.f32 %v3520_v7, %v3436_v58  ;;  %v816_v7 = vsub.f32 %v582_v36, %v3436_v58  ;;  %v742_v43 = vsub.f32 %v584_v46, %v3423_v51 }
 0x1d8   : > { %v3583_v35 = vmul.f32 14.285714, %v754_v45  ;;  %v3587_v33 = vpop.f32.mrb[15].mxu0  ;;  %v3589_v44 = vpop.f32.mrb[15].mxu1  ;;  %v3592_v23 = vmul.f32 14.285714, %v829_v13  ;;  %v740_v45 = vsub.f32 %v3530_v48, %v3425_v52  ;;  %950 = vmax.xlane.f32.xlu0 %v949_v34  ;;  %v756_v13 = vsub.f32 %v3532_v42, %v717_v5  ;;  %953 = vmax.xlane.f32.xlu1 %v952_v49 }
 0x1d9   : > { %4811 = vst [vmem:[#allocation69_spill] sm:$0xff] %v3580_v39  ;;  %v3594_v32 = vmul.f32 14.285714, %v814_v55  ;;  %v3598_v20 = vmul.f32 14.285714, %v739_v53  ;;  %v722_v63 = vpop.permute.xlu0 %721  ;;  %v831_v55 = vsub.f32 %v3532_v42, %v3439_v0  ;;  %v973_v52 = vmax.f32 %v3528_v41, %v3554_v47 }
 0x1da   : > { %4812 = vst [vmem:[#allocation70_spill] sm:$0xff] %v3592_v23  ;;  %v3600_v21 = vmul.f32 14.285714, %v755_v37  ;;  %v3606_v54 = vmul.f32 14.285714, %v815_v3  ;;  %v757_v53 = vsub.f32 %v622_v28, %v722_v63  ;;  %v832_v37 = vsub.f32 %v622_v28, %v3436_v58 }
 0x1db   : > { %4813 = vst [vmem:[#allocation71_spill] sm:$0xff] %v3594_v32  ;;  %v817_v48 = vsub.f32 %v584_v46, %v3439_v0  ;;  %v1696_v34 = vmax.f32 %v1694_v62, %v3594_v32  ;;  %v3617_v3 = vmul.f32 14.285714, %v830_v14  ;;  %v741_v5 = vsub.f32 %v582_v36, %v3423_v51 }
 0x1dc   : > { %4814 = vst [vmem:[#allocation72_spill] sm:$0xff] %v3606_v54  ;;  %v3620_v12 = vmul.f32 14.285714, %v816_v7  ;;  %v3622_v42 = vmul.f32 14.285714, %v740_v45  ;;  %974 = vmax.xlane.f32.xlu0 %v973_v52  ;;  %v818_v49 = vsub.f32 %v3576_v61, %v3436_v58  ;;  %v1717_v24 = vmax.f32 %v1715_v59, %v3606_v54 }
 0x1dd   : > { %4815 = vst [vmem:[#allocation73_spill] sm:$0xff] %v3617_v3  ;;  %v3625_v28 = vmul.f32 14.285714, %v817_v48  ;;  %v3630_v47 = vmul.f32 14.285714, %v756_v13  ;;  %v758_v59 = vsub.f32 %v3566_v6, %v722_v63  ;;  %v819_v13 = vsub.f32 %v3587_v33, %v3439_v0 }
 0x1de   : > { %4816 = vst [vmem:[#allocation74_spill] sm:$0xff] %v3620_v12  ;;  %v3632_v62 = vmul.f32 14.285714, %v831_v55  ;;  %v1697_v36 = vmax.f32 %v1695_v1, %v3620_v12  ;;  %v3635_v14 = vmul.f32 14.285714, %v757_v53  ;;  %v833_v48 = vsub.f32 %v3566_v6, %v3439_v0 }
 0x1df   : > { %4817 = vst [vmem:[#allocation75_spill] sm:$0xff] %v3625_v28  ;;  %v3637_v45 = vmul.f32 14.285714, %v832_v37  ;;  %v1718_v7 = vmax.f32 %v1716_v27, %v3625_v28  ;;  %v3640_v51 = vmul.f32 14.285714, %v818_v49  ;;  %v834_v27 = vsub.f32 %v3578_v10, %v3436_v58 }
 0x1e0   : > { %4818 = vst [vmem:[#allocation76_spill] sm:$0xff] %v3632_v62  ;;  %v3642_v46 = vmul.f32 14.285714, %v741_v5  ;;  %v1699_v52 = vmax.f32 %v1697_v36, %v3460_v40  ;;  %v3648_v55 = vmul.f32 14.285714, %v742_v43  ;;  %v743_v63 = vsub.f32 %v3576_v61, %v3433_v57 }
 0x1e1   : > { %4819 = vst [vmem:[#allocation77_spill] sm:$0xff] %v3637_v45  ;;  %4820 = vst [vmem:[#allocation78_spill] sm:$0xff] %v3640_v51  ;;  %v1720_v1 = vmax.f32 %v1718_v7, %v3468_v60  ;;  %v1698_v53 = vmax.f32 %v1696_v34, %v3640_v51  ;;  %v3659_v5 = vmul.f32 14.285714, %v819_v13  ;;  %v744_v49 = vsub.f32 %v3587_v33, %v3433_v57 }
 0x1e2   : > { %v1701_v37 = vmax.f32 %v1699_v52, %v3507_v4  ;;  %v976_v34 = vmax.f32 %v3572_v9, %v3583_v35  ;;  %v955_v58 = vmax.f32 %v3598_v20, %v3622_v42  ;;  %v3668_v36 = vmul.f32 14.285714, %v758_v59  ;;  %v727_v52 = vpop.permute.xlu1 %726 }
 0x1e3   : > { %4821 = vst [vmem:[#allocation79_spill] sm:$0xff] %v3659_v5  ;;  %v1700_v43 = vmax.f32 %v1698_v53, %v3478_v8  ;;  %v1722_v6 = vmax.f32 %v1720_v1, %v3509_v2  ;;  %v1719_v7 = vmax.f32 %v1717_v24, %v3659_v5  ;;  %v835_v61 = vsub.f32 %v3589_v44, %v3439_v0  ;;  %v4854_v8 = vld [vmem:[#allocation55_spill] sm:$0xff] }
 0x1e4   : > { %v3674_v13 = vmul.f32 14.285714, %v834_v27  ;;  %v1703_v33 = vmax.f32 %v1701_v37, %v3580_v39  ;;  %977 = vmax.xlane.f32.xlu1 %v976_v34  ;;  %956 = vmax.xlane.f32.xlu0 %v955_v58  ;;  %v958_v59 = vmax.f32 %v3642_v46, %v3648_v55  ;;  %v3680_v53 = vmul.f32 14.285714, %v743_v63 }
 0x1e5   : > { %v1702_v57 = vmax.f32 %v1700_v43, %v3539_v56  ;;  %v759_v1 = vsub.f32 %v3578_v10, %v727_v52  ;;  %v1721_v24 = vmax.f32 %v1719_v7, %v3489_v38  ;;  %v760_v0 = vsub.f32 %v3589_v44, %v727_v52  ;;  %v4853_v56 = vld [vmem:[#allocation52_spill] sm:$0xff] }
 0x1e6   : > { %4822 = vst [vmem:[#allocation80_spill] sm:$0xff] %v3674_v13  ;;  %v3686_v2 = vmul.f32 14.285714, %v744_v49  ;;  %v979_v37 = vmax.f32 %v3600_v21, %v3630_v47  ;;  %v3690_v43 = vmul.f32 14.285714, %v833_v48  ;;  %v1724_v34 = vmax.f32 %v1722_v6, %v3592_v23 }
 0x1e7   : > { %v1704_v27 = vmax.f32 %v1702_v57, %v3617_v3  ;;  %v3693_v58 = vmul.f32 14.285714, %v835_v61  ;;  %v1723_v63 = vmax.f32 %v1721_v24, %v3570_v22  ;;  %v3045_v10 = vmov 0   ;;  %v4852_v22 = vld [vmem:[#allocation56_spill] sm:$0xff] }
 0x1e8   : > { %4823 = vst [vmem:[#allocation81_spill] sm:$0xff] %v3690_v43  ;;  %2595 = vset.pattern.permute.xlu1 %v3045_v10  ;;  %2596 = vset.pattern.permute.xlu0 %v3045_v10  ;;  %v1705_v44 = vmax.f32 %v1703_v33, %v3637_v45  ;;  %v3698_v49 = vmul.f32 14.285714, %v759_v1  ;;  %v3701_v57 = vmul.f32 14.285714, %v760_v0  ;;  %v982_v6 = vmax.f32 %v3635_v14, %v3668_v36 }
 0x1e9   : > { %4824 = vst [vmem:[#allocation82_spill] sm:$0xff] %v3693_v58  ;;  %v1706_v7 = vmax.f32 %v1704_v27, %v3674_v13  ;;  %980 = vmax.xlane.f32.xlu0 %v979_v37  ;;  %959 = vmax.xlane.f32.xlu1 %v958_v59  ;;  %v1725_v48 = vmax.f32 %v1723_v63, %v3632_v62  ;;  %v3046_v10 = vmov 1966171168  }
 0x1ea   : > { %v961_v61 = vmax.f32 %v3680_v53, %v3686_v2  ;;  %v1726_v24 = vmax.f32 %v1724_v34, %v3690_v43  ;;  %v985_v37 = vmax.f32 %v3698_v49, %v3701_v57 }
 0x1eb   : > { %v1707_v52 = vmax.f32 %v1705_v44, %v1706_v7  ;;  %v1727_v33 = vmax.f32 %v1725_v48, %v3693_v58  ;;  %v1673_v44 = vunpack.c.l.s4 %v3046_v10 }
 0x1ed   : > { %v1708_v27 = vrot.slane %v1707_v52, 4  ;;  %983 = vmax.xlane.f32.xlu1 %v982_v6  ;;  %962 = vmax.xlane.f32.xlu0 %v961_v61  ;;  %v1728_v59 = vmax.f32 %v1726_v24, %v1727_v33  ;;  %v1674_v34 = vunpack.c.0.s8 %v1673_v44  ;;  %v3715_v33 = vld [vmem:[#allocation2] sm:$0x3] }
 0x1ee   : > { %4826 = vst [vmem:[#allocation84_spill] sm:$0xff] %v3715_v33 }
 0x1ef   : > { %v1709_v1 = vmax.f32 %v1707_v52, %v1708_v27  ;;  %v1729_v0 = vrot.slane %v1728_v59, 4  ;;  %v3712_v6 = vsub.s32 %v1674_v34, %v3421_v50 }
 0x1f1   : > { %v1710_v63 = vrot.slane %v1709_v1, 2  ;;  %986 = vmax.xlane.f32.xlu0 %v985_v37  ;;  %v1730_v7 = vmax.f32 %v1728_v59, %v1729_v0  ;;  %4825 = vst [vmem:[#allocation83_spill] sm:$0xff] %v3712_v6  ;;  %v4827_v59 = vlaneseq }
 0x1f3   : > { %v1711_v13 = vmax.f32 %v1709_v1, %v1710_v63  ;;  %v1731_v45 = vrot.slane %v1730_v7, 2  ;;  %vm3719_vm2 = vcmp.lt.s32.totalorder %v4827_v59, 256  ;;  %v4828_v1 = vmov 0 }
 0x1f4   : > { %v4829_v1 = vsel %vm3719_vm2, 4294967295, %v4828_v1 }
 0x1f5   : > { %v1712_v62 = vrot.slane %v1711_v13, 1  ;;  %v1732_v43 = vmax.f32 %v1730_v7, %v1731_v45  ;;  %4830 = vst [vmem:[#allocation85_spill] sm:$0xff] %v4829_v1  ;;  %v4834_v45 = vld [vmem:[#allocation28_spill] sm:$0xff] }
 0x1f7   : > { %v1713_v48 = vmax.f32 %v1711_v13, %v1712_v62  ;;  %v1733_v58 = vrot.slane %v1732_v43, 1 }
 0x1f9   : > { %v1734_v52 = vmax.f32 %v1732_v43, %v1733_v58 }
 0x1fb   : > { %v1737_v61 = vcombine.low %v1713_v48, %v1734_v52 }
 0x1fd   : > { %v1744_v24 = vrot.slane %v1737_v61, %v3712_v6 }
 0x1ff   : > { %v1751_v27 = vrot.slane %v1744_v24, %v3712_v6 }
 0x201   : > { %v3724_v62 = vmax.f32 %v3715_v33, %v1751_v27 }
 0x203   : > { %4831 = vst [vmem:[#allocation86_spill] sm:$0xff] %v3724_v62  ;;  %2193 = vst.msk [vmem:[#allocation2] sm:$0x3] %vm3719_vm2, %v3724_v62 }
 0x252   : > { %v942_v13 = vpop.xlane.xlu0 %941  ;;  %v966_v58 = vpop.xlane.xlu1 %965 }
 0x253   : > { %v988_v43 = vmax.f32 %v942_v13, %v3341_v15  ;;  %v996_v37 = vmax.f32 %v966_v58, %v3373_v25 }
 0x255   : > { %1472 = vst.msk [vmem:[%s3326_s27] sm:$0xff] %vm1471_vm3, %v988_v43  ;;  %1006 = vperm.xlu1 %2595, %v988_v43   ;;  %1480 = vst.msk [vmem:[%s3326_s27 + $0x40] sm:$0xff] %vm1471_vm3, %v996_v37  ;;  %1789 = vrot.lane.b32.xlu0 %v996_v37, %s3047_s28  ;;  %v1292_v63 = vsub.f32 %v3341_v15, %v988_v43  ;;  %v1300_v48 = vsub.f32 %v3373_v25, %v996_v37 }
 0x257   : > { %v1308_v52 = vmul.f32 1.442695, %v1292_v63  ;;  %v1324_v25 = vmul.f32 1.442695, %v1300_v48 }
 0x259   : > { %1046 = vperm.xlu1 %2595, %v996_v37   ;;  %2623 = vpow2.f32 %v1308_v52 }
 0x25a   : > { %v969_v0 = vpop.xlane.xlu0 %968  ;;  %2625 = vpow2.f32 %v1324_v25  ;;  %v4832_v25 = vld [vmem:[#allocation27_spill] sm:$0xff] }
 0x25b   : > { %v997_v10 = vmax.f32 %v969_v0, %v3376_v26  ;;  %v945_v44 = vpop.xlane.xlu1 %944 }
 0x25c   : > { %v989_v7 = vmax.f32 %v945_v44, %v3349_v17 }
 0x25d   : > { %1773 = vrot.lane.b32.xlu1 %v988_v43, %s3047_s28  ;;  %1481 = vst.msk [vmem:[%s3326_s27 + $0x48] sm:$0xff] %vm1471_vm3, %v997_v10 }
 0x25e   : > { %1473 = vst.msk [vmem:[%s3326_s27 + $0x8] sm:$0xff] %vm1471_vm3, %v989_v7  ;;  %1011 = vperm.xlu0 %2596, %v989_v7   ;;  %v948_v34 = vpop.xlane.xlu0 %947  ;;  %v1293_v44 = vsub.f32 %v3349_v17, %v989_v7 }
 0x25f   : > { %v972_v61 = vpop.xlane.xlu1 %971  ;;  %v3748_v24 = vmax.f32 %v948_v34, %v3344_v16 }
 0x260   : > { %v3751_v15 = vmax.f32 %v972_v61, %v3381_v29 }
 0x261   : > { %1051 = vperm.xlu1 %2595, %v997_v10   ;;  %1474 = vst.msk [vmem:[%s3326_s27 + $0x10] sm:$0xff] %vm1471_vm3, %v3748_v24 }
 0x262   : > { %1482 = vst.msk [vmem:[%s3326_s27 + $0x50] sm:$0xff] %vm1471_vm3, %v3751_v15  ;;  %1775 = vrot.lane.b32.xlu0 %v989_v7, %s3047_s28 }
 0x263   : > { %v2624_v63 = vpop.eup %2623 }
 0x264   : > { %v2626_v52 = vpop.eup %2625 }
 0x265   : > { %1791 = vrot.lane.b32.xlu1 %v997_v10, %s3047_s28  ;;  %v951_v27 = vpop.xlane.xlu0 %950  ;;  %v954_v43 = vpop.xlane.xlu1 %953 }
 0x266   : > { %v3762_v13 = vmax.f32 %v951_v27, %v3352_v18  ;;  %1056 = vperm.xlu0 %2596, %v3751_v15   ;;  %v3770_v58 = vmax.f32 %v954_v43, %v3357_v19  ;;  %v1301_v43 = vsub.f32 %v3376_v26, %v997_v10 }
 0x268   : > { %1475 = vst.msk [vmem:[%s3326_s27 + $0x18] sm:$0xff] %vm1471_vm3, %v3762_v13  ;;  %1476 = vst.msk [vmem:[%s3326_s27 + $0x20] sm:$0xff] %vm1471_vm3, %v3770_v58  ;;  %v1326_v26 = vmul.f32 1.442695, %v1301_v43 }
 0x269   : > { %1016 = vperm.xlu1 %2595, %v3748_v24   ;;  %v975_v37 = vpop.xlane.xlu0 %974 }
 0x26a   : > { %v999_v0 = vmax.f32 %v975_v37, %v3384_v30  ;;  %1793 = vrot.lane.b32.xlu0 %v3751_v15, %s3047_s28  ;;  %v1310_v37 = vmul.f32 1.442695, %v1293_v44 }
 0x26c   : > { %1483 = vst.msk [vmem:[%s3326_s27 + $0x58] sm:$0xff] %vm1471_vm3, %v999_v0  ;;  %2627 = vpow2.f32 %v1310_v37  ;;  %v1303_v43 = vsub.f32 %v3384_v30, %v999_v0 }
 0x26d   : > { %1777 = vrot.lane.b32.xlu1 %v3748_v24, %s3047_s28  ;;  %2629 = vpow2.f32 %v1326_v26 }
 0x26e   : > { %1356 = vrot.lane.b32.xlu0 %v2624_v63, %s3048_s11  ;;  %v4833_v63 = vld [vmem:[#allocation30_spill] sm:$0xff] }
 0x271   : > { %1021 = vperm.xlu1 %2595, %v3762_v13   ;;  %v978_v34 = vpop.xlane.xlu1 %977  ;;  %v957_v48 = vpop.xlane.xlu0 %956 }
 0x272   : > { %v3786_v61 = vmax.f32 %v978_v34, %v3389_v31  ;;  %v3789_v27 = vmax.f32 %v957_v48, %v4832_v25  ;;  %1372 = vrot.lane.b32.xlu0 %v2626_v52, %s3048_s11  ;;  %v4835_v52 = vld [vmem:[#allocation31_spill] sm:$0xff] }
 0x274   : > { %1484 = vst.msk [vmem:[%s3326_s27 + $0x60] sm:$0xff] %vm1471_vm3, %v3786_v61  ;;  %1477 = vst.msk [vmem:[%s3326_s27 + $0x28] sm:$0xff] %vm1471_vm3, %v3789_v27 }
 0x275   : > { %1061 = vperm.xlu1 %2595, %v999_v0  }
 0x276   : > { %v981_v17 = vpop.xlane.xlu0 %980  ;;  %v960_v7 = vpop.xlane.xlu1 %959  ;;  %1066 = vperm.xlu0 %2596, %v3786_v61  }
 0x277   : > { %v1001_v34 = vmax.f32 %v981_v17, %v4833_v63  ;;  %v3801_v48 = vmax.f32 %v960_v7, %v4834_v45  ;;  %v4836_v7 = vld [vmem:[#allocation29_spill] sm:$0xff]  ;;  %v2628_v30 = vpop.eup %2627 }
 0x278   : > { %v2630_v26 = vpop.eup %2629 }
 0x279   : > { %1779 = vrot.lane.b32.xlu1 %v3762_v13, %s3047_s28  ;;  %1485 = vst.msk [vmem:[%s3326_s27 + $0x68] sm:$0xff] %vm1471_vm3, %v1001_v34  ;;  %1478 = vst.msk [vmem:[%s3326_s27 + $0x30] sm:$0xff] %vm1471_vm3, %v3801_v48 }
 0x27a   : > { %v984_v10 = vpop.xlane.xlu1 %983  ;;  %v963_v44 = vpop.xlane.xlu0 %962  ;;  %1781 = vrot.lane.b32.xlu0 %v3770_v58, %s3047_s28 }
 0x27b   : > { %v3812_v17 = vmax.f32 %v984_v10, %v4835_v52  ;;  %v3815_v1 = vmax.f32 %v963_v44, %v4836_v7  ;;  %v4837_v10 = vld [vmem:[#allocation32_spill] sm:$0xff]  ;;  %v1330_v44 = vmul.f32 1.442695, %v1303_v43 }
 0x27d   : > { %1795 = vrot.lane.b32.xlu1 %v999_v0, %s3047_s28  ;;  %1486 = vst.msk [vmem:[%s3326_s27 + $0x70] sm:$0xff] %vm1471_vm3, %v3812_v17  ;;  %1479 = vst.msk [vmem:[%s3326_s27 + $0x38] sm:$0xff] %vm1471_vm3, %v3815_v1  ;;  %v1294_v0 = vsub.f32 %v3344_v16, %v3748_v24  ;;  %2631 = vpow2.f32 %v1330_v44  ;;  %v4838_v24 = vmov 2  }
 0x27e   : > { %v987_v37 = vpop.xlane.xlu0 %986  ;;  %1797 = vrot.lane.b32.xlu0 %v3786_v61, %s3047_s28 }
 0x27f   : > { %v3828_v33 = vmax.f32 %v987_v37, %v4837_v10  ;;  %v1302_v37 = vsub.f32 %v3381_v29, %v3751_v15  ;;  %v1312_v43 = vmul.f32 1.442695, %v1294_v0  ;;  %v1305_v10 = vsub.f32 %v4833_v63, %v1001_v34 }
 0x280   : > { %v1295_v29 = vsub.f32 %v3352_v18, %v3762_v13  ;;  %v1304_v13 = vsub.f32 %v3389_v31, %v3786_v61  ;;  %v1306_v31 = vsub.f32 %v4835_v52, %v3812_v17 }
 0x281   : > { %1026 = vperm.xlu1 %2595, %v3770_v58   ;;  %1487 = vst.msk [vmem:[%s3326_s27 + $0x78] sm:$0xff] %vm1471_vm3, %v3828_v33  ;;  %v1328_v3 = vmul.f32 1.442695, %v1302_v37  ;;  %2633 = vpow2.f32 %v1312_v43  ;;  %v1334_v16 = vmul.f32 1.442695, %v1305_v10  ;;  %v1297_v37 = vsub.f32 %v4832_v25, %v3789_v27 }
 0x282   : > { %1799 = vrot.lane.b32.xlu0 %v1001_v34, %s3047_s28  ;;  %v1336_v10 = vmul.f32 1.442695, %v1306_v31  ;;  %v1299_v25 = vsub.f32 %v4836_v7, %v3815_v1  ;;  %v4839_v7 = vld [vmem:[#allocation35_spill] sm:$0xff] }
 0x283   : > { %2635 = vpow2.f32 %v1328_v3  ;;  %v1314_v3 = vmul.f32 1.442695, %v1295_v29  ;;  %v1318_v43 = vmul.f32 1.442695, %v1297_v37 }
 0x284   : > { %2637 = vpow2.f32 %v1334_v16 }
 0x285   : > { %1358 = vrot.lane.b32.xlu1 %v2628_v30, %s3048_s11  ;;  %2639 = vpow2.f32 %v1314_v3 }
 0x286   : > { %1076 = vperm.xlu0 %2596, %v3812_v17  }
 0x287   : > { %v2632_v44 = vpop.eup %2631 }
 0x289   : > { %1374 = vrot.lane.b32.xlu1 %v2630_v26, %s3048_s11  ;;  %v1332_v26 = vmul.f32 1.442695, %v1304_v13 }
 0x28a   : > { %1785 = vrot.lane.b32.xlu0 %v3801_v48, %s3047_s28 }
 0x28b   : > { %2598 = vset.pattern.permute.xlu0 %v4838_v24  ;;  %v2634_v15 = vpop.eup %2633 }
 0x28d   : > { %1031 = vperm.xlu1 %2595, %v3789_v27   ;;  %v2636_v63 = vpop.eup %2635 }
 0x28e   : > { %1378 = vrot.lane.b32.xlu0 %v2632_v44, %s3048_s11  ;;  %v2638_v30 = vpop.eup %2637  ;;  %v4840_v44 = vld [vmem:[#allocation37_spill] sm:$0xff] }
 0x28f   : > { %v2640_v0 = vpop.eup %2639 }
 0x291   : > { %1071 = vperm.xlu1 %2595, %v1001_v34   ;;  %v1296_v34 = vsub.f32 %v3357_v19, %v3770_v58  ;;  %v1298_v19 = vsub.f32 %v4834_v45, %v3801_v48  ;;  %v1322_v45 = vmul.f32 1.442695, %v1299_v25 }
 0x292   : > { %1787 = vrot.lane.b32.xlu0 %v3815_v1, %s3047_s28 }
 0x293   : > { %v1316_v18 = vmul.f32 1.442695, %v1296_v34  ;;  %v1320_v58 = vmul.f32 1.442695, %v1298_v19 }
 0x295   : > { %1783 = vrot.lane.b32.xlu1 %v3789_v27, %s3047_s28  ;;  %2641 = vpow2.f32 %v1316_v18  ;;  %v4842_v18 = vld [vmem:[#allocation38_spill] sm:$0xff] }
 0x296   : > { %1803 = vrot.lane.b32.xlu0 %v3828_v33, %s3047_s28  ;;  %2643 = vpow2.f32 %v1332_v26  ;;  %v3894_v26 = vand.u32 127, %v4827_v59  ;;  %v4843_v59 = vld [vmem:[#allocation43_spill] sm:$0xff] }
 0x297   : > { %2645 = vpow2.f32 %v1318_v43 }
 0x298   : > { %2647 = vpow2.f32 %v1320_v58 }
 0x299   : > { %1360 = vrot.lane.b32.xlu1 %v2634_v15, %s3048_s11  ;;  %2649 = vpow2.f32 %v1336_v10  ;;  %v3904_v10 = vadd.s32 128, %v3894_v26 }
 0x29a   : > { %1382 = vrot.lane.b32.xlu0 %v2638_v30, %s3048_s11  ;;  %2651 = vpow2.f32 %v1322_v45  ;;  %v4841_v30 = vld [vmem:[#allocation36_spill] sm:$0xff] }
 0x29d   : > { %1376 = vrot.lane.b32.xlu1 %v2636_v63, %s3048_s11 }
 0x29f   : > { %v2642_v61 = vpop.eup %2641 }
 0x2a0   : > { %v2644_v27 = vpop.eup %2643 }
 0x2a1   : > { %1036 = vperm.xlu1 %2595, %v3801_v48   ;;  %v2646_v48 = vpop.eup %2645 }
 0x2a2   : > { %v2648_v52 = vpop.eup %2647 }
 0x2a5   : > { %1801 = vrot.lane.b32.xlu1 %v3812_v17, %s3047_s28  ;;  %v2650_v17 = vpop.eup %2649 }
 0x2a6   : > { %v2652_v16 = vpop.eup %2651 }
 0x2a9   : > { %1362 = vrot.lane.b32.xlu1 %v2640_v0, %s3048_s11  ;;  %v3891_v0 = vstv %s2440_s13 }
 0x2aa   : > { %v887_v31 = vadd.s32 %v3891_v0, %v3421_v50 }
 0x2ac   : > { %vm906_vm4 = vcmp.eq.s32.totalorder %v887_v31, %v3894_v26  ;;  %vm907_vm5 = vcmp.eq.s32.totalorder %v887_v31, %v3904_v10 }
 0x2ad   : > { %1041 = vperm.xlu1 %2595, %v3815_v1  }
 0x2b1   : > { %1081 = vperm.xlu1 %2595, %v3828_v33  }
 0x2b5   : > { %1364 = vrot.lane.b32.xlu1 %v2642_v61, %s3048_s11  ;;  %v878_v61 = vadd.s32 64, %v3421_v50 }
 0x2b6   : > { %2597 = vset.pattern.permute.xlu1 %v4838_v24 }
 0x2b9   : > { %1380 = vrot.lane.b32.xlu1 %v2644_v27, %s3048_s11 }
 0x2bd   : > { %1366 = vrot.lane.b32.xlu1 %v2646_v48, %s3048_s11  ;;  %v4844_v48 = vld [vmem:[#allocation47_spill] sm:$0xff] }
 0x2c1   : > { %1368 = vrot.lane.b32.xlu1 %v2648_v52, %s3048_s11 }
 0x2c5   : > { %1384 = vrot.lane.b32.xlu1 %v2650_v17, %s3048_s11  ;;  %v4845_v17 = vld [vmem:[#allocation45_spill] sm:$0xff] }
 0x2c7   : > { %v3896_v19 = vpop.permute.xlu0 %1789 }
 0x2c9   : > { %1370 = vrot.lane.b32.xlu1 %v2652_v16, %s3048_s11 }
 0x2d4   : > { %v1007_v1 = vpop.permute.xlu1 %1006 }
 0x2d5   : > { %v1084_v24 = vsub.f32 %v4839_v7, %v1007_v1  ;;  %v1085_v29 = vsub.f32 %v4840_v44, %v1007_v1  ;;  %v895_v1 = vadd.s32 %v3891_v0, %v878_v61  ;;  %v871_v61 = vadd.s32 8, %v3421_v50 }
 0x2d7   : > { %v1116_v15 = vmul.f32 1.442695, %v1084_v24  ;;  %v1118_v3 = vmul.f32 1.442695, %v1085_v29  ;;  %v4846_v24 = vld [vmem:[#allocation49_spill] sm:$0xff]  ;;  %vm922_vm6 = vcmp.eq.s32.totalorder %v895_v1, %v3894_v26  ;;  %vm923_vm7 = vcmp.eq.s32.totalorder %v895_v1, %v3904_v10 }
 0x2d8   : > { %v1047_v63 = vpop.permute.xlu1 %1046  ;;  %v888_v38 = vadd.s32 %v3891_v0, %v871_v61 }
 0x2d9   : > { %2653 = vpow2.f32 %v1116_v15  ;;  %v1100_v34 = vsub.f32 %v4841_v30, %v1047_v63  ;;  %v1101_v13 = vsub.f32 %v4842_v18, %v1047_v63 }
 0x2da   : > { %2655 = vpow2.f32 %v1118_v3  ;;  %vm908_vm8 = vcmp.eq.s32.totalorder %v888_v38, %v3894_v26  ;;  %vm909_vm9 = vcmp.eq.s32.totalorder %v888_v38, %v3904_v10  ;;  %v872_v38 = vadd.s32 16, %v3421_v50 }
 0x2db   : > { %v1148_v37 = vmul.f32 1.442695, %v1100_v34  ;;  %v1150_v43 = vmul.f32 1.442695, %v1101_v13 }
 0x2dc   : > { %v3898_v58 = vpop.permute.xlu1 %1773 }
 0x2dd   : > { %2657 = vpow2.f32 %v1148_v37  ;;  %v1012_v25 = vpop.permute.xlu0 %1011 }
 0x2de   : > { %2659 = vpow2.f32 %v1150_v43  ;;  %v1086_v45 = vsub.f32 %v4843_v59, %v1012_v25  ;;  %v1087_v52 = vsub.f32 %v4844_v48, %v1012_v25 }
 0x2e0   : > { %v1052_v27 = vpop.permute.xlu1 %1051  ;;  %v1120_v3 = vmul.f32 1.442695, %v1086_v45  ;;  %v1122_v63 = vmul.f32 1.442695, %v1087_v52 }
 0x2e1   : > { %v1102_v16 = vsub.f32 %v4845_v17, %v1052_v27  ;;  %v1103_v29 = vsub.f32 %v4846_v24, %v1052_v27  ;;  %v3913_v37 = vpop.permute.xlu0 %1775  ;;  %v879_v27 = vadd.s32 72, %v3421_v50 }
 0x2e2   : > { %2661 = vpow2.f32 %v1120_v3  ;;  %v4851_v3 = vld [vmem:[#allocation51_spill] sm:$0xff] }
 0x2e3   : > { %v2654_v15 = vpop.eup %2653  ;;  %v1152_v34 = vmul.f32 1.442695, %v1102_v16  ;;  %v1154_v43 = vmul.f32 1.442695, %v1103_v29  ;;  %2663 = vpow2.f32 %v1122_v63  ;;  %v896_v1 = vadd.s32 %v3891_v0, %v879_v27 }
 0x2e4   : > { %v2656_v13 = vpop.eup %2655  ;;  %v3915_v23 = vpop.permute.xlu1 %1791  ;;  %v3917_v39 = vsel %vm906_vm4, 0.0, %v2654_v15 }
 0x2e5   : > { %4847 = vst [vmem:[#allocation27_spill] sm:$0xff] %v3915_v23  ;;  %4848 = vst [vmem:[#allocation30_spill] sm:$0xff] %v3917_v39  ;;  %v3919_v25 = vsel %vm907_vm5, 0.0, %v2656_v13  ;;  %2665 = vpow2.f32 %v1152_v34  ;;  %v1057_v16 = vpop.permute.xlu0 %1056  ;;  %vm924_vm10 = vcmp.eq.s32.totalorder %v896_v1, %v3894_v26  ;;  %vm925_vm11 = vcmp.eq.s32.totalorder %v896_v1, %v3904_v10 }
 0x2e6   : > { %4849 = vst [vmem:[#allocation28_spill] sm:$0xff] %v3919_v25  ;;  %v1212_v31 = vadd.f32 %v3919_v25, %v3917_v39  ;;  %2667 = vpow2.f32 %v1154_v43  ;;  %v1104_v13 = vsub.f32 %v4851_v3, %v1057_v16  ;;  %v1105_v63 = vsub.f32 %v4852_v22, %v1057_v16 }
 0x2e7   : > { %v2658_v45 = vpop.eup %2657  ;;  %v1537_v62 = vmul.f32 %v3917_v39, %v4839_v7 }
 0x2e8   : > { %v2660_v52 = vpop.eup %2659  ;;  %1213 = vadd.xlane.f32.xlu0 %v1212_v31  ;;  %v1017_v29 = vpop.permute.xlu1 %1016  ;;  %v3927_v15 = vsel %vm922_vm6, 0.0, %v2658_v45  ;;  %v1156_v43 = vmul.f32 1.442695, %v1104_v13  ;;  %v1158_v40 = vmul.f32 1.442695, %v1105_v63  ;;  %v4857_v63 = vld [vmem:[#allocation61_spill] sm:$0xff] }
 0x2e9   : > { %4850 = vst [vmem:[#allocation31_spill] sm:$0xff] %v3927_v15  ;;  %v1088_v4 = vsub.f32 %v4853_v56, %v1017_v29  ;;  %v1089_v60 = vsub.f32 %v4854_v8, %v1017_v29  ;;  %v3934_v34 = vsel %vm923_vm7, 0.0, %v2660_v52  ;;  %v3939_v5 = vpop.permute.xlu0 %1793 }
 0x2ea   : > { %4855 = vst [vmem:[#allocation29_spill] sm:$0xff] %v3934_v34  ;;  %v1236_v45 = vadd.f32 %v3934_v34, %v3927_v15  ;;  %4856 = vst [vmem:[#allocation32_spill] sm:$0xff] %v3939_v5  ;;  %2669 = vpow2.f32 %v1156_v43  ;;  %v1554_v1 = vmul.f32 %v3934_v34, %v4842_v18 }
 0x2eb   : > { %v1124_v31 = vmul.f32 1.442695, %v1088_v4  ;;  %v1126_v51 = vmul.f32 1.442695, %v1089_v60  ;;  %2671 = vpow2.f32 %v1158_v40  ;;  %v880_v60 = vadd.s32 80, %v3421_v50 }
 0x2ec   : > { %v3941_v16 = vpop.permute.xlu1 %1777  ;;  %v2662_v61 = vpop.eup %2661 }
 0x2ed   : > { %1237 = vadd.xlane.f32.xlu1 %v1236_v45  ;;  %2673 = vpow2.f32 %v1124_v31  ;;  %v2664_v4 = vpop.eup %2663  ;;  %v3946_v27 = vpop.permute.xlu0 %1356  ;;  %v3948_v29 = vsel %vm908_vm8, 0.0, %v2662_v61  ;;  %v873_v31 = vadd.s32 24, %v3421_v50  ;;  %v1553_v61 = vmul.f32 %v3927_v15, %v4841_v30 }
 0x2ee   : > { %2675 = vpow2.f32 %v1126_v51  ;;  %v3956_v51 = vsel %vm909_vm9, 0.0, %v2664_v4  ;;  %v1538_v30 = vmul.f32 %v3919_v25, %v4840_v44  ;;  %v889_v15 = vadd.s32 %v3891_v0, %v872_v38 }
 0x2ef   : > { %v2666_v13 = vpop.eup %2665  ;;  %v1593_v34 = vadd.f32 %v1554_v1, %v1553_v61  ;;  %v890_v5 = vadd.s32 %v3891_v0, %v873_v31  ;;  %v1540_v44 = vmul.f32 %v3956_v51, %v4844_v48 }
 0x2f0   : > { %v1022_v52 = vpop.permute.xlu1 %1021  ;;  %v2668_v45 = vpop.eup %2667  ;;  %v3958_v6 = vsel %vm924_vm10, 0.0, %v2666_v13  ;;  %vm910_vm14 = vcmp.eq.s32.totalorder %v889_v15, %v3894_v26  ;;  %vm911_vm15 = vcmp.eq.s32.totalorder %v889_v15, %v3904_v10 }
 0x2f1   : > { %v1090_v40 = vsub.f32 %v3514_v11, %v1022_v52  ;;  %v1091_v43 = vsub.f32 %v4857_v63, %v1022_v52  ;;  %4858 = vst [vmem:[#allocation35_spill] sm:$0xff] %v3958_v6  ;;  %v1215_v52 = vadd.f32 %v3956_v51, %v3948_v29  ;;  %v3966_v54 = vsel %vm925_vm11, 0.0, %v2668_v45  ;;  %v3968_v32 = vpop.permute.xlu0 %1372 }
 0x2f2   : > { %4859 = vst [vmem:[#allocation37_spill] sm:$0xff] %v3966_v54  ;;  %v1239_v4 = vadd.f32 %v3966_v54, %v3958_v6  ;;  %v897_v45 = vadd.s32 %v3891_v0, %v880_v60  ;;  %v1556_v60 = vmul.f32 %v3966_v54, %v4846_v24  ;;  %vm912_vm0 = vcmp.eq.s32.totalorder %v890_v5, %v3894_v26  ;;  %v4227_v54 = vld [vmem:[%s3316_s21 + $0x20] sm:$0xff] }
 0x2f3   : > { %v1128_v28 = vmul.f32 1.442695, %v1090_v40  ;;  %v1130_v12 = vmul.f32 1.442695, %v1091_v43  ;;  %1216 = vadd.xlane.f32.xlu1 %v1215_v52  ;;  %v4860_v40 = vld [vmem:[#allocation64_spill] sm:$0xff]  ;;  %vm913_vm1 = vcmp.eq.s32.totalorder %v890_v5, %v3904_v10 }
 0x2f4   : > { %v1062_v13 = vpop.permute.xlu1 %1061  ;;  %1240 = vadd.xlane.f32.xlu0 %v1239_v4  ;;  %v2670_v23 = vpop.eup %2669  ;;  %vm926_vm12 = vcmp.eq.s32.totalorder %v897_v45, %v3894_v26  ;;  %vm927_vm13 = vcmp.eq.s32.totalorder %v897_v45, %v3904_v10 }
 0x2f5   : > { %2677 = vpow2.f32 %v1128_v28  ;;  %v1106_v18 = vsub.f32 %v3528_v41, %v1062_v13  ;;  %v1107_v43 = vsub.f32 %v4860_v40, %v1062_v13  ;;  %v1539_v28 = vmul.f32 %v3948_v29, %v4843_v59  ;;  %v2672_v52 = vpop.eup %2671  ;;  %v1067_v31 = vpop.permute.xlu0 %1066 }
 0x2f6   : > { %2679 = vpow2.f32 %v1130_v12  ;;  %v1569_v13 = vadd.f32 %v1538_v30, %v1537_v62  ;;  %v1555_v12 = vmul.f32 %v3958_v6, %v4845_v17  ;;  %v881_v59 = vadd.s32 88, %v3421_v50 }
 0x2f7   : > { %v1160_v7 = vmul.f32 1.442695, %v1106_v18  ;;  %v1162_v39 = vmul.f32 1.442695, %v1107_v43  ;;  %v2674_v38 = vpop.eup %2673  ;;  %1594 = vadd.xlane.f32.xlu1 %v1593_v34  ;;  %v1572_v62 = vadd.f32 %v1540_v44, %v1539_v28  ;;  %v1108_v17 = vsub.f32 %v3572_v9, %v1067_v31 }
 0x2f8   : > { %v3985_v25 = vpop.permute.xlu1 %1779  ;;  %v2676_v48 = vpop.eup %2675  ;;  %1570 = vadd.xlane.f32.xlu0 %v1569_v13  ;;  %v1596_v24 = vadd.f32 %v1556_v60, %v1555_v12  ;;  %v4000_v61 = vsel %vm926_vm12, 0.0, %v2670_v23  ;;  %v4002_v1 = vsel %vm927_vm13, 0.0, %v2672_v52  ;;  %v1109_v4 = vsub.f32 %v3583_v35, %v1067_v31  ;;  %v4863_v60 = vld [vmem:[#allocation66_spill] sm:$0xff] }
 0x2f9   : > { %2681 = vpow2.f32 %v1160_v7  ;;  %4861 = vst [vmem:[#allocation36_spill] sm:$0xff] %v4000_v61  ;;  %4862 = vst [vmem:[#allocation38_spill] sm:$0xff] %v4002_v1  ;;  %v4007_v30 = vsel %vm911_vm15, 0.0, %v2676_v48  ;;  %v898_v15 = vadd.s32 %v3891_v0, %v881_v59  ;;  %v1242_v43 = vadd.f32 %v4002_v1, %v4000_v61 }
 0x2fa   : > { %2683 = vpow2.f32 %v1162_v39  ;;  %v4005_v39 = vsel %vm910_vm14, 0.0, %v2674_v38  ;;  %v1557_v23 = vmul.f32 %v4000_v61, %v4851_v3  ;;  %v1558_v45 = vmul.f32 %v4002_v1, %v4852_v22  ;;  %v4864_v3 = vld [vmem:[#allocation67_spill] sm:$0xff] }
 0x2fb   : > { %1573 = vadd.xlane.f32.xlu1 %v1572_v62  ;;  %v1164_v28 = vmul.f32 1.442695, %v1108_v17  ;;  %v1218_v44 = vadd.f32 %v4007_v30, %v4005_v39  ;;  %v1166_v12 = vmul.f32 1.442695, %v1109_v4  ;;  %vm928_vm3 = vcmp.eq.s32.totalorder %v898_v15, %v3894_v26 }
 0x2fc   : > { %v3998_v34 = vpop.permute.xlu1 %1795  ;;  %1597 = vadd.xlane.f32.xlu0 %v1596_v24  ;;  %vm929_vm4 = vcmp.eq.s32.totalorder %v898_v15, %v3904_v10  ;;  %v1599_v17 = vadd.f32 %v1558_v45, %v1557_v23  ;;  %v1761_v6 = vmul.f32 14.285714, %v4227_v54 }
 0x2fd   : > { %2685 = vpow2.f32 %v1164_v28  ;;  %v874_v28 = vadd.s32 32, %v3421_v50 }
 0x2fe   : > { %2687 = vpow2.f32 %v1166_v12  ;;  %v882_v12 = vadd.s32 96, %v3421_v50 }
 0x2ff   : > { %v2678_v18 = vpop.eup %2677  ;;  %1243 = vadd.xlane.f32.xlu1 %v1242_v43 }
 0x300   : > { %v2680_v7 = vpop.eup %2679  ;;  %v1027_v52 = vpop.permute.xlu1 %1026  ;;  %v4021_v13 = vsel %vm912_vm0, 0.0, %v2678_v18  ;;  %1219 = vadd.xlane.f32.xlu0 %v1218_v44 }
 0x301   : > { %v1092_v38 = vsub.f32 %v4863_v60, %v1027_v52  ;;  %v1093_v31 = vsub.f32 %v4864_v3, %v1027_v52  ;;  %v4026_v22 = vsel %vm913_vm1, 0.0, %v2680_v7  ;;  %v1543_v59 = vmul.f32 %v4021_v13, %v3514_v11  ;;  %v4039_v11 = vpop.permute.xlu0 %1781 }
 0x302   : > { %v1221_v24 = vadd.f32 %v4026_v22, %v4021_v13  ;;  %v1544_v43 = vmul.f32 %v4026_v22, %v4857_v63  ;;  %v1541_v63 = vmul.f32 %v4005_v39, %v4853_v56  ;;  %v1542_v52 = vmul.f32 %v4007_v30, %v4854_v8 }
 0x303   : > { %v2682_v48 = vpop.eup %2681  ;;  %v1132_v5 = vmul.f32 1.442695, %v1092_v38  ;;  %v1134_v62 = vmul.f32 1.442695, %v1093_v31  ;;  %1600 = vadd.xlane.f32.xlu1 %v1599_v17  ;;  %v891_v31 = vadd.s32 %v3891_v0, %v874_v28  ;;  %v899_v17 = vadd.s32 %v3891_v0, %v882_v12 }
 0x304   : > { %v2684_v4 = vpop.eup %2683  ;;  %v4033_v18 = vpop.permute.xlu1 %1358  ;;  %v4037_v7 = vsel %vm928_vm3, 0.0, %v2682_v48  ;;  %1222 = vadd.xlane.f32.xlu0 %v1221_v24  ;;  %v1578_v23 = vadd.f32 %v1544_v43, %v1543_v59  ;;  %v1575_v59 = vadd.f32 %v1542_v52, %v1541_v63 }
 0x305   : > { %4865 = vst [vmem:[#allocation43_spill] sm:$0xff] %v4037_v7  ;;  %v4041_v15 = vsel %vm929_vm4, 0.0, %v2684_v4  ;;  %2689 = vpow2.f32 %v1132_v5  ;;  %v4053_v38 = vpop.permute.xlu0 %1797  ;;  %v1559_v5 = vmul.f32 %v4037_v7, %v3528_v41  ;;  %vm914_vm5 = vcmp.eq.s32.totalorder %v891_v31, %v3894_v26 }
 0x306   : > { %4866 = vst [vmem:[#allocation47_spill] sm:$0xff] %v4041_v15  ;;  %v1245_v45 = vadd.f32 %v4041_v15, %v4037_v7  ;;  %2691 = vpow2.f32 %v1134_v62  ;;  %v1560_v62 = vmul.f32 %v4041_v15, %v4860_v40  ;;  %vm915_vm6 = vcmp.eq.s32.totalorder %v891_v31, %v3904_v10 }
 0x307   : > { %1579 = vadd.xlane.f32.xlu1 %v1578_v23  ;;  %v2686_v24 = vpop.eup %2685  ;;  %vm930_vm7 = vcmp.eq.s32.totalorder %v899_v17, %v3894_v26  ;;  %vm931_vm8 = vcmp.eq.s32.totalorder %v899_v17, %v3904_v10  ;;  %v875_v31 = vadd.s32 40, %v3421_v50  ;;  %v883_v17 = vadd.s32 104, %v3421_v50 }
 0x308   : > { %v4046_v44 = vpop.permute.xlu1 %1374  ;;  %1246 = vadd.xlane.f32.xlu0 %v1245_v45  ;;  %v2688_v4 = vpop.eup %2687  ;;  %v1602_v41 = vadd.f32 %v1560_v62, %v1559_v5 }
 0x309   : > { %v4065_v40 = vpop.permute.xlu0 %1799  ;;  %v4082_v15 = vsel %vm931_vm8, 0.0, %v2688_v4  ;;  %v900_v4 = vadd.s32 %v3891_v0, %v883_v17  ;;  %vm1690_vm8 = vcmask 0  }
 0x30a   : > { %4868 = vst [vmem:[#allocation49_spill] sm:$0xff] %v4082_v15 }
 0x30b   : > { %vm932_vm11 = vcmp.eq.s32.totalorder %v900_v4, %v3894_v26  ;;  %vm933_vm12 = vcmp.eq.s32.totalorder %v900_v4, %v3904_v10 }
 0x30c   : > { %v1032_v48 = vpop.permute.xlu1 %1031  ;;  %1576 = vadd.xlane.f32.xlu0 %v1575_v59 }
 0x30d   : > { %v1094_v56 = vsub.f32 %v3598_v20, %v1032_v48  ;;  %v1095_v8 = vsub.f32 %v3622_v42, %v1032_v48 }
 0x30f   : > { %v1136_v43 = vmul.f32 1.442695, %v1094_v56  ;;  %v1138_v23 = vmul.f32 1.442695, %v1095_v8  ;;  %v2690_v45 = vpop.eup %2689 }
 0x310   : > { %v1072_v28 = vpop.permute.xlu1 %1071  ;;  %v2692_v63 = vpop.eup %2691  ;;  %1603 = vadd.xlane.f32.xlu0 %v1602_v41  ;;  %v4071_v12 = vsel %vm914_vm5, 0.0, %v2690_v45 }
 0x311   : > { %v1110_v52 = vsub.f32 %v3600_v21, %v1072_v28  ;;  %v1111_v48 = vsub.f32 %v3630_v47, %v1072_v28  ;;  %2693 = vpow2.f32 %v1136_v43  ;;  %v4073_v59 = vsel %vm915_vm6, 0.0, %v2692_v63  ;;  %v1077_v45 = vpop.permute.xlu0 %1076 }
 0x312   : > { %2695 = vpow2.f32 %v1138_v23  ;;  %v1224_v56 = vadd.f32 %v4073_v59, %v4071_v12  ;;  %v4080_v28 = vsel %vm930_vm7, 0.0, %v2686_v24  ;;  %v892_v43 = vadd.s32 %v3891_v0, %v875_v31 }
 0x313   : > { %v1168_v5 = vmul.f32 1.442695, %v1110_v52  ;;  %v1170_v62 = vmul.f32 1.442695, %v1111_v48  ;;  %4867 = vst [vmem:[#allocation45_spill] sm:$0xff] %v4080_v28  ;;  %v1248_v23 = vadd.f32 %v4082_v15, %v4080_v28  ;;  %v1561_v41 = vmul.f32 %v4080_v28, %v3572_v9 }
 0x314   : > { %v4078_v8 = vpop.permute.xlu1 %1783  ;;  %1225 = vadd.xlane.f32.xlu1 %v1224_v56  ;;  %v1562_v24 = vmul.f32 %v4082_v15, %v3583_v35  ;;  %v1112_v52 = vsub.f32 %v3635_v14, %v1077_v45  ;;  %vm916_vm9 = vcmp.eq.s32.totalorder %v892_v43, %v3894_v26  ;;  %vm917_vm10 = vcmp.eq.s32.totalorder %v892_v43, %v3904_v10 }
 0x315   : > { %2697 = vpow2.f32 %v1168_v5  ;;  %v1113_v5 = vsub.f32 %v3668_v36, %v1077_v45  ;;  %vm1488_vm7 = vcmask 15368  }
 0x316   : > { %2699 = vpow2.f32 %v1170_v62  ;;  %v1605_v48 = vadd.f32 %v1562_v24, %v1561_v41  ;;  %v1172_v56 = vmul.f32 1.442695, %v1112_v52 }
 0x318   : > { %v4092_v63 = vpop.permute.xlu1 %1360  ;;  %1249 = vadd.xlane.f32.xlu1 %v1248_v23  ;;  %2701 = vpow2.f32 %v1172_v56 }
 0x31b   : > { %v2694_v31 = vpop.eup %2693 }
 0x31c   : > { %v4099_v62 = vpop.permute.xlu1 %1376  ;;  %v2696_v9 = vpop.eup %2695  ;;  %1606 = vadd.xlane.f32.xlu1 %v1605_v48  ;;  %v4101_v35 = vsel %vm916_vm9, 0.0, %v2694_v31  ;;  %v1174_v48 = vmul.f32 1.442695, %v1113_v5  ;;  %v1546_v5 = vmul.f32 %v4073_v59, %v4864_v3  ;;  %vm2230_vm9 = vcmask (!%p2441_p4), 1040384  }
 0x31d   : > { %v4104_v17 = vsel %vm917_vm10, 0.0, %v2696_v9  ;;  %v1547_v23 = vmul.f32 %v4101_v35, %v3598_v20 }
 0x31e   : > { %v1227_v45 = vadd.f32 %v4104_v17, %v4101_v35  ;;  %v1548_v41 = vmul.f32 %v4104_v17, %v3622_v42  ;;  %v1545_v42 = vmul.f32 %v4071_v12, %v4863_v60  ;;  %2703 = vpow2.f32 %v1174_v48 }
 0x31f   : > { %v2698_v43 = vpop.eup %2697 }
 0x320   : > { %v2700_v24 = vpop.eup %2699  ;;  %v1037_v31 = vpop.permute.xlu1 %1036  ;;  %v4113_v15 = vsel %vm932_vm11, 0.0, %v2698_v43  ;;  %1228 = vadd.xlane.f32.xlu0 %v1227_v45  ;;  %v1584_v20 = vadd.f32 %v1548_v41, %v1547_v23  ;;  %v876_v23 = vadd.s32 48, %v3421_v50  ;;  %v1581_v56 = vadd.f32 %v1546_v5, %v1545_v42 }
 0x321   : > { %4869 = vst [vmem:[#allocation51_spill] sm:$0xff] %v4113_v15  ;;  %v1096_v52 = vsub.f32 %v3642_v46, %v1037_v31  ;;  %v1097_v9 = vsub.f32 %v3648_v55, %v1037_v31  ;;  %v4117_v28 = vsel %vm933_vm12, 0.0, %v2700_v24  ;;  %v884_v41 = vadd.s32 112, %v3421_v50 }
 0x322   : > { %4870 = vst [vmem:[#allocation56_spill] sm:$0xff] %v4117_v28  ;;  %v1251_v4 = vadd.f32 %v4117_v28, %v4113_v15  ;;  %1585 = vadd.xlane.f32.xlu1 %v1584_v20  ;;  %v893_v24 = vadd.s32 %v3891_v0, %v876_v23  ;;  %v2702_v60 = vpop.eup %2701  ;;  %v877_v23 = vadd.s32 56, %v3421_v50 }
 0x323   : > { %v1140_v7 = vmul.f32 1.442695, %v1096_v52  ;;  %v1142_v1 = vmul.f32 1.442695, %v1097_v9  ;;  %v901_v3 = vadd.s32 %v3891_v0, %v884_v41 }
 0x324   : > { %v4125_v43 = vpop.permute.xlu1 %1801  ;;  %1252 = vadd.xlane.f32.xlu0 %v1251_v4  ;;  %vm918_vm13 = vcmp.eq.s32.totalorder %v893_v24, %v3894_v26  ;;  %vm919_vm14 = vcmp.eq.s32.totalorder %v893_v24, %v3904_v10 }
 0x325   : > { %2705 = vpow2.f32 %v1140_v7  ;;  %vm934_vm15 = vcmp.eq.s32.totalorder %v901_v3, %v3894_v26  ;;  %vm935_vm0 = vcmp.eq.s32.totalorder %v901_v3, %v3904_v10  ;;  %v894_v3 = vadd.s32 %v3891_v0, %v877_v23 }
 0x326   : > { %2707 = vpow2.f32 %v1142_v1 }
 0x327   : > { %vm920_vm1 = vcmp.eq.s32.totalorder %v894_v3, %v3894_v26  ;;  %vm921_vm3 = vcmp.eq.s32.totalorder %v894_v3, %v3904_v10 }
 0x328   : > { %v4128_v45 = vpop.permute.xlu1 %1362  ;;  %1582 = vadd.xlane.f32.xlu0 %v1581_v56  ;;  %v2704_v52 = vpop.eup %2703 }
 0x329   : > { %v4150_v61 = vsel %vm935_vm0, 0.0, %v2704_v52 }
 0x32a   : > { %4874 = vst [vmem:[#allocation64_spill] sm:$0xff] %v4150_v61 }
 0x32c   : > { %v1042_v31 = vpop.permute.xlu1 %1041 }
 0x32d   : > { %v1098_v48 = vsub.f32 %v3680_v53, %v1042_v31  ;;  %v1099_v7 = vsub.f32 %v3686_v2, %v1042_v31 }
 0x32f   : > { %v2706_v1 = vpop.eup %2705  ;;  %v1144_v9 = vmul.f32 1.442695, %v1098_v48  ;;  %v1146_v20 = vmul.f32 1.442695, %v1099_v7 }
 0x330   : > { %v2708_v4 = vpop.eup %2707  ;;  %v1082_v42 = vpop.permute.xlu1 %1081  ;;  %v4137_v5 = vsel %vm918_vm13, 0.0, %v2706_v1  ;;  %v4148_v1 = vsel %vm934_vm15, 0.0, %v2702_v60  ;;  %v2787_v60 = vld [vmem:[%s3316_s21] sm:$0xff] }
 0x331   : > { %4871 = vst [vmem:[#allocation52_spill] sm:$0xff] %v4137_v5  ;;  %2709 = vpow2.f32 %v1144_v9  ;;  %v1114_v56 = vsub.f32 %v3698_v49, %v1082_v42  ;;  %v1115_v41 = vsub.f32 %v3701_v57, %v1082_v42  ;;  %v4144_v31 = vsel %vm919_vm14, 0.0, %v2708_v4  ;;  %4873 = vst [vmem:[#allocation61_spill] sm:$0xff] %v4148_v1 }
 0x332   : > { %4872 = vst [vmem:[#allocation55_spill] sm:$0xff] %v4144_v31  ;;  %2711 = vpow2.f32 %v1146_v20  ;;  %v1230_v24 = vadd.f32 %v4144_v31, %v4137_v5  ;;  %v885_v9 = vadd.s32 120, %v3421_v50  ;;  %v1254_v4 = vadd.f32 %v4150_v61, %v4148_v1 }
 0x333   : > { %v1176_v48 = vmul.f32 1.442695, %v1114_v56  ;;  %v1178_v7 = vmul.f32 1.442695, %v1115_v41  ;;  %v1549_v20 = vmul.f32 %v4137_v5, %v3642_v46  ;;  %v1550_v42 = vmul.f32 %v4144_v31, %v3648_v55 }
 0x334   : > { %1231 = vadd.xlane.f32.xlu1 %v1230_v24  ;;  %v1757_v52 = vmul.f32 14.285714, %v2787_v60  ;;  %v902_v56 = vadd.s32 %v3891_v0, %v885_v9  ;;  %v1565_v50 = vmul.f32 %v4148_v1, %v3635_v14  ;;  %v1566_v41 = vmul.f32 %v4150_v61, %v3668_v36 }
 0x335   : > { %2713 = vpow2.f32 %v1176_v48  ;;  %v1587_v23 = vadd.f32 %v1550_v42, %v1549_v20  ;;  %v1453_v1 = vstv %s1452_s19 }
 0x336   : > { %2715 = vpow2.f32 %v1178_v7  ;;  %vm936_vm4 = vcmp.eq.s32.totalorder %v902_v56, %v3894_v26  ;;  %v1821_v0 = vadd.f32 %v3898_v58, %v1757_v52  ;;  %v1611_v3 = vadd.f32 %v1566_v41, %v1565_v50  ;;  %v4188_v52 = vld [vmem:[%s3316_s21 + $0x78] sm:$0xff]  ;;  %v4192_v41 = vpop.permute.xlu1 %1364 }
 0x337   : > { %vm937_vm5 = vcmp.eq.s32.totalorder %v902_v56, %v3904_v10  ;;  %v1307_v56 = vsub.f32 %v4188_v52, %v3828_v33  ;;  %vm4236_vm6 = vcmp.eq.s32.totalorder %v1453_v1, 1 }
 0x338   : > { %1255 = vadd.xlane.f32.xlu1 %v1254_v4  ;;  %v1837_v20 = vmul.f32 1.442695, %v1821_v0 }
 0x33a   : > { %2717 = vpow2.f32 %v1837_v20 }
 0x33b   : > { %v2710_v46 = vpop.eup %2709 }
 0x33c   : > { %v2712_v24 = vpop.eup %2711  ;;  %1588 = vadd.xlane.f32.xlu1 %v1587_v23  ;;  %v4168_v55 = vsel %vm920_vm1, 0.0, %v2710_v46  ;;  %v1338_v23 = vmul.f32 1.442695, %v1307_v56 }
 0x33d   : > { %4875 = vst [vmem:[#allocation66_spill] sm:$0xff] %v4168_v55  ;;  %v4170_v48 = vsel %vm921_vm3, 0.0, %v2712_v24  ;;  %v1551_v58 = vmul.f32 %v4168_v55, %v3680_v53  ;;  %v4194_v53 = vpop.permute.xlu0 %1785 }
 0x33e   : > { %4876 = vst [vmem:[#allocation67_spill] sm:$0xff] %v4170_v48  ;;  %v1233_v7 = vadd.f32 %v4170_v48, %v4168_v55  ;;  %v1552_v42 = vmul.f32 %v4170_v48, %v3686_v2  ;;  %2719 = vpow2.f32 %v1338_v23  ;;  %v4196_v2 = vpop.permute.xlu1 %1380 }
 0x33f   : > { %v2714_v14 = vpop.eup %2713 }
 0x340   : > { %v2716_v36 = vpop.eup %2715  ;;  %1234 = vadd.xlane.f32.xlu0 %v1233_v7  ;;  %1612 = vadd.xlane.f32.xlu1 %v1611_v3  ;;  %v4177_v9 = vsel %vm936_vm4, 0.0, %v2714_v14  ;;  %v1590_v10 = vadd.f32 %v1552_v42, %v1551_v58  ;;  %v2789_v14 = vld [vmem:[%s3316_s21 + $0x8] sm:$0xff] }
 0x341   : > { %4877 = vst [vmem:[#allocation87_spill] sm:$0xff] %v4177_v9  ;;  %v4179_v4 = vsel %vm937_vm5, 0.0, %v2716_v36  ;;  %v4199_v24 = vpop.permute.xlu0 %1378  ;;  %v1758_v36 = vmul.f32 14.285714, %v2789_v14  ;;  %v1567_v20 = vmul.f32 %v4177_v9, %v3698_v49 }
 0x342   : > { %4878 = vst [vmem:[#allocation88_spill] sm:$0xff] %v4179_v4  ;;  %v1257_v26 = vadd.f32 %v4179_v4, %v4177_v9  ;;  %v4201_v0 = vpop.permute.xlu1 %1366 }
 0x343   : > { %v1822_v23 = vadd.f32 %v3913_v37, %v1758_v36  ;;  %v1563_v37 = vmul.f32 %v4113_v15, %v3600_v21  ;;  %v4246_v15 = vld [vmem:[%s3316_s21 + $0x18] sm:$0xff] }
 0x344   : > { %1258 = vadd.xlane.f32.xlu0 %v1257_v26  ;;  %v2718_v50 = vpop.eup %2717  ;;  %v1568_v26 = vmul.f32 %v4179_v4, %v3701_v57  ;;  %v1760_v1 = vmul.f32 14.285714, %v4246_v15 }
 0x345   : > { %v4203_v33 = vpop.permute.xlu0 %1787  ;;  %v1839_v9 = vmul.f32 1.442695, %v1822_v23 }
 0x346   : > { %v4205_v7 = vpop.permute.xlu1 %1368 }
 0x347   : > { %2721 = vpow2.f32 %v1839_v9  ;;  %v1772_v9 = vmul.f32 14.285714, %v4188_v52 }
 0x348   : > { %1591 = vadd.xlane.f32.xlu0 %v1590_v10  ;;  %v2720_v46 = vpop.eup %2719  ;;  %v4219_v10 = vld [vmem:[%s3316_s21 + $0x10] sm:$0xff] }
 0x349   : > { %v4207_v3 = vpop.permute.xlu0 %1803  ;;  %v1759_v56 = vmul.f32 14.285714, %v4219_v10 }
 0x34a   : > { %v4214_v58 = vpop.permute.xlu1 %1384 }
 0x34b   : > { %v1823_v57 = vadd.f32 %v3941_v16, %v1759_v56  ;;  %v2792_v16 = vld [vmem:[%s3316_s21 + $0x40] sm:$0xff] }
 0x34d   : > { %v4216_v42 = vpop.permute.xlu0 %1382  ;;  %v1841_v23 = vmul.f32 1.442695, %v1823_v57 }
 0x34e   : > { %v4224_v61 = vpop.permute.xlu1 %1370 }
 0x34f   : > { %2723 = vpow2.f32 %v1841_v23  ;;  %v2796_v23 = vld [vmem:[%s3316_s21 + $0x48] sm:$0xff] }
 0x351   : > { %1876 = vperm.xlu1 %2597, %v2718_v50   ;;  %v1614_v50 = vadd.f32 %v1568_v26, %v1567_v20  ;;  %v1284_v26 = vmul.f32 0.9, %v2792_v16 }
 0x353   : > { %v1412_v48 = vmul.f32 %v3968_v32, %v1284_v26 }
 0x35e   : > { %1386 = vrot.lane.b32.xlu0 %v2720_v46, %s3048_s11  ;;  %v1276_v46 = vmul.f32 0.9, %v2787_v60  ;;  %v1564_v60 = vmul.f32 %v4117_v28, %v3630_v47 }
 0x360   : > { %v1404_v36 = vmul.f32 %v3946_v27, %v1276_v46  ;;  %v1825_v27 = vadd.f32 %v4039_v11, %v1761_v6  ;;  %v1608_v28 = vadd.f32 %v1564_v60, %v1563_v37  ;;  %v4255_v6 = vld [vmem:[%s3316_s21 + $0x30] sm:$0xff]  ;;  %v1824_v60 = vadd.f32 %v3985_v25, %v1760_v1 }
 0x361   : > { %v1763_v11 = vmul.f32 14.285714, %v4255_v6 }
 0x362   : > { %v1845_v37 = vmul.f32 1.442695, %v1825_v27 }
 0x375   : > { %1615 = vadd.xlane.f32.xlu1 %v1614_v50  ;;  %v1214_v49 = vpop.xlane.xlu0 %1213  ;;  %v4241_v50 = vld [vmem:[%s3316_s21 + $0x28] sm:$0xff] }
 0x376   : > { %v1260_v4 = vmul.f32 0.003921569, %v1214_v49  ;;  %v1762_v49 = vmul.f32 14.285714, %v4241_v50 }
 0x378   : > { %v1420_v20 = vmul.f32 0.1, %v1260_v4 }
 0x37a   : > { %v1436_v21 = vadd.f32 %v1420_v20, %v1404_v36  ;;  %v1238_v47 = vpop.xlane.xlu1 %1237  ;;  %v1277_v20 = vmul.f32 0.9, %v2789_v14 }
 0x37b   : > { %v1268_v46 = vmul.f32 0.003921569, %v1238_v47  ;;  %v4266_v47 = vld [vmem:[%s3316_s21 + $0x38] sm:$0xff] }
 0x37c   : > { %v1455_v57 = vsel %vm4236_vm6, %v1260_v4, %v1436_v21  ;;  %v1826_v4 = vadd.f32 %v4078_v8, %v1762_v49  ;;  %v1285_v21 = vmul.f32 0.9, %v2796_v23  ;;  %v1843_v49 = vmul.f32 1.442695, %v1824_v60 }
 0x37d   : > { %1489 = vst.msk [vmem:[%s3326_s27] sm:$0xff] %vm1488_vm7, %v1455_v57  ;;  %v1505_v55 = vmax.f32 %v1455_v57, 1e-14  ;;  %v1428_v36 = vmul.f32 0.1, %v1268_v46  ;;  %1609 = vadd.xlane.f32.xlu0 %v1608_v28  ;;  %v1827_v28 = vadd.f32 %v4194_v53, %v1763_v11  ;;  %v2722_v53 = vpop.eup %2721  ;;  %v1405_v1 = vmul.f32 %v4033_v18, %v1277_v20 }
 0x37e   : > { %v1764_v57 = vmul.f32 14.285714, %v4266_v47  ;;  %v1847_v25 = vmul.f32 1.442695, %v1826_v4  ;;  %v1765_v11 = vmul.f32 14.285714, %v2792_v16  ;;  %v1413_v31 = vmul.f32 %v4046_v44, %v1285_v21  ;;  %v2724_v60 = vpop.eup %2723 }
 0x37f   : > { %2725 = vrcp.f32 %v1505_v55  ;;  %v1444_v32 = vadd.f32 %v1428_v36, %v1412_v48  ;;  %v1836_v55 = vadd.f32 %v4207_v3, %v1772_v9  ;;  %v1766_v20 = vmul.f32 14.285714, %v2796_v23 }
 0x380   : > { %v1217_v8 = vpop.xlane.xlu1 %1216  ;;  %2727 = vpow2.f32 %v1845_v37  ;;  %v1828_v3 = vadd.f32 %v4203_v33, %v1764_v57  ;;  %v1829_v57 = vadd.f32 %v3896_v19, %v1765_v11 }
 0x381   : > { %v1463_v26 = vsel %vm4236_vm6, %v1268_v46, %v1444_v32  ;;  %v1261_v48 = vmul.f32 0.003921569, %v1217_v8  ;;  %v1241_v14 = vpop.xlane.xlu0 %1240  ;;  %v1849_v32 = vmul.f32 1.442695, %v1827_v28  ;;  %v1867_v9 = vmul.f32 1.442695, %v1836_v55 }
 0x382   : > { %1497 = vst.msk [vmem:[%s3326_s27 + $0x40] sm:$0xff] %vm1488_vm7, %v1463_v26  ;;  %v1513_v27 = vmax.f32 %v1463_v26, 1e-14  ;;  %v1269_v46 = vmul.f32 0.003921569, %v1241_v14  ;;  %v2798_v14 = vld [vmem:[%s3316_s21 + $0x50] sm:$0xff] }
 0x383   : > { %v1421_v36 = vmul.f32 0.1, %v1261_v48  ;;  %v1853_v19 = vmul.f32 1.442695, %v1829_v57 }
 0x384   : > { %2729 = vrcp.f32 %v1513_v27  ;;  %v1429_v26 = vmul.f32 0.1, %v1269_v46  ;;  %v1595_v5 = vpop.xlane.xlu1 %1594 }
 0x385   : > { %2731 = vpow2.f32 %v1847_v25  ;;  %v1437_v37 = vadd.f32 %v1421_v36, %v1405_v1  ;;  %v1571_v4 = vpop.xlane.xlu0 %1570  ;;  %v4881_v25 = vld [vmem:[#allocation27_spill] sm:$0xff]  ;;  %v1278_v1 = vmul.f32 0.9, %v4219_v10  ;;  %v1279_v10 = vmul.f32 0.9, %v4246_v15 }
 0x386   : > { %1881 = vperm.xlu1 %2597, %v2722_v53   ;;  %2733 = vpow2.f32 %v1843_v49  ;;  %v1445_v27 = vadd.f32 %v1429_v26, %v1413_v31  ;;  %v1851_v31 = vmul.f32 1.442695, %v1828_v3  ;;  %v1286_v49 = vmul.f32 0.9, %v2798_v14 }
 0x387   : > { %v1456_v16 = vsel %vm4236_vm6, %v1261_v48, %v1437_v37  ;;  %2735 = vpow2.f32 %v1849_v32  ;;  %v1830_v48 = vadd.f32 %v4881_v25, %v1766_v20  ;;  %v1767_v53 = vmul.f32 14.285714, %v2798_v14 }
 0x388   : > { %1490 = vst.msk [vmem:[%s3326_s27 + $0x8] sm:$0xff] %vm1488_vm7, %v1456_v16  ;;  %v1506_v44 = vmax.f32 %v1456_v16, 1e-14  ;;  %v1464_v33 = vsel %vm4236_vm6, %v1269_v46, %v1445_v27  ;;  %v1574_v21 = vpop.xlane.xlu1 %1573  ;;  %2737 = vpow2.f32 %v1867_v9  ;;  %v4882_v16 = vld [vmem:[#allocation32_spill] sm:$0xff] }
 0x389   : > { %v2726_v18 = vpop.eup %2725  ;;  %1498 = vst.msk [vmem:[%s3326_s27 + $0x48] sm:$0xff] %vm1488_vm7, %v1464_v33  ;;  %v1514_v23 = vmax.f32 %v1464_v33, 1e-14  ;;  %v1598_v8 = vpop.xlane.xlu0 %1597  ;;  %v1855_v37 = vmul.f32 1.442695, %v1830_v48 }
 0x38a   : > { %v4281_v28 = vmul.f32 %v2726_v18, %v1571_v4  ;;  %1886 = vperm.xlu1 %2597, %v2724_v60   ;;  %2739 = vrcp.f32 %v1506_v44  ;;  %v2728_v55 = vpop.eup %2727  ;;  %v1414_v4 = vmul.f32 %v4099_v62, %v1286_v49  ;;  %v1406_v18 = vmul.f32 %v4092_v63, %v1278_v1  ;;  %v2799_v44 = vld [vmem:[%s3316_s21 + $0x58] sm:$0xff]  ;;  %v4297_v63 = vld [vmem:[%s3316_s21 + $0x60] sm:$0xff] }
 0x38b   : > { %2741 = vrcp.f32 %v1514_v23  ;;  %v1768_v33 = vmul.f32 14.285714, %v2799_v44  ;;  %v1769_v15 = vmul.f32 14.285714, %v4297_v63  ;;  %v1287_v48 = vmul.f32 0.9, %v2799_v44 }
 0x38c   : > { %v1244_v36 = vpop.xlane.xlu1 %1243  ;;  %2743 = vpow2.f32 %v1851_v31 }
 0x38d   : > { %v1270_v32 = vmul.f32 0.003921569, %v1244_v36  ;;  %v1220_v26 = vpop.xlane.xlu0 %1219  ;;  %2745 = vpow2.f32 %v1853_v19 }
 0x38e   : > { %v2730_v46 = vpop.eup %2729  ;;  %1896 = vperm.xlu1 %2597, %v2728_v55   ;;  %v1262_v3 = vmul.f32 0.003921569, %v1220_v26  ;;  %2747 = vpow2.f32 %v1855_v37 }
 0x38f   : > { %v4289_v11 = vmul.f32 %v2730_v46, %v1595_v5  ;;  %v2732_v9 = vpop.eup %2731  ;;  %v1430_v60 = vmul.f32 0.1, %v1270_v32  ;;  %v1831_v5 = vadd.f32 %v4882_v16, %v1767_v53  ;;  %v1407_v46 = vmul.f32 %v4128_v45, %v1279_v10  ;;  %v4313_v10 = vld [vmem:[%s3316_s21 + $0x68] sm:$0xff] }
 0x390   : > { %v2734_v27 = vpop.eup %2733  ;;  %v1422_v20 = vmul.f32 0.1, %v1262_v3  ;;  %v1415_v16 = vmul.f32 %v4199_v24, %v1287_v48 }
 0x391   : > { %v1446_v57 = vadd.f32 %v1430_v60, %v1414_v4  ;;  %v1223_v31 = vpop.xlane.xlu0 %1222  ;;  %v2736_v23 = vpop.eup %2735  ;;  %v1857_v26 = vmul.f32 1.442695, %v1831_v5 }
 0x392   : > { %1901 = vperm.xlu1 %2597, %v2732_v9   ;;  %v1438_v62 = vadd.f32 %v1422_v20, %v1406_v18  ;;  %v1263_v55 = vmul.f32 0.003921569, %v1223_v31  ;;  %v2738_v25 = vpop.eup %2737  ;;  %v1832_v9 = vadd.f32 %v3998_v34, %v1768_v33  ;;  %v1601_v60 = vpop.xlane.xlu1 %1600  ;;  %v1770_v20 = vmul.f32 14.285714, %v4313_v10 }
 0x393   : > { %1891 = vperm.xlu0 %2598, %v2734_v27   ;;  %v1465_v14 = vsel %vm4236_vm6, %v1270_v32, %v1446_v57  ;;  %v1634_v34 = vsel %vm1488_vm7, %v4281_v28, 0.0  ;;  %v1833_v33 = vadd.f32 %v4053_v38, %v1769_v15 }
 0x394   : > { %v2740_v49 = vpop.eup %2739  ;;  %1499 = vst.msk [vmem:[%s3326_s27 + $0x50] sm:$0xff] %vm1488_vm7, %v1465_v14  ;;  %v1515_v53 = vmax.f32 %v1465_v14, 1e-14  ;;  %v1457_v1 = vsel %vm4236_vm6, %v1262_v3, %v1438_v62  ;;  %v1423_v36 = vmul.f32 0.1, %v1263_v55  ;;  %v1834_v24 = vadd.f32 %v4065_v40, %v1770_v20  ;;  %v4329_v14 = vld [vmem:[%s3316_s21 + $0x70] sm:$0xff] }
 0x395   : > { %v2742_v19 = vpop.eup %2741  ;;  %v1618_v37 = vmul.f32 %v2740_v49, %v1574_v21  ;;  %1491 = vst.msk [vmem:[%s3326_s27 + $0x10] sm:$0xff] %vm1488_vm7, %v1457_v1  ;;  %v1507_v32 = vmax.f32 %v1457_v1, 1e-14  ;;  %v1247_v4 = vpop.xlane.xlu0 %1246  ;;  %v1859_v57 = vmul.f32 1.442695, %v1832_v9 }
 0x396   : > { %1906 = vperm.xlu1 %2597, %v2736_v23   ;;  %v4310_v45 = vmul.f32 %v2742_v19, %v1598_v8  ;;  %2749 = vrcp.f32 %v1515_v53  ;;  %v1439_v27 = vadd.f32 %v1423_v36, %v1407_v46  ;;  %v1271_v3 = vmul.f32 0.003921569, %v1247_v4  ;;  %v2744_v18 = vpop.eup %2743  ;;  %v1580_v62 = vpop.xlane.xlu1 %1579 }
 0x397   : > { %1951 = vperm.xlu0 %2598, %v2738_v25   ;;  %v1635_v21 = vsel %vm1488_vm7, %v1618_v37, 0.0  ;;  %2751 = vrcp.f32 %v1507_v32  ;;  %v2746_v23 = vpop.eup %2745  ;;  %v1861_v48 = vmul.f32 1.442695, %v1833_v33  ;;  %v1771_v38 = vmul.f32 14.285714, %v4329_v14 }
 0x398   : > { %v1636_v8 = vadd.f32 %v1635_v21, %v1634_v34  ;;  %v1458_v5 = vsel %vm4236_vm6, %v1263_v55, %v1439_v27  ;;  %v1431_v44 = vmul.f32 0.1, %v1271_v3  ;;  %2753 = vpow2.f32 %v1857_v26  ;;  %v2748_v25 = vpop.eup %2747 }
 0x399   : > { %1492 = vst.msk [vmem:[%s3326_s27 + $0x18] sm:$0xff] %vm1488_vm7, %v1458_v5  ;;  %v1508_v28 = vmax.f32 %v1458_v5, 1e-14  ;;  %v1280_v49 = vmul.f32 0.9, %v4227_v54  ;;  %v1835_v36 = vadd.f32 %v4125_v43, %v1771_v38  ;;  %v1577_v26 = vpop.xlane.xlu0 %1576 }
 0x39a   : > { %1911 = vperm.xlu1 %2597, %v2744_v18   ;;  %v1447_v31 = vadd.f32 %v1431_v44, %v1415_v16  ;;  %v1863_v40 = vmul.f32 1.442695, %v1834_v24  ;;  %v1288_v27 = vmul.f32 0.9, %v4297_v63 }
 0x39b   : > { %2755 = vrcp.f32 %v1508_v28  ;;  %v1408_v4 = vmul.f32 %v4192_v41, %v1280_v49  ;;  %v1865_v34 = vmul.f32 1.442695, %v1835_v36  ;;  %v1289_v49 = vmul.f32 0.9, %v4313_v10 }
 0x39c   : > { %v1466_v55 = vsel %vm4236_vm6, %v1271_v3, %v1447_v31  ;;  %2757 = vpow2.f32 %v1859_v57  ;;  %v1416_v44 = vmul.f32 %v4196_v2, %v1288_v27 }
 0x39d   : > { %1500 = vst.msk [vmem:[%s3326_s27 + $0x58] sm:$0xff] %vm1488_vm7, %v1466_v55  ;;  %v1516_v15 = vmax.f32 %v1466_v55, 1e-14  ;;  %v1604_v57 = vpop.xlane.xlu0 %1603 }
 0x39e   : > { %1916 = vperm.xlu1 %2597, %v2746_v23  }
 0x39f   : > { %2759 = vrcp.f32 %v1516_v15 }
 0x3a0   : > { %v2750_v46 = vpop.eup %2749  ;;  %2761 = vpow2.f32 %v1861_v48 }
 0x3a1   : > { %v1226_v53 = vpop.xlane.xlu1 %1225  ;;  %v2752_v1 = vpop.eup %2751  ;;  %v4336_v19 = vmul.f32 %v2750_v46, %v1601_v60  ;;  %2763 = vpow2.f32 %v1863_v40 }
 0x3a2   : > { %1921 = vperm.xlu1 %2597, %v2748_v25   ;;  %v1264_v9 = vmul.f32 0.003921569, %v1226_v53  ;;  %v1619_v37 = vmul.f32 %v2752_v1, %v1577_v26  ;;  %v2754_v32 = vpop.eup %2753  ;;  %2765 = vpow2.f32 %v1865_v34  ;;  %v1417_v26 = vmul.f32 %v4216_v42, %v1289_v49 }
 0x3a4   : > { %v1424_v54 = vmul.f32 0.1, %v1264_v9  ;;  %v1637_v3 = vsel %vm1488_vm7, %v1619_v37, 0.0 }
 0x3a5   : > { %v1250_v18 = vpop.xlane.xlu1 %1249  ;;  %v2756_v20 = vpop.eup %2755  ;;  %v1638_v43 = vadd.f32 %v1637_v3, %v1636_v8 }
 0x3a6   : > { %1926 = vperm.xlu1 %2597, %v2754_v32   ;;  %v1440_v60 = vadd.f32 %v1424_v54, %v1408_v4  ;;  %v1272_v21 = vmul.f32 0.003921569, %v1250_v18  ;;  %v1620_v16 = vmul.f32 %v2756_v20, %v1580_v62  ;;  %v2758_v5 = vpop.eup %2757  ;;  %v1281_v62 = vmul.f32 0.9, %v4241_v50 }
 0x3a8   : > { %v1459_v41 = vsel %vm4236_vm6, %v1264_v9, %v1440_v60  ;;  %v1432_v63 = vmul.f32 0.1, %v1272_v21  ;;  %v1639_v33 = vsel %vm1488_vm7, %v1620_v16, 0.0  ;;  %v1409_v46 = vmul.f32 %v4201_v0, %v1281_v62 }
 0x3a9   : > { %1493 = vst.msk [vmem:[%s3326_s27 + $0x20] sm:$0xff] %vm1488_vm7, %v1459_v41  ;;  %v1509_v28 = vmax.f32 %v1459_v41, 1e-14  ;;  %v2760_v31 = vpop.eup %2759  ;;  %v1640_v23 = vadd.f32 %v1639_v33, %v1638_v43  ;;  %v1607_v54 = vpop.xlane.xlu1 %1606  ;;  %v1282_v60 = vmul.f32 0.9, %v4255_v6 }
 0x3aa   : > { %1931 = vperm.xlu1 %2597, %v2758_v5   ;;  %v1448_v8 = vadd.f32 %v1432_v63, %v1416_v44  ;;  %v4347_v24 = vmul.f32 %v2760_v31, %v1604_v57  ;;  %v2762_v2 = vpop.eup %2761  ;;  %v1290_v63 = vmul.f32 0.9, %v4329_v14  ;;  %v1283_v14 = vmul.f32 0.9, %v4266_v47 }
 0x3ab   : > { %2767 = vrcp.f32 %v1509_v28  ;;  %v2764_v15 = vpop.eup %2763  ;;  %v1410_v41 = vmul.f32 %v4205_v7, %v1282_v60  ;;  %v1651_v60 = vsel %vm1488_vm7, %v4310_v45, 0.0 }
 0x3ac   : > { %v1467_v55 = vsel %vm4236_vm6, %v1272_v21, %v1448_v8  ;;  %v2766_v36 = vpop.eup %2765 }
 0x3ad   : > { %1501 = vst.msk [vmem:[%s3326_s27 + $0x60] sm:$0xff] %vm1488_vm7, %v1467_v55  ;;  %v1517_v25 = vmax.f32 %v1467_v55, 1e-14  ;;  %v1229_v48 = vpop.xlane.xlu0 %1228 }
 0x3ae   : > { %1936 = vperm.xlu1 %2597, %v2762_v2   ;;  %v1265_v38 = vmul.f32 0.003921569, %v1229_v48  ;;  %v1418_v2 = vmul.f32 %v4214_v58, %v1290_v63  ;;  %v1411_v58 = vmul.f32 %v4224_v61, %v1283_v14 }
 0x3af   : > { %2769 = vrcp.f32 %v1517_v25  ;;  %v1586_v43 = vpop.xlane.xlu1 %1585 }
 0x3b0   : > { %v1425_v40 = vmul.f32 0.1, %v1265_v38 }
 0x3b1   : > { %v1253_v53 = vpop.xlane.xlu0 %1252 }
 0x3b2   : > { %1941 = vperm.xlu1 %2597, %v2764_v15   ;;  %v1441_v50 = vadd.f32 %v1425_v40, %v1409_v46  ;;  %v1273_v1 = vmul.f32 0.003921569, %v1253_v53 }
 0x3b4   : > { %v1460_v9 = vsel %vm4236_vm6, %v1265_v38, %v1441_v50  ;;  %v1433_v37 = vmul.f32 0.1, %v1273_v1 }
 0x3b5   : > { %v2768_v32 = vpop.eup %2767  ;;  %1494 = vst.msk [vmem:[%s3326_s27 + $0x28] sm:$0xff] %vm1488_vm7, %v1460_v9  ;;  %v1510_v4 = vmax.f32 %v1460_v9, 1e-14  ;;  %v1583_v10 = vpop.xlane.xlu0 %1582  ;;  %v1291_v9 = vmul.f32 0.9, %v4188_v52  ;;  %v1649_v52 = vsel %vm1488_vm7, %v4289_v11, 0.0 }
 0x3b6   : > { %1946 = vperm.xlu1 %2597, %v2766_v36   ;;  %v1449_v0 = vadd.f32 %v1433_v37, %v1417_v26  ;;  %v1621_v27 = vmul.f32 %v2768_v32, %v1583_v10  ;;  %v4883_v11 = vld [vmem:[#allocation86_spill] sm:$0xff] }
 0x3b7   : > { %2771 = vrcp.f32 %v1510_v4 }
 0x3b8   : > { %v4363_v3 = vsel %vm4236_vm6, %v1273_v1, %v1449_v0  ;;  %v1641_v42 = vsel %vm1488_vm7, %v1621_v27, 0.0 }
 0x3b9   : > { %v2770_v18 = vpop.eup %2769  ;;  %1502 = vst.msk [vmem:[%s3326_s27 + $0x68] sm:$0xff] %vm1488_vm7, %v4363_v3  ;;  %v1642_v20 = vadd.f32 %v1641_v42, %v1640_v23 }
 0x3ba   : > { %v1629_v34 = vmul.f32 %v2770_v18, %v1607_v54 }
 0x3bc   : > { %v1657_v63 = vsel %vm1488_vm7, %v1629_v34, 0.0 }
 0x3c1   : > { %v1232_v21 = vpop.xlane.xlu1 %1231  ;;  %v2772_v16 = vpop.eup %2771 }
 0x3c2   : > { %v1266_v5 = vmul.f32 0.003921569, %v1232_v21  ;;  %v1622_v44 = vmul.f32 %v2772_v16, %v1586_v43  ;;  %v1653_v16 = vsel %vm1488_vm7, %v4336_v19, 0.0 }
 0x3c4   : > { %v1426_v33 = vmul.f32 0.1, %v1266_v5  ;;  %v1643_v57 = vsel %vm1488_vm7, %v1622_v44, 0.0  ;;  %v1655_v44 = vsel %vm1488_vm7, %v4347_v24, 0.0 }
 0x3c5   : > { %v1256_v28 = vpop.xlane.xlu1 %1255  ;;  %v1644_v23 = vadd.f32 %v1643_v57, %v1642_v20  ;;  %v2803_v57 = vld [vmem:[#allocation14 + $0x2] ss:$4 sm:$0x3] }
 0x3c6   : > { %v1442_v31 = vadd.f32 %v1426_v33, %v1410_v41  ;;  %v1274_v8 = vmul.f32 0.003921569, %v1256_v28  ;;  %v1869_v28 = vsub.f32 0.0, %v2803_v57  ;;  %v4891_v57 = vld [vmem:[#allocation41_spill] sm:$0xff] }
 0x3c8   : > { %v1461_v6 = vsel %vm4236_vm6, %v1266_v5, %v1442_v31  ;;  %v1434_v62 = vmul.f32 0.1, %v1274_v8  ;;  %v1870_v31 = vmul.f32 14.285714, %v1869_v28 }
 0x3c9   : > { %1495 = vst.msk [vmem:[%s3326_s27 + $0x30] sm:$0xff] %vm1488_vm7, %v1461_v6  ;;  %v1511_v7 = vmax.f32 %v1461_v6, 1e-14  ;;  %v1589_v50 = vpop.xlane.xlu1 %1588  ;;  %v1518_v6 = vmax.f32 %v4363_v3, 1e-14 }
 0x3ca   : > { %v1450_v55 = vadd.f32 %v1434_v62, %v1418_v2 }
 0x3cb   : > { %2773 = vrcp.f32 %v1511_v7 }
 0x3cc   : > { %v1469_v25 = vsel %vm4236_vm6, %v1274_v8, %v1450_v55  ;;  %v1871_v8 = vsub.f32 %v1870_v31, %v4883_v11 }
 0x3cd   : > { %1503 = vst.msk [vmem:[%s3326_s27 + $0x70] sm:$0xff] %vm1488_vm7, %v1469_v25  ;;  %v1235_v48 = vpop.xlane.xlu0 %1234  ;;  %v1519_v2 = vmax.f32 %v1469_v25, 1e-14 }
 0x3ce   : > { %v1267_v38 = vmul.f32 0.003921569, %v1235_v48  ;;  %v1872_v45 = vmul.f32 1.442695, %v1871_v8 }
 0x3d0   : > { %v1427_v15 = vmul.f32 0.1, %v1267_v38 }
 0x3d1   : > { %v1259_v49 = vpop.xlane.xlu0 %1258 }
 0x3d2   : > { %v1443_v46 = vadd.f32 %v1427_v15, %v1411_v58  ;;  %v1275_v26 = vmul.f32 0.003921569, %v1259_v49 }
 0x3d4   : > { %v1462_v40 = vsel %vm4236_vm6, %v1267_v38, %v1443_v46  ;;  %v1435_v4 = vmul.f32 0.1, %v1275_v26  ;;  %v4884_v46 = vld [vmem:[#allocation33_spill] sm:$0xff] }
 0x3d5   : > { %v2774_v53 = vpop.eup %2773  ;;  %1496 = vst.msk [vmem:[%s3326_s27 + $0x38] sm:$0xff] %vm1488_vm7, %v1462_v40  ;;  %v1512_v47 = vmax.f32 %v1462_v40, 1e-14  ;;  %v1592_v1 = vpop.xlane.xlu0 %1591 }
 0x3d6   : > { %v1623_v36 = vmul.f32 %v2774_v53, %v1589_v50  ;;  %v4885_v53 = vld [vmem:[#allocation30_spill] sm:$0xff] }
 0x3d7   : > { %2775 = vrcp.f32 %v1512_v47  ;;  %v4886_v47 = vld [vmem:[#allocation28_spill] sm:$0xff] }
 0x3d8   : > { %v1645_v61 = vsel %vm1488_vm7, %v1623_v36, 0.0  ;;  %2777 = vrcp.f32 %v1519_v2  ;;  %v4887_v36 = vld [vmem:[#allocation34_spill] sm:$0xff]  ;;  %v4892_v2 = vld [vmem:[#allocation53_spill] sm:$0xff] }
 0x3d9   : > { %v1646_v37 = vadd.f32 %v1645_v61, %v1644_v23  ;;  %v1387_v32 = vpop.permute.xlu0 %1386  ;;  %v1613_v23 = vpop.xlane.xlu1 %1612  ;;  %2779 = vpow2.f32 %v1872_v45 }
 0x3da   : > { %v1419_v10 = vmul.f32 %v1387_v32, %v1291_v9  ;;  %2781 = vrcp.f32 %v1518_v6 }
 0x3dc   : > { %v1451_v0 = vadd.f32 %v1435_v4, %v1419_v10 }
 0x3dd   : > { %v1877_v62 = vpop.permute.xlu1 %1876 }
 0x3de   : > { %v1470_v27 = vsel %vm4236_vm6, %v1275_v26, %v1451_v0  ;;  %v1954_v50 = vmul.f32 %v1877_v62, %v4885_v53 }
 0x3df   : > { %1504 = vst.msk [vmem:[%s3326_s27 + $0x78] sm:$0xff] %vm1488_vm7, %v1470_v27  ;;  %v1520_v19 = vmax.f32 %v1470_v27, 1e-14 }
 0x3e1   : > { %v2776_v54 = vpop.eup %2775  ;;  %2783 = vrcp.f32 %v1520_v19 }
 0x3e2   : > { %v1624_v42 = vmul.f32 %v2776_v54, %v1592_v1  ;;  %v2778_v34 = vpop.eup %2777  ;;  %v1955_v1 = vmul.f32 %v1877_v62, %v4886_v47 }
 0x3e3   : > { %v2780_v55 = vpop.eup %2779  ;;  %v1631_v58 = vmul.f32 %v2778_v34, %v1613_v23 }
 0x3e4   : > { %v1647_v18 = vsel %vm1488_vm7, %v1624_v42, 0.0  ;;  %v2782_v38 = vpop.eup %2781  ;;  %v4409_v40 = vrot.slane %v2780_v55, %v4884_v46  ;;  %v4414_v26 = vrot.slane %v2780_v55, %v4887_v36 }
 0x3e5   : > { %v1648_v20 = vadd.f32 %v1647_v18, %v1646_v37  ;;  %v1661_v4 = vsel %vm1488_vm7, %v1631_v58, 0.0 }
 0x3e6   : > { %v1997_v27 = vmul.f32 %v4409_v40, %v1954_v50  ;;  %v1998_v54 = vmul.f32 %v4414_v26, %v1955_v1 }
 0x3e7   : > { %v1650_v43 = vadd.f32 %v1649_v52, %v1648_v20 }
 0x3e8   : > { %v2100_v28 = vmul.f32 %v1998_v54, %v4891_v57 }
 0x3e9   : > { %v1652_v21 = vadd.f32 %v1651_v60, %v1650_v43  ;;  %v4888_v60 = vld [vmem:[#allocation44_spill] sm:$0xff] }
 0x3eb   : > { %v1654_v5 = vadd.f32 %v1653_v16, %v1652_v21  ;;  %v2784_v3 = vpop.eup %2783  ;;  %v4889_v16 = vld [vmem:[#allocation48_spill] sm:$0xff] }
 0x3ed   : > { %v1656_v41 = vadd.f32 %v1655_v44, %v1654_v5 }
 0x3ef   : > { %v1658_v33 = vadd.f32 %v1657_v63, %v1656_v41  ;;  %v4890_v63 = vld [vmem:[#allocation39_spill] sm:$0xff] }
 0x402   : > { %v1616_v24 = vpop.xlane.xlu1 %1615 }
 0x403   : > { %v1632_v9 = vmul.f32 %v2784_v3, %v1616_v24 }
 0x405   : > { %v1663_v18 = vsel %vm1488_vm7, %v1632_v9, 0.0 }
 0x406   : > { %v1882_v7 = vpop.permute.xlu1 %1881 }
 0x407   : > { %v1956_v15 = vmul.f32 %v1882_v7, %v3948_v29  ;;  %v1957_v25 = vmul.f32 %v1882_v7, %v3956_v51  ;;  %v4893_v7 = vld [vmem:[#allocation54_spill] sm:$0xff] }
 0x409   : > { %v1999_v10 = vmul.f32 %v4409_v40, %v1956_v15  ;;  %v2000_v0 = vmul.f32 %v4414_v26, %v1957_v25  ;;  %v4895_v25 = vld [vmem:[#allocation62_spill] sm:$0xff] }
 0x40a   : > { %v1887_v14 = vpop.permute.xlu1 %1886  ;;  %v1610_v48 = vpop.xlane.xlu0 %1609 }
 0x40b   : > { %v1630_v49 = vmul.f32 %v2782_v38, %v1610_v48  ;;  %v1958_v61 = vmul.f32 %v1887_v14, %v4005_v39  ;;  %v1959_v51 = vmul.f32 %v1887_v14, %v4007_v30  ;;  %v2101_v21 = vmul.f32 %v1999_v10, %v4888_v60  ;;  %v4894_v48 = vld [vmem:[#allocation59_spill] sm:$0xff] }
 0x40c   : > { %v2102_v5 = vmul.f32 %v2000_v0, %v4889_v16  ;;  %v2031_v23 = vadd.f32 %v1999_v10, %v1997_v27  ;;  %v2052_v24 = vadd.f32 %v2000_v0, %v1998_v54  ;;  %v4897_v0 = vld [vmem:[#allocation52_spill] sm:$0xff]  ;;  %v4898_v54 = vld [vmem:[#allocation65_spill] sm:$0xff] }
 0x40d   : > { %v1659_v37 = vsel %vm1488_vm7, %v1630_v49, 0.0  ;;  %v2001_v39 = vmul.f32 %v4409_v40, %v1958_v61  ;;  %v2002_v30 = vmul.f32 %v4414_v26, %v1959_v51 }
 0x40e   : > { %v1897_v29 = vpop.permute.xlu1 %1896  ;;  %v1660_v32 = vadd.f32 %v1659_v37, %v1658_v33  ;;  %v2099_v33 = vmul.f32 %v1997_v27, %v4890_v63  ;;  %v2152_v14 = vadd.f32 %v2102_v5, %v2100_v28  ;;  %v4896_v37 = vld [vmem:[#allocation63_spill] sm:$0xff] }
 0x40f   : > { %v1962_v8 = vmul.f32 %v1897_v29, %v4071_v12  ;;  %v2103_v45 = vmul.f32 %v2001_v39, %v4892_v2  ;;  %v2032_v58 = vadd.f32 %v2031_v23, %v2001_v39  ;;  %v2053_v12 = vadd.f32 %v2052_v24, %v2002_v30  ;;  %v4902_v5 = vld [vmem:[#allocation71_spill] sm:$0xff] }
 0x410   : > { %v1662_v42 = vadd.f32 %v1661_v4, %v1660_v32  ;;  %v2131_v55 = vadd.f32 %v2101_v21, %v2099_v33  ;;  %v4901_v21 = vld [vmem:[#allocation67_spill] sm:$0xff] }
 0x411   : > { %v2005_v15 = vmul.f32 %v4409_v40, %v1962_v8  ;;  %v4904_v23 = vld [vmem:[#allocation31_spill] sm:$0xff] }
 0x412   : > { %v1902_v20 = vpop.permute.xlu1 %1901  ;;  %v1892_v52 = vpop.permute.xlu0 %1891  ;;  %v1664_v43 = vadd.f32 %v1663_v18, %v1662_v42  ;;  %v2132_v3 = vadd.f32 %v2131_v55, %v2103_v45  ;;  %v4899_v18 = vld [vmem:[#allocation55_spill] sm:$0xff]  ;;  %v4905_v45 = vld [vmem:[#allocation29_spill] sm:$0xff] }
 0x413   : > { %v1960_v44 = vmul.f32 %v1892_v52, %v4021_v13  ;;  %v1961_v41 = vmul.f32 %v1892_v52, %v4026_v22  ;;  %v2104_v13 = vmul.f32 %v2002_v30, %v4893_v7  ;;  %v1963_v22 = vmul.f32 %v1897_v29, %v4073_v59 }
 0x414   : > { %v1665_v31 = vrot.slane %v1664_v43, 4  ;;  %v1964_v53 = vmul.f32 %v1902_v20, %v4101_v35  ;;  %v1965_v50 = vmul.f32 %v1902_v20, %v4104_v17  ;;  %v2107_v29 = vmul.f32 %v2005_v15, %v4896_v37 }
 0x415   : > { %v2003_v6 = vmul.f32 %v4409_v40, %v1960_v44  ;;  %v2004_v62 = vmul.f32 %v4414_v26, %v1961_v41  ;;  %v2153_v1 = vadd.f32 %v2152_v14, %v2104_v13  ;;  %v2006_v59 = vmul.f32 %v4414_v26, %v1963_v22  ;;  %v4903_v41 = vld [vmem:[#allocation72_spill] sm:$0xff]  ;;  %v4906_v22 = vld [vmem:[#allocation74_spill] sm:$0xff]  ;;  %v4907_v14 = vld [vmem:[#allocation35_spill] sm:$0xff] }
 0x416   : > { %v1907_v19 = vpop.permute.xlu1 %1906  ;;  %v1666_v34 = vadd.f32 %v1665_v31, %v1664_v43  ;;  %v2007_v4 = vmul.f32 %v4409_v40, %v1964_v53  ;;  %v2008_v10 = vmul.f32 %v4414_v26, %v1965_v50  ;;  %v4900_v43 = vld [vmem:[#allocation66_spill] sm:$0xff]  ;;  %v4910_v50 = vld [vmem:[#allocation83_spill] sm:$0xff] }
 0x417   : > { %v2105_v38 = vmul.f32 %v2003_v6, %v4894_v48  ;;  %v2106_v49 = vmul.f32 %v2004_v62, %v4895_v25  ;;  %v2033_v36 = vadd.f32 %v2032_v58, %v2003_v6  ;;  %v2054_v9 = vadd.f32 %v2053_v12, %v2004_v62  ;;  %v4909_v25 = vld [vmem:[#allocation75_spill] sm:$0xff] }
 0x418   : > { %v1667_v46 = vrot.slane %v1666_v34, 2  ;;  %v1966_v27 = vmul.f32 %v1907_v19, %v4897_v0  ;;  %v2108_v17 = vmul.f32 %v2006_v59, %v4898_v54  ;;  %v1967_v39 = vmul.f32 %v1907_v19, %v4899_v18  ;;  %v4915_v54 = vld [vmem:[#allocation40_spill] sm:$0xff] }
 0x419   : > { %v2133_v61 = vadd.f32 %v2132_v3, %v2105_v38  ;;  %v2154_v51 = vadd.f32 %v2153_v1, %v2106_v49  ;;  %v2034_v42 = vadd.f32 %v2033_v36, %v2005_v15  ;;  %v2055_v20 = vadd.f32 %v2054_v9, %v2006_v59  ;;  %v4908_v38 = vld [vmem:[#allocation37_spill] sm:$0xff]  ;;  %v4911_v1 = vld [vmem:[#allocation36_spill] sm:$0xff]  ;;  %v4912_v36 = vld [vmem:[#allocation38_spill] sm:$0xff] }
 0x41a   : > { %v1912_v47 = vpop.permute.xlu1 %1911  ;;  %v1668_v32 = vadd.f32 %v1667_v46, %v1666_v34  ;;  %v2109_v44 = vmul.f32 %v2007_v4, %v4902_v5  ;;  %v2110_v63 = vmul.f32 %v2008_v10, %v4903_v41  ;;  %v2009_v33 = vmul.f32 %v4409_v40, %v1966_v27  ;;  %v1952_v41 = vpop.permute.xlu0 %1951 }
 0x41b   : > { %v2134_v52 = vadd.f32 %v2133_v61, %v2107_v29  ;;  %v2155_v30 = vadd.f32 %v2154_v51, %v2108_v17  ;;  %v1968_v60 = vmul.f32 %v1912_v47, %v4900_v43  ;;  %v1969_v16 = vmul.f32 %v1912_v47, %v4901_v21  ;;  %v4913_v29 = vld [vmem:[#allocation78_spill] sm:$0xff] }
 0x41c   : > { %v1669_v28 = vrot.slane %v1668_v32, 1  ;;  %v2010_v31 = vmul.f32 %v4414_v26, %v1967_v39  ;;  %v2035_v8 = vadd.f32 %v2034_v42, %v2007_v4  ;;  %v2056_v62 = vadd.f32 %v2055_v20, %v2008_v10  ;;  %v4916_v42 = vld [vmem:[#allocation42_spill] sm:$0xff]  ;;  %v4917_v39 = vld [vmem:[#allocation43_spill] sm:$0xff] }
 0x41d   : > { %v2135_v19 = vadd.f32 %v2134_v52, %v2109_v44  ;;  %v2156_v24 = vadd.f32 %v2155_v30, %v2110_v63  ;;  %v2011_v7 = vmul.f32 %v4409_v40, %v1968_v60  ;;  %v2012_v13 = vmul.f32 %v4414_v26, %v1969_v16  ;;  %v4918_v52 = vld [vmem:[#allocation47_spill] sm:$0xff] }
 0x41e   : > { %v1917_v35 = vpop.permute.xlu1 %1916  ;;  %v1670_v34 = vadd.f32 %v1669_v28, %v1668_v32  ;;  %v2111_v55 = vmul.f32 %v2009_v33, %v4906_v22  ;;  %v2036_v15 = vadd.f32 %v2035_v8, %v2009_v33  ;;  %v2112_v49 = vmul.f32 %v2010_v31, %v4909_v25  ;;  %v4914_v32 = vld [vmem:[#allocation79_spill] sm:$0xff] }
 0x41f   : > { %v1970_v2 = vmul.f32 %v1917_v35, %v4904_v23  ;;  %v1971_v6 = vmul.f32 %v1917_v35, %v4905_v45  ;;  %v2057_v53 = vadd.f32 %v2056_v62, %v2010_v31  ;;  %v2113_v51 = vmul.f32 %v2011_v7, %v4913_v29  ;;  %v4920_v31 = vld [vmem:[#allocation50_spill] sm:$0xff]  ;;  %v4930_v29 = vld [vmem:[#allocation56_spill] sm:$0xff] }
 0x420   : > { %v1678_v47 = vrot.slane %v1670_v34, %v4910_v50  ;;  %v2136_v61 = vadd.f32 %v2135_v19, %v2111_v55  ;;  %v2157_v37 = vadd.f32 %v2156_v24, %v2112_v49  ;;  %v2114_v4 = vmul.f32 %v2012_v13, %v4914_v32  ;;  %v4921_v19 = vld [vmem:[#allocation57_spill] sm:$0xff] }
 0x421   : > { %v2013_v3 = vmul.f32 %v4409_v40, %v1970_v2  ;;  %v2014_v46 = vmul.f32 %v4414_v26, %v1971_v6  ;;  %v2037_v43 = vadd.f32 %v2036_v15, %v2011_v7  ;;  %v2058_v60 = vadd.f32 %v2057_v53, %v2012_v13  ;;  %v4922_v7 = vld [vmem:[#allocation58_spill] sm:$0xff]  ;;  %v4923_v34 = vld [vmem:[#allocation45_spill] sm:$0xff] }
 0x422   : > { %v1922_v57 = vpop.permute.xlu1 %1921  ;;  %v1685_v27 = vrot.slane %v1678_v47, %v4910_v50  ;;  %v2137_v5 = vadd.f32 %v2136_v61, %v2113_v51  ;;  %v2158_v44 = vadd.f32 %v2157_v37, %v2114_v4  ;;  %v4924_v55 = vld [vmem:[#allocation49_spill] sm:$0xff]  ;;  %v4929_v61 = vld [vmem:[#allocation51_spill] sm:$0xff] }
 0x423   : > { %v1972_v48 = vmul.f32 %v1922_v57, %v4907_v14  ;;  %v1973_v58 = vmul.f32 %v1922_v57, %v4908_v38  ;;  %v2115_v17 = vmul.f32 %v2013_v3, %v4915_v54  ;;  %v2116_v18 = vmul.f32 %v2014_v46, %v4916_v42  ;;  %v4919_v57 = vld [vmem:[#allocation46_spill] sm:$0xff] }
 0x424   : > { %1686 = vrot.lane.b32.xlu1 %v1685_v27, %s3049_s20  ;;  %v2038_v63 = vadd.f32 %v2037_v43, %v2013_v3  ;;  %v2059_v33 = vadd.f32 %v2058_v60, %v2014_v46  ;;  %v4932_v54 = vld [vmem:[#allocation70_spill] sm:$0xff]  ;;  %v4933_v60 = vld [vmem:[#allocation73_spill] sm:$0xff] }
 0x425   : > { %v2015_v10 = vmul.f32 %v4409_v40, %v1972_v48  ;;  %v2016_v0 = vmul.f32 %v4414_v26, %v1973_v58  ;;  %v2138_v2 = vadd.f32 %v2137_v5, %v2115_v17  ;;  %v2159_v45 = vadd.f32 %v2158_v44, %v2116_v18  ;;  %v4925_v48 = vld [vmem:[#allocation87_spill] sm:$0xff]  ;;  %v4926_v58 = vld [vmem:[#allocation88_spill] sm:$0xff] }
 0x426   : > { %v1927_v12 = vpop.permute.xlu1 %1926  ;;  %v1984_v38 = vmul.f32 %v1952_v41, %v4925_v48  ;;  %v4934_v44 = vld [vmem:[#allocation76_spill] sm:$0xff] }
 0x427   : > { %v1974_v59 = vmul.f32 %v1927_v12, %v4911_v1  ;;  %v1975_v9 = vmul.f32 %v1927_v12, %v4912_v36  ;;  %v2117_v28 = vmul.f32 %v2015_v10, %v4919_v57  ;;  %v2118_v8 = vmul.f32 %v2016_v0, %v4920_v31  ;;  %v4927_v1 = vld [vmem:[#allocation60_spill] sm:$0xff] }
 0x428   : > { %v1985_v12 = vmul.f32 %v1952_v41, %v4926_v58  ;;  %v2039_v15 = vadd.f32 %v2038_v63, %v2015_v10  ;;  %v2060_v25 = vadd.f32 %v2059_v33, %v2016_v0  ;;  %v4928_v36 = vld [vmem:[#allocation68_spill] sm:$0xff]  ;;  %v4931_v0 = vld [vmem:[#allocation69_spill] sm:$0xff]  ;;  %v2027_v31 = vmul.f32 %v4409_v40, %v1984_v38 }
 0x429   : > { %v2017_v21 = vmul.f32 %v4409_v40, %v1974_v59  ;;  %v2018_v16 = vmul.f32 %v4414_v26, %v1975_v9  ;;  %v2139_v49 = vadd.f32 %v2138_v2, %v2117_v28  ;;  %v2160_v3 = vadd.f32 %v2159_v45, %v2118_v8  ;;  %v4935_v63 = vld [vmem:[#allocation61_spill] sm:$0xff]  ;;  %v4936_v57 = vld [vmem:[#allocation64_spill] sm:$0xff] }
 0x42a   : > { %v1932_v35 = vpop.permute.xlu1 %1931  ;;  %v2028_v8 = vmul.f32 %v4414_v26, %v1985_v12  ;;  %v4939_v58 = vld [vmem:[#allocation80_spill] sm:$0xff] }
 0x42b   : > { %v1976_v20 = vmul.f32 %v1932_v35, %v4917_v39  ;;  %v1977_v30 = vmul.f32 %v1932_v35, %v4918_v52  ;;  %v2119_v24 = vmul.f32 %v2017_v21, %v4921_v19  ;;  %v2120_v13 = vmul.f32 %v2018_v16, %v4922_v7 }
 0x42c   : > { %v2040_v32 = vadd.f32 %v2039_v15, %v2017_v21  ;;  %v2061_v4 = vadd.f32 %v2060_v25, %v2018_v16  ;;  %v2129_v38 = vmul.f32 %v2027_v31, %v4939_v58  ;;  %v4940_v15 = vld [vmem:[#allocation82_spill] sm:$0xff] }
 0x42d   : > { %v2019_v6 = vmul.f32 %v4409_v40, %v1976_v20  ;;  %v2020_v62 = vmul.f32 %v4414_v26, %v1977_v30  ;;  %v2140_v27 = vadd.f32 %v2139_v49, %v2119_v24  ;;  %v2161_v10 = vadd.f32 %v2160_v3, %v2120_v13 }
 0x42e   : > { %v1937_v23 = vpop.permute.xlu1 %1936  ;;  %v2130_v12 = vmul.f32 %v2028_v8, %v4940_v15 }
 0x42f   : > { %v1978_v22 = vmul.f32 %v1937_v23, %v4923_v34  ;;  %v1979_v14 = vmul.f32 %v1937_v23, %v4924_v55  ;;  %v2121_v59 = vmul.f32 %v2019_v6, %v4927_v1  ;;  %v2122_v9 = vmul.f32 %v2020_v62, %v4928_v36 }
 0x430   : > { %v2041_v39 = vadd.f32 %v2040_v32, %v2019_v6  ;;  %v2062_v20 = vadd.f32 %v2061_v4, %v2020_v62 }
 0x431   : > { %v2021_v46 = vmul.f32 %v4409_v40, %v1978_v22  ;;  %v2022_v53 = vmul.f32 %v4414_v26, %v1979_v14  ;;  %v2141_v30 = vadd.f32 %v2140_v27, %v2121_v59  ;;  %v2162_v43 = vadd.f32 %v2161_v10, %v2122_v9  ;;  %v4937_v22 = vld [vmem:[#allocation77_spill] sm:$0xff] }
 0x432   : > { %v1942_v47 = vpop.permute.xlu1 %1941  ;;  %v4938_v14 = vld [vmem:[#allocation81_spill] sm:$0xff] }
 0x433   : > { %v1980_v37 = vmul.f32 %v1942_v47, %v4929_v61  ;;  %v1981_v51 = vmul.f32 %v1942_v47, %v4930_v29  ;;  %v2123_v35 = vmul.f32 %v2021_v46, %v4931_v0  ;;  %v2124_v17 = vmul.f32 %v2022_v53, %v4932_v54 }
 0x434   : > { %v2042_v16 = vadd.f32 %v2041_v39, %v2021_v46  ;;  %v2063_v41 = vadd.f32 %v2062_v20, %v2022_v53  ;;  %v4941_v53 = vld [vmem:[#allocation84_spill] sm:$0xff] }
 0x435   : > { %v2023_v42 = vmul.f32 %v4409_v40, %v1980_v37  ;;  %v2024_v18 = vmul.f32 %v4414_v26, %v1981_v51  ;;  %v2142_v23 = vadd.f32 %v2141_v30, %v2123_v35  ;;  %v2163_v2 = vadd.f32 %v2162_v43, %v2124_v17 }
 0x436   : > { %v1947_v52 = vpop.permute.xlu1 %1946 }
 0x437   : > { %v2125_v5 = vmul.f32 %v2023_v42, %v4933_v60  ;;  %v2126_v21 = vmul.f32 %v2024_v18, %v4934_v44  ;;  %v1982_v33 = vmul.f32 %v1947_v52, %v4935_v63  ;;  %v1983_v28 = vmul.f32 %v1947_v52, %v4936_v57  ;;  %v2097_v63 = vld [vmem:[#allocation4] sm:$0x3] }
 0x438   : > { %v2043_v45 = vadd.f32 %v2042_v16, %v2023_v42  ;;  %v2064_v6 = vadd.f32 %v2063_v41, %v2024_v18 }
 0x439   : > { %v2025_v62 = vmul.f32 %v4409_v40, %v1982_v33  ;;  %v2026_v19 = vmul.f32 %v4414_v26, %v1983_v28  ;;  %v2143_v24 = vadd.f32 %v2142_v23, %v2125_v5  ;;  %v2164_v7 = vadd.f32 %v2163_v2, %v2126_v21  ;;  %v2029_v21 = vld [vmem:[#allocation3] sm:$0x3] }
 0x43a   : > { %v4942_v40 = vsub.f32 %v4941_v53, %v4883_v11 }
 0x43b   : > { %v2044_v13 = vadd.f32 %v2043_v45, %v2025_v62  ;;  %v2065_v34 = vadd.f32 %v2064_v6, %v2026_v19  ;;  %v2127_v55 = vmul.f32 %v2025_v62, %v4937_v22  ;;  %v2128_v48 = vmul.f32 %v2026_v19, %v4938_v14  ;;  %v1633_v6 = vld [vmem:[#allocation5] sm:$0x1] }
 0x43c   : > { %v1755_v26 = vmul.f32 1.442695, %v4942_v40  ;;  %v4945_v40 = vld [vmem:[#allocation33_spill] sm:$0xff] (!%p2441_p4) }
 0x43d   : > { %v2045_v25 = vadd.f32 %v2044_v13, %v2027_v31  ;;  %v2066_v49 = vadd.f32 %v2065_v34, %v2028_v8  ;;  %v2144_v3 = vadd.f32 %v2143_v24, %v2127_v55  ;;  %v2165_v46 = vadd.f32 %v2164_v7, %v2128_v48  ;;  %v2198_v24 = vld [vmem:[#allocation2] sm:$0x3] (!%p2441_p4)  ;;  %v2201_v7 = vld [vmem:[#allocation14] ss:$4 sm:$0x3] (!%p2441_p4) }
 0x43e   : > { %2785 = vpow2.f32 %v1755_v26  ;;  %2212 = vst.msk [vmem:[#allocation16] ss:$4 sm:$0x3] (!%p2441_p4), %vm3719_vm2, %v2198_v24  ;;  %v2203_v55 = vld [vmem:[#allocation14 + $0x1] ss:$4 sm:$0x3] (!%p2441_p4) }
 0x43f   : > { %v2046_v47 = vrot.slane %v2045_v25, 4  ;;  %v2067_v1 = vrot.slane %v2066_v49, 4  ;;  %v2145_v59 = vadd.f32 %v2144_v3, %v2129_v38  ;;  %v2166_v36 = vadd.f32 %v2165_v46, %v2130_v12 }
 0x440   : > { %v2204_v48 = vmul.f32 (!%p2441_p4), 0.9, %v2203_v55 }
 0x441   : > { %v2047_v9 = vadd.f32 %v2046_v47, %v2045_v25  ;;  %v2068_v61 = vadd.f32 %v2067_v1, %v2066_v49  ;;  %v2146_v37 = vrot.slane %v2145_v59, 4  ;;  %v2167_v29 = vrot.slane %v2166_v36, 4  ;;  %v4946_v47 = vld [vmem:[#allocation34_spill] sm:$0xff] (!%p2441_p4) }
 0x443   : > { %v2048_v51 = vrot.slane %v2047_v9, 2  ;;  %v2069_v32 = vrot.slane %v2068_v61, 2  ;;  %v2147_v4 = vadd.f32 %v2146_v37, %v2145_v59  ;;  %v2168_v27 = vadd.f32 %v2167_v29, %v2166_v36 }
 0x445   : > { %v2049_v10 = vadd.f32 %v2048_v51, %v2047_v9  ;;  %v2070_v0 = vadd.f32 %v2069_v32, %v2068_v61  ;;  %v2148_v35 = vrot.slane %v2147_v4, 2  ;;  %v2169_v54 = vrot.slane %v2168_v27, 2 }
 0x446   : > { %v3050_v61 = vmov (!%p2441_p4), 0  }
 0x447   : > { %v2050_v17 = vrot.slane %v2049_v10, 1  ;;  %v2071_v11 = vrot.slane %v2070_v0, 1  ;;  %v2149_v42 = vadd.f32 %v2148_v35, %v2147_v4  ;;  %v2170_v18 = vadd.f32 %v2169_v54, %v2168_v27  ;;  %2804 = vset.pattern.permute.xlu0 (!%p2441_p4), %v3050_v61 }
 0x448   : > { %v2786_v44 = vpop.eup %2785 }
 0x449   : > { %v2051_v39 = vadd.f32 %v2050_v17, %v2049_v10  ;;  %v2072_v20 = vadd.f32 %v2071_v11, %v2070_v0  ;;  %v2150_v52 = vrot.slane %v2149_v42, 1  ;;  %v2171_v30 = vrot.slane %v2170_v18, 1 }
 0x44a   : > { %v2030_v33 = vmul.f32 %v2786_v44, %v2029_v21  ;;  %v2098_v31 = vmul.f32 %v2786_v44, %v2097_v63 }
 0x44b   : > { %v2075_v43 = vcombine.low %v2051_v39, %v2072_v20  ;;  %v2151_v60 = vadd.f32 %v2150_v52, %v2149_v42  ;;  %v2172_v5 = vadd.f32 %v2171_v30, %v2170_v18 }
 0x44d   : > { %v2082_v16 = vrot.slane %v2075_v43, %v4910_v50  ;;  %v2175_v41 = vcombine.low %v2151_v60, %v2172_v5 }
 0x44f   : > { %v2089_v57 = vrot.slane %v2082_v16, %v4910_v50  ;;  %v2182_v28 = vrot.slane %v2175_v41, %v4910_v50 }
 0x451   : > { %v2091_v8 = vadd.f32 %v2089_v57, %v2030_v33  ;;  %v2189_v23 = vrot.slane %v2182_v28, %v4910_v50  ;;  %v2205_v50 = vsub.f32 (!%p2441_p4), %v2201_v7, %v2198_v24 }
 0x453   : > { %2096 = vst.msk [vmem:[#allocation3] sm:$0x3] %vm3719_vm2, %v2091_v8  ;;  %v2191_v45 = vadd.f32 %v2189_v23, %v2098_v31  ;;  %v2206_v34 = vmul.f32 (!%p2441_p4), 1.442695, %v2205_v50 }
 0x455   : > { %2192 = vst.msk [vmem:[#allocation4] sm:$0x3] %vm3719_vm2, %v2191_v45  ;;  %2805 = vpow2.f32 (!%p2441_p4), %v2206_v34 }
 0x45a   : > { %v2199_v22 = vld [vmem:[#allocation3] sm:$0x3] (!%p2441_p4) }
 0x45b   : > { %v2200_v14 = vmul.f32 (!%p2441_p4), 0.003921569, %v2199_v22 }
 0x45c   : > { %v2217_v3 = vld [vmem:[#allocation4] sm:$0x3] (!%p2441_p4) }
 0x45d   : > { %v2209_v58 = vmul.f32 (!%p2441_p4), 0.1, %v2200_v14 }
 0x45f   : > { %v2806_v38 = vpop.eup (!%p2441_p4), %2805 }
 0x460   : > { %v2208_v15 = vmul.f32 (!%p2441_p4), %v2806_v38, %v2204_v48 }
 0x462   : > { %v2210_v12 = vadd.f32 (!%p2441_p4), %v2209_v58, %v2208_v15 }
 0x464   : > { %v2211_v25 = vsel (!%p2441_p4), %vm4236_vm6, %v2200_v14, %v2210_v12 }
 0x465   : > { %v2215_v49 = vmax.f32 (!%p2441_p4), %v2211_v25, 1e-14  ;;  %2214 = vst.msk [vmem:[#allocation16 + $0x1] ss:$4 sm:$0x3] (!%p2441_p4), %vm3719_vm2, %v2211_v25 }
 0x467   : > { %2807 = vrcp.f32 (!%p2441_p4), %v2215_v49 }
 0x471   : > { %v2808_v46 = vpop.eup (!%p2441_p4), %2807 }
 0x472   : > { %v2218_v53 = vmul.f32 (!%p2441_p4), %v2808_v46, %v2217_v3 }
 0x474   : > { %v2223_v26 = vrot.slane (!%p2441_p4), %v2218_v53, %v4945_v40  ;;  %v2227_v1 = vrot.slane (!%p2441_p4), %v2218_v53, %v4946_v47 }
 0x476   : > { %v2231_v59 = vsel (!%p2441_p4), %vm2230_vm9, %v2223_v26, 0.0  ;;  %v2232_v36 = vsel (!%p2441_p4), %vm2230_vm9, %v2227_v1, 0.0 }
 0x477   : > { %v2233_v9 = vadd.f32 (!%p2441_p4), %v2232_v36, %v2231_v59 }
 0x479   : > { %2234 = vadd.xlane.f32.xlu0 (!%p2441_p4), %v2233_v9 }
 0x493   : > { %2197 = sbr.rel (%p2441_p4) target bundleno = 1422 (0x58e), region = 60 }
 0x496   : > { %v1687_v62 = vpop.permute.xlu1 %1686 }
 0x497   : > { %v1689_v19 = vadd.f32 %v1687_v62, %v1633_v6 }
 0x499   : > { %1691 = vst.msk [vmem:[#allocation5] sm:$0x1] %vm1690_vm8, %v1689_v19 }
 0x4a0   : > { %v2236_v56 = vld [vmem:[#allocation5] sm:$0x1] }
 0x506   : > { %v2235_v37 = vpop.xlane.xlu0 %2234 }
 0x507   : > { %v2237_v29 = vadd.f32 %v2236_v56, %v2235_v37 }
 0x509   : > { %v2238_v51 = vmul.f32 1.0723039e-06, %v2237_v29 }
 0x50b   : > { %2241 = vperm.xlu0 %2804, %v2238_v51  }
 0x58a   : > { %v2242_v32 = vpop.permute.xlu0 %2241 }
 0x58b   : > { %v2247_v4 = vrot.slane %v2242_v32, %v4945_v40 }
 0x58d   : > { %2249 = vst.msk [vmem:[#allocation16 + $0x2] ss:$4 sm:$0x3] %vm3719_vm2, %v2247_v4 }
 0x58e PF: > { %s2451_s16 = sshll.u32 %s3114_s0, 11  ;;  %s2264_s8 = sshll.u32 %s3326_s27, 4  ;;  %s4543_s8 = int_to_ptr.vmem [resolvable:$true] %s2264_s8 }
 0x58f   : > { %s4540_s22 = scalar_lea.hbm %s4614_s5, %s2451_s16  ;;  %s2251_s12 = scalar_lea.sflag [#allocation10], %s3302_s2 }
 0x590   : > { %s2925_s1 = scalar_lea.vmem %s4543_s8, 2048  ;;  %p4947_p9 = scmp.ne.s32.totalorder %s4752_s14, 0 }
 0x591   : > { %p2926_p10 = scmp.ne.s32.totalorder %s4543_s8, %s2925_s1  ;;  %s3051_s25 = smov [#allocation15]  }
 0x592   : > { %s2929_s10 = sshll.u32 %s3051_s25, 4  ;;  %s2930_s10 = int_to_ptr.vmem [resolvable:$false] %s2929_s10 }
 0x593   : > { %p2927_p0 = pnand %p2926_p10, %p4947_p9  ;;  %s2931_s7 = scalar_lea.vmem %s2930_s10, 4096 }
 0x594   : > { %p2932_p2 = scmp.lt.s32.totalorder %s4543_s8, %s2930_s10  ;;  %p2933_p7 = scmp.lt.s32.totalorder %s2931_s7, %s2925_s1 }
 0x595   : > { %p2928_p12 = pneg %p2927_p0 }
 0x596   : > { %p2934_p5 = por %p2933_p7, %p2932_p2 }
 0x598   : > { %p2935_p3 = pnand %p2934_p5, %p2928_p12 }
 0x59a   : > { %2938 = shalt.err (!%p2935_p3)
}
 0x59b   : > { %s2939_s9 = scalar_lea.hbm %s4540_s22, 2048  ;;  %s2943_s27 = scalar_lea.hbm %s4614_s5, 4096 }
 0x59c   : > { %p2940_p13 = scmp.ne.s32.totalorder %s4540_s22, %s2939_s9  ;;  %p2944_p8 = scmp.lt.u32.totalorder %s4540_s22, %s4614_s5 }
 0x59d   : > { %p2945_p11 = scmp.lt.u32.totalorder %s2943_s27, %s2939_s9  ;;  %p2947_p10 = scmp.lt.u32.totalorder %s2939_s9, %s4540_s22 }
 0x59e   : > { %p2941_p1 = pnand %p2940_p13, %p4947_p9 }
 0x59f   : > { %p2946_p4 = por %p2945_p11, %p2944_p8 }
 0x5a0   : > { %p2942_p6 = pneg %p2941_p1 }
 0x5a1   : > { %p2948_p0 = por %p2947_p10, %p2946_p4 }
 0x5a3   : > { %p2949_p12 = pnand %p2948_p0, %p2942_p6 }
 0x5a5   : > { %2952 = shalt.err (!%p2949_p12)
}
 0x5a6   : > { %s3052_s13 = smov 128   ;;  %s3053_s18 = smov 8  }
 0x5a7   : > { %2512 = dma.vmem_to_hbm [thread:$0]  (%p4947_p9), %s4543_s8, 2048, %s4540_s22, %s2251_s12, %s3052_s13, %s3052_s13, %s3053_s18  }
 0x5a8   : > { %s3054_s19 = smov [#allocation16]   ;;  %p4948_p7 = scmp.eq.s32.totalorder %s3114_s0, 1 }
 0x5a9   : > { %s2278_s20 = sshll.u32 %s3054_s19, 4  ;;  %s2279_s20 = int_to_ptr.vmem [resolvable:$true] %s2278_s20 }
 0x5aa   : > { %s2953_s16 = scalar_lea.vmem %s2279_s20, 128  ;;  %p2960_p13 = scmp.lt.s32.totalorder %s2279_s20, %s2279_s20 }
 0x5ab   : > { %p2954_p2 = scmp.ne.s32.totalorder %s2279_s20, %s2953_s16  ;;  %p2961_p1 = scmp.lt.s32.totalorder %s2953_s16, %s2953_s16 }
 0x5ad   : > { %p2955_p5 = pnand %p2954_p2, %p4948_p7  ;;  %p2962_p6 = por %p2961_p1, %p2960_p13 }
 0x5af   : > { %p2956_p3 = pneg %p2955_p5 }
 0x5b1   : > { %p2963_p8 = pnand %p2962_p6, %p2956_p3 }
 0x5b3   : > { %2966 = shalt.err (!%p2963_p8)
}
 0x5b4   : > { %s2967_s14 = scalar_lea.hbm %s4615_s6, 128  ;;  %p4949_p11 = pmov %p4948_p7 }
 0x5b5   : > { %p2968_p9 = scmp.ne.s32.totalorder %s4615_s6, %s2967_s14  ;;  %p2973_p0 = scmp.lt.u32.totalorder %s2967_s14, %s4615_s6 }
 0x5b7   : > { %p2969_p4 = pnand %p2968_p9, %p4949_p11 }
 0x5b9   : > { %p2970_p10 = pneg %p2969_p4 }
 0x5bb   : > { %p2975_p12 = pnand %p2973_p0, %p2970_p10 }
 0x5bd   : > { %2978 = shalt.err (!%p2975_p12)
}
 0x5be   : > { %p4950_p2 = pmov %p4948_p7 }
 0x5c0   : > { %2514 = dma.vmem_to_hbm [thread:$0]  (%p4950_p2), %s2279_s20, 128, %s4615_s6, [#allocation17]  }
 0x5c1   : > { %p4951_p7 = pmov %p4950_p2 }
 0x5c2   : > { %p4952_p5 = pmov %p4950_p2 }
 0x5c3   : > { %3012 = dma.done.wait (%p4951_p7), [#allocation17], 128  }
 0x5c4   : > { %3014 = vsyncadd (%p4952_p5), [#allocation17], 4294967168 }
 0x5c5 PF: > { %s2294_s10 = sand.u32 1, %s3021_s23   ;;  %p4953_p3 = scmp.ne.s32.totalorder %s4745_s29, 0 }
 0x5c6   : > { %p4954_p13 = scmp.ge.s32.totalorder %s3033_s26, 2  ;;  %s2295_s7 = scalar_lea.sflag [#allocation10], %s2294_s10 }
 0x5c8   : > { %p2533_p1 = pnand %p4954_p13, %p4953_p3 }
 0x5ca   : > { %3016 = dma.done.wait (!%p2533_p1), %s2295_s7, 2048  }
 0x5cb   : > { %3018 = vsyncadd (!%p2533_p1), %s2295_s7, 4294965248  ;;  %s4955_s26 = sld [smem:[#allocation25_spill]]  ;;  %s4956_s9 = sld [smem:[#allocation24_spill]] }
 0x5cc   : > { %s4957_s25 = sld [smem:[#allocation26_spill]]  ;;  %s4958_s23 = smov %s3025_s24 }
 0x5d1   : > { %p23_p6 = scmp.ge.s32.totalorder %s4955_s26, 4   ;;  %s4959_s24 = smov %s4956_s9 }
 0x5d3   :  { %25 = sbr.rel (!%p23_p6) target bundleno = 11 (0xb), region = 120 }
 0x5da   :  { %2300 = vsyncpa [#allocation9], 1 }
 0x5db   :  { %2302 = vsyncpa [#allocation9 + $0x1], 1 }
 0x5dc   :  { %2303 = vsyncpa [#allocation12], 1 }
 0x5dd   :  { %2304 = vsyncpa [#allocation10], 1 }
 0x5de   :  { %2306 = vsyncpa [#allocation10 + $0x1], 1 }
 0x5df   :  { %2307 = vsyncpa [#allocation17], 1 }

</bundles_post_ra>
